<compile_context>
chip_gen: v7x
topology: tpu7x:2x2x1
jax: 0.10.0
libtpu: 0.0.40
codegen_flags: <defaults>
</compile_context>

<pallas_src>
import functools
import numpy as np
import jax
import jax.numpy as jnp
from jax.experimental import pallas as pl
from jax.experimental.pallas import tpu as pltpu


# -----------------------------------------------------------------------------
# small helpers
# -----------------------------------------------------------------------------
def _pick_divisor(n, cap):
    """Largest divisor of n that is <= cap (>= 1)."""
    best = 1
    for t in range(1, min(n, cap) + 1):
        if n % t == 0:
            best = t
    return best


def _col_tile(n, cap=16384):
    """Lane-dense column tile: multiple-of-128 divisor of n (or n if small)."""
    if n <= cap or n % 128 != 0:
        return n
    return 128 * _pick_divisor(n // 128, cap // 128)


def _sigmoid(v):
    # exp on the EUP + reciprocal primitive (exact, approx=False).
    return pl.reciprocal(1.0 + jnp.exp(-v))


# -----------------------------------------------------------------------------
# fused 3x3 convolution (+ bias + ReLU): bf16 MXU dots, no im2col in HBM
# -----------------------------------------------------------------------------
def _conv3x3_kernel(x_ref, w_ref, b_ref, o_ref, *, TH, Wo, stride, phase_rows, relu):
    Cout = o_ref.shape[-1]
    r0 = pl.program_id(1) * TH
    acc = jnp.zeros((TH * Wo, Cout), jnp.float32)
    for ky in range(3):
        for kx in range(3):
            k = ky * 3 + kx
            if stride == 1:
                tap = x_ref[0, pl.ds(r0 + ky, TH), kx:kx + Wo, :]
            else:
                p = (ky % 2) * 2 + (kx % 2)                     # phase index
                tap = x_ref[0, pl.ds(p * phase_rows + r0 + ky // 2, TH),
                            (kx // 2):(kx // 2) + Wo, :]
            tap = tap.reshape(TH * Wo, tap.shape[-1]).astype(jnp.bfloat16)
            acc = acc + jnp.dot(tap, w_ref[k], preferred_element_type=jnp.float32)
    acc = acc + b_ref[...]
    if relu:
        acc = jnp.maximum(acc, 0.0)
    o_ref[0] = acc.reshape(TH, Wo, Cout).astype(o_ref.dtype)


def conv2d_3x3(x, w9, b, stride, relu=True):
    """x: (B,H,W,Cin) f32 NHWC; w9: (9,Cin,Cout) bf16; b: (Cout,). padding=1."""
    B, H, W, Cin = x.shape
    Cout = w9.shape[-1]
    Ho = (H + 2 - 3) // stride + 1
    Wo = (W + 2 - 3) // stride + 1

    if stride == 1:
        xin = jnp.pad(x, ((0, 0), (1, 1), (1, 1), (0, 0)))
        phase_rows = 0
    else:
        Hp, Wp = 2 * Ho + 2, 2 * Wo + 2                 # even-ized padded extent
        xp = jnp.pad(x, ((0, 0), (1, Hp - H - 1), (1, Wp - W - 1), (0, 0)))
        # 4-phase space-to-depth split: phase (r,c) = padded pixels of row parity
        # r / col parity c; every phase has shape (Ho+1, Wo+1).
        phases = [xp[:, r::2, c::2, :] for r in range(2) for c in range(2)]
        phase_rows = Ho + 1
        xin = jnp.concatenate(phases, axis=1)           # (B, 4*(Ho+1), Wo+1, Cin)

    # Pad tiny channel counts (conv1: Cin=3) up to 8 for a friendlier MXU K dim.
    if Cin < 8:
        pad_c = 8 - Cin
        xin = jnp.pad(xin, ((0, 0), (0, 0), (0, 0), (0, pad_c)))
        w9 = jnp.pad(w9, ((0, 0), (0, pad_c), (0, 0)))

    TH = _pick_divisor(Ho, 64)                          # output-row tile
    grid = (B, Ho // TH)
    kernel = functools.partial(_conv3x3_kernel, TH=TH, Wo=Wo, stride=stride,
                               phase_rows=phase_rows, relu=relu)
    return pl.pallas_call(
        kernel,
        grid=grid,
        out_shape=jax.ShapeDtypeStruct((B, Ho, Wo, Cout), jnp.float32),
        in_specs=[
            pl.BlockSpec((1,) + xin.shape[1:], lambda bb, t: (bb, 0, 0, 0)),
            pl.BlockSpec(w9.shape, lambda bb, t: (0, 0, 0)),
            pl.BlockSpec((1, Cout), lambda bb, t: (0, 0)),
        ],
        out_specs=pl.BlockSpec((1, TH, Wo, Cout), lambda bb, t: (bb, t, 0, 0)),
        compiler_params=pltpu.CompilerParams(
            dimension_semantics=("parallel", "parallel")),
    )(xin, w9, b.reshape(1, Cout))


# -----------------------------------------------------------------------------
# fused MSEF block: LayerNorm -> ShuffleAttention -> depthwise3x3 * attn + skip
# -----------------------------------------------------------------------------
def _msef_kernel(x_ref, ln_ref, dww_ref, dwb_ref, mask_ref, perm_ref, sa_ref,
                 o_ref, pad_scr, *, H, W, eps):
    C = o_ref.shape[-1]
    x = x_ref[0]                                        # (H, W, C) residual input
    xr = x.reshape(H * W, C)

    # --- LayerNormalization over channels (gamma/beta folded into scale/bias)
    mean = jnp.mean(xr, axis=-1, keepdims=True)
    xc = xr - mean
    var = jnp.mean(xc * xc, axis=-1, keepdims=True)     # biased (nn.LayerNorm)
    xn = xc * jax.lax.rsqrt(var + eps) * ln_ref[0:1] + ln_ref[1:2]     # (HW, C)

    # --- ShuffleAttention (specialized to channels == 2*groups)
    smean = jnp.mean(xn, axis=0, keepdims=True)         # (1, C) spatial mean
    sc = xn - smean
    svar = jnp.mean(sc * sc, axis=0, keepdims=True)     # biased (GroupNorm)
    cw = sa_ref[0]
    cb = sa_ref[1]
    sw = sa_ref[2]
    sb = sa_ref[3]
    chan_gate = _sigmoid(cw * smean + cb)                                # (1, C)
    spat_gate = _sigmoid(sw * (sc * jax.lax.rsqrt(svar + eps)) + sb)     # (HW, C)
    mask = mask_ref[...]                                # 1.0 on even channels
    gated = xn * (mask * chan_gate + (1.0 - mask) * spat_gate)
    # channel_shuffle(out, 2) as an exact 0/1 permutation matmul (MXU, f32)
    attn = jnp.dot(gated, perm_ref[...], preferred_element_type=jnp.float32)

    # --- depthwise 3x3 (padding=1) on x_norm, * attention, + residual
    pad_scr[...] = jnp.zeros((H + 2, W + 2, C), jnp.float32)
    pad_scr[1:H + 1, 1:W + 1, :] = xn.reshape(H, W, C)
    w = dww_ref[...]                                    # (9, C)
    acc = jnp.zeros((H, W, C), jnp.float32)
    for k in range(9):
        ky, kx = k // 3, k % 3
        acc = acc + pad_scr[ky:ky + H, kx:kx + W, :] * w[k]
    acc = acc + dwb_ref[0]
    o_ref[0] = acc * attn.reshape(H, W, C) + x


def msef_block(x, p):
    B, H, W, C = x.shape
    assert C == 128, "kernel specialized to channels == 2*groups (groups=64)"
    cn = np.arange(C)
    src = (cn % 2) * (C // 2) + cn // 2                 # channel_shuffle(., 2) src
    perm = np.zeros((C, C), np.float32)
    perm[src, cn] = 1.0
    mask = (cn % 2 == 0).astype(np.float32).reshape(1, C)
    return pl.pallas_call(
        functools.partial(_msef_kernel, H=H, W=W, eps=1e-5),
        grid=(B,),
        out_shape=jax.ShapeDtypeStruct((B, H, W, C), jnp.float32),
        in_specs=[
            pl.BlockSpec((1, H, W, C), lambda b: (b, 0, 0, 0)),
            pl.BlockSpec((2, C), lambda b: (0, 0)),
            pl.BlockSpec((9, C), lambda b: (0, 0)),
            pl.BlockSpec((1, C), lambda b: (0, 0)),
            pl.BlockSpec((1, C), lambda b: (0, 0)),
            pl.BlockSpec((C, C), lambda b: (0, 0)),
            pl.BlockSpec(memory_space=pltpu.MemorySpace.SMEM),
        ],
        out_specs=pl.BlockSpec((1, H, W, C), lambda b: (b, 0, 0, 0)),
        scratch_shapes=[pltpu.VMEM((H + 2, W + 2, C), jnp.float32)],
        compiler_params=pltpu.CompilerParams(dimension_semantics=("parallel",)),
    )(x, p['ln_params'], p['dw_w'], p['dw_b'], jnp.asarray(mask),
      jnp.asarray(perm), p['sa_params'])


# -----------------------------------------------------------------------------
# separable bilinear 2x upsample (align_corners=True), skip add fused
# -----------------------------------------------------------------------------
def _bilinear_matrix(s_in, s_out):
    # F.interpolate(mode='bilinear', align_corners=True): src = dst*(in-1)/(out-1)
    i = np.arange(s_out)
    coord = i * (s_in - 1) / (s_out - 1) if s_out > 1 else np.zeros(1)
    i0 = np.clip(np.floor(coord).astype(np.int64), 0, s_in - 1)
    i1 = np.clip(i0 + 1, 0, s_in - 1)
    frac = (coord - i0).astype(np.float32)
    A = np.zeros((s_out, s_in), np.float32)
    A[np.arange(s_out), i0] += (1.0 - frac)
    A[np.arange(s_out), i1] += frac
    return A


def _rowup_kernel(a_ref, x_ref, o_ref):
    o_ref[0] = jnp.dot(a_ref[...], x_ref[0], preferred_element_type=jnp.float32)


def _rowup_add_kernel(a_ref, x_ref, s_ref, o_ref):
    o_ref[0] = (jnp.dot(a_ref[...], x_ref[0], preferred_element_type=jnp.float32)
                + s_ref[0])


def _rows_upsample(A, x, skip=None):
    """Per-batch left matmul: out[b] = A @ x[b] (+ skip[b]).  A: (R2, R)."""
    B, R, N = x.shape
    R2 = A.shape[0]
    TN = _col_tile(N)
    grid = (B, N // TN)
    in_specs = [
        pl.BlockSpec((R2, R), lambda b, t: (0, 0)),
        pl.BlockSpec((1, R, TN), lambda b, t: (b, 0, t)),
    ]
    args = [A, x]
    kern = _rowup_kernel
    if skip is not None:
        kern = _rowup_add_kernel
        in_specs.append(pl.BlockSpec((1, R2, TN), lambda b, t: (b, 0, t)))
        args.append(skip)
    return pl.pallas_call(
        kern,
        grid=grid,
        out_shape=jax.ShapeDtypeStruct((B, R2, N), jnp.float32),
        in_specs=in_specs,
        out_specs=pl.BlockSpec((1, R2, TN), lambda b, t: (b, 0, t)),
        compiler_params=pltpu.CompilerParams(
            dimension_semantics=("parallel", "parallel")),
    )(*args)


def upsample2x_add(x, skip):
    """Bilinear 2x upsample (align_corners=True) of x fused with `+ skip`."""
    B, H, W, C = x.shape
    Aw = jnp.asarray(_bilinear_matrix(W, 2 * W))
    Ah = jnp.asarray(_bilinear_matrix(H, 2 * H))
    # pass 1: W direction
    xt = jnp.transpose(x, (0, 2, 1, 3)).reshape(B, W, H * C)
    y = _rows_upsample(Aw, xt)                                    # (B, 2W, H*C)
    y = jnp.transpose(y.reshape(B, 2 * W, H, C), (0, 2, 1, 3))
    y = y.reshape(B, H, 2 * W * C)
    # pass 2: H direction + fused skip add
    y = _rows_upsample(Ah, y, skip.reshape(B, 2 * H, 2 * W * C))  # (B, 2H, 2W*C)
    return y.reshape(B, 2 * H, 2 * W, C)


# -----------------------------------------------------------------------------
# parameters & forward
# -----------------------------------------------------------------------------
def _kaiming_uniform(key, shape, fan_in):
    bound = float(np.sqrt(6.0 / fan_in))          # gain=sqrt(2), kaiming uniform
    return jax.random.uniform(key, shape, jnp.float32, -bound, bound)


def _conv_pack(w):
    """(3,3,Cin,Cout) f32 -> (9,Cin,Cout) bf16 for the MXU."""
    return w.reshape(9, w.shape[2], w.shape[3]).astype(jnp.bfloat16)


def init_params(key, nf):
    ks = jax.random.split(key, 8)
    p = {}
    p['conv1_w'] = _conv_pack(_kaiming_uniform(ks[0], (3, 3, 3, nf), 3 * 9))
    p['conv1_b'] = jnp.zeros((nf,), jnp.float32)
    p['conv2_w'] = _conv_pack(_kaiming_uniform(ks[1], (3, 3, nf, nf), nf * 9))
    p['conv2_b'] = jnp.zeros((nf,), jnp.float32)
    p['conv3_w'] = _conv_pack(_kaiming_uniform(ks[2], (3, 3, nf, nf), nf * 9))
    p['conv3_b'] = jnp.zeros((nf,), jnp.float32)
    # MSEFBlock LayerNormalization: LN weight=1 bias=0, gamma=1, beta=0 (folded)
    p['ln_params'] = jnp.stack([jnp.ones((nf,), jnp.float32),
                                jnp.zeros((nf,), jnp.float32)])
    # depthwise 3x3: fan_in = 1*3*3
    p['dw_w'] = _kaiming_uniform(ks[3], (9, nf), 9)
    p['dw_b'] = jnp.zeros((1, nf), jnp.float32)
    # ShuffleAttention: cweight/sweight kaiming (fan_in=1), cbias=sbias=1
    cw = jax.random.uniform(ks[4], (), jnp.float32, -np.sqrt(6.0), np.sqrt(6.0))
    sw = jax.random.uniform(ks[5], (), jnp.float32, -np.sqrt(6.0), np.sqrt(6.0))
    p['sa_params'] = jnp.stack([cw, jnp.float32(1.0), sw, jnp.float32(1.0)])

    # ECB refine blocks: re-parameterized 3x3 with identity folded at init time.
    def ecb_weight(k):
        w = _kaiming_uniform(k, (3, 3, nf, nf), nf * 9)
        w = w.at[1, 1, jnp.arange(nf), jnp.arange(nf)].add(1.0)
        return _conv_pack(w)

    p['refine3_w'] = ecb_weight(ks[6])
    p['refine3_b'] = jnp.zeros((nf,), jnp.float32)
    p['refine2_w'] = ecb_weight(ks[7])
    p['refine2_b'] = jnp.zeros((nf,), jnp.float32)
    return p


def denoiser_forward(x_nchw, p):
    x = jnp.transpose(x_nchw, (0, 2, 3, 1)).astype(jnp.float32)   # NCHW -> NHWC
    x1 = conv2d_3x3(x,  p['conv1_w'], p['conv1_b'], stride=1, relu=True)
    x2 = conv2d_3x3(x1, p['conv2_w'], p['conv2_b'], stride=2, relu=True)
    x3 = conv2d_3x3(x2, p['conv3_w'], p['conv3_b'], stride=2, relu=True)
    xb = msef_block(x3, p)
    y = upsample2x_add(xb, x2)                                    # up3(x) + x2
    y = conv2d_3x3(y, p['refine3_w'], p['refine3_b'], stride=1, relu=True)   # ECB
    y = upsample2x_add(y, x1)                                     # up2(x) + x1
    y = conv2d_3x3(y, p['refine2_w'], p['refine2_b'], stride=1, relu=True)   # ECB
    return jnp.transpose(y, (0, 3, 1, 2))                         # NHWC -> NCHW


if __name__ == "__main__":
    # num_filters must equal 2*groups=128 for this ShuffleAttention(groups=64).
    NF = 128
    B, H, W = 2, 16, 16
    root = jax.random.PRNGKey(0)
    kp, kx = jax.random.split(root)
    params = init_params(kp, NF)
    x = jax.random.normal(kx, (B, 3, H, W), jnp.float32)

    fwd = jax.jit(denoiser_forward)
    y = jax.block_until_ready(fwd(x, params))
    assert y.shape == (B, NF, H, W), y.shape
    assert bool(jnp.all(jnp.isfinite(y)))
    print("KERNEL_OK")
</pallas_src>

<mosaic_0001>
module attributes {stable_mosaic.version = 11 : i64} {
  func.func @_conv3x3_kernel(%arg0: i32, %arg1: i32, %arg2: memref<1x18x18x8xf32, #tpu.memory_space<vmem>>, %arg3: memref<9x8x128xbf16, #tpu.memory_space<vmem>>, %arg4: memref<1x128xf32, #tpu.memory_space<vmem>>, %arg5: memref<1x16x16x128xf32, #tpu.memory_space<vmem>>) attributes {dimension_semantics = [#tpu.dimension_semantics<parallel>, #tpu.dimension_semantics<parallel>], iteration_bounds = array<i64: 2, 1>, scalar_prefetch = 0 : i64, scratch_operands = 0 : i64, tpu.core_type = #tpu.core_type<tc>, window_params = [{transform_indices = @transform_0, window_bounds = array<i64: 1, 18, 18, 8>}, {pipeline_mode = #tpu.pipeline_mode<synchronous>, transform_indices = @transform_1, window_bounds = array<i64: 9, 8, 128>}, {pipeline_mode = #tpu.pipeline_mode<synchronous>, transform_indices = @transform_2, window_bounds = array<i64: 1, 128>}, {transform_indices = @transform_3, window_bounds = array<i64: 1, 16, 16, 128>}]} {
    %c16_i32 = arith.constant 16 : i32
    %0 = arith.muli %arg1, %c16_i32 : i32
    %cst = arith.constant 0.000000e+00 : f32
    %1 = vector.broadcast %cst : f32 to vector<256x128xf32>
    %c0_i32 = arith.constant 0 : i32
    %2 = arith.addi %0, %c0_i32 : i32
    %c0 = arith.constant 0 : index
    %3 = arith.index_cast %2 : i32 to index
    %c0_0 = arith.constant 0 : index
    %c0_1 = arith.constant 0 : index
    %4 = vector.load %arg2[%c0, %3, %c0_0, %c0_1] : memref<1x18x18x8xf32, #tpu.memory_space<vmem>>, vector<1x16x16x8xf32>
    %5 = vector.shape_cast %4 : vector<1x16x16x8xf32> to vector<16x16x8xf32>
    %6 = vector.shape_cast %5 : vector<16x16x8xf32> to vector<256x8xf32>
    %7 = arith.truncf %6 : vector<256x8xf32> to vector<256x8xbf16>
    %c0_2 = arith.constant 0 : index
    %c0_3 = arith.constant 0 : index
    %c0_4 = arith.constant 0 : index
    %8 = vector.load %arg3[%c0_2, %c0_3, %c0_4] : memref<9x8x128xbf16, #tpu.memory_space<vmem>>, vector<1x8x128xbf16>
    %9 = vector.shape_cast %8 : vector<1x8x128xbf16> to vector<8x128xbf16>
    %cst_5 = arith.constant dense<0.000000e+00> : vector<256x128xf32>
    %10 = tpu.matmul %7, %9, %cst_5 {dimension_numbers = #tpu.dot_dimension_numbers<[1], [0], [0], [1], [0, 0, 1, 1], [], []>} : vector<256x8xbf16>, vector<8x128xbf16>, vector<256x128xf32> -> vector<256x128xf32>
    %11 = arith.addf %1, %10 : vector<256x128xf32>
    %c0_i32_6 = arith.constant 0 : i32
    %12 = arith.addi %0, %c0_i32_6 : i32
    %c0_7 = arith.constant 0 : index
    %13 = arith.index_cast %12 : i32 to index
    %c1 = arith.constant 1 : index
    %c0_8 = arith.constant 0 : index
    %14 = vector.load %arg2[%c0_7, %13, %c1, %c0_8] : memref<1x18x18x8xf32, #tpu.memory_space<vmem>>, vector<1x16x16x8xf32>
    %15 = vector.shape_cast %14 : vector<1x16x16x8xf32> to vector<16x16x8xf32>
    %16 = vector.shape_cast %15 : vector<16x16x8xf32> to vector<256x8xf32>
    %17 = arith.truncf %16 : vector<256x8xf32> to vector<256x8xbf16>
    %c1_9 = arith.constant 1 : index
    %c0_10 = arith.constant 0 : index
    %c0_11 = arith.constant 0 : index
    %18 = vector.load %arg3[%c1_9, %c0_10, %c0_11] : memref<9x8x128xbf16, #tpu.memory_space<vmem>>, vector<1x8x128xbf16>
    %19 = vector.shape_cast %18 : vector<1x8x128xbf16> to vector<8x128xbf16>
    %cst_12 = arith.constant dense<0.000000e+00> : vector<256x128xf32>
    %20 = tpu.matmul %17, %19, %cst_12 {dimension_numbers = #tpu.dot_dimension_numbers<[1], [0], [0], [1], [0, 0, 1, 1], [], []>} : vector<256x8xbf16>, vector<8x128xbf16>, vector<256x128xf32> -> vector<256x128xf32>
    %21 = arith.addf %11, %20 : vector<256x128xf32>
    %c0_i32_13 = arith.constant 0 : i32
    %22 = arith.addi %0, %c0_i32_13 : i32
    %c0_14 = arith.constant 0 : index
    %23 = arith.index_cast %22 : i32 to index
    %c2 = arith.constant 2 : index
    %c0_15 = arith.constant 0 : index
    %24 = vector.load %arg2[%c0_14, %23, %c2, %c0_15] : memref<1x18x18x8xf32, #tpu.memory_space<vmem>>, vector<1x16x16x8xf32>
    %25 = vector.shape_cast %24 : vector<1x16x16x8xf32> to vector<16x16x8xf32>
    %26 = vector.shape_cast %25 : vector<16x16x8xf32> to vector<256x8xf32>
    %27 = arith.truncf %26 : vector<256x8xf32> to vector<256x8xbf16>
    %c2_16 = arith.constant 2 : index
    %c0_17 = arith.constant 0 : index
    %c0_18 = arith.constant 0 : index
    %28 = vector.load %arg3[%c2_16, %c0_17, %c0_18] : memref<9x8x128xbf16, #tpu.memory_space<vmem>>, vector<1x8x128xbf16>
    %29 = vector.shape_cast %28 : vector<1x8x128xbf16> to vector<8x128xbf16>
    %cst_19 = arith.constant dense<0.000000e+00> : vector<256x128xf32>
    %30 = tpu.matmul %27, %29, %cst_19 {dimension_numbers = #tpu.dot_dimension_numbers<[1], [0], [0], [1], [0, 0, 1, 1], [], []>} : vector<256x8xbf16>, vector<8x128xbf16>, vector<256x128xf32> -> vector<256x128xf32>
    %31 = arith.addf %21, %30 : vector<256x128xf32>
    %c1_i32 = arith.constant 1 : i32
    %32 = arith.addi %0, %c1_i32 : i32
    %c0_20 = arith.constant 0 : index
    %33 = arith.index_cast %32 : i32 to index
    %c0_21 = arith.constant 0 : index
    %c0_22 = arith.constant 0 : index
    %34 = vector.load %arg2[%c0_20, %33, %c0_21, %c0_22] : memref<1x18x18x8xf32, #tpu.memory_space<vmem>>, vector<1x16x16x8xf32>
    %35 = vector.shape_cast %34 : vector<1x16x16x8xf32> to vector<16x16x8xf32>
    %36 = vector.shape_cast %35 : vector<16x16x8xf32> to vector<256x8xf32>
    %37 = arith.truncf %36 : vector<256x8xf32> to vector<256x8xbf16>
    %c3 = arith.constant 3 : index
    %c0_23 = arith.constant 0 : index
    %c0_24 = arith.constant 0 : index
    %38 = vector.load %arg3[%c3, %c0_23, %c0_24] : memref<9x8x128xbf16, #tpu.memory_space<vmem>>, vector<1x8x128xbf16>
    %39 = vector.shape_cast %38 : vector<1x8x128xbf16> to vector<8x128xbf16>
    %cst_25 = arith.constant dense<0.000000e+00> : vector<256x128xf32>
    %40 = tpu.matmul %37, %39, %cst_25 {dimension_numbers = #tpu.dot_dimension_numbers<[1], [0], [0], [1], [0, 0, 1, 1], [], []>} : vector<256x8xbf16>, vector<8x128xbf16>, vector<256x128xf32> -> vector<256x128xf32>
    %41 = arith.addf %31, %40 : vector<256x128xf32>
    %c1_i32_26 = arith.constant 1 : i32
    %42 = arith.addi %0, %c1_i32_26 : i32
    %c0_27 = arith.constant 0 : index
    %43 = arith.index_cast %42 : i32 to index
    %c1_28 = arith.constant 1 : index
    %c0_29 = arith.constant 0 : index
    %44 = vector.load %arg2[%c0_27, %43, %c1_28, %c0_29] : memref<1x18x18x8xf32, #tpu.memory_space<vmem>>, vector<1x16x16x8xf32>
    %45 = vector.shape_cast %44 : vector<1x16x16x8xf32> to vector<16x16x8xf32>
    %46 = vector.shape_cast %45 : vector<16x16x8xf32> to vector<256x8xf32>
    %47 = arith.truncf %46 : vector<256x8xf32> to vector<256x8xbf16>
    %c4 = arith.constant 4 : index
    %c0_30 = arith.constant 0 : index
    %c0_31 = arith.constant 0 : index
    %48 = vector.load %arg3[%c4, %c0_30, %c0_31] : memref<9x8x128xbf16, #tpu.memory_space<vmem>>, vector<1x8x128xbf16>
    %49 = vector.shape_cast %48 : vector<1x8x128xbf16> to vector<8x128xbf16>
    %cst_32 = arith.constant dense<0.000000e+00> : vector<256x128xf32>
    %50 = tpu.matmul %47, %49, %cst_32 {dimension_numbers = #tpu.dot_dimension_numbers<[1], [0], [0], [1], [0, 0, 1, 1], [], []>} : vector<256x8xbf16>, vector<8x128xbf16>, vector<256x128xf32> -> vector<256x128xf32>
    %51 = arith.addf %41, %50 : vector<256x128xf32>
    %c1_i32_33 = arith.constant 1 : i32
    %52 = arith.addi %0, %c1_i32_33 : i32
    %c0_34 = arith.constant 0 : index
    %53 = arith.index_cast %52 : i32 to index
    %c2_35 = arith.constant 2 : index
    %c0_36 = arith.constant 0 : index
    %54 = vector.load %arg2[%c0_34, %53, %c2_35, %c0_36] : memref<1x18x18x8xf32, #tpu.memory_space<vmem>>, vector<1x16x16x8xf32>
    %55 = vector.shape_cast %54 : vector<1x16x16x8xf32> to vector<16x16x8xf32>
    %56 = vector.shape_cast %55 : vector<16x16x8xf32> to vector<256x8xf32>
    %57 = arith.truncf %56 : vector<256x8xf32> to vector<256x8xbf16>
    %c5 = arith.constant 5 : index
    %c0_37 = arith.constant 0 : index
    %c0_38 = arith.constant 0 : index
    %58 = vector.load %arg3[%c5, %c0_37, %c0_38] : memref<9x8x128xbf16, #tpu.memory_space<vmem>>, vector<1x8x128xbf16>
    %59 = vector.shape_cast %58 : vector<1x8x128xbf16> to vector<8x128xbf16>
    %cst_39 = arith.constant dense<0.000000e+00> : vector<256x128xf32>
    %60 = tpu.matmul %57, %59, %cst_39 {dimension_numbers = #tpu.dot_dimension_numbers<[1], [0], [0], [1], [0, 0, 1, 1], [], []>} : vector<256x8xbf16>, vector<8x128xbf16>, vector<256x128xf32> -> vector<256x128xf32>
    %61 = arith.addf %51, %60 : vector<256x128xf32>
    %c2_i32 = arith.constant 2 : i32
    %62 = arith.addi %0, %c2_i32 : i32
    %c0_40 = arith.constant 0 : index
    %63 = arith.index_cast %62 : i32 to index
    %c0_41 = arith.constant 0 : index
    %c0_42 = arith.constant 0 : index
    %64 = vector.load %arg2[%c0_40, %63, %c0_41, %c0_42] : memref<1x18x18x8xf32, #tpu.memory_space<vmem>>, vector<1x16x16x8xf32>
    %65 = vector.shape_cast %64 : vector<1x16x16x8xf32> to vector<16x16x8xf32>
    %66 = vector.shape_cast %65 : vector<16x16x8xf32> to vector<256x8xf32>
    %67 = arith.truncf %66 : vector<256x8xf32> to vector<256x8xbf16>
    %c6 = arith.constant 6 : index
    %c0_43 = arith.constant 0 : index
    %c0_44 = arith.constant 0 : index
    %68 = vector.load %arg3[%c6, %c0_43, %c0_44] : memref<9x8x128xbf16, #tpu.memory_space<vmem>>, vector<1x8x128xbf16>
    %69 = vector.shape_cast %68 : vector<1x8x128xbf16> to vector<8x128xbf16>
    %cst_45 = arith.constant dense<0.000000e+00> : vector<256x128xf32>
    %70 = tpu.matmul %67, %69, %cst_45 {dimension_numbers = #tpu.dot_dimension_numbers<[1], [0], [0], [1], [0, 0, 1, 1], [], []>} : vector<256x8xbf16>, vector<8x128xbf16>, vector<256x128xf32> -> vector<256x128xf32>
    %71 = arith.addf %61, %70 : vector<256x128xf32>
    %c2_i32_46 = arith.constant 2 : i32
    %72 = arith.addi %0, %c2_i32_46 : i32
    %c0_47 = arith.constant 0 : index
    %73 = arith.index_cast %72 : i32 to index
    %c1_48 = arith.constant 1 : index
    %c0_49 = arith.constant 0 : index
    %74 = vector.load %arg2[%c0_47, %73, %c1_48, %c0_49] : memref<1x18x18x8xf32, #tpu.memory_space<vmem>>, vector<1x16x16x8xf32>
    %75 = vector.shape_cast %74 : vector<1x16x16x8xf32> to vector<16x16x8xf32>
    %76 = vector.shape_cast %75 : vector<16x16x8xf32> to vector<256x8xf32>
    %77 = arith.truncf %76 : vector<256x8xf32> to vector<256x8xbf16>
    %c7 = arith.constant 7 : index
    %c0_50 = arith.constant 0 : index
    %c0_51 = arith.constant 0 : index
    %78 = vector.load %arg3[%c7, %c0_50, %c0_51] : memref<9x8x128xbf16, #tpu.memory_space<vmem>>, vector<1x8x128xbf16>
    %79 = vector.shape_cast %78 : vector<1x8x128xbf16> to vector<8x128xbf16>
    %cst_52 = arith.constant dense<0.000000e+00> : vector<256x128xf32>
    %80 = tpu.matmul %77, %79, %cst_52 {dimension_numbers = #tpu.dot_dimension_numbers<[1], [0], [0], [1], [0, 0, 1, 1], [], []>} : vector<256x8xbf16>, vector<8x128xbf16>, vector<256x128xf32> -> vector<256x128xf32>
    %81 = arith.addf %71, %80 : vector<256x128xf32>
    %c2_i32_53 = arith.constant 2 : i32
    %82 = arith.addi %0, %c2_i32_53 : i32
    %c0_54 = arith.constant 0 : index
    %83 = arith.index_cast %82 : i32 to index
    %c2_55 = arith.constant 2 : index
    %c0_56 = arith.constant 0 : index
    %84 = vector.load %arg2[%c0_54, %83, %c2_55, %c0_56] : memref<1x18x18x8xf32, #tpu.memory_space<vmem>>, vector<1x16x16x8xf32>
    %85 = vector.shape_cast %84 : vector<1x16x16x8xf32> to vector<16x16x8xf32>
    %86 = vector.shape_cast %85 : vector<16x16x8xf32> to vector<256x8xf32>
    %87 = arith.truncf %86 : vector<256x8xf32> to vector<256x8xbf16>
    %c8 = arith.constant 8 : index
    %c0_57 = arith.constant 0 : index
    %c0_58 = arith.constant 0 : index
    %88 = vector.load %arg3[%c8, %c0_57, %c0_58] : memref<9x8x128xbf16, #tpu.memory_space<vmem>>, vector<1x8x128xbf16>
    %89 = vector.shape_cast %88 : vector<1x8x128xbf16> to vector<8x128xbf16>
    %cst_59 = arith.constant dense<0.000000e+00> : vector<256x128xf32>
    %90 = tpu.matmul %87, %89, %cst_59 {dimension_numbers = #tpu.dot_dimension_numbers<[1], [0], [0], [1], [0, 0, 1, 1], [], []>} : vector<256x8xbf16>, vector<8x128xbf16>, vector<256x128xf32> -> vector<256x128xf32>
    %91 = arith.addf %81, %90 : vector<256x128xf32>
    %c0_60 = arith.constant 0 : index
    %c0_61 = arith.constant 0 : index
    %92 = vector.load %arg4[%c0_60, %c0_61] : memref<1x128xf32, #tpu.memory_space<vmem>>, vector<1x128xf32>
    %93 = vector.broadcast %92 : vector<1x128xf32> to vector<256x128xf32>
    %94 = arith.addf %91, %93 : vector<256x128xf32>
    %cst_62 = arith.constant 0.000000e+00 : f32
    %95 = vector.broadcast %cst_62 : f32 to vector<256x128xf32>
    %96 = arith.maximumf %94, %95 : vector<256x128xf32>
    %97 = vector.shape_cast %96 : vector<256x128xf32> to vector<16x16x128xf32>
    %c0_63 = arith.constant 0 : index
    %c0_64 = arith.constant 0 : index
    %c0_65 = arith.constant 0 : index
    %c0_66 = arith.constant 0 : index
    %98 = vector.load %arg5[%c0_63, %c0_64, %c0_65, %c0_66] : memref<1x16x16x128xf32, #tpu.memory_space<vmem>>, vector<1x16x16x128xf32>
    %99 = vector.shape_cast %98 : vector<1x16x16x128xf32> to vector<16x16x128xf32>
    %100 = vector.shape_cast %97 : vector<16x16x128xf32> to vector<1x16x16x128xf32>
    tpu.vector_store %arg5[%c0_63, %c0_64, %c0_65, %c0_66], %100 {strides = array<i32>} : memref<1x16x16x128xf32, #tpu.memory_space<vmem>>, vector<1x16x16x128xf32>,
    return
  }
  func.func @transform_0(%arg0: i32, %arg1: i32) -> (i32, i32, i32, i32) {
    %c0_i32 = arith.constant 0 : i32
    %c0_i32_0 = arith.constant 0 : i32
    %c0_i32_1 = arith.constant 0 : i32
    %c0_i32_2 = arith.constant 0 : i32
    return %arg0, %c0_i32, %c0_i32_0, %c0_i32_1 : i32, i32, i32, i32
  }
  func.func @transform_1(%arg0: i32, %arg1: i32) -> (i32, i32, i32) {
    %c0_i32 = arith.constant 0 : i32
    %c0_i32_0 = arith.constant 0 : i32
    %c0_i32_1 = arith.constant 0 : i32
    %c0_i32_2 = arith.constant 0 : i32
    return %c0_i32, %c0_i32_0, %c0_i32_1 : i32, i32, i32
  }
  func.func @transform_2(%arg0: i32, %arg1: i32) -> (i32, i32) {
    %c0_i32 = arith.constant 0 : i32
    %c0_i32_0 = arith.constant 0 : i32
    %c0_i32_1 = arith.constant 0 : i32
    return %c0_i32, %c0_i32_0 : i32, i32
  }
  func.func @transform_3(%arg0: i32, %arg1: i32) -> (i32, i32, i32, i32) {
    %c0_i32 = arith.constant 0 : i32
    %c0_i32_0 = arith.constant 0 : i32
    %c0_i32_1 = arith.constant 0 : i32
    return %arg0, %arg1, %c0_i32, %c0_i32_0 : i32, i32, i32, i32
  }
}

module attributes {stable_mosaic.version = 11 : i64} {
  func.func @_conv3x3_kernel(%arg0: i32, %arg1: i32, %arg2: memref<1x36x9x128xf32, #tpu.memory_space<vmem>>, %arg3: memref<9x128x128xbf16, #tpu.memory_space<vmem>>, %arg4: memref<1x128xf32, #tpu.memory_space<vmem>>, %arg5: memref<1x8x8x128xf32, #tpu.memory_space<vmem>>) attributes {dimension_semantics = [#tpu.dimension_semantics<parallel>, #tpu.dimension_semantics<parallel>], iteration_bounds = array<i64: 2, 1>, scalar_prefetch = 0 : i64, scratch_operands = 0 : i64, tpu.core_type = #tpu.core_type<tc>, window_params = [{transform_indices = @transform_0, window_bounds = array<i64: 1, 36, 9, 128>}, {pipeline_mode = #tpu.pipeline_mode<synchronous>, transform_indices = @transform_1, window_bounds = array<i64: 9, 128, 128>}, {pipeline_mode = #tpu.pipeline_mode<synchronous>, transform_indices = @transform_2, window_bounds = array<i64: 1, 128>}, {transform_indices = @transform_3, window_bounds = array<i64: 1, 8, 8, 128>}]} {
    %c8_i32 = arith.constant 8 : i32
    %0 = arith.muli %arg1, %c8_i32 : i32
    %cst = arith.constant 0.000000e+00 : f32
    %1 = vector.broadcast %cst : f32 to vector<64x128xf32>
    %c0_i32 = arith.constant 0 : i32
    %2 = arith.addi %c0_i32, %0 : i32
    %c0_i32_0 = arith.constant 0 : i32
    %3 = arith.addi %2, %c0_i32_0 : i32
    %c0 = arith.constant 0 : index
    %4 = arith.index_cast %3 : i32 to index
    %c0_1 = arith.constant 0 : index
    %c0_2 = arith.constant 0 : index
    %5 = vector.load %arg2[%c0, %4, %c0_1, %c0_2] : memref<1x36x9x128xf32, #tpu.memory_space<vmem>>, vector<1x8x8x128xf32>
    %6 = vector.shape_cast %5 : vector<1x8x8x128xf32> to vector<8x8x128xf32>
    %7 = vector.shape_cast %6 : vector<8x8x128xf32> to vector<64x128xf32>
    %8 = arith.truncf %7 : vector<64x128xf32> to vector<64x128xbf16>
    %c0_3 = arith.constant 0 : index
    %c0_4 = arith.constant 0 : index
    %c0_5 = arith.constant 0 : index
    %9 = vector.load %arg3[%c0_3, %c0_4, %c0_5] : memref<9x128x128xbf16, #tpu.memory_space<vmem>>, vector<1x128x128xbf16>
    %10 = vector.shape_cast %9 : vector<1x128x128xbf16> to vector<128x128xbf16>
    %cst_6 = arith.constant dense<0.000000e+00> : vector<64x128xf32>
    %11 = tpu.matmul %8, %10, %cst_6 {dimension_numbers = #tpu.dot_dimension_numbers<[1], [0], [0], [1], [0, 0, 1, 1], [], []>} : vector<64x128xbf16>, vector<128x128xbf16>, vector<64x128xf32> -> vector<64x128xf32>
    %12 = arith.addf %1, %11 : vector<64x128xf32>
    %c9_i32 = arith.constant 9 : i32
    %13 = arith.addi %c9_i32, %0 : i32
    %c0_i32_7 = arith.constant 0 : i32
    %14 = arith.addi %13, %c0_i32_7 : i32
    %c0_8 = arith.constant 0 : index
    %15 = arith.index_cast %14 : i32 to index
    %c0_9 = arith.constant 0 : index
    %c0_10 = arith.constant 0 : index
    %16 = vector.load %arg2[%c0_8, %15, %c0_9, %c0_10] : memref<1x36x9x128xf32, #tpu.memory_space<vmem>>, vector<1x8x8x128xf32>
    %17 = vector.shape_cast %16 : vector<1x8x8x128xf32> to vector<8x8x128xf32>
    %18 = vector.shape_cast %17 : vector<8x8x128xf32> to vector<64x128xf32>
    %19 = arith.truncf %18 : vector<64x128xf32> to vector<64x128xbf16>
    %c1 = arith.constant 1 : index
    %c0_11 = arith.constant 0 : index
    %c0_12 = arith.constant 0 : index
    %20 = vector.load %arg3[%c1, %c0_11, %c0_12] : memref<9x128x128xbf16, #tpu.memory_space<vmem>>, vector<1x128x128xbf16>
    %21 = vector.shape_cast %20 : vector<1x128x128xbf16> to vector<128x128xbf16>
    %cst_13 = arith.constant dense<0.000000e+00> : vector<64x128xf32>
    %22 = tpu.matmul %19, %21, %cst_13 {dimension_numbers = #tpu.dot_dimension_numbers<[1], [0], [0], [1], [0, 0, 1, 1], [], []>} : vector<64x128xbf16>, vector<128x128xbf16>, vector<64x128xf32> -> vector<64x128xf32>
    %23 = arith.addf %12, %22 : vector<64x128xf32>
    %c0_i32_14 = arith.constant 0 : i32
    %24 = arith.addi %c0_i32_14, %0 : i32
    %c0_i32_15 = arith.constant 0 : i32
    %25 = arith.addi %24, %c0_i32_15 : i32
    %c0_16 = arith.constant 0 : index
    %26 = arith.index_cast %25 : i32 to index
    %c1_17 = arith.constant 1 : index
    %c0_18 = arith.constant 0 : index
    %27 = vector.load %arg2[%c0_16, %26, %c1_17, %c0_18] : memref<1x36x9x128xf32, #tpu.memory_space<vmem>>, vector<1x8x8x128xf32>
    %28 = vector.shape_cast %27 : vector<1x8x8x128xf32> to vector<8x8x128xf32>
    %29 = vector.shape_cast %28 : vector<8x8x128xf32> to vector<64x128xf32>
    %30 = arith.truncf %29 : vector<64x128xf32> to vector<64x128xbf16>
    %c2 = arith.constant 2 : index
    %c0_19 = arith.constant 0 : index
    %c0_20 = arith.constant 0 : index
    %31 = vector.load %arg3[%c2, %c0_19, %c0_20] : memref<9x128x128xbf16, #tpu.memory_space<vmem>>, vector<1x128x128xbf16>
    %32 = vector.shape_cast %31 : vector<1x128x128xbf16> to vector<128x128xbf16>
    %cst_21 = arith.constant dense<0.000000e+00> : vector<64x128xf32>
    %33 = tpu.matmul %30, %32, %cst_21 {dimension_numbers = #tpu.dot_dimension_numbers<[1], [0], [0], [1], [0, 0, 1, 1], [], []>} : vector<64x128xbf16>, vector<128x128xbf16>, vector<64x128xf32> -> vector<64x128xf32>
    %34 = arith.addf %23, %33 : vector<64x128xf32>
    %c18_i32 = arith.constant 18 : i32
    %35 = arith.addi %c18_i32, %0 : i32
    %c0_i32_22 = arith.constant 0 : i32
    %36 = arith.addi %35, %c0_i32_22 : i32
    %c0_23 = arith.constant 0 : index
    %37 = arith.index_cast %36 : i32 to index
    %c0_24 = arith.constant 0 : index
    %c0_25 = arith.constant 0 : index
    %38 = vector.load %arg2[%c0_23, %37, %c0_24, %c0_25] : memref<1x36x9x128xf32, #tpu.memory_space<vmem>>, vector<1x8x8x128xf32>
    %39 = vector.shape_cast %38 : vector<1x8x8x128xf32> to vector<8x8x128xf32>
    %40 = vector.shape_cast %39 : vector<8x8x128xf32> to vector<64x128xf32>
    %41 = arith.truncf %40 : vector<64x128xf32> to vector<64x128xbf16>
    %c3 = arith.constant 3 : index
    %c0_26 = arith.constant 0 : index
    %c0_27 = arith.constant 0 : index
    %42 = vector.load %arg3[%c3, %c0_26, %c0_27] : memref<9x128x128xbf16, #tpu.memory_space<vmem>>, vector<1x128x128xbf16>
    %43 = vector.shape_cast %42 : vector<1x128x128xbf16> to vector<128x128xbf16>
    %cst_28 = arith.constant dense<0.000000e+00> : vector<64x128xf32>
    %44 = tpu.matmul %41, %43, %cst_28 {dimension_numbers = #tpu.dot_dimension_numbers<[1], [0], [0], [1], [0, 0, 1, 1], [], []>} : vector<64x128xbf16>, vector<128x128xbf16>, vector<64x128xf32> -> vector<64x128xf32>
    %45 = arith.addf %34, %44 : vector<64x128xf32>
    %c27_i32 = arith.constant 27 : i32
    %46 = arith.addi %c27_i32, %0 : i32
    %c0_i32_29 = arith.constant 0 : i32
    %47 = arith.addi %46, %c0_i32_29 : i32
    %c0_30 = arith.constant 0 : index
    %48 = arith.index_cast %47 : i32 to index
    %c0_31 = arith.constant 0 : index
    %c0_32 = arith.constant 0 : index
    %49 = vector.load %arg2[%c0_30, %48, %c0_31, %c0_32] : memref<1x36x9x128xf32, #tpu.memory_space<vmem>>, vector<1x8x8x128xf32>
    %50 = vector.shape_cast %49 : vector<1x8x8x128xf32> to vector<8x8x128xf32>
    %51 = vector.shape_cast %50 : vector<8x8x128xf32> to vector<64x128xf32>
    %52 = arith.truncf %51 : vector<64x128xf32> to vector<64x128xbf16>
    %c4 = arith.constant 4 : index
    %c0_33 = arith.constant 0 : index
    %c0_34 = arith.constant 0 : index
    %53 = vector.load %arg3[%c4, %c0_33, %c0_34] : memref<9x128x128xbf16, #tpu.memory_space<vmem>>, vector<1x128x128xbf16>
    %54 = vector.shape_cast %53 : vector<1x128x128xbf16> to vector<128x128xbf16>
    %cst_35 = arith.constant dense<0.000000e+00> : vector<64x128xf32>
    %55 = tpu.matmul %52, %54, %cst_35 {dimension_numbers = #tpu.dot_dimension_numbers<[1], [0], [0], [1], [0, 0, 1, 1], [], []>} : vector<64x128xbf16>, vector<128x128xbf16>, vector<64x128xf32> -> vector<64x128xf32>
    %56 = arith.addf %45, %55 : vector<64x128xf32>
    %c18_i32_36 = arith.constant 18 : i32
    %57 = arith.addi %c18_i32_36, %0 : i32
    %c0_i32_37 = arith.constant 0 : i32
    %58 = arith.addi %57, %c0_i32_37 : i32
    %c0_38 = arith.constant 0 : index
    %59 = arith.index_cast %58 : i32 to index
    %c1_39 = arith.constant 1 : index
    %c0_40 = arith.constant 0 : index
    %60 = vector.load %arg2[%c0_38, %59, %c1_39, %c0_40] : memref<1x36x9x128xf32, #tpu.memory_space<vmem>>, vector<1x8x8x128xf32>
    %61 = vector.shape_cast %60 : vector<1x8x8x128xf32> to vector<8x8x128xf32>
    %62 = vector.shape_cast %61 : vector<8x8x128xf32> to vector<64x128xf32>
    %63 = arith.truncf %62 : vector<64x128xf32> to vector<64x128xbf16>
    %c5 = arith.constant 5 : index
    %c0_41 = arith.constant 0 : index
    %c0_42 = arith.constant 0 : index
    %64 = vector.load %arg3[%c5, %c0_41, %c0_42] : memref<9x128x128xbf16, #tpu.memory_space<vmem>>, vector<1x128x128xbf16>
    %65 = vector.shape_cast %64 : vector<1x128x128xbf16> to vector<128x128xbf16>
    %cst_43 = arith.constant dense<0.000000e+00> : vector<64x128xf32>
    %66 = tpu.matmul %63, %65, %cst_43 {dimension_numbers = #tpu.dot_dimension_numbers<[1], [0], [0], [1], [0, 0, 1, 1], [], []>} : vector<64x128xbf16>, vector<128x128xbf16>, vector<64x128xf32> -> vector<64x128xf32>
    %67 = arith.addf %56, %66 : vector<64x128xf32>
    %c0_i32_44 = arith.constant 0 : i32
    %68 = arith.addi %c0_i32_44, %0 : i32
    %c1_i32 = arith.constant 1 : i32
    %69 = arith.addi %68, %c1_i32 : i32
    %c0_45 = arith.constant 0 : index
    %70 = arith.index_cast %69 : i32 to index
    %c0_46 = arith.constant 0 : index
    %c0_47 = arith.constant 0 : index
    %71 = vector.load %arg2[%c0_45, %70, %c0_46, %c0_47] : memref<1x36x9x128xf32, #tpu.memory_space<vmem>>, vector<1x8x8x128xf32>
    %72 = vector.shape_cast %71 : vector<1x8x8x128xf32> to vector<8x8x128xf32>
    %73 = vector.shape_cast %72 : vector<8x8x128xf32> to vector<64x128xf32>
    %74 = arith.truncf %73 : vector<64x128xf32> to vector<64x128xbf16>
    %c6 = arith.constant 6 : index
    %c0_48 = arith.constant 0 : index
    %c0_49 = arith.constant 0 : index
    %75 = vector.load %arg3[%c6, %c0_48, %c0_49] : memref<9x128x128xbf16, #tpu.memory_space<vmem>>, vector<1x128x128xbf16>
    %76 = vector.shape_cast %75 : vector<1x128x128xbf16> to vector<128x128xbf16>
    %cst_50 = arith.constant dense<0.000000e+00> : vector<64x128xf32>
    %77 = tpu.matmul %74, %76, %cst_50 {dimension_numbers = #tpu.dot_dimension_numbers<[1], [0], [0], [1], [0, 0, 1, 1], [], []>} : vector<64x128xbf16>, vector<128x128xbf16>, vector<64x128xf32> -> vector<64x128xf32>
    %78 = arith.addf %67, %77 : vector<64x128xf32>
    %c9_i32_51 = arith.constant 9 : i32
    %79 = arith.addi %c9_i32_51, %0 : i32
    %c1_i32_52 = arith.constant 1 : i32
    %80 = arith.addi %79, %c1_i32_52 : i32
    %c0_53 = arith.constant 0 : index
    %81 = arith.index_cast %80 : i32 to index
    %c0_54 = arith.constant 0 : index
    %c0_55 = arith.constant 0 : index
    %82 = vector.load %arg2[%c0_53, %81, %c0_54, %c0_55] : memref<1x36x9x128xf32, #tpu.memory_space<vmem>>, vector<1x8x8x128xf32>
    %83 = vector.shape_cast %82 : vector<1x8x8x128xf32> to vector<8x8x128xf32>
    %84 = vector.shape_cast %83 : vector<8x8x128xf32> to vector<64x128xf32>
    %85 = arith.truncf %84 : vector<64x128xf32> to vector<64x128xbf16>
    %c7 = arith.constant 7 : index
    %c0_56 = arith.constant 0 : index
    %c0_57 = arith.constant 0 : index
    %86 = vector.load %arg3[%c7, %c0_56, %c0_57] : memref<9x128x128xbf16, #tpu.memory_space<vmem>>, vector<1x128x128xbf16>
    %87 = vector.shape_cast %86 : vector<1x128x128xbf16> to vector<128x128xbf16>
    %cst_58 = arith.constant dense<0.000000e+00> : vector<64x128xf32>
    %88 = tpu.matmul %85, %87, %cst_58 {dimension_numbers = #tpu.dot_dimension_numbers<[1], [0], [0], [1], [0, 0, 1, 1], [], []>} : vector<64x128xbf16>, vector<128x128xbf16>, vector<64x128xf32> -> vector<64x128xf32>
    %89 = arith.addf %78, %88 : vector<64x128xf32>
    %c0_i32_59 = arith.constant 0 : i32
    %90 = arith.addi %c0_i32_59, %0 : i32
    %c1_i32_60 = arith.constant 1 : i32
    %91 = arith.addi %90, %c1_i32_60 : i32
    %c0_61 = arith.constant 0 : index
    %92 = arith.index_cast %91 : i32 to index
    %c1_62 = arith.constant 1 : index
    %c0_63 = arith.constant 0 : index
    %93 = vector.load %arg2[%c0_61, %92, %c1_62, %c0_63] : memref<1x36x9x128xf32, #tpu.memory_space<vmem>>, vector<1x8x8x128xf32>
    %94 = vector.shape_cast %93 : vector<1x8x8x128xf32> to vector<8x8x128xf32>
    %95 = vector.shape_cast %94 : vector<8x8x128xf32> to vector<64x128xf32>
    %96 = arith.truncf %95 : vector<64x128xf32> to vector<64x128xbf16>
    %c8 = arith.constant 8 : index
    %c0_64 = arith.constant 0 : index
    %c0_65 = arith.constant 0 : index
    %97 = vector.load %arg3[%c8, %c0_64, %c0_65] : memref<9x128x128xbf16, #tpu.memory_space<vmem>>, vector<1x128x128xbf16>
    %98 = vector.shape_cast %97 : vector<1x128x128xbf16> to vector<128x128xbf16>
    %cst_66 = arith.constant dense<0.000000e+00> : vector<64x128xf32>
    %99 = tpu.matmul %96, %98, %cst_66 {dimension_numbers = #tpu.dot_dimension_numbers<[1], [0], [0], [1], [0, 0, 1, 1], [], []>} : vector<64x128xbf16>, vector<128x128xbf16>, vector<64x128xf32> -> vector<64x128xf32>
    %100 = arith.addf %89, %99 : vector<64x128xf32>
    %c0_67 = arith.constant 0 : index
    %c0_68 = arith.constant 0 : index
    %101 = vector.load %arg4[%c0_67, %c0_68] : memref<1x128xf32, #tpu.memory_space<vmem>>, vector<1x128xf32>
    %102 = vector.broadcast %101 : vector<1x128xf32> to vector<64x128xf32>
    %103 = arith.addf %100, %102 : vector<64x128xf32>
    %cst_69 = arith.constant 0.000000e+00 : f32
    %104 = vector.broadcast %cst_69 : f32 to vector<64x128xf32>
    %105 = arith.maximumf %103, %104 : vector<64x128xf32>
    %106 = vector.shape_cast %105 : vector<64x128xf32> to vector<8x8x128xf32>
    %c0_70 = arith.constant 0 : index
    %c0_71 = arith.constant 0 : index
    %c0_72 = arith.constant 0 : index
    %c0_73 = arith.constant 0 : index
    %107 = vector.load %arg5[%c0_70, %c0_71, %c0_72, %c0_73] : memref<1x8x8x128xf32, #tpu.memory_space<vmem>>, vector<1x8x8x128xf32>
    %108 = vector.shape_cast %107 : vector<1x8x8x128xf32> to vector<8x8x128xf32>
    %109 = vector.shape_cast %106 : vector<8x8x128xf32> to vector<1x8x8x128xf32>
    tpu.vector_store %arg5[%c0_70, %c0_71, %c0_72, %c0_73], %109 {strides = array<i32>} : memref<1x8x8x128xf32, #tpu.memory_space<vmem>>, vector<1x8x8x128xf32>,
    return
  }
  func.func @transform_0(%arg0: i32, %arg1: i32) -> (i32, i32, i32, i32) {
    %c0_i32 = arith.constant 0 : i32
    %c0_i32_0 = arith.constant 0 : i32
    %c0_i32_1 = arith.constant 0 : i32
    %c0_i32_2 = arith.constant 0 : i32
    return %arg0, %c0_i32, %c0_i32_0, %c0_i32_1 : i32, i32, i32, i32
  }
  func.func @transform_1(%arg0: i32, %arg1: i32) -> (i32, i32, i32) {
    %c0_i32 = arith.constant 0 : i32
    %c0_i32_0 = arith.constant 0 : i32
    %c0_i32_1 = arith.constant 0 : i32
    %c0_i32_2 = arith.constant 0 : i32
    return %c0_i32, %c0_i32_0, %c0_i32_1 : i32, i32, i32
  }
  func.func @transform_2(%arg0: i32, %arg1: i32) -> (i32, i32) {
    %c0_i32 = arith.constant 0 : i32
    %c0_i32_0 = arith.constant 0 : i32
    %c0_i32_1 = arith.constant 0 : i32
    return %c0_i32, %c0_i32_0 : i32, i32
  }
  func.func @transform_3(%arg0: i32, %arg1: i32) -> (i32, i32, i32, i32) {
    %c0_i32 = arith.constant 0 : i32
    %c0_i32_0 = arith.constant 0 : i32
    %c0_i32_1 = arith.constant 0 : i32
    return %arg0, %arg1, %c0_i32, %c0_i32_0 : i32, i32, i32, i32
  }
}

module attributes {stable_mosaic.version = 11 : i64} {
  func.func @_conv3x3_kernel(%arg0: i32, %arg1: i32, %arg2: memref<1x20x5x128xf32, #tpu.memory_space<vmem>>, %arg3: memref<9x128x128xbf16, #tpu.memory_space<vmem>>, %arg4: memref<1x128xf32, #tpu.memory_space<vmem>>, %arg5: memref<1x4x4x128xf32, #tpu.memory_space<vmem>>) attributes {dimension_semantics = [#tpu.dimension_semantics<parallel>, #tpu.dimension_semantics<parallel>], iteration_bounds = array<i64: 2, 1>, scalar_prefetch = 0 : i64, scratch_operands = 0 : i64, tpu.core_type = #tpu.core_type<tc>, window_params = [{transform_indices = @transform_0, window_bounds = array<i64: 1, 20, 5, 128>}, {pipeline_mode = #tpu.pipeline_mode<synchronous>, transform_indices = @transform_1, window_bounds = array<i64: 9, 128, 128>}, {pipeline_mode = #tpu.pipeline_mode<synchronous>, transform_indices = @transform_2, window_bounds = array<i64: 1, 128>}, {transform_indices = @transform_3, window_bounds = array<i64: 1, 4, 4, 128>}]} {
    %c4_i32 = arith.constant 4 : i32
    %0 = arith.muli %arg1, %c4_i32 : i32
    %cst = arith.constant 0.000000e+00 : f32
    %1 = vector.broadcast %cst : f32 to vector<16x128xf32>
    %c0_i32 = arith.constant 0 : i32
    %2 = arith.addi %c0_i32, %0 : i32
    %c0_i32_0 = arith.constant 0 : i32
    %3 = arith.addi %2, %c0_i32_0 : i32
    %c0 = arith.constant 0 : index
    %4 = arith.index_cast %3 : i32 to index
    %c0_1 = arith.constant 0 : index
    %c0_2 = arith.constant 0 : index
    %5 = vector.load %arg2[%c0, %4, %c0_1, %c0_2] : memref<1x20x5x128xf32, #tpu.memory_space<vmem>>, vector<1x4x4x128xf32>
    %6 = vector.shape_cast %5 : vector<1x4x4x128xf32> to vector<4x4x128xf32>
    %7 = vector.shape_cast %6 : vector<4x4x128xf32> to vector<16x128xf32>
    %8 = arith.truncf %7 : vector<16x128xf32> to vector<16x128xbf16>
    %c0_3 = arith.constant 0 : index
    %c0_4 = arith.constant 0 : index
    %c0_5 = arith.constant 0 : index
    %9 = vector.load %arg3[%c0_3, %c0_4, %c0_5] : memref<9x128x128xbf16, #tpu.memory_space<vmem>>, vector<1x128x128xbf16>
    %10 = vector.shape_cast %9 : vector<1x128x128xbf16> to vector<128x128xbf16>
    %cst_6 = arith.constant dense<0.000000e+00> : vector<16x128xf32>
    %11 = tpu.matmul %8, %10, %cst_6 {dimension_numbers = #tpu.dot_dimension_numbers<[1], [0], [0], [1], [0, 0, 1, 1], [], []>} : vector<16x128xbf16>, vector<128x128xbf16>, vector<16x128xf32> -> vector<16x128xf32>
    %12 = arith.addf %1, %11 : vector<16x128xf32>
    %c5_i32 = arith.constant 5 : i32
    %13 = arith.addi %c5_i32, %0 : i32
    %c0_i32_7 = arith.constant 0 : i32
    %14 = arith.addi %13, %c0_i32_7 : i32
    %c0_8 = arith.constant 0 : index
    %15 = arith.index_cast %14 : i32 to index
    %c0_9 = arith.constant 0 : index
    %c0_10 = arith.constant 0 : index
    %16 = vector.load %arg2[%c0_8, %15, %c0_9, %c0_10] : memref<1x20x5x128xf32, #tpu.memory_space<vmem>>, vector<1x4x4x128xf32>
    %17 = vector.shape_cast %16 : vector<1x4x4x128xf32> to vector<4x4x128xf32>
    %18 = vector.shape_cast %17 : vector<4x4x128xf32> to vector<16x128xf32>
    %19 = arith.truncf %18 : vector<16x128xf32> to vector<16x128xbf16>
    %c1 = arith.constant 1 : index
    %c0_11 = arith.constant 0 : index
    %c0_12 = arith.constant 0 : index
    %20 = vector.load %arg3[%c1, %c0_11, %c0_12] : memref<9x128x128xbf16, #tpu.memory_space<vmem>>, vector<1x128x128xbf16>
    %21 = vector.shape_cast %20 : vector<1x128x128xbf16> to vector<128x128xbf16>
    %cst_13 = arith.constant dense<0.000000e+00> : vector<16x128xf32>
    %22 = tpu.matmul %19, %21, %cst_13 {dimension_numbers = #tpu.dot_dimension_numbers<[1], [0], [0], [1], [0, 0, 1, 1], [], []>} : vector<16x128xbf16>, vector<128x128xbf16>, vector<16x128xf32> -> vector<16x128xf32>
    %23 = arith.addf %12, %22 : vector<16x128xf32>
    %c0_i32_14 = arith.constant 0 : i32
    %24 = arith.addi %c0_i32_14, %0 : i32
    %c0_i32_15 = arith.constant 0 : i32
    %25 = arith.addi %24, %c0_i32_15 : i32
    %c0_16 = arith.constant 0 : index
    %26 = arith.index_cast %25 : i32 to index
    %c1_17 = arith.constant 1 : index
    %c0_18 = arith.constant 0 : index
    %27 = vector.load %arg2[%c0_16, %26, %c1_17, %c0_18] : memref<1x20x5x128xf32, #tpu.memory_space<vmem>>, vector<1x4x4x128xf32>
    %28 = vector.shape_cast %27 : vector<1x4x4x128xf32> to vector<4x4x128xf32>
    %29 = vector.shape_cast %28 : vector<4x4x128xf32> to vector<16x128xf32>
    %30 = arith.truncf %29 : vector<16x128xf32> to vector<16x128xbf16>
    %c2 = arith.constant 2 : index
    %c0_19 = arith.constant 0 : index
    %c0_20 = arith.constant 0 : index
    %31 = vector.load %arg3[%c2, %c0_19, %c0_20] : memref<9x128x128xbf16, #tpu.memory_space<vmem>>, vector<1x128x128xbf16>
    %32 = vector.shape_cast %31 : vector<1x128x128xbf16> to vector<128x128xbf16>
    %cst_21 = arith.constant dense<0.000000e+00> : vector<16x128xf32>
    %33 = tpu.matmul %30, %32, %cst_21 {dimension_numbers = #tpu.dot_dimension_numbers<[1], [0], [0], [1], [0, 0, 1, 1], [], []>} : vector<16x128xbf16>, vector<128x128xbf16>, vector<16x128xf32> -> vector<16x128xf32>
    %34 = arith.addf %23, %33 : vector<16x128xf32>
    %c10_i32 = arith.constant 10 : i32
    %35 = arith.addi %c10_i32, %0 : i32
    %c0_i32_22 = arith.constant 0 : i32
    %36 = arith.addi %35, %c0_i32_22 : i32
    %c0_23 = arith.constant 0 : index
    %37 = arith.index_cast %36 : i32 to index
    %c0_24 = arith.constant 0 : index
    %c0_25 = arith.constant 0 : index
    %38 = vector.load %arg2[%c0_23, %37, %c0_24, %c0_25] : memref<1x20x5x128xf32, #tpu.memory_space<vmem>>, vector<1x4x4x128xf32>
    %39 = vector.shape_cast %38 : vector<1x4x4x128xf32> to vector<4x4x128xf32>
    %40 = vector.shape_cast %39 : vector<4x4x128xf32> to vector<16x128xf32>
    %41 = arith.truncf %40 : vector<16x128xf32> to vector<16x128xbf16>
    %c3 = arith.constant 3 : index
    %c0_26 = arith.constant 0 : index
    %c0_27 = arith.constant 0 : index
    %42 = vector.load %arg3[%c3, %c0_26, %c0_27] : memref<9x128x128xbf16, #tpu.memory_space<vmem>>, vector<1x128x128xbf16>
    %43 = vector.shape_cast %42 : vector<1x128x128xbf16> to vector<128x128xbf16>
    %cst_28 = arith.constant dense<0.000000e+00> : vector<16x128xf32>
    %44 = tpu.matmul %41, %43, %cst_28 {dimension_numbers = #tpu.dot_dimension_numbers<[1], [0], [0], [1], [0, 0, 1, 1], [], []>} : vector<16x128xbf16>, vector<128x128xbf16>, vector<16x128xf32> -> vector<16x128xf32>
    %45 = arith.addf %34, %44 : vector<16x128xf32>
    %c15_i32 = arith.constant 15 : i32
    %46 = arith.addi %c15_i32, %0 : i32
    %c0_i32_29 = arith.constant 0 : i32
    %47 = arith.addi %46, %c0_i32_29 : i32
    %c0_30 = arith.constant 0 : index
    %48 = arith.index_cast %47 : i32 to index
    %c0_31 = arith.constant 0 : index
    %c0_32 = arith.constant 0 : index
    %49 = vector.load %arg2[%c0_30, %48, %c0_31, %c0_32] : memref<1x20x5x128xf32, #tpu.memory_space<vmem>>, vector<1x4x4x128xf32>
    %50 = vector.shape_cast %49 : vector<1x4x4x128xf32> to vector<4x4x128xf32>
    %51 = vector.shape_cast %50 : vector<4x4x128xf32> to vector<16x128xf32>
    %52 = arith.truncf %51 : vector<16x128xf32> to vector<16x128xbf16>
    %c4 = arith.constant 4 : index
    %c0_33 = arith.constant 0 : index
    %c0_34 = arith.constant 0 : index
    %53 = vector.load %arg3[%c4, %c0_33, %c0_34] : memref<9x128x128xbf16, #tpu.memory_space<vmem>>, vector<1x128x128xbf16>
    %54 = vector.shape_cast %53 : vector<1x128x128xbf16> to vector<128x128xbf16>
    %cst_35 = arith.constant dense<0.000000e+00> : vector<16x128xf32>
    %55 = tpu.matmul %52, %54, %cst_35 {dimension_numbers = #tpu.dot_dimension_numbers<[1], [0], [0], [1], [0, 0, 1, 1], [], []>} : vector<16x128xbf16>, vector<128x128xbf16>, vector<16x128xf32> -> vector<16x128xf32>
    %56 = arith.addf %45, %55 : vector<16x128xf32>
    %c10_i32_36 = arith.constant 10 : i32
    %57 = arith.addi %c10_i32_36, %0 : i32
    %c0_i32_37 = arith.constant 0 : i32
    %58 = arith.addi %57, %c0_i32_37 : i32
    %c0_38 = arith.constant 0 : index
    %59 = arith.index_cast %58 : i32 to index
    %c1_39 = arith.constant 1 : index
    %c0_40 = arith.constant 0 : index
    %60 = vector.load %arg2[%c0_38, %59, %c1_39, %c0_40] : memref<1x20x5x128xf32, #tpu.memory_space<vmem>>, vector<1x4x4x128xf32>
    %61 = vector.shape_cast %60 : vector<1x4x4x128xf32> to vector<4x4x128xf32>
    %62 = vector.shape_cast %61 : vector<4x4x128xf32> to vector<16x128xf32>
    %63 = arith.truncf %62 : vector<16x128xf32> to vector<16x128xbf16>
    %c5 = arith.constant 5 : index
    %c0_41 = arith.constant 0 : index
    %c0_42 = arith.constant 0 : index
    %64 = vector.load %arg3[%c5, %c0_41, %c0_42] : memref<9x128x128xbf16, #tpu.memory_space<vmem>>, vector<1x128x128xbf16>
    %65 = vector.shape_cast %64 : vector<1x128x128xbf16> to vector<128x128xbf16>
    %cst_43 = arith.constant dense<0.000000e+00> : vector<16x128xf32>
    %66 = tpu.matmul %63, %65, %cst_43 {dimension_numbers = #tpu.dot_dimension_numbers<[1], [0], [0], [1], [0, 0, 1, 1], [], []>} : vector<16x128xbf16>, vector<128x128xbf16>, vector<16x128xf32> -> vector<16x128xf32>
    %67 = arith.addf %56, %66 : vector<16x128xf32>
    %c0_i32_44 = arith.constant 0 : i32
    %68 = arith.addi %c0_i32_44, %0 : i32
    %c1_i32 = arith.constant 1 : i32
    %69 = arith.addi %68, %c1_i32 : i32
    %c0_45 = arith.constant 0 : index
    %70 = arith.index_cast %69 : i32 to index
    %c0_46 = arith.constant 0 : index
    %c0_47 = arith.constant 0 : index
    %71 = vector.load %arg2[%c0_45, %70, %c0_46, %c0_47] : memref<1x20x5x128xf32, #tpu.memory_space<vmem>>, vector<1x4x4x128xf32>
    %72 = vector.shape_cast %71 : vector<1x4x4x128xf32> to vector<4x4x128xf32>
    %73 = vector.shape_cast %72 : vector<4x4x128xf32> to vector<16x128xf32>
    %74 = arith.truncf %73 : vector<16x128xf32> to vector<16x128xbf16>
    %c6 = arith.constant 6 : index
    %c0_48 = arith.constant 0 : index
    %c0_49 = arith.constant 0 : index
    %75 = vector.load %arg3[%c6, %c0_48, %c0_49] : memref<9x128x128xbf16, #tpu.memory_space<vmem>>, vector<1x128x128xbf16>
    %76 = vector.shape_cast %75 : vector<1x128x128xbf16> to vector<128x128xbf16>
    %cst_50 = arith.constant dense<0.000000e+00> : vector<16x128xf32>
    %77 = tpu.matmul %74, %76, %cst_50 {dimension_numbers = #tpu.dot_dimension_numbers<[1], [0], [0], [1], [0, 0, 1, 1], [], []>} : vector<16x128xbf16>, vector<128x128xbf16>, vector<16x128xf32> -> vector<16x128xf32>
    %78 = arith.addf %67, %77 : vector<16x128xf32>
    %c5_i32_51 = arith.constant 5 : i32
    %79 = arith.addi %c5_i32_51, %0 : i32
    %c1_i32_52 = arith.constant 1 : i32
    %80 = arith.addi %79, %c1_i32_52 : i32
    %c0_53 = arith.constant 0 : index
    %81 = arith.index_cast %80 : i32 to index
    %c0_54 = arith.constant 0 : index
    %c0_55 = arith.constant 0 : index
    %82 = vector.load %arg2[%c0_53, %81, %c0_54, %c0_55] : memref<1x20x5x128xf32, #tpu.memory_space<vmem>>, vector<1x4x4x128xf32>
    %83 = vector.shape_cast %82 : vector<1x4x4x128xf32> to vector<4x4x128xf32>
    %84 = vector.shape_cast %83 : vector<4x4x128xf32> to vector<16x128xf32>
    %85 = arith.truncf %84 : vector<16x128xf32> to vector<16x128xbf16>
    %c7 = arith.constant 7 : index
    %c0_56 = arith.constant 0 : index
    %c0_57 = arith.constant 0 : index
    %86 = vector.load %arg3[%c7, %c0_56, %c0_57] : memref<9x128x128xbf16, #tpu.memory_space<vmem>>, vector<1x128x128xbf16>
    %87 = vector.shape_cast %86 : vector<1x128x128xbf16> to vector<128x128xbf16>
    %cst_58 = arith.constant dense<0.000000e+00> : vector<16x128xf32>
    %88 = tpu.matmul %85, %87, %cst_58 {dimension_numbers = #tpu.dot_dimension_numbers<[1], [0], [0], [1], [0, 0, 1, 1], [], []>} : vector<16x128xbf16>, vector<128x128xbf16>, vector<16x128xf32> -> vector<16x128xf32>
    %89 = arith.addf %78, %88 : vector<16x128xf32>
    %c0_i32_59 = arith.constant 0 : i32
    %90 = arith.addi %c0_i32_59, %0 : i32
    %c1_i32_60 = arith.constant 1 : i32
    %91 = arith.addi %90, %c1_i32_60 : i32
    %c0_61 = arith.constant 0 : index
    %92 = arith.index_cast %91 : i32 to index
    %c1_62 = arith.constant 1 : index
    %c0_63 = arith.constant 0 : index
    %93 = vector.load %arg2[%c0_61, %92, %c1_62, %c0_63] : memref<1x20x5x128xf32, #tpu.memory_space<vmem>>, vector<1x4x4x128xf32>
    %94 = vector.shape_cast %93 : vector<1x4x4x128xf32> to vector<4x4x128xf32>
    %95 = vector.shape_cast %94 : vector<4x4x128xf32> to vector<16x128xf32>
    %96 = arith.truncf %95 : vector<16x128xf32> to vector<16x128xbf16>
    %c8 = arith.constant 8 : index
    %c0_64 = arith.constant 0 : index
    %c0_65 = arith.constant 0 : index
    %97 = vector.load %arg3[%c8, %c0_64, %c0_65] : memref<9x128x128xbf16, #tpu.memory_space<vmem>>, vector<1x128x128xbf16>
    %98 = vector.shape_cast %97 : vector<1x128x128xbf16> to vector<128x128xbf16>
    %cst_66 = arith.constant dense<0.000000e+00> : vector<16x128xf32>
    %99 = tpu.matmul %96, %98, %cst_66 {dimension_numbers = #tpu.dot_dimension_numbers<[1], [0], [0], [1], [0, 0, 1, 1], [], []>} : vector<16x128xbf16>, vector<128x128xbf16>, vector<16x128xf32> -> vector<16x128xf32>
    %100 = arith.addf %89, %99 : vector<16x128xf32>
    %c0_67 = arith.constant 0 : index
    %c0_68 = arith.constant 0 : index
    %101 = vector.load %arg4[%c0_67, %c0_68] : memref<1x128xf32, #tpu.memory_space<vmem>>, vector<1x128xf32>
    %102 = vector.broadcast %101 : vector<1x128xf32> to vector<16x128xf32>
    %103 = arith.addf %100, %102 : vector<16x128xf32>
    %cst_69 = arith.constant 0.000000e+00 : f32
    %104 = vector.broadcast %cst_69 : f32 to vector<16x128xf32>
    %105 = arith.maximumf %103, %104 : vector<16x128xf32>
    %106 = vector.shape_cast %105 : vector<16x128xf32> to vector<4x4x128xf32>
    %c0_70 = arith.constant 0 : index
    %c0_71 = arith.constant 0 : index
    %c0_72 = arith.constant 0 : index
    %c0_73 = arith.constant 0 : index
    %107 = vector.load %arg5[%c0_70, %c0_71, %c0_72, %c0_73] : memref<1x4x4x128xf32, #tpu.memory_space<vmem>>, vector<1x4x4x128xf32>
    %108 = vector.shape_cast %107 : vector<1x4x4x128xf32> to vector<4x4x128xf32>
    %109 = vector.shape_cast %106 : vector<4x4x128xf32> to vector<1x4x4x128xf32>
    tpu.vector_store %arg5[%c0_70, %c0_71, %c0_72, %c0_73], %109 {strides = array<i32>} : memref<1x4x4x128xf32, #tpu.memory_space<vmem>>, vector<1x4x4x128xf32>,
    return
  }
  func.func @transform_0(%arg0: i32, %arg1: i32) -> (i32, i32, i32, i32) {
    %c0_i32 = arith.constant 0 : i32
    %c0_i32_0 = arith.constant 0 : i32
    %c0_i32_1 = arith.constant 0 : i32
    %c0_i32_2 = arith.constant 0 : i32
    return %arg0, %c0_i32, %c0_i32_0, %c0_i32_1 : i32, i32, i32, i32
  }
  func.func @transform_1(%arg0: i32, %arg1: i32) -> (i32, i32, i32) {
    %c0_i32 = arith.constant 0 : i32
    %c0_i32_0 = arith.constant 0 : i32
    %c0_i32_1 = arith.constant 0 : i32
    %c0_i32_2 = arith.constant 0 : i32
    return %c0_i32, %c0_i32_0, %c0_i32_1 : i32, i32, i32
  }
  func.func @transform_2(%arg0: i32, %arg1: i32) -> (i32, i32) {
    %c0_i32 = arith.constant 0 : i32
    %c0_i32_0 = arith.constant 0 : i32
    %c0_i32_1 = arith.constant 0 : i32
    return %c0_i32, %c0_i32_0 : i32, i32
  }
  func.func @transform_3(%arg0: i32, %arg1: i32) -> (i32, i32, i32, i32) {
    %c0_i32 = arith.constant 0 : i32
    %c0_i32_0 = arith.constant 0 : i32
    %c0_i32_1 = arith.constant 0 : i32
    return %arg0, %arg1, %c0_i32, %c0_i32_0 : i32, i32, i32, i32
  }
}

module attributes {stable_mosaic.version = 11 : i64} {
  func.func @_msef_kernel(%arg0: i32, %arg1: memref<1x4x4x128xf32, #tpu.memory_space<vmem>>, %arg2: memref<2x128xf32, #tpu.memory_space<vmem>>, %arg3: memref<9x128xf32, #tpu.memory_space<vmem>>, %arg4: memref<1x128xf32, #tpu.memory_space<vmem>>, %arg5: memref<1x128xf32, #tpu.memory_space<vmem>>, %arg6: memref<128x128xf32, #tpu.memory_space<vmem>>, %arg7: memref<4xf32, #tpu.memory_space<smem>>, %arg8: memref<1x4x4x128xf32, #tpu.memory_space<vmem>>, %arg9: memref<6x6x128xf32, #tpu.memory_space<vmem>>) attributes {dimension_semantics = [#tpu.dimension_semantics<parallel>], iteration_bounds = array<i64: 2>, scalar_prefetch = 0 : i64, scratch_operands = 1 : i64, tpu.core_type = #tpu.core_type<tc>, window_params = [{transform_indices = @transform_0, window_bounds = array<i64: 1, 4, 4, 128>}, {pipeline_mode = #tpu.pipeline_mode<synchronous>, transform_indices = @transform_1, window_bounds = array<i64: 2, 128>}, {pipeline_mode = #tpu.pipeline_mode<synchronous>, transform_indices = @transform_2, window_bounds = array<i64: 9, 128>}, {pipeline_mode = #tpu.pipeline_mode<synchronous>, transform_indices = @transform_3, window_bounds = array<i64: 1, 128>}, {pipeline_mode = #tpu.pipeline_mode<synchronous>, transform_indices = @transform_4, window_bounds = array<i64: 1, 128>}, {pipeline_mode = #tpu.pipeline_mode<synchronous>, transform_indices = @transform_5, window_bounds = array<i64: 128, 128>}, {transform_indices = @transform_6, window_bounds = array<i64: 4>}, {transform_indices = @transform_7, window_bounds = array<i64: 1, 4, 4, 128>}]} {
    %c0 = arith.constant 0 : index
    %c0_0 = arith.constant 0 : index
    %c0_1 = arith.constant 0 : index
    %c0_2 = arith.constant 0 : index
    %0 = vector.load %arg1[%c0, %c0_0, %c0_1, %c0_2] : memref<1x4x4x128xf32, #tpu.memory_space<vmem>>, vector<1x4x4x128xf32>
    %1 = vector.shape_cast %0 : vector<1x4x4x128xf32> to vector<4x4x128xf32>
    %2 = vector.shape_cast %1 : vector<4x4x128xf32> to vector<16x128xf32>
    %cst = arith.constant dense<0.000000e+00> : vector<16xf32>
    %3 = vector.multi_reduction <add>, %2, %cst [1] : vector<16x128xf32> to vector<16xf32>
    %4 = vector.shape_cast %3 : vector<16xf32> to vector<16x1xf32>
    %cst_3 = arith.constant 1.280000e+02 : f32
    %5 = vector.broadcast %cst_3 : f32 to vector<16x1xf32>
    %6 = arith.divf %4, %5 : vector<16x1xf32>
    %7 = vector.broadcast %6 : vector<16x1xf32> to vector<16x128xf32>
    %8 = arith.subf %2, %7 : vector<16x128xf32>
    %9 = arith.mulf %8, %8 : vector<16x128xf32>
    %cst_4 = arith.constant dense<0.000000e+00> : vector<16xf32>
    %10 = vector.multi_reduction <add>, %9, %cst_4 [1] : vector<16x128xf32> to vector<16xf32>
    %11 = vector.shape_cast %10 : vector<16xf32> to vector<16x1xf32>
    %cst_5 = arith.constant 1.280000e+02 : f32
    %12 = vector.broadcast %cst_5 : f32 to vector<16x1xf32>
    %13 = arith.divf %11, %12 : vector<16x1xf32>
    %cst_6 = arith.constant 9.99999974E-6 : f32
    %14 = vector.broadcast %cst_6 : f32 to vector<16x1xf32>
    %15 = arith.addf %13, %14 : vector<16x1xf32>
    %16 = math.rsqrt %15 : vector<16x1xf32>
    %17 = vector.broadcast %16 : vector<16x1xf32> to vector<16x128xf32>
    %18 = arith.mulf %8, %17 : vector<16x128xf32>
    %c0_7 = arith.constant 0 : index
    %c0_8 = arith.constant 0 : index
    %19 = vector.load %arg2[%c0_7, %c0_8] : memref<2x128xf32, #tpu.memory_space<vmem>>, vector<1x128xf32>
    %20 = vector.broadcast %19 : vector<1x128xf32> to vector<16x128xf32>
    %21 = arith.mulf %18, %20 : vector<16x128xf32>
    %c1 = arith.constant 1 : index
    %c0_9 = arith.constant 0 : index
    %22 = vector.load %arg2[%c1, %c0_9] : memref<2x128xf32, #tpu.memory_space<vmem>>, vector<1x128xf32>
    %23 = vector.broadcast %22 : vector<1x128xf32> to vector<16x128xf32>
    %24 = arith.addf %21, %23 : vector<16x128xf32>
    %cst_10 = arith.constant dense<0.000000e+00> : vector<128xf32>
    %25 = vector.multi_reduction <add>, %24, %cst_10 [0] : vector<16x128xf32> to vector<128xf32>
    %26 = vector.shape_cast %25 : vector<128xf32> to vector<1x128xf32>
    %cst_11 = arith.constant 1.600000e+01 : f32
    %27 = vector.broadcast %cst_11 : f32 to vector<1x128xf32>
    %28 = arith.divf %26, %27 : vector<1x128xf32>
    %29 = vector.broadcast %28 : vector<1x128xf32> to vector<16x128xf32>
    %30 = arith.subf %24, %29 : vector<16x128xf32>
    %31 = arith.mulf %30, %30 : vector<16x128xf32>
    %cst_12 = arith.constant dense<0.000000e+00> : vector<128xf32>
    %32 = vector.multi_reduction <add>, %31, %cst_12 [0] : vector<16x128xf32> to vector<128xf32>
    %33 = vector.shape_cast %32 : vector<128xf32> to vector<1x128xf32>
    %cst_13 = arith.constant 1.600000e+01 : f32
    %34 = vector.broadcast %cst_13 : f32 to vector<1x128xf32>
    %35 = arith.divf %33, %34 : vector<1x128xf32>
    %c0_14 = arith.constant 0 : index
    %36 = memref.load %arg7[%c0_14] : memref<4xf32, #tpu.memory_space<smem>>
    %c1_15 = arith.constant 1 : index
    %37 = memref.load %arg7[%c1_15] : memref<4xf32, #tpu.memory_space<smem>>
    %c2 = arith.constant 2 : index
    %38 = memref.load %arg7[%c2] : memref<4xf32, #tpu.memory_space<smem>>
    %c3 = arith.constant 3 : index
    %39 = memref.load %arg7[%c3] : memref<4xf32, #tpu.memory_space<smem>>
    %40 = vector.broadcast %36 : f32 to vector<1x128xf32>
    %41 = arith.mulf %40, %28 : vector<1x128xf32>
    %42 = vector.broadcast %37 : f32 to vector<1x128xf32>
    %43 = arith.addf %41, %42 : vector<1x128xf32>
    %cst_16 = arith.constant 0.000000e+00 : f32
    %44 = vector.broadcast %cst_16 : f32 to vector<1x128xf32>
    %45 = arith.subf %44, %43 : vector<1x128xf32>
    %46 = math.exp %45 : vector<1x128xf32>
    %cst_17 = arith.constant 1.000000e+00 : f32
    %47 = vector.broadcast %cst_17 : f32 to vector<1x128xf32>
    %48 = arith.addf %47, %46 : vector<1x128xf32>
    %49 = tpu.reciprocal %48 : vector<1x128xf32> -> vector<1x128xf32>
    %cst_18 = arith.constant 9.99999974E-6 : f32
    %50 = vector.broadcast %cst_18 : f32 to vector<1x128xf32>
    %51 = arith.addf %35, %50 : vector<1x128xf32>
    %52 = math.rsqrt %51 : vector<1x128xf32>
    %53 = vector.broadcast %52 : vector<1x128xf32> to vector<16x128xf32>
    %54 = arith.mulf %30, %53 : vector<16x128xf32>
    %55 = vector.broadcast %38 : f32 to vector<16x128xf32>
    %56 = arith.mulf %55, %54 : vector<16x128xf32>
    %57 = vector.broadcast %39 : f32 to vector<16x128xf32>
    %58 = arith.addf %56, %57 : vector<16x128xf32>
    %cst_19 = arith.constant 0.000000e+00 : f32
    %59 = vector.broadcast %cst_19 : f32 to vector<16x128xf32>
    %60 = arith.subf %59, %58 : vector<16x128xf32>
    %61 = math.exp %60 : vector<16x128xf32>
    %cst_20 = arith.constant 1.000000e+00 : f32
    %62 = vector.broadcast %cst_20 : f32 to vector<16x128xf32>
    %63 = arith.addf %62, %61 : vector<16x128xf32>
    %64 = tpu.reciprocal %63 : vector<16x128xf32> -> vector<16x128xf32>
    %c0_21 = arith.constant 0 : index
    %c0_22 = arith.constant 0 : index
    %65 = vector.load %arg5[%c0_21, %c0_22] : memref<1x128xf32, #tpu.memory_space<vmem>>, vector<1x128xf32>
    %66 = arith.mulf %65, %49 : vector<1x128xf32>
    %cst_23 = arith.constant 1.000000e+00 : f32
    %67 = vector.broadcast %cst_23 : f32 to vector<1x128xf32>
    %68 = arith.subf %67, %65 : vector<1x128xf32>
    %69 = vector.broadcast %68 : vector<1x128xf32> to vector<16x128xf32>
    %70 = arith.mulf %69, %64 : vector<16x128xf32>
    %71 = vector.broadcast %66 : vector<1x128xf32> to vector<16x128xf32>
    %72 = arith.addf %71, %70 : vector<16x128xf32>
    %73 = arith.mulf %24, %72 : vector<16x128xf32>
    %c0_24 = arith.constant 0 : index
    %c0_25 = arith.constant 0 : index
    %74 = vector.load %arg6[%c0_24, %c0_25] : memref<128x128xf32, #tpu.memory_space<vmem>>, vector<128x128xf32>
    %cst_26 = arith.constant dense<0.000000e+00> : vector<16x128xf32>
    %75 = tpu.matmul %73, %74, %cst_26 {dimension_numbers = #tpu.dot_dimension_numbers<[1], [0], [0], [1], [0, 0, 1, 1], [], []>} : vector<16x128xf32>, vector<128x128xf32>, vector<16x128xf32> -> vector<16x128xf32>
    %cst_27 = arith.constant 0.000000e+00 : f32
    %76 = vector.broadcast %cst_27 : f32 to vector<6x6x128xf32>
    %c0_28 = arith.constant 0 : index
    %c0_29 = arith.constant 0 : index
    %c0_30 = arith.constant 0 : index
    %77 = vector.load %arg9[%c0_28, %c0_29, %c0_30] : memref<6x6x128xf32, #tpu.memory_space<vmem>>, vector<6x6x128xf32>
    tpu.vector_store %arg9[%c0_28, %c0_29, %c0_30], %76 {strides = array<i32>} : memref<6x6x128xf32, #tpu.memory_space<vmem>>, vector<6x6x128xf32>,
    %78 = vector.shape_cast %24 : vector<16x128xf32> to vector<4x4x128xf32>
    %c1_31 = arith.constant 1 : index
    %c1_32 = arith.constant 1 : index
    %c0_33 = arith.constant 0 : index
    %79 = vector.load %arg9[%c1_31, %c1_32, %c0_33] : memref<6x6x128xf32, #tpu.memory_space<vmem>>, vector<4x4x128xf32>
    tpu.vector_store %arg9[%c1_31, %c1_32, %c0_33], %78 {strides = array<i32>} : memref<6x6x128xf32, #tpu.memory_space<vmem>>, vector<4x4x128xf32>,
    %c0_34 = arith.constant 0 : index
    %c0_35 = arith.constant 0 : index
    %80 = vector.load %arg3[%c0_34, %c0_35] : memref<9x128xf32, #tpu.memory_space<vmem>>, vector<9x128xf32>
    %cst_36 = arith.constant 0.000000e+00 : f32
    %81 = vector.broadcast %cst_36 : f32 to vector<4x4x128xf32>
    %c0_37 = arith.constant 0 : index
    %c0_38 = arith.constant 0 : index
    %c0_39 = arith.constant 0 : index
    %82 = vector.load %arg9[%c0_37, %c0_38, %c0_39] : memref<6x6x128xf32, #tpu.memory_space<vmem>>, vector<4x4x128xf32>
    %83 = vector.extract_strided_slice %80 {offsets = [0, 0], sizes = [1, 128], strides = [1, 1]} : vector<9x128xf32> to vector<1x128xf32>
    %84 = vector.shape_cast %83 : vector<1x128xf32> to vector<128xf32>
    %85 = vector.shape_cast %84 : vector<128xf32> to vector<1x1x128xf32>
    %86 = vector.broadcast %85 : vector<1x1x128xf32> to vector<4x4x128xf32>
    %87 = arith.mulf %82, %86 : vector<4x4x128xf32>
    %88 = arith.addf %81, %87 : vector<4x4x128xf32>
    %c0_40 = arith.constant 0 : index
    %c1_41 = arith.constant 1 : index
    %c0_42 = arith.constant 0 : index
    %89 = vector.load %arg9[%c0_40, %c1_41, %c0_42] : memref<6x6x128xf32, #tpu.memory_space<vmem>>, vector<4x4x128xf32>
    %90 = vector.extract_strided_slice %80 {offsets = [1, 0], sizes = [1, 128], strides = [1, 1]} : vector<9x128xf32> to vector<1x128xf32>
    %91 = vector.shape_cast %90 : vector<1x128xf32> to vector<128xf32>
    %92 = vector.shape_cast %91 : vector<128xf32> to vector<1x1x128xf32>
    %93 = vector.broadcast %92 : vector<1x1x128xf32> to vector<4x4x128xf32>
    %94 = arith.mulf %89, %93 : vector<4x4x128xf32>
    %95 = arith.addf %88, %94 : vector<4x4x128xf32>
    %c0_43 = arith.constant 0 : index
    %c2_44 = arith.constant 2 : index
    %c0_45 = arith.constant 0 : index
    %96 = vector.load %arg9[%c0_43, %c2_44, %c0_45] : memref<6x6x128xf32, #tpu.memory_space<vmem>>, vector<4x4x128xf32>
    %97 = vector.extract_strided_slice %80 {offsets = [2, 0], sizes = [1, 128], strides = [1, 1]} : vector<9x128xf32> to vector<1x128xf32>
    %98 = vector.shape_cast %97 : vector<1x128xf32> to vector<128xf32>
    %99 = vector.shape_cast %98 : vector<128xf32> to vector<1x1x128xf32>
    %100 = vector.broadcast %99 : vector<1x1x128xf32> to vector<4x4x128xf32>
    %101 = arith.mulf %96, %100 : vector<4x4x128xf32>
    %102 = arith.addf %95, %101 : vector<4x4x128xf32>
    %c1_46 = arith.constant 1 : index
    %c0_47 = arith.constant 0 : index
    %c0_48 = arith.constant 0 : index
    %103 = vector.load %arg9[%c1_46, %c0_47, %c0_48] : memref<6x6x128xf32, #tpu.memory_space<vmem>>, vector<4x4x128xf32>
    %104 = vector.extract_strided_slice %80 {offsets = [3, 0], sizes = [1, 128], strides = [1, 1]} : vector<9x128xf32> to vector<1x128xf32>
    %105 = vector.shape_cast %104 : vector<1x128xf32> to vector<128xf32>
    %106 = vector.shape_cast %105 : vector<128xf32> to vector<1x1x128xf32>
    %107 = vector.broadcast %106 : vector<1x1x128xf32> to vector<4x4x128xf32>
    %108 = arith.mulf %103, %107 : vector<4x4x128xf32>
    %109 = arith.addf %102, %108 : vector<4x4x128xf32>
    %c1_49 = arith.constant 1 : index
    %c1_50 = arith.constant 1 : index
    %c0_51 = arith.constant 0 : index
    %110 = vector.load %arg9[%c1_49, %c1_50, %c0_51] : memref<6x6x128xf32, #tpu.memory_space<vmem>>, vector<4x4x128xf32>
    %111 = vector.extract_strided_slice %80 {offsets = [4, 0], sizes = [1, 128], strides = [1, 1]} : vector<9x128xf32> to vector<1x128xf32>
    %112 = vector.shape_cast %111 : vector<1x128xf32> to vector<128xf32>
    %113 = vector.shape_cast %112 : vector<128xf32> to vector<1x1x128xf32>
    %114 = vector.broadcast %113 : vector<1x1x128xf32> to vector<4x4x128xf32>
    %115 = arith.mulf %110, %114 : vector<4x4x128xf32>
    %116 = arith.addf %109, %115 : vector<4x4x128xf32>
    %c1_52 = arith.constant 1 : index
    %c2_53 = arith.constant 2 : index
    %c0_54 = arith.constant 0 : index
    %117 = vector.load %arg9[%c1_52, %c2_53, %c0_54] : memref<6x6x128xf32, #tpu.memory_space<vmem>>, vector<4x4x128xf32>
    %118 = vector.extract_strided_slice %80 {offsets = [5, 0], sizes = [1, 128], strides = [1, 1]} : vector<9x128xf32> to vector<1x128xf32>
    %119 = vector.shape_cast %118 : vector<1x128xf32> to vector<128xf32>
    %120 = vector.shape_cast %119 : vector<128xf32> to vector<1x1x128xf32>
    %121 = vector.broadcast %120 : vector<1x1x128xf32> to vector<4x4x128xf32>
    %122 = arith.mulf %117, %121 : vector<4x4x128xf32>
    %123 = arith.addf %116, %122 : vector<4x4x128xf32>
    %c2_55 = arith.constant 2 : index
    %c0_56 = arith.constant 0 : index
    %c0_57 = arith.constant 0 : index
    %124 = vector.load %arg9[%c2_55, %c0_56, %c0_57] : memref<6x6x128xf32, #tpu.memory_space<vmem>>, vector<4x4x128xf32>
    %125 = vector.extract_strided_slice %80 {offsets = [6, 0], sizes = [1, 128], strides = [1, 1]} : vector<9x128xf32> to vector<1x128xf32>
    %126 = vector.shape_cast %125 : vector<1x128xf32> to vector<128xf32>
    %127 = vector.shape_cast %126 : vector<128xf32> to vector<1x1x128xf32>
    %128 = vector.broadcast %127 : vector<1x1x128xf32> to vector<4x4x128xf32>
    %129 = arith.mulf %124, %128 : vector<4x4x128xf32>
    %130 = arith.addf %123, %129 : vector<4x4x128xf32>
    %c2_58 = arith.constant 2 : index
    %c1_59 = arith.constant 1 : index
    %c0_60 = arith.constant 0 : index
    %131 = vector.load %arg9[%c2_58, %c1_59, %c0_60] : memref<6x6x128xf32, #tpu.memory_space<vmem>>, vector<4x4x128xf32>
    %132 = vector.extract_strided_slice %80 {offsets = [7, 0], sizes = [1, 128], strides = [1, 1]} : vector<9x128xf32> to vector<1x128xf32>
    %133 = vector.shape_cast %132 : vector<1x128xf32> to vector<128xf32>
    %134 = vector.shape_cast %133 : vector<128xf32> to vector<1x1x128xf32>
    %135 = vector.broadcast %134 : vector<1x1x128xf32> to vector<4x4x128xf32>
    %136 = arith.mulf %131, %135 : vector<4x4x128xf32>
    %137 = arith.addf %130, %136 : vector<4x4x128xf32>
    %c2_61 = arith.constant 2 : index
    %c2_62 = arith.constant 2 : index
    %c0_63 = arith.constant 0 : index
    %138 = vector.load %arg9[%c2_61, %c2_62, %c0_63] : memref<6x6x128xf32, #tpu.memory_space<vmem>>, vector<4x4x128xf32>
    %139 = vector.extract_strided_slice %80 {offsets = [8, 0], sizes = [1, 128], strides = [1, 1]} : vector<9x128xf32> to vector<1x128xf32>
    %140 = vector.shape_cast %139 : vector<1x128xf32> to vector<128xf32>
    %141 = vector.shape_cast %140 : vector<128xf32> to vector<1x1x128xf32>
    %142 = vector.broadcast %141 : vector<1x1x128xf32> to vector<4x4x128xf32>
    %143 = arith.mulf %138, %142 : vector<4x4x128xf32>
    %144 = arith.addf %137, %143 : vector<4x4x128xf32>
    %c0_64 = arith.constant 0 : index
    %c0_65 = arith.constant 0 : index
    %145 = vector.load %arg4[%c0_64, %c0_65] : memref<1x128xf32, #tpu.memory_space<vmem>>, vector<1x128xf32>
    %146 = vector.shape_cast %145 : vector<1x128xf32> to vector<128xf32>
    %147 = vector.shape_cast %146 : vector<128xf32> to vector<1x1x128xf32>
    %148 = vector.broadcast %147 : vector<1x1x128xf32> to vector<4x4x128xf32>
    %149 = arith.addf %144, %148 : vector<4x4x128xf32>
    %150 = vector.shape_cast %75 : vector<16x128xf32> to vector<4x4x128xf32>
    %151 = arith.mulf %149, %150 : vector<4x4x128xf32>
    %152 = arith.addf %151, %1 : vector<4x4x128xf32>
    %c0_66 = arith.constant 0 : index
    %c0_67 = arith.constant 0 : index
    %c0_68 = arith.constant 0 : index
    %c0_69 = arith.constant 0 : index
    %153 = vector.load %arg8[%c0_66, %c0_67, %c0_68, %c0_69] : memref<1x4x4x128xf32, #tpu.memory_space<vmem>>, vector<1x4x4x128xf32>
    %154 = vector.shape_cast %153 : vector<1x4x4x128xf32> to vector<4x4x128xf32>
    %155 = vector.shape_cast %152 : vector<4x4x128xf32> to vector<1x4x4x128xf32>
    tpu.vector_store %arg8[%c0_66, %c0_67, %c0_68, %c0_69], %155 {strides = array<i32>} : memref<1x4x4x128xf32, #tpu.memory_space<vmem>>, vector<1x4x4x128xf32>,
    return
  }
  func.func @transform_0(%arg0: i32) -> (i32, i32, i32, i32) {
    %c0_i32 = arith.constant 0 : i32
    %c0_i32_0 = arith.constant 0 : i32
    %c0_i32_1 = arith.constant 0 : i32
    %c0_i32_2 = arith.constant 0 : i32
    return %arg0, %c0_i32, %c0_i32_0, %c0_i32_1 : i32, i32, i32, i32
  }
  func.func @transform_1(%arg0: i32) -> (i32, i32) {
    %c0_i32 = arith.constant 0 : i32
    %c0_i32_0 = arith.constant 0 : i32
    %c0_i32_1 = arith.constant 0 : i32
    return %c0_i32, %c0_i32_0 : i32, i32
  }
  func.func @transform_2(%arg0: i32) -> (i32, i32) {
    %c0_i32 = arith.constant 0 : i32
    %c0_i32_0 = arith.constant 0 : i32
    %c0_i32_1 = arith.constant 0 : i32
    return %c0_i32, %c0_i32_0 : i32, i32
  }
  func.func @transform_3(%arg0: i32) -> (i32, i32) {
    %c0_i32 = arith.constant 0 : i32
    %c0_i32_0 = arith.constant 0 : i32
    %c0_i32_1 = arith.constant 0 : i32
    return %c0_i32, %c0_i32_0 : i32, i32
  }
  func.func @transform_4(%arg0: i32) -> (i32, i32) {
    %c0_i32 = arith.constant 0 : i32
    %c0_i32_0 = arith.constant 0 : i32
    %c0_i32_1 = arith.constant 0 : i32
    return %c0_i32, %c0_i32_0 : i32, i32
  }
  func.func @transform_5(%arg0: i32) -> (i32, i32) {
    %c0_i32 = arith.constant 0 : i32
    %c0_i32_0 = arith.constant 0 : i32
    %c0_i32_1 = arith.constant 0 : i32
    return %c0_i32, %c0_i32_0 : i32, i32
  }
  func.func @transform_6(%arg0: i32) -> i32 {
    %c0_i32 = arith.constant 0 : i32
    %c0_i32_0 = arith.constant 0 : i32
    return %c0_i32 : i32
  }
  func.func @transform_7(%arg0: i32) -> (i32, i32, i32, i32) {
    %c0_i32 = arith.constant 0 : i32
    %c0_i32_0 = arith.constant 0 : i32
    %c0_i32_1 = arith.constant 0 : i32
    %c0_i32_2 = arith.constant 0 : i32
    return %arg0, %c0_i32, %c0_i32_0, %c0_i32_1 : i32, i32, i32, i32
  }
}

module attributes {stable_mosaic.version = 11 : i64} {
  func.func @_rowup_kernel(%arg0: i32, %arg1: i32, %arg2: memref<8x4xf32, #tpu.memory_space<vmem>>, %arg3: memref<1x4x512xf32, #tpu.memory_space<vmem>>, %arg4: memref<1x8x512xf32, #tpu.memory_space<vmem>>) attributes {dimension_semantics = [#tpu.dimension_semantics<parallel>, #tpu.dimension_semantics<parallel>], iteration_bounds = array<i64: 2, 1>, scalar_prefetch = 0 : i64, scratch_operands = 0 : i64, tpu.core_type = #tpu.core_type<tc>, window_params = [{pipeline_mode = #tpu.pipeline_mode<synchronous>, transform_indices = @transform_0, window_bounds = array<i64: 8, 4>}, {transform_indices = @transform_1, window_bounds = array<i64: 1, 4, 512>}, {transform_indices = @transform_2, window_bounds = array<i64: 1, 8, 512>}]} {
    %c0 = arith.constant 0 : index
    %c0_0 = arith.constant 0 : index
    %0 = vector.load %arg2[%c0, %c0_0] : memref<8x4xf32, #tpu.memory_space<vmem>>, vector<8x4xf32>
    %c0_1 = arith.constant 0 : index
    %c0_2 = arith.constant 0 : index
    %c0_3 = arith.constant 0 : index
    %1 = vector.load %arg3[%c0_1, %c0_2, %c0_3] : memref<1x4x512xf32, #tpu.memory_space<vmem>>, vector<1x4x512xf32>
    %2 = vector.shape_cast %1 : vector<1x4x512xf32> to vector<4x512xf32>
    %cst = arith.constant dense<0.000000e+00> : vector<8x512xf32>
    %3 = tpu.matmul %0, %2, %cst {dimension_numbers = #tpu.dot_dimension_numbers<[1], [0], [0], [1], [0, 0, 1, 1], [], []>} : vector<8x4xf32>, vector<4x512xf32>, vector<8x512xf32> -> vector<8x512xf32>
    %c0_4 = arith.constant 0 : index
    %c0_5 = arith.constant 0 : index
    %c0_6 = arith.constant 0 : index
    %4 = vector.load %arg4[%c0_4, %c0_5, %c0_6] : memref<1x8x512xf32, #tpu.memory_space<vmem>>, vector<1x8x512xf32>
    %5 = vector.shape_cast %4 : vector<1x8x512xf32> to vector<8x512xf32>
    %6 = vector.shape_cast %3 : vector<8x512xf32> to vector<1x8x512xf32>
    tpu.vector_store %arg4[%c0_4, %c0_5, %c0_6], %6 {strides = array<i32>} : memref<1x8x512xf32, #tpu.memory_space<vmem>>, vector<1x8x512xf32>,
    return
  }
  func.func @transform_0(%arg0: i32, %arg1: i32) -> (i32, i32) {
    %c0_i32 = arith.constant 0 : i32
    %c0_i32_0 = arith.constant 0 : i32
    %c0_i32_1 = arith.constant 0 : i32
    return %c0_i32, %c0_i32_0 : i32, i32
  }
  func.func @transform_1(%arg0: i32, %arg1: i32) -> (i32, i32, i32) {
    %c0_i32 = arith.constant 0 : i32
    %c0_i32_0 = arith.constant 0 : i32
    return %arg0, %c0_i32, %arg1 : i32, i32, i32
  }
  func.func @transform_2(%arg0: i32, %arg1: i32) -> (i32, i32, i32) {
    %c0_i32 = arith.constant 0 : i32
    %c0_i32_0 = arith.constant 0 : i32
    return %arg0, %c0_i32, %arg1 : i32, i32, i32
  }
}

module attributes {stable_mosaic.version = 11 : i64} {
  func.func @_rowup_kernel(%arg0: i32, %arg1: i32, %arg2: memref<16x8xf32, #tpu.memory_space<vmem>>, %arg3: memref<1x8x1024xf32, #tpu.memory_space<vmem>>, %arg4: memref<1x16x1024xf32, #tpu.memory_space<vmem>>) attributes {dimension_semantics = [#tpu.dimension_semantics<parallel>, #tpu.dimension_semantics<parallel>], iteration_bounds = array<i64: 2, 1>, scalar_prefetch = 0 : i64, scratch_operands = 0 : i64, tpu.core_type = #tpu.core_type<tc>, window_params = [{pipeline_mode = #tpu.pipeline_mode<synchronous>, transform_indices = @transform_0, window_bounds = array<i64: 16, 8>}, {transform_indices = @transform_1, window_bounds = array<i64: 1, 8, 1024>}, {transform_indices = @transform_2, window_bounds = array<i64: 1, 16, 1024>}]} {
    %c0 = arith.constant 0 : index
    %c0_0 = arith.constant 0 : index
    %0 = vector.load %arg2[%c0, %c0_0] : memref<16x8xf32, #tpu.memory_space<vmem>>, vector<16x8xf32>
    %c0_1 = arith.constant 0 : index
    %c0_2 = arith.constant 0 : index
    %c0_3 = arith.constant 0 : index
    %1 = vector.load %arg3[%c0_1, %c0_2, %c0_3] : memref<1x8x1024xf32, #tpu.memory_space<vmem>>, vector<1x8x1024xf32>
    %2 = vector.shape_cast %1 : vector<1x8x1024xf32> to vector<8x1024xf32>
    %cst = arith.constant dense<0.000000e+00> : vector<16x1024xf32>
    %3 = tpu.matmul %0, %2, %cst {dimension_numbers = #tpu.dot_dimension_numbers<[1], [0], [0], [1], [0, 0, 1, 1], [], []>} : vector<16x8xf32>, vector<8x1024xf32>, vector<16x1024xf32> -> vector<16x1024xf32>
    %c0_4 = arith.constant 0 : index
    %c0_5 = arith.constant 0 : index
    %c0_6 = arith.constant 0 : index
    %4 = vector.load %arg4[%c0_4, %c0_5, %c0_6] : memref<1x16x1024xf32, #tpu.memory_space<vmem>>, vector<1x16x1024xf32>
    %5 = vector.shape_cast %4 : vector<1x16x1024xf32> to vector<16x1024xf32>
    %6 = vector.shape_cast %3 : vector<16x1024xf32> to vector<1x16x1024xf32>
    tpu.vector_store %arg4[%c0_4, %c0_5, %c0_6], %6 {strides = array<i32>} : memref<1x16x1024xf32, #tpu.memory_space<vmem>>, vector<1x16x1024xf32>,
    return
  }
  func.func @transform_0(%arg0: i32, %arg1: i32) -> (i32, i32) {
    %c0_i32 = arith.constant 0 : i32
    %c0_i32_0 = arith.constant 0 : i32
    %c0_i32_1 = arith.constant 0 : i32
    return %c0_i32, %c0_i32_0 : i32, i32
  }
  func.func @transform_1(%arg0: i32, %arg1: i32) -> (i32, i32, i32) {
    %c0_i32 = arith.constant 0 : i32
    %c0_i32_0 = arith.constant 0 : i32
    return %arg0, %c0_i32, %arg1 : i32, i32, i32
  }
  func.func @transform_2(%arg0: i32, %arg1: i32) -> (i32, i32, i32) {
    %c0_i32 = arith.constant 0 : i32
    %c0_i32_0 = arith.constant 0 : i32
    return %arg0, %c0_i32, %arg1 : i32, i32, i32
  }
}

module attributes {stable_mosaic.version = 11 : i64} {
  func.func @_conv3x3_kernel(%arg0: i32, %arg1: i32, %arg2: memref<1x10x10x128xf32, #tpu.memory_space<vmem>>, %arg3: memref<9x128x128xbf16, #tpu.memory_space<vmem>>, %arg4: memref<1x128xf32, #tpu.memory_space<vmem>>, %arg5: memref<1x8x8x128xf32, #tpu.memory_space<vmem>>) attributes {dimension_semantics = [#tpu.dimension_semantics<parallel>, #tpu.dimension_semantics<parallel>], iteration_bounds = array<i64: 2, 1>, scalar_prefetch = 0 : i64, scratch_operands = 0 : i64, tpu.core_type = #tpu.core_type<tc>, window_params = [{transform_indices = @transform_0, window_bounds = array<i64: 1, 10, 10, 128>}, {pipeline_mode = #tpu.pipeline_mode<synchronous>, transform_indices = @transform_1, window_bounds = array<i64: 9, 128, 128>}, {pipeline_mode = #tpu.pipeline_mode<synchronous>, transform_indices = @transform_2, window_bounds = array<i64: 1, 128>}, {transform_indices = @transform_3, window_bounds = array<i64: 1, 8, 8, 128>}]} {
    %c8_i32 = arith.constant 8 : i32
    %0 = arith.muli %arg1, %c8_i32 : i32
    %cst = arith.constant 0.000000e+00 : f32
    %1 = vector.broadcast %cst : f32 to vector<64x128xf32>
    %c0_i32 = arith.constant 0 : i32
    %2 = arith.addi %0, %c0_i32 : i32
    %c0 = arith.constant 0 : index
    %3 = arith.index_cast %2 : i32 to index
    %c0_0 = arith.constant 0 : index
    %c0_1 = arith.constant 0 : index
    %4 = vector.load %arg2[%c0, %3, %c0_0, %c0_1] : memref<1x10x10x128xf32, #tpu.memory_space<vmem>>, vector<1x8x8x128xf32>
    %5 = vector.shape_cast %4 : vector<1x8x8x128xf32> to vector<8x8x128xf32>
    %6 = vector.shape_cast %5 : vector<8x8x128xf32> to vector<64x128xf32>
    %7 = arith.truncf %6 : vector<64x128xf32> to vector<64x128xbf16>
    %c0_2 = arith.constant 0 : index
    %c0_3 = arith.constant 0 : index
    %c0_4 = arith.constant 0 : index
    %8 = vector.load %arg3[%c0_2, %c0_3, %c0_4] : memref<9x128x128xbf16, #tpu.memory_space<vmem>>, vector<1x128x128xbf16>
    %9 = vector.shape_cast %8 : vector<1x128x128xbf16> to vector<128x128xbf16>
    %cst_5 = arith.constant dense<0.000000e+00> : vector<64x128xf32>
    %10 = tpu.matmul %7, %9, %cst_5 {dimension_numbers = #tpu.dot_dimension_numbers<[1], [0], [0], [1], [0, 0, 1, 1], [], []>} : vector<64x128xbf16>, vector<128x128xbf16>, vector<64x128xf32> -> vector<64x128xf32>
    %11 = arith.addf %1, %10 : vector<64x128xf32>
    %c0_i32_6 = arith.constant 0 : i32
    %12 = arith.addi %0, %c0_i32_6 : i32
    %c0_7 = arith.constant 0 : index
    %13 = arith.index_cast %12 : i32 to index
    %c1 = arith.constant 1 : index
    %c0_8 = arith.constant 0 : index
    %14 = vector.load %arg2[%c0_7, %13, %c1, %c0_8] : memref<1x10x10x128xf32, #tpu.memory_space<vmem>>, vector<1x8x8x128xf32>
    %15 = vector.shape_cast %14 : vector<1x8x8x128xf32> to vector<8x8x128xf32>
    %16 = vector.shape_cast %15 : vector<8x8x128xf32> to vector<64x128xf32>
    %17 = arith.truncf %16 : vector<64x128xf32> to vector<64x128xbf16>
    %c1_9 = arith.constant 1 : index
    %c0_10 = arith.constant 0 : index
    %c0_11 = arith.constant 0 : index
    %18 = vector.load %arg3[%c1_9, %c0_10, %c0_11] : memref<9x128x128xbf16, #tpu.memory_space<vmem>>, vector<1x128x128xbf16>
    %19 = vector.shape_cast %18 : vector<1x128x128xbf16> to vector<128x128xbf16>
    %cst_12 = arith.constant dense<0.000000e+00> : vector<64x128xf32>
    %20 = tpu.matmul %17, %19, %cst_12 {dimension_numbers = #tpu.dot_dimension_numbers<[1], [0], [0], [1], [0, 0, 1, 1], [], []>} : vector<64x128xbf16>, vector<128x128xbf16>, vector<64x128xf32> -> vector<64x128xf32>
    %21 = arith.addf %11, %20 : vector<64x128xf32>
    %c0_i32_13 = arith.constant 0 : i32
    %22 = arith.addi %0, %c0_i32_13 : i32
    %c0_14 = arith.constant 0 : index
    %23 = arith.index_cast %22 : i32 to index
    %c2 = arith.constant 2 : index
    %c0_15 = arith.constant 0 : index
    %24 = vector.load %arg2[%c0_14, %23, %c2, %c0_15] : memref<1x10x10x128xf32, #tpu.memory_space<vmem>>, vector<1x8x8x128xf32>
    %25 = vector.shape_cast %24 : vector<1x8x8x128xf32> to vector<8x8x128xf32>
    %26 = vector.shape_cast %25 : vector<8x8x128xf32> to vector<64x128xf32>
    %27 = arith.truncf %26 : vector<64x128xf32> to vector<64x128xbf16>
    %c2_16 = arith.constant 2 : index
    %c0_17 = arith.constant 0 : index
    %c0_18 = arith.constant 0 : index
    %28 = vector.load %arg3[%c2_16, %c0_17, %c0_18] : memref<9x128x128xbf16, #tpu.memory_space<vmem>>, vector<1x128x128xbf16>
    %29 = vector.shape_cast %28 : vector<1x128x128xbf16> to vector<128x128xbf16>
    %cst_19 = arith.constant dense<0.000000e+00> : vector<64x128xf32>
    %30 = tpu.matmul %27, %29, %cst_19 {dimension_numbers = #tpu.dot_dimension_numbers<[1], [0], [0], [1], [0, 0, 1, 1], [], []>} : vector<64x128xbf16>, vector<128x128xbf16>, vector<64x128xf32> -> vector<64x128xf32>
    %31 = arith.addf %21, %30 : vector<64x128xf32>
    %c1_i32 = arith.constant 1 : i32
    %32 = arith.addi %0, %c1_i32 : i32
    %c0_20 = arith.constant 0 : index
    %33 = arith.index_cast %32 : i32 to index
    %c0_21 = arith.constant 0 : index
    %c0_22 = arith.constant 0 : index
    %34 = vector.load %arg2[%c0_20, %33, %c0_21, %c0_22] : memref<1x10x10x128xf32, #tpu.memory_space<vmem>>, vector<1x8x8x128xf32>
    %35 = vector.shape_cast %34 : vector<1x8x8x128xf32> to vector<8x8x128xf32>
    %36 = vector.shape_cast %35 : vector<8x8x128xf32> to vector<64x128xf32>
    %37 = arith.truncf %36 : vector<64x128xf32> to vector<64x128xbf16>
    %c3 = arith.constant 3 : index
    %c0_23 = arith.constant 0 : index
    %c0_24 = arith.constant 0 : index
    %38 = vector.load %arg3[%c3, %c0_23, %c0_24] : memref<9x128x128xbf16, #tpu.memory_space<vmem>>, vector<1x128x128xbf16>
    %39 = vector.shape_cast %38 : vector<1x128x128xbf16> to vector<128x128xbf16>
    %cst_25 = arith.constant dense<0.000000e+00> : vector<64x128xf32>
    %40 = tpu.matmul %37, %39, %cst_25 {dimension_numbers = #tpu.dot_dimension_numbers<[1], [0], [0], [1], [0, 0, 1, 1], [], []>} : vector<64x128xbf16>, vector<128x128xbf16>, vector<64x128xf32> -> vector<64x128xf32>
    %41 = arith.addf %31, %40 : vector<64x128xf32>
    %c1_i32_26 = arith.constant 1 : i32
    %42 = arith.addi %0, %c1_i32_26 : i32
    %c0_27 = arith.constant 0 : index
    %43 = arith.index_cast %42 : i32 to index
    %c1_28 = arith.constant 1 : index
    %c0_29 = arith.constant 0 : index
    %44 = vector.load %arg2[%c0_27, %43, %c1_28, %c0_29] : memref<1x10x10x128xf32, #tpu.memory_space<vmem>>, vector<1x8x8x128xf32>
    %45 = vector.shape_cast %44 : vector<1x8x8x128xf32> to vector<8x8x128xf32>
    %46 = vector.shape_cast %45 : vector<8x8x128xf32> to vector<64x128xf32>
    %47 = arith.truncf %46 : vector<64x128xf32> to vector<64x128xbf16>
    %c4 = arith.constant 4 : index
    %c0_30 = arith.constant 0 : index
    %c0_31 = arith.constant 0 : index
    %48 = vector.load %arg3[%c4, %c0_30, %c0_31] : memref<9x128x128xbf16, #tpu.memory_space<vmem>>, vector<1x128x128xbf16>
    %49 = vector.shape_cast %48 : vector<1x128x128xbf16> to vector<128x128xbf16>
    %cst_32 = arith.constant dense<0.000000e+00> : vector<64x128xf32>
    %50 = tpu.matmul %47, %49, %cst_32 {dimension_numbers = #tpu.dot_dimension_numbers<[1], [0], [0], [1], [0, 0, 1, 1], [], []>} : vector<64x128xbf16>, vector<128x128xbf16>, vector<64x128xf32> -> vector<64x128xf32>
    %51 = arith.addf %41, %50 : vector<64x128xf32>
    %c1_i32_33 = arith.constant 1 : i32
    %52 = arith.addi %0, %c1_i32_33 : i32
    %c0_34 = arith.constant 0 : index
    %53 = arith.index_cast %52 : i32 to index
    %c2_35 = arith.constant 2 : index
    %c0_36 = arith.constant 0 : index
    %54 = vector.load %arg2[%c0_34, %53, %c2_35, %c0_36] : memref<1x10x10x128xf32, #tpu.memory_space<vmem>>, vector<1x8x8x128xf32>
    %55 = vector.shape_cast %54 : vector<1x8x8x128xf32> to vector<8x8x128xf32>
    %56 = vector.shape_cast %55 : vector<8x8x128xf32> to vector<64x128xf32>
    %57 = arith.truncf %56 : vector<64x128xf32> to vector<64x128xbf16>
    %c5 = arith.constant 5 : index
    %c0_37 = arith.constant 0 : index
    %c0_38 = arith.constant 0 : index
    %58 = vector.load %arg3[%c5, %c0_37, %c0_38] : memref<9x128x128xbf16, #tpu.memory_space<vmem>>, vector<1x128x128xbf16>
    %59 = vector.shape_cast %58 : vector<1x128x128xbf16> to vector<128x128xbf16>
    %cst_39 = arith.constant dense<0.000000e+00> : vector<64x128xf32>
    %60 = tpu.matmul %57, %59, %cst_39 {dimension_numbers = #tpu.dot_dimension_numbers<[1], [0], [0], [1], [0, 0, 1, 1], [], []>} : vector<64x128xbf16>, vector<128x128xbf16>, vector<64x128xf32> -> vector<64x128xf32>
    %61 = arith.addf %51, %60 : vector<64x128xf32>
    %c2_i32 = arith.constant 2 : i32
    %62 = arith.addi %0, %c2_i32 : i32
    %c0_40 = arith.constant 0 : index
    %63 = arith.index_cast %62 : i32 to index
    %c0_41 = arith.constant 0 : index
    %c0_42 = arith.constant 0 : index
    %64 = vector.load %arg2[%c0_40, %63, %c0_41, %c0_42] : memref<1x10x10x128xf32, #tpu.memory_space<vmem>>, vector<1x8x8x128xf32>
    %65 = vector.shape_cast %64 : vector<1x8x8x128xf32> to vector<8x8x128xf32>
    %66 = vector.shape_cast %65 : vector<8x8x128xf32> to vector<64x128xf32>
    %67 = arith.truncf %66 : vector<64x128xf32> to vector<64x128xbf16>
    %c6 = arith.constant 6 : index
    %c0_43 = arith.constant 0 : index
    %c0_44 = arith.constant 0 : index
    %68 = vector.load %arg3[%c6, %c0_43, %c0_44] : memref<9x128x128xbf16, #tpu.memory_space<vmem>>, vector<1x128x128xbf16>
    %69 = vector.shape_cast %68 : vector<1x128x128xbf16> to vector<128x128xbf16>
    %cst_45 = arith.constant dense<0.000000e+00> : vector<64x128xf32>
    %70 = tpu.matmul %67, %69, %cst_45 {dimension_numbers = #tpu.dot_dimension_numbers<[1], [0], [0], [1], [0, 0, 1, 1], [], []>} : vector<64x128xbf16>, vector<128x128xbf16>, vector<64x128xf32> -> vector<64x128xf32>
    %71 = arith.addf %61, %70 : vector<64x128xf32>
    %c2_i32_46 = arith.constant 2 : i32
    %72 = arith.addi %0, %c2_i32_46 : i32
    %c0_47 = arith.constant 0 : index
    %73 = arith.index_cast %72 : i32 to index
    %c1_48 = arith.constant 1 : index
    %c0_49 = arith.constant 0 : index
    %74 = vector.load %arg2[%c0_47, %73, %c1_48, %c0_49] : memref<1x10x10x128xf32, #tpu.memory_space<vmem>>, vector<1x8x8x128xf32>
    %75 = vector.shape_cast %74 : vector<1x8x8x128xf32> to vector<8x8x128xf32>
    %76 = vector.shape_cast %75 : vector<8x8x128xf32> to vector<64x128xf32>
    %77 = arith.truncf %76 : vector<64x128xf32> to vector<64x128xbf16>
    %c7 = arith.constant 7 : index
    %c0_50 = arith.constant 0 : index
    %c0_51 = arith.constant 0 : index
    %78 = vector.load %arg3[%c7, %c0_50, %c0_51] : memref<9x128x128xbf16, #tpu.memory_space<vmem>>, vector<1x128x128xbf16>
    %79 = vector.shape_cast %78 : vector<1x128x128xbf16> to vector<128x128xbf16>
    %cst_52 = arith.constant dense<0.000000e+00> : vector<64x128xf32>
    %80 = tpu.matmul %77, %79, %cst_52 {dimension_numbers = #tpu.dot_dimension_numbers<[1], [0], [0], [1], [0, 0, 1, 1], [], []>} : vector<64x128xbf16>, vector<128x128xbf16>, vector<64x128xf32> -> vector<64x128xf32>
    %81 = arith.addf %71, %80 : vector<64x128xf32>
    %c2_i32_53 = arith.constant 2 : i32
    %82 = arith.addi %0, %c2_i32_53 : i32
    %c0_54 = arith.constant 0 : index
    %83 = arith.index_cast %82 : i32 to index
    %c2_55 = arith.constant 2 : index
    %c0_56 = arith.constant 0 : index
    %84 = vector.load %arg2[%c0_54, %83, %c2_55, %c0_56] : memref<1x10x10x128xf32, #tpu.memory_space<vmem>>, vector<1x8x8x128xf32>
    %85 = vector.shape_cast %84 : vector<1x8x8x128xf32> to vector<8x8x128xf32>
    %86 = vector.shape_cast %85 : vector<8x8x128xf32> to vector<64x128xf32>
    %87 = arith.truncf %86 : vector<64x128xf32> to vector<64x128xbf16>
    %c8 = arith.constant 8 : index
    %c0_57 = arith.constant 0 : index
    %c0_58 = arith.constant 0 : index
    %88 = vector.load %arg3[%c8, %c0_57, %c0_58] : memref<9x128x128xbf16, #tpu.memory_space<vmem>>, vector<1x128x128xbf16>
    %89 = vector.shape_cast %88 : vector<1x128x128xbf16> to vector<128x128xbf16>
    %cst_59 = arith.constant dense<0.000000e+00> : vector<64x128xf32>
    %90 = tpu.matmul %87, %89, %cst_59 {dimension_numbers = #tpu.dot_dimension_numbers<[1], [0], [0], [1], [0, 0, 1, 1], [], []>} : vector<64x128xbf16>, vector<128x128xbf16>, vector<64x128xf32> -> vector<64x128xf32>
    %91 = arith.addf %81, %90 : vector<64x128xf32>
    %c0_60 = arith.constant 0 : index
    %c0_61 = arith.constant 0 : index
    %92 = vector.load %arg4[%c0_60, %c0_61] : memref<1x128xf32, #tpu.memory_space<vmem>>, vector<1x128xf32>
    %93 = vector.broadcast %92 : vector<1x128xf32> to vector<64x128xf32>
    %94 = arith.addf %91, %93 : vector<64x128xf32>
    %cst_62 = arith.constant 0.000000e+00 : f32
    %95 = vector.broadcast %cst_62 : f32 to vector<64x128xf32>
    %96 = arith.maximumf %94, %95 : vector<64x128xf32>
    %97 = vector.shape_cast %96 : vector<64x128xf32> to vector<8x8x128xf32>
    %c0_63 = arith.constant 0 : index
    %c0_64 = arith.constant 0 : index
    %c0_65 = arith.constant 0 : index
    %c0_66 = arith.constant 0 : index
    %98 = vector.load %arg5[%c0_63, %c0_64, %c0_65, %c0_66] : memref<1x8x8x128xf32, #tpu.memory_space<vmem>>, vector<1x8x8x128xf32>
    %99 = vector.shape_cast %98 : vector<1x8x8x128xf32> to vector<8x8x128xf32>
    %100 = vector.shape_cast %97 : vector<8x8x128xf32> to vector<1x8x8x128xf32>
    tpu.vector_store %arg5[%c0_63, %c0_64, %c0_65, %c0_66], %100 {strides = array<i32>} : memref<1x8x8x128xf32, #tpu.memory_space<vmem>>, vector<1x8x8x128xf32>,
    return
  }
  func.func @transform_0(%arg0: i32, %arg1: i32) -> (i32, i32, i32, i32) {
    %c0_i32 = arith.constant 0 : i32
    %c0_i32_0 = arith.constant 0 : i32
    %c0_i32_1 = arith.constant 0 : i32
    %c0_i32_2 = arith.constant 0 : i32
    return %arg0, %c0_i32, %c0_i32_0, %c0_i32_1 : i32, i32, i32, i32
  }
  func.func @transform_1(%arg0: i32, %arg1: i32) -> (i32, i32, i32) {
    %c0_i32 = arith.constant 0 : i32
    %c0_i32_0 = arith.constant 0 : i32
    %c0_i32_1 = arith.constant 0 : i32
    %c0_i32_2 = arith.constant 0 : i32
    return %c0_i32, %c0_i32_0, %c0_i32_1 : i32, i32, i32
  }
  func.func @transform_2(%arg0: i32, %arg1: i32) -> (i32, i32) {
    %c0_i32 = arith.constant 0 : i32
    %c0_i32_0 = arith.constant 0 : i32
    %c0_i32_1 = arith.constant 0 : i32
    return %c0_i32, %c0_i32_0 : i32, i32
  }
  func.func @transform_3(%arg0: i32, %arg1: i32) -> (i32, i32, i32, i32) {
    %c0_i32 = arith.constant 0 : i32
    %c0_i32_0 = arith.constant 0 : i32
    %c0_i32_1 = arith.constant 0 : i32
    return %arg0, %arg1, %c0_i32, %c0_i32_0 : i32, i32, i32, i32
  }
}

module attributes {stable_mosaic.version = 11 : i64} {
  func.func @_rowup_add_kernel(%arg0: i32, %arg1: i32, %arg2: memref<8x4xf32, #tpu.memory_space<vmem>>, %arg3: memref<1x4x1024xf32, #tpu.memory_space<vmem>>, %arg4: memref<1x8x1024xf32, #tpu.memory_space<vmem>>, %arg5: memref<1x8x1024xf32, #tpu.memory_space<vmem>>) attributes {dimension_semantics = [#tpu.dimension_semantics<parallel>, #tpu.dimension_semantics<parallel>], iteration_bounds = array<i64: 2, 1>, scalar_prefetch = 0 : i64, scratch_operands = 0 : i64, tpu.core_type = #tpu.core_type<tc>, window_params = [{pipeline_mode = #tpu.pipeline_mode<synchronous>, transform_indices = @transform_0, window_bounds = array<i64: 8, 4>}, {transform_indices = @transform_1, window_bounds = array<i64: 1, 4, 1024>}, {transform_indices = @transform_2, window_bounds = array<i64: 1, 8, 1024>}, {transform_indices = @transform_3, window_bounds = array<i64: 1, 8, 1024>}]} {
    %c0 = arith.constant 0 : index
    %c0_0 = arith.constant 0 : index
    %0 = vector.load %arg2[%c0, %c0_0] : memref<8x4xf32, #tpu.memory_space<vmem>>, vector<8x4xf32>
    %c0_1 = arith.constant 0 : index
    %c0_2 = arith.constant 0 : index
    %c0_3 = arith.constant 0 : index
    %1 = vector.load %arg3[%c0_1, %c0_2, %c0_3] : memref<1x4x1024xf32, #tpu.memory_space<vmem>>, vector<1x4x1024xf32>
    %2 = vector.shape_cast %1 : vector<1x4x1024xf32> to vector<4x1024xf32>
    %cst = arith.constant dense<0.000000e+00> : vector<8x1024xf32>
    %3 = tpu.matmul %0, %2, %cst {dimension_numbers = #tpu.dot_dimension_numbers<[1], [0], [0], [1], [0, 0, 1, 1], [], []>} : vector<8x4xf32>, vector<4x1024xf32>, vector<8x1024xf32> -> vector<8x1024xf32>
    %c0_4 = arith.constant 0 : index
    %c0_5 = arith.constant 0 : index
    %c0_6 = arith.constant 0 : index
    %4 = vector.load %arg4[%c0_4, %c0_5, %c0_6] : memref<1x8x1024xf32, #tpu.memory_space<vmem>>, vector<1x8x1024xf32>
    %5 = vector.shape_cast %4 : vector<1x8x1024xf32> to vector<8x1024xf32>
    %6 = arith.addf %3, %5 : vector<8x1024xf32>
    %c0_7 = arith.constant 0 : index
    %c0_8 = arith.constant 0 : index
    %c0_9 = arith.constant 0 : index
    %7 = vector.load %arg5[%c0_7, %c0_8, %c0_9] : memref<1x8x1024xf32, #tpu.memory_space<vmem>>, vector<1x8x1024xf32>
    %8 = vector.shape_cast %7 : vector<1x8x1024xf32> to vector<8x1024xf32>
    %9 = vector.shape_cast %6 : vector<8x1024xf32> to vector<1x8x1024xf32>
    tpu.vector_store %arg5[%c0_7, %c0_8, %c0_9], %9 {strides = array<i32>} : memref<1x8x1024xf32, #tpu.memory_space<vmem>>, vector<1x8x1024xf32>,
    return
  }
  func.func @transform_0(%arg0: i32, %arg1: i32) -> (i32, i32) {
    %c0_i32 = arith.constant 0 : i32
    %c0_i32_0 = arith.constant 0 : i32
    %c0_i32_1 = arith.constant 0 : i32
    return %c0_i32, %c0_i32_0 : i32, i32
  }
  func.func @transform_1(%arg0: i32, %arg1: i32) -> (i32, i32, i32) {
    %c0_i32 = arith.constant 0 : i32
    %c0_i32_0 = arith.constant 0 : i32
    return %arg0, %c0_i32, %arg1 : i32, i32, i32
  }
  func.func @transform_2(%arg0: i32, %arg1: i32) -> (i32, i32, i32) {
    %c0_i32 = arith.constant 0 : i32
    %c0_i32_0 = arith.constant 0 : i32
    return %arg0, %c0_i32, %arg1 : i32, i32, i32
  }
  func.func @transform_3(%arg0: i32, %arg1: i32) -> (i32, i32, i32) {
    %c0_i32 = arith.constant 0 : i32
    %c0_i32_0 = arith.constant 0 : i32
    return %arg0, %c0_i32, %arg1 : i32, i32, i32
  }
}

module attributes {stable_mosaic.version = 11 : i64} {
  func.func @_rowup_add_kernel(%arg0: i32, %arg1: i32, %arg2: memref<16x8xf32, #tpu.memory_space<vmem>>, %arg3: memref<1x8x2048xf32, #tpu.memory_space<vmem>>, %arg4: memref<1x16x2048xf32, #tpu.memory_space<vmem>>, %arg5: memref<1x16x2048xf32, #tpu.memory_space<vmem>>) attributes {dimension_semantics = [#tpu.dimension_semantics<parallel>, #tpu.dimension_semantics<parallel>], iteration_bounds = array<i64: 2, 1>, scalar_prefetch = 0 : i64, scratch_operands = 0 : i64, tpu.core_type = #tpu.core_type<tc>, window_params = [{pipeline_mode = #tpu.pipeline_mode<synchronous>, transform_indices = @transform_0, window_bounds = array<i64: 16, 8>}, {transform_indices = @transform_1, window_bounds = array<i64: 1, 8, 2048>}, {transform_indices = @transform_2, window_bounds = array<i64: 1, 16, 2048>}, {transform_indices = @transform_3, window_bounds = array<i64: 1, 16, 2048>}]} {
    %c0 = arith.constant 0 : index
    %c0_0 = arith.constant 0 : index
    %0 = vector.load %arg2[%c0, %c0_0] : memref<16x8xf32, #tpu.memory_space<vmem>>, vector<16x8xf32>
    %c0_1 = arith.constant 0 : index
    %c0_2 = arith.constant 0 : index
    %c0_3 = arith.constant 0 : index
    %1 = vector.load %arg3[%c0_1, %c0_2, %c0_3] : memref<1x8x2048xf32, #tpu.memory_space<vmem>>, vector<1x8x2048xf32>
    %2 = vector.shape_cast %1 : vector<1x8x2048xf32> to vector<8x2048xf32>
    %cst = arith.constant dense<0.000000e+00> : vector<16x2048xf32>
    %3 = tpu.matmul %0, %2, %cst {dimension_numbers = #tpu.dot_dimension_numbers<[1], [0], [0], [1], [0, 0, 1, 1], [], []>} : vector<16x8xf32>, vector<8x2048xf32>, vector<16x2048xf32> -> vector<16x2048xf32>
    %c0_4 = arith.constant 0 : index
    %c0_5 = arith.constant 0 : index
    %c0_6 = arith.constant 0 : index
    %4 = vector.load %arg4[%c0_4, %c0_5, %c0_6] : memref<1x16x2048xf32, #tpu.memory_space<vmem>>, vector<1x16x2048xf32>
    %5 = vector.shape_cast %4 : vector<1x16x2048xf32> to vector<16x2048xf32>
    %6 = arith.addf %3, %5 : vector<16x2048xf32>
    %c0_7 = arith.constant 0 : index
    %c0_8 = arith.constant 0 : index
    %c0_9 = arith.constant 0 : index
    %7 = vector.load %arg5[%c0_7, %c0_8, %c0_9] : memref<1x16x2048xf32, #tpu.memory_space<vmem>>, vector<1x16x2048xf32>
    %8 = vector.shape_cast %7 : vector<1x16x2048xf32> to vector<16x2048xf32>
    %9 = vector.shape_cast %6 : vector<16x2048xf32> to vector<1x16x2048xf32>
    tpu.vector_store %arg5[%c0_7, %c0_8, %c0_9], %9 {strides = array<i32>} : memref<1x16x2048xf32, #tpu.memory_space<vmem>>, vector<1x16x2048xf32>,
    return
  }
  func.func @transform_0(%arg0: i32, %arg1: i32) -> (i32, i32) {
    %c0_i32 = arith.constant 0 : i32
    %c0_i32_0 = arith.constant 0 : i32
    %c0_i32_1 = arith.constant 0 : i32
    return %c0_i32, %c0_i32_0 : i32, i32
  }
  func.func @transform_1(%arg0: i32, %arg1: i32) -> (i32, i32, i32) {
    %c0_i32 = arith.constant 0 : i32
    %c0_i32_0 = arith.constant 0 : i32
    return %arg0, %c0_i32, %arg1 : i32, i32, i32
  }
  func.func @transform_2(%arg0: i32, %arg1: i32) -> (i32, i32, i32) {
    %c0_i32 = arith.constant 0 : i32
    %c0_i32_0 = arith.constant 0 : i32
    return %arg0, %c0_i32, %arg1 : i32, i32, i32
  }
  func.func @transform_3(%arg0: i32, %arg1: i32) -> (i32, i32, i32) {
    %c0_i32 = arith.constant 0 : i32
    %c0_i32_0 = arith.constant 0 : i32
    return %arg0, %c0_i32, %arg1 : i32, i32, i32
  }
}

module attributes {stable_mosaic.version = 11 : i64} {
  func.func @_conv3x3_kernel(%arg0: i32, %arg1: i32, %arg2: memref<1x18x18x128xf32, #tpu.memory_space<vmem>>, %arg3: memref<9x128x128xbf16, #tpu.memory_space<vmem>>, %arg4: memref<1x128xf32, #tpu.memory_space<vmem>>, %arg5: memref<1x16x16x128xf32, #tpu.memory_space<vmem>>) attributes {dimension_semantics = [#tpu.dimension_semantics<parallel>, #tpu.dimension_semantics<parallel>], iteration_bounds = array<i64: 2, 1>, scalar_prefetch = 0 : i64, scratch_operands = 0 : i64, tpu.core_type = #tpu.core_type<tc>, window_params = [{transform_indices = @transform_0, window_bounds = array<i64: 1, 18, 18, 128>}, {pipeline_mode = #tpu.pipeline_mode<synchronous>, transform_indices = @transform_1, window_bounds = array<i64: 9, 128, 128>}, {pipeline_mode = #tpu.pipeline_mode<synchronous>, transform_indices = @transform_2, window_bounds = array<i64: 1, 128>}, {transform_indices = @transform_3, window_bounds = array<i64: 1, 16, 16, 128>}]} {
    %c16_i32 = arith.constant 16 : i32
    %0 = arith.muli %arg1, %c16_i32 : i32
    %cst = arith.constant 0.000000e+00 : f32
    %1 = vector.broadcast %cst : f32 to vector<256x128xf32>
    %c0_i32 = arith.constant 0 : i32
    %2 = arith.addi %0, %c0_i32 : i32
    %c0 = arith.constant 0 : index
    %3 = arith.index_cast %2 : i32 to index
    %c0_0 = arith.constant 0 : index
    %c0_1 = arith.constant 0 : index
    %4 = vector.load %arg2[%c0, %3, %c0_0, %c0_1] : memref<1x18x18x128xf32, #tpu.memory_space<vmem>>, vector<1x16x16x128xf32>
    %5 = vector.shape_cast %4 : vector<1x16x16x128xf32> to vector<16x16x128xf32>
    %6 = vector.shape_cast %5 : vector<16x16x128xf32> to vector<256x128xf32>
    %7 = arith.truncf %6 : vector<256x128xf32> to vector<256x128xbf16>
    %c0_2 = arith.constant 0 : index
    %c0_3 = arith.constant 0 : index
    %c0_4 = arith.constant 0 : index
    %8 = vector.load %arg3[%c0_2, %c0_3, %c0_4] : memref<9x128x128xbf16, #tpu.memory_space<vmem>>, vector<1x128x128xbf16>
    %9 = vector.shape_cast %8 : vector<1x128x128xbf16> to vector<128x128xbf16>
    %cst_5 = arith.constant dense<0.000000e+00> : vector<256x128xf32>
    %10 = tpu.matmul %7, %9, %cst_5 {dimension_numbers = #tpu.dot_dimension_numbers<[1], [0], [0], [1], [0, 0, 1, 1], [], []>} : vector<256x128xbf16>, vector<128x128xbf16>, vector<256x128xf32> -> vector<256x128xf32>
    %11 = arith.addf %1, %10 : vector<256x128xf32>
    %c0_i32_6 = arith.constant 0 : i32
    %12 = arith.addi %0, %c0_i32_6 : i32
    %c0_7 = arith.constant 0 : index
    %13 = arith.index_cast %12 : i32 to index
    %c1 = arith.constant 1 : index
    %c0_8 = arith.constant 0 : index
    %14 = vector.load %arg2[%c0_7, %13, %c1, %c0_8] : memref<1x18x18x128xf32, #tpu.memory_space<vmem>>, vector<1x16x16x128xf32>
    %15 = vector.shape_cast %14 : vector<1x16x16x128xf32> to vector<16x16x128xf32>
    %16 = vector.shape_cast %15 : vector<16x16x128xf32> to vector<256x128xf32>
    %17 = arith.truncf %16 : vector<256x128xf32> to vector<256x128xbf16>
    %c1_9 = arith.constant 1 : index
    %c0_10 = arith.constant 0 : index
    %c0_11 = arith.constant 0 : index
    %18 = vector.load %arg3[%c1_9, %c0_10, %c0_11] : memref<9x128x128xbf16, #tpu.memory_space<vmem>>, vector<1x128x128xbf16>
    %19 = vector.shape_cast %18 : vector<1x128x128xbf16> to vector<128x128xbf16>
    %cst_12 = arith.constant dense<0.000000e+00> : vector<256x128xf32>
    %20 = tpu.matmul %17, %19, %cst_12 {dimension_numbers = #tpu.dot_dimension_numbers<[1], [0], [0], [1], [0, 0, 1, 1], [], []>} : vector<256x128xbf16>, vector<128x128xbf16>, vector<256x128xf32> -> vector<256x128xf32>
    %21 = arith.addf %11, %20 : vector<256x128xf32>
    %c0_i32_13 = arith.constant 0 : i32
    %22 = arith.addi %0, %c0_i32_13 : i32
    %c0_14 = arith.constant 0 : index
    %23 = arith.index_cast %22 : i32 to index
    %c2 = arith.constant 2 : index
    %c0_15 = arith.constant 0 : index
    %24 = vector.load %arg2[%c0_14, %23, %c2, %c0_15] : memref<1x18x18x128xf32, #tpu.memory_space<vmem>>, vector<1x16x16x128xf32>
    %25 = vector.shape_cast %24 : vector<1x16x16x128xf32> to vector<16x16x128xf32>
    %26 = vector.shape_cast %25 : vector<16x16x128xf32> to vector<256x128xf32>
    %27 = arith.truncf %26 : vector<256x128xf32> to vector<256x128xbf16>
    %c2_16 = arith.constant 2 : index
    %c0_17 = arith.constant 0 : index
    %c0_18 = arith.constant 0 : index
    %28 = vector.load %arg3[%c2_16, %c0_17, %c0_18] : memref<9x128x128xbf16, #tpu.memory_space<vmem>>, vector<1x128x128xbf16>
    %29 = vector.shape_cast %28 : vector<1x128x128xbf16> to vector<128x128xbf16>
    %cst_19 = arith.constant dense<0.000000e+00> : vector<256x128xf32>
    %30 = tpu.matmul %27, %29, %cst_19 {dimension_numbers = #tpu.dot_dimension_numbers<[1], [0], [0], [1], [0, 0, 1, 1], [], []>} : vector<256x128xbf16>, vector<128x128xbf16>, vector<256x128xf32> -> vector<256x128xf32>
    %31 = arith.addf %21, %30 : vector<256x128xf32>
    %c1_i32 = arith.constant 1 : i32
    %32 = arith.addi %0, %c1_i32 : i32
    %c0_20 = arith.constant 0 : index
    %33 = arith.index_cast %32 : i32 to index
    %c0_21 = arith.constant 0 : index
    %c0_22 = arith.constant 0 : index
    %34 = vector.load %arg2[%c0_20, %33, %c0_21, %c0_22] : memref<1x18x18x128xf32, #tpu.memory_space<vmem>>, vector<1x16x16x128xf32>
    %35 = vector.shape_cast %34 : vector<1x16x16x128xf32> to vector<16x16x128xf32>
    %36 = vector.shape_cast %35 : vector<16x16x128xf32> to vector<256x128xf32>
    %37 = arith.truncf %36 : vector<256x128xf32> to vector<256x128xbf16>
    %c3 = arith.constant 3 : index
    %c0_23 = arith.constant 0 : index
    %c0_24 = arith.constant 0 : index
    %38 = vector.load %arg3[%c3, %c0_23, %c0_24] : memref<9x128x128xbf16, #tpu.memory_space<vmem>>, vector<1x128x128xbf16>
    %39 = vector.shape_cast %38 : vector<1x128x128xbf16> to vector<128x128xbf16>
    %cst_25 = arith.constant dense<0.000000e+00> : vector<256x128xf32>
    %40 = tpu.matmul %37, %39, %cst_25 {dimension_numbers = #tpu.dot_dimension_numbers<[1], [0], [0], [1], [0, 0, 1, 1], [], []>} : vector<256x128xbf16>, vector<128x128xbf16>, vector<256x128xf32> -> vector<256x128xf32>
    %41 = arith.addf %31, %40 : vector<256x128xf32>
    %c1_i32_26 = arith.constant 1 : i32
    %42 = arith.addi %0, %c1_i32_26 : i32
    %c0_27 = arith.constant 0 : index
    %43 = arith.index_cast %42 : i32 to index
    %c1_28 = arith.constant 1 : index
    %c0_29 = arith.constant 0 : index
    %44 = vector.load %arg2[%c0_27, %43, %c1_28, %c0_29] : memref<1x18x18x128xf32, #tpu.memory_space<vmem>>, vector<1x16x16x128xf32>
    %45 = vector.shape_cast %44 : vector<1x16x16x128xf32> to vector<16x16x128xf32>
    %46 = vector.shape_cast %45 : vector<16x16x128xf32> to vector<256x128xf32>
    %47 = arith.truncf %46 : vector<256x128xf32> to vector<256x128xbf16>
    %c4 = arith.constant 4 : index
    %c0_30 = arith.constant 0 : index
    %c0_31 = arith.constant 0 : index
    %48 = vector.load %arg3[%c4, %c0_30, %c0_31] : memref<9x128x128xbf16, #tpu.memory_space<vmem>>, vector<1x128x128xbf16>
    %49 = vector.shape_cast %48 : vector<1x128x128xbf16> to vector<128x128xbf16>
    %cst_32 = arith.constant dense<0.000000e+00> : vector<256x128xf32>
    %50 = tpu.matmul %47, %49, %cst_32 {dimension_numbers = #tpu.dot_dimension_numbers<[1], [0], [0], [1], [0, 0, 1, 1], [], []>} : vector<256x128xbf16>, vector<128x128xbf16>, vector<256x128xf32> -> vector<256x128xf32>
    %51 = arith.addf %41, %50 : vector<256x128xf32>
    %c1_i32_33 = arith.constant 1 : i32
    %52 = arith.addi %0, %c1_i32_33 : i32
    %c0_34 = arith.constant 0 : index
    %53 = arith.index_cast %52 : i32 to index
    %c2_35 = arith.constant 2 : index
    %c0_36 = arith.constant 0 : index
    %54 = vector.load %arg2[%c0_34, %53, %c2_35, %c0_36] : memref<1x18x18x128xf32, #tpu.memory_space<vmem>>, vector<1x16x16x128xf32>
    %55 = vector.shape_cast %54 : vector<1x16x16x128xf32> to vector<16x16x128xf32>
    %56 = vector.shape_cast %55 : vector<16x16x128xf32> to vector<256x128xf32>
    %57 = arith.truncf %56 : vector<256x128xf32> to vector<256x128xbf16>
    %c5 = arith.constant 5 : index
    %c0_37 = arith.constant 0 : index
    %c0_38 = arith.constant 0 : index
    %58 = vector.load %arg3[%c5, %c0_37, %c0_38] : memref<9x128x128xbf16, #tpu.memory_space<vmem>>, vector<1x128x128xbf16>
    %59 = vector.shape_cast %58 : vector<1x128x128xbf16> to vector<128x128xbf16>
    %cst_39 = arith.constant dense<0.000000e+00> : vector<256x128xf32>
    %60 = tpu.matmul %57, %59, %cst_39 {dimension_numbers = #tpu.dot_dimension_numbers<[1], [0], [0], [1], [0, 0, 1, 1], [], []>} : vector<256x128xbf16>, vector<128x128xbf16>, vector<256x128xf32> -> vector<256x128xf32>
    %61 = arith.addf %51, %60 : vector<256x128xf32>
    %c2_i32 = arith.constant 2 : i32
    %62 = arith.addi %0, %c2_i32 : i32
    %c0_40 = arith.constant 0 : index
    %63 = arith.index_cast %62 : i32 to index
    %c0_41 = arith.constant 0 : index
    %c0_42 = arith.constant 0 : index
    %64 = vector.load %arg2[%c0_40, %63, %c0_41, %c0_42] : memref<1x18x18x128xf32, #tpu.memory_space<vmem>>, vector<1x16x16x128xf32>
    %65 = vector.shape_cast %64 : vector<1x16x16x128xf32> to vector<16x16x128xf32>
    %66 = vector.shape_cast %65 : vector<16x16x128xf32> to vector<256x128xf32>
    %67 = arith.truncf %66 : vector<256x128xf32> to vector<256x128xbf16>
    %c6 = arith.constant 6 : index
    %c0_43 = arith.constant 0 : index
    %c0_44 = arith.constant 0 : index
    %68 = vector.load %arg3[%c6, %c0_43, %c0_44] : memref<9x128x128xbf16, #tpu.memory_space<vmem>>, vector<1x128x128xbf16>
    %69 = vector.shape_cast %68 : vector<1x128x128xbf16> to vector<128x128xbf16>
    %cst_45 = arith.constant dense<0.000000e+00> : vector<256x128xf32>
    %70 = tpu.matmul %67, %69, %cst_45 {dimension_numbers = #tpu.dot_dimension_numbers<[1], [0], [0], [1], [0, 0, 1, 1], [], []>} : vector<256x128xbf16>, vector<128x128xbf16>, vector<256x128xf32> -> vector<256x128xf32>
    %71 = arith.addf %61, %70 : vector<256x128xf32>
    %c2_i32_46 = arith.constant 2 : i32
    %72 = arith.addi %0, %c2_i32_46 : i32
    %c0_47 = arith.constant 0 : index
    %73 = arith.index_cast %72 : i32 to index
    %c1_48 = arith.constant 1 : index
    %c0_49 = arith.constant 0 : index
    %74 = vector.load %arg2[%c0_47, %73, %c1_48, %c0_49] : memref<1x18x18x128xf32, #tpu.memory_space<vmem>>, vector<1x16x16x128xf32>
    %75 = vector.shape_cast %74 : vector<1x16x16x128xf32> to vector<16x16x128xf32>
    %76 = vector.shape_cast %75 : vector<16x16x128xf32> to vector<256x128xf32>
    %77 = arith.truncf %76 : vector<256x128xf32> to vector<256x128xbf16>
    %c7 = arith.constant 7 : index
    %c0_50 = arith.constant 0 : index
    %c0_51 = arith.constant 0 : index
    %78 = vector.load %arg3[%c7, %c0_50, %c0_51] : memref<9x128x128xbf16, #tpu.memory_space<vmem>>, vector<1x128x128xbf16>
    %79 = vector.shape_cast %78 : vector<1x128x128xbf16> to vector<128x128xbf16>
    %cst_52 = arith.constant dense<0.000000e+00> : vector<256x128xf32>
    %80 = tpu.matmul %77, %79, %cst_52 {dimension_numbers = #tpu.dot_dimension_numbers<[1], [0], [0], [1], [0, 0, 1, 1], [], []>} : vector<256x128xbf16>, vector<128x128xbf16>, vector<256x128xf32> -> vector<256x128xf32>
    %81 = arith.addf %71, %80 : vector<256x128xf32>
    %c2_i32_53 = arith.constant 2 : i32
    %82 = arith.addi %0, %c2_i32_53 : i32
    %c0_54 = arith.constant 0 : index
    %83 = arith.index_cast %82 : i32 to index
    %c2_55 = arith.constant 2 : index
    %c0_56 = arith.constant 0 : index
    %84 = vector.load %arg2[%c0_54, %83, %c2_55, %c0_56] : memref<1x18x18x128xf32, #tpu.memory_space<vmem>>, vector<1x16x16x128xf32>
    %85 = vector.shape_cast %84 : vector<1x16x16x128xf32> to vector<16x16x128xf32>
    %86 = vector.shape_cast %85 : vector<16x16x128xf32> to vector<256x128xf32>
    %87 = arith.truncf %86 : vector<256x128xf32> to vector<256x128xbf16>
    %c8 = arith.constant 8 : index
    %c0_57 = arith.constant 0 : index
    %c0_58 = arith.constant 0 : index
    %88 = vector.load %arg3[%c8, %c0_57, %c0_58] : memref<9x128x128xbf16, #tpu.memory_space<vmem>>, vector<1x128x128xbf16>
    %89 = vector.shape_cast %88 : vector<1x128x128xbf16> to vector<128x128xbf16>
    %cst_59 = arith.constant dense<0.000000e+00> : vector<256x128xf32>
    %90 = tpu.matmul %87, %89, %cst_59 {dimension_numbers = #tpu.dot_dimension_numbers<[1], [0], [0], [1], [0, 0, 1, 1], [], []>} : vector<256x128xbf16>, vector<128x128xbf16>, vector<256x128xf32> -> vector<256x128xf32>
    %91 = arith.addf %81, %90 : vector<256x128xf32>
    %c0_60 = arith.constant 0 : index
    %c0_61 = arith.constant 0 : index
    %92 = vector.load %arg4[%c0_60, %c0_61] : memref<1x128xf32, #tpu.memory_space<vmem>>, vector<1x128xf32>
    %93 = vector.broadcast %92 : vector<1x128xf32> to vector<256x128xf32>
    %94 = arith.addf %91, %93 : vector<256x128xf32>
    %cst_62 = arith.constant 0.000000e+00 : f32
    %95 = vector.broadcast %cst_62 : f32 to vector<256x128xf32>
    %96 = arith.maximumf %94, %95 : vector<256x128xf32>
    %97 = vector.shape_cast %96 : vector<256x128xf32> to vector<16x16x128xf32>
    %c0_63 = arith.constant 0 : index
    %c0_64 = arith.constant 0 : index
    %c0_65 = arith.constant 0 : index
    %c0_66 = arith.constant 0 : index
    %98 = vector.load %arg5[%c0_63, %c0_64, %c0_65, %c0_66] : memref<1x16x16x128xf32, #tpu.memory_space<vmem>>, vector<1x16x16x128xf32>
    %99 = vector.shape_cast %98 : vector<1x16x16x128xf32> to vector<16x16x128xf32>
    %100 = vector.shape_cast %97 : vector<16x16x128xf32> to vector<1x16x16x128xf32>
    tpu.vector_store %arg5[%c0_63, %c0_64, %c0_65, %c0_66], %100 {strides = array<i32>} : memref<1x16x16x128xf32, #tpu.memory_space<vmem>>, vector<1x16x16x128xf32>,
    return
  }
  func.func @transform_0(%arg0: i32, %arg1: i32) -> (i32, i32, i32, i32) {
    %c0_i32 = arith.constant 0 : i32
    %c0_i32_0 = arith.constant 0 : i32
    %c0_i32_1 = arith.constant 0 : i32
    %c0_i32_2 = arith.constant 0 : i32
    return %arg0, %c0_i32, %c0_i32_0, %c0_i32_1 : i32, i32, i32, i32
  }
  func.func @transform_1(%arg0: i32, %arg1: i32) -> (i32, i32, i32) {
    %c0_i32 = arith.constant 0 : i32
    %c0_i32_0 = arith.constant 0 : i32
    %c0_i32_1 = arith.constant 0 : i32
    %c0_i32_2 = arith.constant 0 : i32
    return %c0_i32, %c0_i32_0, %c0_i32_1 : i32, i32, i32
  }
  func.func @transform_2(%arg0: i32, %arg1: i32) -> (i32, i32) {
    %c0_i32 = arith.constant 0 : i32
    %c0_i32_0 = arith.constant 0 : i32
    %c0_i32_1 = arith.constant 0 : i32
    return %c0_i32, %c0_i32_0 : i32, i32
  }
  func.func @transform_3(%arg0: i32, %arg1: i32) -> (i32, i32, i32, i32) {
    %c0_i32 = arith.constant 0 : i32
    %c0_i32_0 = arith.constant 0 : i32
    %c0_i32_1 = arith.constant 0 : i32
    return %arg0, %arg1, %c0_i32, %c0_i32_0 : i32, i32, i32, i32
  }
}

</mosaic_0001>

<bundles_post_ra>
// kernel: denoiser_forward.10
= control target key start
LH: loop header
LB: loop body
LE: loop exit
PB: predicated region body
PF: predicated region fallthrough
CT: control target
= control target key end

     0   :  { %s4141_s12 = smov 0   ;;  %s4143_s13 = smov 0   ;;  %s4808_s0 = inlined_call_operand.vmem [shape: f32[2,18,18,8], index: 0, kind: input, shape index: {}]   ;;  %s4809_s1 = inlined_call_operand.vmem [shape: bf16[9,8,128], index: 1, kind: input, shape index: {}]   ;;  %s4810_s2 = inlined_call_operand.vmem [shape: f32[1,128], index: 2, kind: input, shape index: {}]   ;;  %s4811_s3 = inlined_call_operand.vmem [shape: f32[2,16,16,128], index: 3, kind: output, shape index: {}]  }
   0x1   :  { %s4145_s14 = smov 0  }
   0x2 LB: > { %s25_s15 = sadd.s32 1, %s4115_s13  ;;  %p2993_p0 = scmp.ge.s32.totalorder %s4119_s14, 1  ;;  %s4119_s14 = sphi %s4145_s14, %s13_s14   ;;  %s4115_s13 = sphi %s4143_s13, %s4813_s13   ;;  %s4111_s12 = sphi %s4141_s12, %s4812_s12  }
   0x3   : > { %p27_p1 = scmp.ge.s32.totalorder %s25_s15, 2  ;;  %p151_p2 = scmp.lt.s32.totalorder %s4119_s14, 3 }
   0x5   : > { %s4815_s15 = smov (%p27_p1, %s25_s15), 0  ;;  %p152_p3 = pnand %p2993_p0, %p151_p2 }
   0x6   : > { %v2997_v0 = vld [vmem:[%s4809_s1 + $0x4] sm:$0xf] (!%p152_p3)  ;;  %vm348_vm0 = vcmask (!%p152_p3), 1043456   ;;  %v4165_v1 = vld [vmem:[%s4809_s1 + $0x10] sm:$0xf] (!%p152_p3)  ;;  %p180_p4 = scmp.lt.s32.totalorder (!%p152_p3), %s4111_s12, 1 }
   0x7   : > { %155 = sbr.rel (%p152_p3) target bundleno = 525 (0x20d), region = 32  ;;  %4062 = vmatprep.subr.msk.bf16.mxu1 (!%p152_p3), %vm348_vm0, %v2997_v0  ;;  %4066 = vmatprep.subr.msk.bf16.mxu0 (!%p152_p3), %vm348_vm0, %v4165_v1  ;;  %v350_v2 = vsel (!%p152_p3), %vm348_vm0, %v2997_v0, 0  ;;  %v4173_v3 = vsel (!%p152_p3), %vm348_vm0, %v4165_v1, 0  ;;  %v248_v4 = vld [vmem:[%s4809_s1] sm:$0xf] (!%p152_p3)  ;;  %vm299_vm1 = vcmask (!%p152_p3), 64512  }
   0x8   : > { %3499 = vmatpush3.bf16.msra.mxu1 (!%p152_p3), %v350_v2  ;;  %3635 = vmatpush3.bf16.msra.mxu0 (!%p152_p3), %v4173_v3  ;;  %v3177_v5 = vld [vmem:[%s4809_s1 + $0x14] sm:$0xf] (!%p152_p3)  ;;  %v562_v14 = vsel (!%p152_p3), %vm348_vm0, %v248_v4, 0  ;;  %v3226_v20 = vld [vmem:[%s4809_s1 + $0x18] sm:$0xf] (!%p152_p3) }
   0x9   : > { %4063 = vmatprep.subr.msk.bf16.mxu1 (!%p152_p3), %vm348_vm0, %v248_v4  ;;  %4068 = vmatprep.subr.msk.bf16.mxu0 (!%p152_p3), %vm348_vm0, %v3177_v5  ;;  %v1709_v18 = vsel (!%p152_p3), %vm348_vm0, %v3177_v5, 0  ;;  %v4217_v21 = vld [vmem:[%s4809_s1 + $0x8] sm:$0xf] (!%p152_p3)  ;;  %v2006_v52 = vsel (!%p152_p3), %vm348_vm0, %v3226_v20, 0  ;;  %v4296_v53 = vld [vmem:[%s4809_s1 + $0x1c] sm:$0xf] (!%p152_p3) }
   0xe   : > { %s4817_s12 = smov (!%p180_p4, %s4111_s12), 1 }
   0xf   : > { %s4072_s24 = smul.u32 432, %s4817_s12  ;;  %s3344_s17 = sshll.u32 %s4817_s12, 8 }
  0x10   : > { %s4730_s20 = scalar_lea.vmem %s4811_s3, %s3344_s17 }
  0x11   : > { %s4190_s27 = scalar_lea.vmem %s4808_s0, %s4072_s24 }
  0x12   : > { %v249_v6 = vld [vmem:[%s4190_s27 + $0x1] sm:$0xff]  ;;  %v250_v7 = vld [vmem:[%s4190_s27 + $0x9] sm:$0xff]  ;;  %v3096_v8 = vld [vmem:[%s4190_s27 + $0x19] sm:$0xff] }
  0x13   : > { %v281_v9 = vpack.c.bf16 %v250_v7, %v249_v6  ;;  %v3097_v10 = vld [vmem:[%s4190_s27 + $0x21] sm:$0xff]  ;;  %v3098_v11 = vld [vmem:[%s4190_s27 + $0x31] sm:$0xff]  ;;  %v3099_v12 = vld [vmem:[%s4190_s27 + $0x39] sm:$0xff] }
  0x14   : > { %v1348_v13 = vpack.c.bf16 %v3097_v10, %v3096_v8  ;;  %v4199_v15 = vpack.c.bf16 %v3099_v12, %v3098_v11  ;;  %v3100_v16 = vld [vmem:[%s4190_s27 + $0x49] sm:$0xff]  ;;  %v3101_v17 = vld [vmem:[%s4190_s27 + $0x51] sm:$0xff]  ;;  %v3102_v22 = vld [vmem:[%s4190_s27 + $0x61] sm:$0xff] }
  0x15   : > { %3500 = vmatprep.mubr.msk.bf16.mxu1 %vm299_vm1, %v281_v9  ;;  %v4205_v19 = vpack.c.bf16 %v3101_v17, %v3100_v16  ;;  %v3103_v23 = vld [vmem:[%s4190_s27 + $0x69] sm:$0xff]  ;;  %v3104_v24 = vld [vmem:[%s4190_s27 + $0x79] sm:$0xff]  ;;  %v3105_v25 = vld [vmem:[%s4190_s27 + $0x81] sm:$0xff] }
  0x16   : > { %3636 = vmatprep.mubr.msk.bf16.mxu0 %vm299_vm1, %v1348_v13  ;;  %3501 = vmatmul.mubr.msk.bf16.vlgmr.msra.gmra.mrb[0].mxu1 %vm299_vm1, %v1348_v13  ;;  %v4230_v26 = vpack.c.bf16 %v3103_v23, %v3102_v22  ;;  %v4232_v27 = vpack.c.bf16 %v3105_v25, %v3104_v24  ;;  %v3106_v28 = vld [vmem:[%s4190_s27 + $0x91] sm:$0xff]  ;;  %v3107_v29 = vld [vmem:[%s4190_s27 + $0x99] sm:$0xff]  ;;  %v3108_v30 = vld [vmem:[%s4190_s27 + $0xa9] sm:$0xff] }
  0x17   : > { %3533 = vmatpush3.bf16.msra.mxu1 %v562_v14  ;;  %3637 = vmatmul.mubr.msk.bf16.vlgmr.msra.gmra.mrb[0].mxu0 %vm299_vm1, %v4199_v15  ;;  %v3109_v31 = vld [vmem:[%s4190_s27 + $0xb1] sm:$0xff]  ;;  %v4246_v32 = vpack.c.bf16 %v3107_v29, %v3106_v28  ;;  %v3110_v34 = vld [vmem:[%s4190_s27 + $0xc1] sm:$0xff]  ;;  %v3111_v35 = vld [vmem:[%s4190_s27 + $0xc9] sm:$0xff] }
  0x18   : > { %3669 = vmatpush3.bf16.msra.mxu0 %v1709_v18  ;;  %3504 = vmatprep.mubr.msk.bf16.mxu1 %vm299_vm1, %v4199_v15  ;;  %v4248_v33 = vpack.c.bf16 %v3109_v31, %v3108_v30  ;;  %v3145_v36 = vld [vmem:[%s4190_s27 + $0x1a] sm:$0xff]  ;;  %v3146_v37 = vld [vmem:[%s4190_s27 + $0x22] sm:$0xff]  ;;  %v4262_v38 = vpack.c.bf16 %v3111_v35, %v3110_v34  ;;  %v3147_v42 = vld [vmem:[%s4190_s27 + $0x32] sm:$0xff] }
  0x19   : > { %3640 = vmatprep.mubr.msk.bf16.mxu0 %vm299_vm1, %v4205_v19  ;;  %4069 = vmatprep.subr.msk.bf16.mxu0 %vm348_vm0, %v3226_v20  ;;  %v4264_v39 = vpack.c.bf16 %v3146_v37, %v3145_v36  ;;  %v267_v40 = vld [vmem:[%s4190_s27 + $0xd9] sm:$0xff]  ;;  %v268_v41 = vld [vmem:[%s4190_s27 + $0xe1] sm:$0xff]  ;;  %v269_v44 = vld [vmem:[%s4190_s27 + $0xf1] sm:$0xff] }
  0x1a   : > { %4064 = vmatprep.subr.msk.bf16.mxu1 %vm348_vm0, %v4217_v21  ;;  %v3148_v43 = vld [vmem:[%s4190_s27 + $0x3a] sm:$0xff]  ;;  %v3149_v46 = vld [vmem:[%s4190_s27 + $0x4a] sm:$0xff]  ;;  %v3150_v47 = vld [vmem:[%s4190_s27 + $0x52] sm:$0xff]  ;;  %v4282_v48 = vpack.c.bf16 %v268_v41, %v267_v40 }
  0x1b   : > { %v270_v45 = vld [vmem:[%s4190_s27 + $0xf9] sm:$0xff]  ;;  %v4284_v49 = vpack.c.bf16 %v3148_v43, %v3147_v42  ;;  %v4288_v51 = vpack.c.bf16 %v3150_v47, %v3149_v46  ;;  %v271_v54 = vld [vmem:[%s4190_s27 + $0x109] sm:$0xff]  ;;  %v272_v55 = vld [vmem:[%s4190_s27 + $0x111] sm:$0xff]  ;;  %v824_v47 = vsel %vm348_vm0, %v4217_v21, 0 }
  0x1c   : > { %v4286_v50 = vpack.c.bf16 %v270_v45, %v269_v44  ;;  %v3151_v56 = vld [vmem:[%s4190_s27 + $0x62] sm:$0xff]  ;;  %v3152_v57 = vld [vmem:[%s4190_s27 + $0x6a] sm:$0xff]  ;;  %v3153_v60 = vld [vmem:[%s4190_s27 + $0x7a] sm:$0xff]  ;;  %v4314_v62 = vpack.c.bf16 %v272_v55, %v271_v54 }
  0x1d   : > { %v273_v58 = vld [vmem:[%s4190_s27 + $0x121] sm:$0xff]  ;;  %v274_v59 = vld [vmem:[%s4190_s27 + $0x129] sm:$0xff]  ;;  %v4316_v63 = vpack.c.bf16 %v3152_v57, %v3151_v56  ;;  %v275_v4 = vld [vmem:[%s4190_s27 + $0x139] sm:$0xff] }
  0x1e   : > { %3505 = vmatmul.mubr.msk.bf16.gmra.mrb[4].mxu1 %vm299_vm1, %v4205_v19  ;;  %v3154_v61 = vld [vmem:[%s4190_s27 + $0x82] sm:$0xff]  ;;  %v4318_v0 = vpack.c.bf16 %v274_v59, %v273_v58  ;;  %v3155_v6 = vld [vmem:[%s4190_s27 + $0x92] sm:$0xff]  ;;  %v3156_v7 = vld [vmem:[%s4190_s27 + $0x9a] sm:$0xff] }
  0x1f   : > { %3641 = vmatmul.mubr.msk.bf16.gmra.mrb[4].mxu0 %vm299_vm1, %v4230_v26  ;;  %3508 = vmatprep.mubr.msk.bf16.mxu1 %vm299_vm1, %v4230_v26  ;;  %v4320_v2 = vpack.c.bf16 %v3154_v61, %v3153_v60  ;;  %v276_v5 = vld [vmem:[%s4190_s27 + $0x141] sm:$0xff]  ;;  %v277_v8 = vld [vmem:[%s4190_s27 + $0x151] sm:$0xff]  ;;  %v278_v9 = vld [vmem:[%s4190_s27 + $0x159] sm:$0xff]  ;;  %v4340_v13 = vpack.c.bf16 %v3156_v7, %v3155_v6 }
  0x20   : > { %3644 = vmatprep.mubr.msk.bf16.mxu0 %vm299_vm1, %v4232_v27  ;;  %v3157_v10 = vld [vmem:[%s4190_s27 + $0xaa] sm:$0xff]  ;;  %v3158_v11 = vld [vmem:[%s4190_s27 + $0xb2] sm:$0xff]  ;;  %v4338_v12 = vpack.c.bf16 %v276_v5, %v275_v4  ;;  %v4342_v14 = vpack.c.bf16 %v278_v9, %v277_v8  ;;  %v3159_v20 = vld [vmem:[%s4190_s27 + $0xc2] sm:$0xff] }
  0x21   : > { %v4344_v16 = vpack.c.bf16 %v3158_v11, %v3157_v10  ;;  %v279_v17 = vld [vmem:[%s4190_s27 + $0x169] sm:$0xff]  ;;  %v280_v18 = vld [vmem:[%s4190_s27 + $0x171] sm:$0xff]  ;;  %v200_v23 = vld [vmem:[%s4190_s27] sm:$0xff] }
  0x22   : > { %v3160_v22 = vld [vmem:[%s4190_s27 + $0xca] sm:$0xff]  ;;  %v3161_v25 = vld [vmem:[%s4190_s27 + $0xda] sm:$0xff]  ;;  %v3162_v28 = vld [vmem:[%s4190_s27 + $0xe2] sm:$0xff]  ;;  %v4362_v29 = vpack.c.bf16 %v280_v18, %v279_v17 }
  0x23   : > { %v201_v24 = vld [vmem:[%s4190_s27 + $0x8] sm:$0xff]  ;;  %v4364_v30 = vpack.c.bf16 %v3160_v22, %v3159_v20  ;;  %v4366_v34 = vpack.c.bf16 %v3162_v28, %v3161_v25  ;;  %v202_v35 = vld [vmem:[%s4190_s27 + $0x18] sm:$0xff]  ;;  %v203_v36 = vld [vmem:[%s4190_s27 + $0x20] sm:$0xff] }
  0x24   : > { %v232_v31 = vpack.c.bf16 %v201_v24, %v200_v23  ;;  %v3163_v37 = vld [vmem:[%s4190_s27 + $0xf2] sm:$0xff]  ;;  %v3164_v40 = vld [vmem:[%s4190_s27 + $0xfa] sm:$0xff]  ;;  %v3165_v43 = vld [vmem:[%s4190_s27 + $0x10a] sm:$0xff]  ;;  %v4383_v45 = vpack.c.bf16 %v203_v36, %v202_v35 }
  0x25   : > { %v204_v41 = vld [vmem:[%s4190_s27 + $0x30] sm:$0xff]  ;;  %v205_v42 = vld [vmem:[%s4190_s27 + $0x38] sm:$0xff]  ;;  %v4385_v46 = vpack.c.bf16 %v3164_v40, %v3163_v37  ;;  %v4398_v55 = vld [vmem:[%s4809_s1 + $0xc] sm:$0xf] }
  0x26   : > { %3509 = vmatmul.mubr.msk.bf16.gmra.mrb[8].mxu1 %vm299_vm1, %v4232_v27  ;;  %v3166_v44 = vld [vmem:[%s4190_s27 + $0x112] sm:$0xff]  ;;  %v206_v56 = vld [vmem:[%s4190_s27 + $0x48] sm:$0xff]  ;;  %v208_v59 = vld [vmem:[%s4190_s27 + $0x60] sm:$0xff] }
  0x27   : > { %3645 = vmatmul.mubr.msk.bf16.gmra.mrb[8].mxu0 %vm299_vm1, %v4246_v32  ;;  %3512 = vmatprep.mubr.msk.bf16.mxu1 %vm299_vm1, %v4246_v32  ;;  %v4391_v54 = vpack.c.bf16 %v3166_v44, %v3165_v43  ;;  %v207_v57 = vld [vmem:[%s4190_s27 + $0x50] sm:$0xff]  ;;  %v3167_v21 = vld [vmem:[%s4190_s27 + $0x122] sm:$0xff]  ;;  %v3169_v61 = vld [vmem:[%s4190_s27 + $0x13a] sm:$0xff] }
  0x28   : > { %3648 = vmatprep.mubr.msk.bf16.mxu0 %vm299_vm1, %v4248_v33  ;;  %v3168_v58 = vld [vmem:[%s4190_s27 + $0x12a] sm:$0xff]  ;;  %v3170_v4 = vld [vmem:[%s4190_s27 + $0x142] sm:$0xff]  ;;  %v4416_v5 = vpack.c.bf16 %v207_v57, %v206_v56  ;;  %v210_v9 = vld [vmem:[%s4190_s27 + $0x78] sm:$0xff] }
  0x29   : > { %v209_v60 = vld [vmem:[%s4190_s27 + $0x68] sm:$0xff]  ;;  %v4418_v6 = vpack.c.bf16 %v3168_v58, %v3167_v21  ;;  %v4422_v8 = vpack.c.bf16 %v3170_v4, %v3169_v61  ;;  %v211_v10 = vld [vmem:[%s4190_s27 + $0x80] sm:$0xff]  ;;  %v3171_v11 = vld [vmem:[%s4190_s27 + $0x152] sm:$0xff]  ;;  %v2300_v61 = vsel %vm348_vm0, %v4296_v53, 0 }
  0x2a   : > { %v4420_v7 = vpack.c.bf16 %v209_v60, %v208_v59  ;;  %v3172_v17 = vld [vmem:[%s4190_s27 + $0x15a] sm:$0xff]  ;;  %v212_v18 = vld [vmem:[%s4190_s27 + $0x90] sm:$0xff]  ;;  %v4440_v24 = vpack.c.bf16 %v211_v10, %v210_v9  ;;  %v214_v35 = vld [vmem:[%s4190_s27 + $0xa8] sm:$0xff] }
  0x2b   : > { %v213_v20 = vld [vmem:[%s4190_s27 + $0x98] sm:$0xff]  ;;  %v3173_v22 = vld [vmem:[%s4190_s27 + $0x16a] sm:$0xff]  ;;  %v4442_v25 = vpack.c.bf16 %v3172_v17, %v3171_v11  ;;  %v3175_v37 = vld [vmem:[%s4190_s27 + $0x182] sm:$0xff] }
  0x2c   : > { %v3174_v23 = vld [vmem:[%s4190_s27 + $0x172] sm:$0xff]  ;;  %v4444_v28 = vpack.c.bf16 %v213_v20, %v212_v18  ;;  %v3176_v40 = vld [vmem:[%s4190_s27 + $0x18a] sm:$0xff]  ;;  %v219_v57 = vld [vmem:[%s4190_s27 + $0xe0] sm:$0xff] }
  0x2d   : > { %v215_v36 = vld [vmem:[%s4190_s27 + $0xb0] sm:$0xff]  ;;  %v4464_v44 = vpack.c.bf16 %v3176_v40, %v3175_v37  ;;  %v218_v56 = vld [vmem:[%s4190_s27 + $0xd8] sm:$0xff]  ;;  %v3324_v4 = vld [vmem:[%s4809_s1 + $0x20] sm:$0xf] }
  0x2e   : > { %3513 = vmatmul.mubr.msk.bf16.gmra.mrb[12].mxu1 %vm299_vm1, %v4248_v33  ;;  %v4462_v43 = vpack.c.bf16 %v215_v36, %v214_v35  ;;  %v220_v21 = vld [vmem:[%s4190_s27 + $0xf0] sm:$0xff]  ;;  %v221_v58 = vld [vmem:[%s4190_s27 + $0xf8] sm:$0xff]  ;;  %v4480_v59 = vpack.c.bf16 %v219_v57, %v218_v56  ;;  %v222_v9 = vld [vmem:[%s4190_s27 + $0x108] sm:$0xff] }
  0x2f   : > { %3649 = vmatmul.mubr.msk.bf16.gmra.mrb[12].mxu0 %vm299_vm1, %v4262_v38  ;;  %3516 = vmatprep.mubr.msk.bf16.mxu1 %vm299_vm1, %v4262_v38  ;;  %v4482_v60 = vpack.c.bf16 %v221_v58, %v220_v21  ;;  %v223_v10 = vld [vmem:[%s4190_s27 + $0x110] sm:$0xff]  ;;  %v225_v11 = vld [vmem:[%s4190_s27 + $0x128] sm:$0xff]  ;;  %v226_v20 = vld [vmem:[%s4190_s27 + $0x138] sm:$0xff]  ;;  %v1121_v58 = vsel %vm348_vm0, %v4398_v55, 0 }
  0x30   : > { %3670 = vmatprep.mubr.msk.bf16.mxu0 %vm299_vm1, %v4264_v39  ;;  %v4502_v17 = vpack.c.bf16 %v223_v10, %v222_v9  ;;  %v229_v35 = vld [vmem:[%s4190_s27 + $0x158] sm:$0xff]  ;;  %v230_v40 = vld [vmem:[%s4190_s27 + $0x168] sm:$0xff]  ;;  %v3225_v9 = vld [vmem:[%s4190_s27 + $0x1a0] sm:$0xff] }
  0x31   : > { %v726_v56 = vld [vmem:[%s4190_s27 + $0xa] sm:$0xff] }
  0x36   : > { %3517 = vmatmul.mubr.msk.bf16.gmra.mrb[16].mxu1 %vm299_vm1, %v4282_v48 }
  0x37   : > { %3671 = vmatmul.mubr.msk.bf16.vlgmr.msra.gmra.mrb[0].mxu0 %vm299_vm1, %v4284_v49  ;;  %3520 = vmatprep.mubr.msk.bf16.mxu1 %vm299_vm1, %v4286_v50 }
  0x38   : > { %3703 = vmatpush3.bf16.msra.mxu0 %v2006_v52  ;;  %3674 = vmatprep.mubr.msk.bf16.mxu0 %vm299_vm1, %v4288_v51  ;;  %v4389_v52 = vpack.c.bf16 %v205_v42, %v204_v41  ;;  %v216_v41 = vld [vmem:[%s4190_s27 + $0xc0] sm:$0xff]  ;;  %v217_v42 = vld [vmem:[%s4190_s27 + $0xc8] sm:$0xff] }
  0x39   : > { %4070 = vmatprep.subr.msk.bf16.mxu0 %vm348_vm0, %v4296_v53  ;;  %v224_v53 = vld [vmem:[%s4190_s27 + $0x120] sm:$0xff] }
  0x3a   : > { %v4504_v18 = vpack.c.bf16 %v225_v11, %v224_v53  ;;  %v2594_v53 = vsel %vm348_vm0, %v3324_v4, 0 }
  0x3e   : > { %3521 = vmatmul.mubr.msk.bf16.gmra.mrb[20].mxu1 %vm299_vm1, %v4314_v62 }
  0x3f   : > { %3675 = vmatmul.mubr.msk.bf16.gmra.mrb[4].mxu0 %vm299_vm1, %v4316_v63  ;;  %3524 = vmatprep.mubr.msk.bf16.mxu1 %vm299_vm1, %v4318_v0 }
  0x40   : > { %3678 = vmatprep.mubr.msk.bf16.mxu0 %vm299_vm1, %v4320_v2 }
  0x46   : > { %3525 = vmatmul.mubr.msk.bf16.gmra.mrb[24].mxu1 %vm299_vm1, %v4338_v12 }
  0x47   : > { %3679 = vmatmul.mubr.msk.bf16.gmra.mrb[8].mxu0 %vm299_vm1, %v4340_v13  ;;  %3528 = vmatprep.mubr.msk.bf16.mxu1 %vm299_vm1, %v4342_v14 }
  0x48   : > { %3682 = vmatprep.mubr.msk.bf16.mxu0 %vm299_vm1, %v4344_v16 }
  0x4e   : > { %3529 = vmatmul.mubr.msk.bf16.gmra.mrb[28].mxu1 %vm299_vm1, %v4362_v29 }
  0x4f   : > { %3683 = vmatmul.mubr.msk.bf16.gmra.mrb[12].mxu0 %vm299_vm1, %v4364_v30  ;;  %3534 = vmatprep.mubr.msk.bf16.mxu1 %vm299_vm1, %v232_v31  ;;  %v4446_v31 = vpack.c.bf16 %v3174_v23, %v3173_v22  ;;  %v227_v22 = vld [vmem:[%s4190_s27 + $0x140] sm:$0xff]  ;;  %v228_v23 = vld [vmem:[%s4190_s27 + $0x150] sm:$0xff] }
  0x50   : > { %3686 = vmatprep.mubr.msk.bf16.mxu0 %vm299_vm1, %v4366_v34  ;;  %v4518_v36 = vpack.c.bf16 %v227_v22, %v226_v20  ;;  %v4520_v37 = vpack.c.bf16 %v229_v35, %v228_v23 }
  0x56   : > { %3535 = vmatmul.mubr.msk.bf16.vlgmr.msra.gmra.mrb[0].mxu1 %vm299_vm1, %v4383_v45 }
  0x57   : > { %3567 = vmatpush3.bf16.msra.mxu1 %v824_v47  ;;  %3687 = vmatmul.mubr.msk.bf16.gmra.mrb[16].mxu0 %vm299_vm1, %v4385_v46  ;;  %v4466_v47 = vpack.c.bf16 %v217_v42, %v216_v41  ;;  %v231_v41 = vld [vmem:[%s4190_s27 + $0x170] sm:$0xff]  ;;  %v725_v42 = vld [vmem:[%s4190_s27 + $0x2] sm:$0xff] }
  0x58   : > { %3538 = vmatprep.mubr.msk.bf16.mxu1 %vm299_vm1, %v4389_v52  ;;  %3690 = vmatprep.mubr.msk.bf16.mxu0 %vm299_vm1, %v4391_v54  ;;  %v4534_v57 = vpack.c.bf16 %v231_v41, %v230_v40  ;;  %v757_v21 = vpack.c.bf16 %v726_v56, %v725_v42 }
  0x59   : > { %4065 = vmatprep.subr.msk.bf16.mxu1 %vm348_vm0, %v4398_v55  ;;  %v3223_v55 = vld [vmem:[%s4190_s27 + $0x188] sm:$0xff] }
  0x5e   : > { %3539 = vmatmul.mubr.msk.bf16.gmra.mrb[4].mxu1 %vm299_vm1, %v4416_v5 }
  0x5f   : > { %3691 = vmatmul.mubr.msk.bf16.gmra.mrb[20].mxu0 %vm299_vm1, %v4418_v6  ;;  %3542 = vmatprep.mubr.msk.bf16.mxu1 %vm299_vm1, %v4420_v7 }
  0x60   : > { %3694 = vmatprep.mubr.msk.bf16.mxu0 %vm299_vm1, %v4422_v8 }
  0x66   : > { %3543 = vmatmul.mubr.msk.bf16.gmra.mrb[8].mxu1 %vm299_vm1, %v4440_v24 }
  0x67   : > { %3695 = vmatmul.mubr.msk.bf16.gmra.mrb[24].mxu0 %vm299_vm1, %v4442_v25  ;;  %3546 = vmatprep.mubr.msk.bf16.mxu1 %vm299_vm1, %v4444_v28 }
  0x68   : > { %3698 = vmatprep.mubr.msk.bf16.mxu0 %vm299_vm1, %v4446_v31 }
  0x6e   : > { %3547 = vmatmul.mubr.msk.bf16.gmra.mrb[12].mxu1 %vm299_vm1, %v4462_v43 }
  0x6f   : > { %3699 = vmatmul.mubr.msk.bf16.gmra.mrb[28].mxu0 %vm299_vm1, %v4464_v44  ;;  %3550 = vmatprep.mubr.msk.bf16.mxu1 %vm299_vm1, %v4466_v47 }
  0x70   : > { %3704 = vmatprep.mubr.msk.bf16.mxu0 %vm299_vm1, %v4389_v52 }
  0x76   : > { %3551 = vmatmul.mubr.msk.bf16.gmra.mrb[16].mxu1 %vm299_vm1, %v4480_v59 }
  0x77   : > { %3705 = vmatmul.mubr.msk.bf16.vlgmr.msra.gmra.mrb[0].mxu0 %vm299_vm1, %v4416_v5  ;;  %3554 = vmatprep.mubr.msk.bf16.mxu1 %vm299_vm1, %v4482_v60 }
  0x78   : > { %3737 = vmatpush3.bf16.msra.mxu0 %v2300_v61  ;;  %3708 = vmatprep.mubr.msk.bf16.mxu0 %vm299_vm1, %v4420_v7 }
  0x79   : > { %4071 = vmatprep.subr.msk.bf16.mxu0 %vm348_vm0, %v3324_v4 }
  0x7e   : > { %3555 = vmatmul.mubr.msk.bf16.gmra.mrb[20].mxu1 %vm299_vm1, %v4502_v17 }
  0x7f   : > { %3709 = vmatmul.mubr.msk.bf16.gmra.mrb[4].mxu0 %vm299_vm1, %v4440_v24  ;;  %3558 = vmatprep.mubr.msk.bf16.mxu1 %vm299_vm1, %v4504_v18 }
  0x80   : > { %3712 = vmatprep.mubr.msk.bf16.mxu0 %vm299_vm1, %v4444_v28 }
  0x86   : > { %3559 = vmatmul.mubr.msk.bf16.gmra.mrb[24].mxu1 %vm299_vm1, %v4518_v36 }
  0x87   : > { %3713 = vmatmul.mubr.msk.bf16.gmra.mrb[8].mxu0 %vm299_vm1, %v4462_v43  ;;  %3562 = vmatprep.mubr.msk.bf16.mxu1 %vm299_vm1, %v4520_v37 }
  0x88   : > { %3716 = vmatprep.mubr.msk.bf16.mxu0 %vm299_vm1, %v4466_v47 }
  0x8e   : > { %3563 = vmatmul.mubr.msk.bf16.gmra.mrb[28].mxu1 %vm299_vm1, %v4534_v57 }
  0x8f   : > { %3717 = vmatmul.mubr.msk.bf16.gmra.mrb[12].mxu0 %vm299_vm1, %v4480_v59  ;;  %3568 = vmatprep.mubr.msk.bf16.mxu1 %vm299_vm1, %v757_v21 }
  0x90   : > { %3720 = vmatprep.mubr.msk.bf16.mxu0 %vm299_vm1, %v4482_v60 }
  0x96   : > { %3569 = vmatmul.mubr.msk.bf16.vlgmr.msra.gmra.mrb[0].mxu1 %vm299_vm1, %v4264_v39  ;;  %v3222_v39 = vld [vmem:[%s4190_s27 + $0x180] sm:$0xff] }
  0x97   : > { %3601 = vmatpush3.bf16.msra.mxu1 %v1121_v58  ;;  %3721 = vmatmul.mubr.msk.bf16.gmra.mrb[16].mxu0 %vm299_vm1, %v4502_v17  ;;  %v4565_v61 = vpack.c.bf16 %v3223_v55, %v3222_v39 }
  0x98   : > { %3572 = vmatprep.mubr.msk.bf16.mxu1 %vm299_vm1, %v4284_v49  ;;  %3724 = vmatprep.mubr.msk.bf16.mxu0 %vm299_vm1, %v4504_v18 }
  0x99   : > { %4067 = vmatprep.subr.msk.bf16.mxu1 %vm348_vm0, %v4165_v1  ;;  %v3224_v1 = vld [vmem:[%s4190_s27 + $0x198] sm:$0xff] }
  0x9a   : > { %v1954_v10 = vpack.c.bf16 %v3225_v9, %v3224_v1 }
  0x9e   : > { %3573 = vmatmul.mubr.msk.bf16.gmra.mrb[4].mxu1 %vm299_vm1, %v4288_v51 }
  0x9f   : > { %3725 = vmatmul.mubr.msk.bf16.gmra.mrb[20].mxu0 %vm299_vm1, %v4518_v36  ;;  %3576 = vmatprep.mubr.msk.bf16.mxu1 %vm299_vm1, %v4316_v63 }
  0xa0   : > { %3728 = vmatprep.mubr.msk.bf16.mxu0 %vm299_vm1, %v4520_v37 }
  0xa6   : > { %3577 = vmatmul.mubr.msk.bf16.gmra.mrb[8].mxu1 %vm299_vm1, %v4320_v2 }
  0xa7   : > { %3729 = vmatmul.mubr.msk.bf16.gmra.mrb[24].mxu0 %vm299_vm1, %v4534_v57  ;;  %3580 = vmatprep.mubr.msk.bf16.mxu1 %vm299_vm1, %v4340_v13 }
  0xa8   : > { %3732 = vmatprep.mubr.msk.bf16.mxu0 %vm299_vm1, %v4565_v61 }
  0xae   : > { %3581 = vmatmul.mubr.msk.bf16.gmra.mrb[12].mxu1 %vm299_vm1, %v4344_v16 }
  0xaf   : > { %3733 = vmatmul.mubr.msk.bf16.gmra.mrb[28].mxu0 %vm299_vm1, %v1954_v10  ;;  %3584 = vmatprep.mubr.msk.bf16.mxu1 %vm299_vm1, %v4364_v30 }
  0xb0   : > { %3738 = vmatprep.mubr.msk.bf16.mxu0 %vm299_vm1, %v4199_v15  ;;  %v3272_v15 = vld [vmem:[%s4190_s27 + $0x189] sm:$0xff] }
  0xb6   : > { %3585 = vmatmul.mubr.msk.bf16.gmra.mrb[16].mxu1 %vm299_vm1, %v4366_v34 }
  0xb7   : > { %3739 = vmatmul.mubr.msk.bf16.vlgmr.msra.gmra.mrb[0].mxu0 %vm299_vm1, %v4205_v19  ;;  %3588 = vmatprep.mubr.msk.bf16.mxu1 %vm299_vm1, %v4385_v46 }
  0xb8   : > { %3771 = vmatpush3.bf16.msra.mxu0 %v2594_v53  ;;  %3742 = vmatprep.mubr.msk.bf16.mxu0 %vm299_vm1, %v4230_v26  ;;  %v3273_v26 = vld [vmem:[%s4190_s27 + $0x199] sm:$0xff] }
  0xbe   : > { %3589 = vmatmul.mubr.msk.bf16.gmra.mrb[20].mxu1 %vm299_vm1, %v4391_v54 }
  0xbf   : > { %3743 = vmatmul.mubr.msk.bf16.gmra.mrb[4].mxu0 %vm299_vm1, %v4232_v27  ;;  %3592 = vmatprep.mubr.msk.bf16.mxu1 %vm299_vm1, %v4418_v6  ;;  %v3274_v27 = vld [vmem:[%s4190_s27 + $0x1a1] sm:$0xff] }
  0xc0   : > { %3746 = vmatprep.mubr.msk.bf16.mxu0 %vm299_vm1, %v4246_v32  ;;  %v2248_v32 = vpack.c.bf16 %v3274_v27, %v3273_v26 }
  0xc6   : > { %3593 = vmatmul.mubr.msk.bf16.gmra.mrb[24].mxu1 %vm299_vm1, %v4422_v8 }
  0xc7   : > { %3747 = vmatmul.mubr.msk.bf16.gmra.mrb[8].mxu0 %vm299_vm1, %v4248_v33  ;;  %3596 = vmatprep.mubr.msk.bf16.mxu1 %vm299_vm1, %v4442_v25  ;;  %v3322_v33 = vld [vmem:[%s4190_s27 + $0x19a] sm:$0xff] }
  0xc8   : > { %3750 = vmatprep.mubr.msk.bf16.mxu0 %vm299_vm1, %v4262_v38  ;;  %v3323_v38 = vld [vmem:[%s4190_s27 + $0x1a2] sm:$0xff] }
  0xce   : > { %3597 = vmatmul.mubr.msk.bf16.gmra.mrb[28].mxu1 %vm299_vm1, %v4446_v31 }
  0xcf   : > { %3751 = vmatmul.mubr.msk.bf16.gmra.mrb[12].mxu0 %vm299_vm1, %v4282_v48  ;;  %3602 = vmatprep.mubr.msk.bf16.mxu1 %vm299_vm1, %v4383_v45 }
  0xd0   : > { %3754 = vmatprep.mubr.msk.bf16.mxu0 %vm299_vm1, %v4286_v50 }
  0xd6   : > { %3603 = vmatmul.mubr.msk.bf16.vlgmr.msra.gmra.mrb[0].mxu1 %vm299_vm1, %v4389_v52 }
  0xd7   : > { %3805 = vmatpush3.bf16.msra.mxu1 %v4173_v3  ;;  %3755 = vmatmul.mubr.msk.bf16.gmra.mrb[16].mxu0 %vm299_vm1, %v4314_v62  ;;  %v3271_v3 = vld [vmem:[%s4190_s27 + $0x181] sm:$0xff] }
  0xd8   : > { %3606 = vmatprep.mubr.msk.bf16.mxu1 %vm299_vm1, %v4416_v5  ;;  %3758 = vmatprep.mubr.msk.bf16.mxu0 %vm299_vm1, %v4318_v0  ;;  %v2247_v19 = vpack.c.bf16 %v3272_v15, %v3271_v3 }
  0xde   : > { %3607 = vmatmul.mubr.msk.bf16.gmra.mrb[4].mxu1 %vm299_vm1, %v4420_v7 }
  0xdf   : > { %3759 = vmatmul.mubr.msk.bf16.gmra.mrb[20].mxu0 %vm299_vm1, %v4338_v12  ;;  %3610 = vmatprep.mubr.msk.bf16.mxu1 %vm299_vm1, %v4440_v24 }
  0xe0   : > { %3762 = vmatprep.mubr.msk.bf16.mxu0 %vm299_vm1, %v4342_v14 }
  0xe6   : > { %3611 = vmatmul.mubr.msk.bf16.gmra.mrb[8].mxu1 %vm299_vm1, %v4444_v28 }
  0xe7   : > { %3763 = vmatmul.mubr.msk.bf16.gmra.mrb[24].mxu0 %vm299_vm1, %v4362_v29  ;;  %3614 = vmatprep.mubr.msk.bf16.mxu1 %vm299_vm1, %v4462_v43 }
  0xe8   : > { %3766 = vmatprep.mubr.msk.bf16.mxu0 %vm299_vm1, %v2247_v19 }
  0xee   : > { %3615 = vmatmul.mubr.msk.bf16.gmra.mrb[12].mxu1 %vm299_vm1, %v4466_v47 }
  0xef   : > { %3767 = vmatmul.mubr.msk.bf16.gmra.mrb[28].mxu0 %vm299_vm1, %v2248_v32  ;;  %3618 = vmatprep.mubr.msk.bf16.mxu1 %vm299_vm1, %v4480_v59 }
  0xf0   : > { %3772 = vmatprep.mubr.msk.bf16.mxu0 %vm299_vm1, %v4284_v49 }
  0xf6   : > { %3619 = vmatmul.mubr.msk.bf16.gmra.mrb[16].mxu1 %vm299_vm1, %v4482_v60 }
  0xf7   : > { %3773 = vmatmul.mubr.msk.bf16.vlgmr.msra.gmra.mrb[0].mxu0 %vm299_vm1, %v4288_v51  ;;  %3622 = vmatprep.mubr.msk.bf16.mxu1 %vm299_vm1, %v4502_v17 }
  0xf8   : > { %3776 = vmatprep.mubr.msk.bf16.mxu0 %vm299_vm1, %v4316_v63 }
  0xfe   : > { %3623 = vmatmul.mubr.msk.bf16.gmra.mrb[20].mxu1 %vm299_vm1, %v4504_v18 }
  0xff   : > { %3777 = vmatmul.mubr.msk.bf16.gmra.mrb[4].mxu0 %vm299_vm1, %v4320_v2  ;;  %3626 = vmatprep.mubr.msk.bf16.mxu1 %vm299_vm1, %v4518_v36 }
 0x100   : > { %3780 = vmatprep.mubr.msk.bf16.mxu0 %vm299_vm1, %v4340_v13 }
 0x106   : > { %3627 = vmatmul.mubr.msk.bf16.gmra.mrb[24].mxu1 %vm299_vm1, %v4520_v37 }
 0x107   : > { %3781 = vmatmul.mubr.msk.bf16.gmra.mrb[8].mxu0 %vm299_vm1, %v4344_v16  ;;  %3630 = vmatprep.mubr.msk.bf16.mxu1 %vm299_vm1, %v4534_v57 }
 0x108   : > { %3784 = vmatprep.mubr.msk.bf16.mxu0 %vm299_vm1, %v4364_v30 }
 0x10e   : > { %3631 = vmatmul.mubr.msk.bf16.gmra.mrb[28].mxu1 %vm299_vm1, %v4565_v61 }
 0x10f   : > { %3785 = vmatmul.mubr.msk.bf16.gmra.mrb[12].mxu0 %vm299_vm1, %v4366_v34  ;;  %3652 = vmatprep.mubr.msk.bf16.mxu1 %vm299_vm1, %v4282_v48  ;;  %v2542_v48 = vpack.c.bf16 %v3323_v38, %v3322_v33 }
 0x110   : > { %3788 = vmatprep.mubr.msk.bf16.mxu0 %vm299_vm1, %v4385_v46 }
 0x116   : > { %3653 = vmatmul.mubr.msk.bf16.vlgmr.msra.gmra.mrb[16].mxu1 %vm299_vm1, %v4286_v50 }
 0x117   : > { %3789 = vmatmul.mubr.msk.bf16.gmra.mrb[16].mxu0 %vm299_vm1, %v4391_v54  ;;  %3656 = vmatprep.mubr.msk.bf16.mxu1 %vm299_vm1, %v4314_v62  ;;  %v4723_v54 = vld [vmem:[%s4810_s2] ss:$0 sm:$0xff] }
 0x118   : > { %3792 = vmatprep.mubr.msk.bf16.mxu0 %vm299_vm1, %v4418_v6 }
 0x11e   : > { %3657 = vmatmul.mubr.msk.bf16.gmra.mrb[20].mxu1 %vm299_vm1, %v4318_v0 }
 0x11f   : > { %3793 = vmatmul.mubr.msk.bf16.gmra.mrb[20].mxu0 %vm299_vm1, %v4422_v8  ;;  %3660 = vmatprep.mubr.msk.bf16.mxu1 %vm299_vm1, %v4338_v12 }
 0x120   : > { %3796 = vmatprep.mubr.msk.bf16.mxu0 %vm299_vm1, %v4442_v25 }
 0x126   : > { %3661 = vmatmul.mubr.msk.bf16.gmra.mrb[24].mxu1 %vm299_vm1, %v4342_v14 }
 0x127   : > { %3797 = vmatmul.mubr.msk.bf16.gmra.mrb[24].mxu0 %vm299_vm1, %v4446_v31  ;;  %3664 = vmatprep.mubr.msk.bf16.mxu1 %vm299_vm1, %v4362_v29 }
 0x128   : > { %3800 = vmatprep.mubr.msk.bf16.mxu0 %vm299_vm1, %v4464_v44 }
 0x12e   : > { %3665 = vmatmul.mubr.msk.bf16.gmra.mrb[28].mxu1 %vm299_vm1, %v2247_v19 }
 0x12f   : > { %3801 = vmatmul.mubr.msk.bf16.gmra.mrb[28].mxu0 %vm299_vm1, %v2542_v48 }
 0x1a9   : > { %v3604_v49 = vpop.f32.mrb[0].mxu1 }
 0x1aa   : > { %v1157_v50 = vpop.f32.mrb[1].mxu1 }
 0x1ab   : > { %v3605_v51 = vpop.f32.mrb[2].mxu1 }
 0x1ac   : > { %v1160_v62 = vpop.f32.mrb[3].mxu1 }
 0x1b1   : > { %v3608_v63 = vpop.f32.mrb[4].mxu1 }
 0x1b2   : > { %v1173_v0 = vpop.f32.mrb[5].mxu1 }
 0x1b3   : > { %v3609_v2 = vpop.f32.mrb[6].mxu1 }
 0x1b4   : > { %v1176_v12 = vpop.f32.mrb[7].mxu1 }
 0x1b9   : > { %v3612_v13 = vpop.f32.mrb[8].mxu1 }
 0x1ba   : > { %v1189_v14 = vpop.f32.mrb[9].mxu1 }
 0x1bb   : > { %v3613_v16 = vpop.f32.mrb[10].mxu1 }
 0x1bc   : > { %v1192_v29 = vpop.f32.mrb[11].mxu1 }
 0x1c1   : > { %v4712_v30 = vpop.f32.mrb[12].mxu1 }
 0x1c2   : > { %v4714_v34 = vpop.f32.mrb[13].mxu1 }
 0x1c3   : > { %v4716_v45 = vpop.f32.mrb[14].mxu1 }
 0x1c4   : > { %v4718_v46 = vpop.f32.mrb[15].mxu1 }
 0x1ca   : > { %v3774_v52 = vpop.f32.mrb[0].mxu0 }
 0x1cb   : > { %v3806_v5 = vadd.f32 %v3774_v52, %v3604_v49  ;;  %v2630_v6 = vpop.f32.mrb[1].mxu0 }
 0x1cc   : > { %v3807_v7 = vadd.f32 %v2630_v6, %v1157_v50  ;;  %v3775_v8 = vpop.f32.mrb[2].mxu0 }
 0x1cd   : > { %v2798_v24 = vadd.f32 %v3806_v5, %v4723_v54  ;;  %v3808_v25 = vadd.f32 %v3775_v8, %v3605_v51  ;;  %v2633_v28 = vpop.f32.mrb[3].mxu0 }
 0x1ce   : > { %v2796_v31 = vadd.f32 %v3807_v7, %v4723_v54  ;;  %v3809_v43 = vadd.f32 %v2633_v28, %v1160_v62 }
 0x1cf   : > { %v2830_v44 = vmax.f32 %v2798_v24, 0.0  ;;  %v2799_v47 = vadd.f32 %v3808_v25, %v4723_v54 }
 0x1d0   : > { %v2828_v59 = vmax.f32 %v2796_v31, 0.0  ;;  %v2797_v60 = vadd.f32 %v3809_v43, %v4723_v54 }
 0x1d1   : > { %2862 = vst [vmem:[%s4730_s20 + $0x10] sm:$0xff] %v2830_v44  ;;  %v2831_v4 = vmax.f32 %v2799_v47, 0.0 }
 0x1d2   : > { %2860 = vst [vmem:[%s4730_s20] sm:$0xff] %v2828_v59  ;;  %v2829_v11 = vmax.f32 %v2797_v60, 0.0  ;;  %v3778_v17 = vpop.f32.mrb[4].mxu0 }
 0x1d3   : > { %2863 = vst [vmem:[%s4730_s20 + $0x18] sm:$0xff] %v2831_v4  ;;  %v3810_v18 = vadd.f32 %v3778_v17, %v3608_v63  ;;  %v2646_v20 = vpop.f32.mrb[5].mxu0 }
 0x1d4   : > { %2861 = vst [vmem:[%s4730_s20 + $0x8] sm:$0xff] %v2829_v11  ;;  %v3811_v22 = vadd.f32 %v2646_v20, %v1173_v0  ;;  %v3779_v23 = vpop.f32.mrb[6].mxu0 }
 0x1d5   : > { %v2802_v35 = vadd.f32 %v3810_v18, %v4723_v54  ;;  %v3812_v36 = vadd.f32 %v3779_v23, %v3609_v2  ;;  %v2649_v37 = vpop.f32.mrb[7].mxu0 }
 0x1d6   : > { %v2800_v40 = vadd.f32 %v3811_v22, %v4723_v54  ;;  %v3813_v41 = vadd.f32 %v2649_v37, %v1176_v12 }
 0x1d7   : > { %v2834_v42 = vmax.f32 %v2802_v35, 0.0  ;;  %v2803_v56 = vadd.f32 %v3812_v36, %v4723_v54 }
 0x1d8   : > { %v2832_v57 = vmax.f32 %v2800_v40, 0.0  ;;  %v2801_v21 = vadd.f32 %v3813_v41, %v4723_v54 }
 0x1d9   : > { %2866 = vst [vmem:[%s4730_s20 + $0x30] sm:$0xff] %v2834_v42  ;;  %v2835_v58 = vmax.f32 %v2803_v56, 0.0 }
 0x1da   : > { %2864 = vst [vmem:[%s4730_s20 + $0x20] sm:$0xff] %v2832_v57  ;;  %v2833_v39 = vmax.f32 %v2801_v21, 0.0  ;;  %v3782_v55 = vpop.f32.mrb[8].mxu0 }
 0x1db   : > { %2867 = vst [vmem:[%s4730_s20 + $0x38] sm:$0xff] %v2835_v58  ;;  %v3814_v61 = vadd.f32 %v3782_v55, %v3612_v13  ;;  %v2662_v1 = vpop.f32.mrb[9].mxu0 }
 0x1dc   : > { %2865 = vst [vmem:[%s4730_s20 + $0x28] sm:$0xff] %v2833_v39  ;;  %v3815_v9 = vadd.f32 %v2662_v1, %v1189_v14  ;;  %v3783_v10 = vpop.f32.mrb[10].mxu0 }
 0x1dd   : > { %v2806_v53 = vadd.f32 %v3814_v61, %v4723_v54  ;;  %v3816_v3 = vadd.f32 %v3783_v10, %v3613_v16  ;;  %v2665_v15 = vpop.f32.mrb[11].mxu0 }
 0x1de   : > { %v2804_v19 = vadd.f32 %v3815_v9, %v4723_v54  ;;  %v3817_v26 = vadd.f32 %v2665_v15, %v1192_v29 }
 0x1df   : > { %v2838_v27 = vmax.f32 %v2806_v53, 0.0  ;;  %v2807_v32 = vadd.f32 %v3816_v3, %v4723_v54 }
 0x1e0   : > { %v2836_v33 = vmax.f32 %v2804_v19, 0.0  ;;  %v2805_v38 = vadd.f32 %v3817_v26, %v4723_v54 }
 0x1e1   : > { %2870 = vst [vmem:[%s4730_s20 + $0x50] sm:$0xff] %v2838_v27  ;;  %v2839_v48 = vmax.f32 %v2807_v32, 0.0 }
 0x1e2   : > { %2868 = vst [vmem:[%s4730_s20 + $0x40] sm:$0xff] %v2836_v33  ;;  %v2837_v49 = vmax.f32 %v2805_v38, 0.0  ;;  %v3786_v50 = vpop.f32.mrb[12].mxu0 }
 0x1e3   : > { %2871 = vst [vmem:[%s4730_s20 + $0x58] sm:$0xff] %v2839_v48  ;;  %v3818_v51 = vadd.f32 %v3786_v50, %v4712_v30  ;;  %v2678_v62 = vpop.f32.mrb[13].mxu0 }
 0x1e4   : > { %2869 = vst [vmem:[%s4730_s20 + $0x48] sm:$0xff] %v2837_v49  ;;  %v3819_v63 = vadd.f32 %v2678_v62, %v4714_v34  ;;  %v3787_v0 = vpop.f32.mrb[14].mxu0 }
 0x1e5   : > { %v2810_v2 = vadd.f32 %v3818_v51, %v4723_v54  ;;  %v3820_v12 = vadd.f32 %v3787_v0, %v4716_v45  ;;  %v2681_v13 = vpop.f32.mrb[15].mxu0 }
 0x1e6   : > { %v2808_v14 = vadd.f32 %v3819_v63, %v4723_v54  ;;  %v3821_v16 = vadd.f32 %v2681_v13, %v4718_v46 }
 0x1e7   : > { %v2842_v29 = vmax.f32 %v2810_v2, 0.0  ;;  %v2811_v30 = vadd.f32 %v3820_v12, %v4723_v54 }
 0x1e8   : > { %v2840_v52 = vmax.f32 %v2808_v14, 0.0  ;;  %v2809_v5 = vadd.f32 %v3821_v16, %v4723_v54 }
 0x1e9   : > { %2874 = vst [vmem:[%s4730_s20 + $0x70] sm:$0xff] %v2842_v29  ;;  %v2843_v34 = vmax.f32 %v2811_v30, 0.0  ;;  %v3654_v6 = vpop.f32.mrb[16].mxu1 }
 0x1ea   : > { %2872 = vst [vmem:[%s4730_s20 + $0x60] sm:$0xff] %v2840_v52  ;;  %v2841_v7 = vmax.f32 %v2809_v5, 0.0  ;;  %v3790_v8 = vpop.f32.mrb[16].mxu0  ;;  %v1515_v24 = vpop.f32.mrb[17].mxu1 }
 0x1eb   : > { %2875 = vst [vmem:[%s4730_s20 + $0x78] sm:$0xff] %v2843_v34  ;;  %v3822_v45 = vadd.f32 %v3790_v8, %v3654_v6  ;;  %v2694_v25 = vpop.f32.mrb[17].mxu0  ;;  %v3655_v28 = vpop.f32.mrb[18].mxu1 }
 0x1ec   : > { %2873 = vst [vmem:[%s4730_s20 + $0x68] sm:$0xff] %v2841_v7  ;;  %v3823_v46 = vadd.f32 %v2694_v25, %v1515_v24  ;;  %v3791_v31 = vpop.f32.mrb[18].mxu0  ;;  %v1518_v43 = vpop.f32.mrb[19].mxu1 }
 0x1ed   : > { %v2814_v44 = vadd.f32 %v3822_v45, %v4723_v54  ;;  %v3824_v47 = vadd.f32 %v3791_v31, %v3655_v28  ;;  %v2697_v59 = vpop.f32.mrb[19].mxu0 }
 0x1ee   : > { %v2812_v60 = vadd.f32 %v3823_v46, %v4723_v54  ;;  %v3825_v4 = vadd.f32 %v2697_v59, %v1518_v43 }
 0x1ef   : > { %v2846_v11 = vmax.f32 %v2814_v44, 0.0  ;;  %v2815_v17 = vadd.f32 %v3824_v47, %v4723_v54 }
 0x1f0   : > { %v2844_v18 = vmax.f32 %v2812_v60, 0.0  ;;  %v2813_v20 = vadd.f32 %v3825_v4, %v4723_v54 }
 0x1f1   : > { %2878 = vst [vmem:[%s4730_s20 + $0x90] sm:$0xff] %v2846_v11  ;;  %v2847_v22 = vmax.f32 %v2815_v17, 0.0  ;;  %v3658_v23 = vpop.f32.mrb[20].mxu1 }
 0x1f2   : > { %2876 = vst [vmem:[%s4730_s20 + $0x80] sm:$0xff] %v2844_v18  ;;  %v2845_v35 = vmax.f32 %v2813_v20, 0.0  ;;  %v3794_v36 = vpop.f32.mrb[20].mxu0  ;;  %v1531_v37 = vpop.f32.mrb[21].mxu1 }
 0x1f3   : > { %2879 = vst [vmem:[%s4730_s20 + $0x98] sm:$0xff] %v2847_v22  ;;  %v3826_v40 = vadd.f32 %v3794_v36, %v3658_v23  ;;  %v2710_v41 = vpop.f32.mrb[21].mxu0  ;;  %v3659_v42 = vpop.f32.mrb[22].mxu1 }
 0x1f4   : > { %2877 = vst [vmem:[%s4730_s20 + $0x88] sm:$0xff] %v2845_v35  ;;  %v3827_v56 = vadd.f32 %v2710_v41, %v1531_v37  ;;  %v3795_v57 = vpop.f32.mrb[22].mxu0  ;;  %v1534_v21 = vpop.f32.mrb[23].mxu1 }
 0x1f5   : > { %v2818_v58 = vadd.f32 %v3826_v40, %v4723_v54  ;;  %v3828_v39 = vadd.f32 %v3795_v57, %v3659_v42  ;;  %v2713_v55 = vpop.f32.mrb[23].mxu0 }
 0x1f6   : > { %v2816_v61 = vadd.f32 %v3827_v56, %v4723_v54  ;;  %v3829_v1 = vadd.f32 %v2713_v55, %v1534_v21 }
 0x1f7   : > { %v2850_v9 = vmax.f32 %v2818_v58, 0.0  ;;  %v2819_v10 = vadd.f32 %v3828_v39, %v4723_v54 }
 0x1f8   : > { %v2848_v53 = vmax.f32 %v2816_v61, 0.0  ;;  %v2817_v3 = vadd.f32 %v3829_v1, %v4723_v54 }
 0x1f9   : > { %2882 = vst [vmem:[%s4730_s20 + $0xb0] sm:$0xff] %v2850_v9  ;;  %v2851_v15 = vmax.f32 %v2819_v10, 0.0  ;;  %v3662_v19 = vpop.f32.mrb[24].mxu1 }
 0x1fa   : > { %2880 = vst [vmem:[%s4730_s20 + $0xa0] sm:$0xff] %v2848_v53  ;;  %v2849_v26 = vmax.f32 %v2817_v3, 0.0  ;;  %v3798_v27 = vpop.f32.mrb[24].mxu0  ;;  %v1547_v32 = vpop.f32.mrb[25].mxu1 }
 0x1fb   : > { %2883 = vst [vmem:[%s4730_s20 + $0xb8] sm:$0xff] %v2851_v15  ;;  %v3830_v33 = vadd.f32 %v3798_v27, %v3662_v19  ;;  %v2726_v38 = vpop.f32.mrb[25].mxu0  ;;  %v3663_v48 = vpop.f32.mrb[26].mxu1 }
 0x1fc   : > { %2881 = vst [vmem:[%s4730_s20 + $0xa8] sm:$0xff] %v2849_v26  ;;  %v3831_v49 = vadd.f32 %v2726_v38, %v1547_v32  ;;  %v3799_v50 = vpop.f32.mrb[26].mxu0  ;;  %v1550_v51 = vpop.f32.mrb[27].mxu1 }
 0x1fd   : > { %v2822_v62 = vadd.f32 %v3830_v33, %v4723_v54  ;;  %v3832_v63 = vadd.f32 %v3799_v50, %v3663_v48  ;;  %v2729_v0 = vpop.f32.mrb[27].mxu0 }
 0x1fe   : > { %v2820_v2 = vadd.f32 %v3831_v49, %v4723_v54  ;;  %v3833_v12 = vadd.f32 %v2729_v0, %v1550_v51 }
 0x1ff   : > { %v2854_v13 = vmax.f32 %v2822_v62, 0.0  ;;  %v2823_v14 = vadd.f32 %v3832_v63, %v4723_v54 }
 0x200   : > { %v2852_v16 = vmax.f32 %v2820_v2, 0.0  ;;  %v2821_v29 = vadd.f32 %v3833_v12, %v4723_v54 }
 0x201   : > { %2886 = vst [vmem:[%s4730_s20 + $0xd0] sm:$0xff] %v2854_v13  ;;  %v2855_v30 = vmax.f32 %v2823_v14, 0.0  ;;  %v3666_v52 = vpop.f32.mrb[28].mxu1 }
 0x202   : > { %2884 = vst [vmem:[%s4730_s20 + $0xc0] sm:$0xff] %v2852_v16  ;;  %v2853_v5 = vmax.f32 %v2821_v29, 0.0  ;;  %v3802_v34 = vpop.f32.mrb[28].mxu0  ;;  %v1563_v6 = vpop.f32.mrb[29].mxu1 }
 0x203   : > { %2887 = vst [vmem:[%s4730_s20 + $0xd8] sm:$0xff] %v2855_v30  ;;  %v3834_v7 = vadd.f32 %v3802_v34, %v3666_v52  ;;  %v2742_v8 = vpop.f32.mrb[29].mxu0  ;;  %v3667_v24 = vpop.f32.mrb[30].mxu1 }
 0x204   : > { %2885 = vst [vmem:[%s4730_s20 + $0xc8] sm:$0xff] %v2853_v5  ;;  %v3835_v45 = vadd.f32 %v2742_v8, %v1563_v6  ;;  %v3803_v25 = vpop.f32.mrb[30].mxu0  ;;  %v1566_v28 = vpop.f32.mrb[31].mxu1 }
 0x205   : > { %v2826_v46 = vadd.f32 %v3834_v7, %v4723_v54  ;;  %v3836_v31 = vadd.f32 %v3803_v25, %v3667_v24  ;;  %v2745_v43 = vpop.f32.mrb[31].mxu0 }
 0x206   : > { %v2824_v44 = vadd.f32 %v3835_v45, %v4723_v54  ;;  %v3837_v47 = vadd.f32 %v2745_v43, %v1566_v28 }
 0x207   : > { %v2858_v59 = vmax.f32 %v2826_v46, 0.0  ;;  %v2827_v60 = vadd.f32 %v3836_v31, %v4723_v54 }
 0x208   : > { %v2856_v4 = vmax.f32 %v2824_v44, 0.0  ;;  %v2825_v11 = vadd.f32 %v3837_v47, %v4723_v54 }
 0x209   : > { %2890 = vst [vmem:[%s4730_s20 + $0xf0] sm:$0xff] %v2858_v59  ;;  %v2859_v17 = vmax.f32 %v2827_v60, 0.0 }
 0x20a   : > { %2888 = vst [vmem:[%s4730_s20 + $0xe0] sm:$0xff] %v2856_v4  ;;  %v2857_v18 = vmax.f32 %v2825_v11, 0.0 }
 0x20b   : > { %2891 = vst [vmem:[%s4730_s20 + $0xf8] sm:$0xff] %v2859_v17 }
 0x20c   : > { %2889 = vst [vmem:[%s4730_s20 + $0xe8] sm:$0xff] %v2857_v18 }
 0x20d PF: > { %s13_s14 = sadd.s32 1, %s4119_s14   ;;  %s4812_s12 = smov %s4115_s13 }
 0x20e   : > { %p10_p5 = scmp.ge.s32.totalorder %s13_s14, 4   ;;  %s4813_s13 = smov %s4815_s15 }
 0x210   :  { %12 = sbr.rel (!%p10_p5) target bundleno = 2 (0x2), region = 73 }

// kernel: denoiser_forward.11
= control target key start
LH: loop header
LB: loop body
LE: loop exit
PB: predicated region body
PF: predicated region fallthrough
CT: control target
= control target key end

     0   :  { %s2493_s12 = smov 0   ;;  %s2495_s13 = smov 0   ;;  %s2891_s0 = inlined_call_operand.vmem [shape: f32[2,36,9,128], index: 0, kind: input, shape index: {}]   ;;  %s2892_s1 = inlined_call_operand.vmem [shape: bf16[9,128,128], index: 1, kind: input, shape index: {}]   ;;  %s2893_s2 = inlined_call_operand.vmem [shape: f32[1,128], index: 2, kind: input, shape index: {}]   ;;  %s2894_s3 = inlined_call_operand.vmem [shape: f32[2,8,8,128], index: 3, kind: output, shape index: {}]  }
   0x1   :  { %s2497_s14 = smov 0  }
   0x2 LB: > { %s25_s15 = sadd.s32 1, %s2467_s13  ;;  %p1684_p0 = scmp.ge.s32.totalorder %s2471_s14, 1  ;;  %s2471_s14 = sphi %s2497_s14, %s13_s14   ;;  %s2467_s13 = sphi %s2495_s13, %s2896_s13   ;;  %s2463_s12 = sphi %s2493_s12, %s2895_s12  }
   0x3   : > { %p27_p1 = scmp.ge.s32.totalorder %s25_s15, 2  ;;  %p151_p2 = scmp.lt.s32.totalorder %s2471_s14, 3 }
   0x5   : > { %s2898_s15 = smov (%p27_p1, %s25_s15), 0  ;;  %p152_p3 = pnand %p1684_p0, %p151_p2 }
   0x6   : > { %v2377_v0 = vld [vmem:[%s2892_s1 + $0x40] sm:$0xff] (!%p152_p3)   ;;  %p179_p4 = scmp.lt.s32.totalorder (!%p152_p3), %s2463_s12, 1  ;;  %v2379_v2 = vld [vmem:[%s2892_s1 + $0x48] sm:$0xff] (!%p152_p3)   ;;  %v2381_v4 = vld [vmem:[%s2892_s1 + $0x50] sm:$0xff] (!%p152_p3)  }
   0x7   : > { %155 = sbr.rel (%p152_p3) target bundleno = 390 (0x186), region = 32  ;;  %v2378_v1 = vld [vmem:[%s2892_s1 + $0x100] sm:$0xff] (!%p152_p3)   ;;  %2056 = vmatprep.subr.bf16.mxu1 (!%p152_p3), %v2377_v0  ;;  %v2380_v3 = vld [vmem:[%s2892_s1 + $0x108] sm:$0xff] (!%p152_p3)   ;;  %v2382_v5 = vld [vmem:[%s2892_s1 + $0x110] sm:$0xff] (!%p152_p3)  }
   0x8   : > { %2152 = vmatprep.subr.bf16.mxu0 (!%p152_p3), %v2378_v1  ;;  %2057 = vmatpush3.bf16.msra.mxu1 (!%p152_p3), %v2377_v0  ;;  %v2383_v6 = vld [vmem:[%s2892_s1 + $0x58] sm:$0xff] (!%p152_p3)   ;;  %v2385_v8 = vld [vmem:[%s2892_s1 + $0x60] sm:$0xff] (!%p152_p3)   ;;  %v2387_v10 = vld [vmem:[%s2892_s1 + $0x68] sm:$0xff] (!%p152_p3)  }
   0x9   : > { %2153 = vmatpush3.bf16.msra.mxu0 (!%p152_p3), %v2378_v1  ;;  %2058 = vmatprep.subr.bf16.mxu1 (!%p152_p3), %v2379_v2  ;;  %v2384_v7 = vld [vmem:[%s2892_s1 + $0x118] sm:$0xff] (!%p152_p3)   ;;  %v2386_v9 = vld [vmem:[%s2892_s1 + $0x120] sm:$0xff] (!%p152_p3)   ;;  %v2388_v13 = vld [vmem:[%s2892_s1 + $0x128] sm:$0xff] (!%p152_p3)  }
   0xa   : > { %2154 = vmatprep.subr.bf16.mxu0 (!%p152_p3), %v2380_v3  ;;  %v2389_v19 = vld [vmem:[%s2892_s1 + $0x70] sm:$0xff] (!%p152_p3)   ;;  %v2391_v22 = vld [vmem:[%s2892_s1 + $0x78] sm:$0xff] (!%p152_p3)   ;;  %v2393_v24 = vld [vmem:[%s2892_s1] sm:$0xff] (!%p152_p3)  }
   0xb   : > { %v2390_v21 = vld [vmem:[%s2892_s1 + $0x130] sm:$0xff] (!%p152_p3)   ;;  %v2392_v23 = vld [vmem:[%s2892_s1 + $0x138] sm:$0xff] (!%p152_p3)   ;;  %v2394_v28 = vld [vmem:[%s2892_s1 + $0x140] sm:$0xff] (!%p152_p3)  }
   0xc   : > { %2059 = vmatpush3.bf16.msra.mxu1 (!%p152_p3), %v2379_v2  ;;  %v2395_v34 = vld [vmem:[%s2892_s1 + $0x8] sm:$0xff] (!%p152_p3)   ;;  %v2397_v39 = vld [vmem:[%s2892_s1 + $0x10] sm:$0xff] (!%p152_p3)   ;;  %v2399_v53 = vld [vmem:[%s2892_s1 + $0x18] sm:$0xff] (!%p152_p3)  }
   0xd   : > { %2155 = vmatpush3.bf16.msra.mxu0 (!%p152_p3), %v2380_v3  ;;  %2060 = vmatprep.subr.bf16.mxu1 (!%p152_p3), %v2381_v4  ;;  %v2396_v37 = vld [vmem:[%s2892_s1 + $0x148] sm:$0xff] (!%p152_p3)   ;;  %v2398_v46 = vld [vmem:[%s2892_s1 + $0x150] sm:$0xff] (!%p152_p3)   ;;  %v2400_v54 = vld [vmem:[%s2892_s1 + $0x158] sm:$0xff] (!%p152_p3)  }
   0xe   : > { %s2900_s12 = smov (!%p179_p4, %s2463_s12), 1  ;;  %2156 = vmatprep.subr.bf16.mxu0 %v2382_v5  ;;  %v2401_v57 = vld [vmem:[%s2892_s1 + $0x20] sm:$0xff]   ;;  %v2403_v59 = vld [vmem:[%s2892_s1 + $0x28] sm:$0xff]   ;;  %v2405_v61 = vld [vmem:[%s2892_s1 + $0x30] sm:$0xff]  }
   0xf   : > { %s2352_s5 = smul.u32 576, %s2900_s12  ;;  %v2402_v58 = vld [vmem:[%s2892_s1 + $0x160] sm:$0xff]   ;;  %v2404_v60 = vld [vmem:[%s2892_s1 + $0x168] sm:$0xff]   ;;  %v2406_v62 = vld [vmem:[%s2892_s1 + $0x170] sm:$0xff]  }
  0x10   : > { %2061 = vmatpush3.bf16.msra.mxu1 %v2381_v4  ;;  %v2407_v63 = vld [vmem:[%s2892_s1 + $0x38] sm:$0xff]   ;;  %v2409_v1 = vld [vmem:[%s2892_s1 + $0x80] sm:$0xff]  }
  0x11   : > { %2157 = vmatpush3.bf16.msra.mxu0 %v2382_v5  ;;  %2062 = vmatprep.subr.bf16.mxu1 %v2383_v6  ;;  %s2547_s16 = scalar_lea.vmem %s2891_s0, %s2352_s5  ;;  %v2408_v0 = vld [vmem:[%s2892_s1 + $0x178] sm:$0xff]   ;;  %s1947_s5 = sshll.u32 %s2900_s12, 6 }
  0x12   : > { %2158 = vmatprep.subr.bf16.mxu0 %v2384_v7  ;;  %v1688_v11 = vld [vmem:[%s2547_s16 + $0x90] sm:$0xff]  ;;  %v2554_v12 = vld [vmem:[%s2547_s16 + $0xa0] sm:$0xff]  ;;  %s192_s8 = scalar_lea.vmem %s2894_s3, %s1947_s5 }
  0x13   : > { %v237_v14 = vpack.c.bf16 %v2554_v12, %v1688_v11  ;;  %v1784_v15 = vld [vmem:[%s2547_s16 + $0x1b0] sm:$0xff]  ;;  %v1785_v16 = vld [vmem:[%s2547_s16 + $0x1c0] sm:$0xff] }
  0x14   : > { %2063 = vmatpush3.bf16.msra.mxu1 %v2383_v6  ;;  %v798_v17 = vpack.c.bf16 %v1785_v16, %v1784_v15  ;;  %v2563_v18 = vld [vmem:[%s2547_s16 + $0xb0] sm:$0xff]  ;;  %v2583_v25 = vld [vmem:[%s2547_s16 + $0xc0] sm:$0xff]  ;;  %v2412_v15 = vld [vmem:[%s2892_s1 + $0x188] sm:$0xff]  }
  0x15   : > { %2159 = vmatpush3.bf16.msra.mxu0 %v2384_v7  ;;  %2064 = vmatprep.subr.bf16.mxu1 %v2385_v8  ;;  %v1254_v20 = vpack.c.bf16 %v2563_v18, %v2554_v12  ;;  %v1786_v26 = vld [vmem:[%s2547_s16 + $0x1d0] sm:$0xff]  ;;  %v1787_v27 = vld [vmem:[%s2547_s16 + $0x1e0] sm:$0xff]  ;;  %v238_v29 = vpack.c.bf16 %v2583_v25, %v2563_v18 }
  0x16   : > { %2160 = vmatprep.subr.bf16.mxu0 %v2386_v9  ;;  %2072 = vmatprep.mubr.bf16.mxu1 %v237_v14  ;;  %v2593_v30 = vld [vmem:[%s2547_s16 + $0xd0] sm:$0xff]  ;;  %v799_v31 = vpack.c.bf16 %v1787_v27, %v1786_v26  ;;  %v2596_v32 = vld [vmem:[%s2547_s16 + $0xe0] sm:$0xff] }
  0x17   : > { %2168 = vmatprep.mubr.bf16.mxu0 %v798_v17  ;;  %v1255_v33 = vpack.c.bf16 %v2593_v30, %v2583_v25  ;;  %v1788_v35 = vld [vmem:[%s2547_s16 + $0x1f0] sm:$0xff]  ;;  %v1789_v36 = vld [vmem:[%s2547_s16 + $0x200] sm:$0xff]  ;;  %v239_v38 = vpack.c.bf16 %v2596_v32, %v2593_v30  ;;  %v2444_v30 = vld [vmem:[%s2892_s1 + $0x218] sm:$0xff]  }
  0x18   : > { %2065 = vmatpush3.bf16.msra.mxu1 %v2385_v8  ;;  %v800_v40 = vpack.c.bf16 %v1789_v36, %v1788_v35  ;;  %v2614_v41 = vld [vmem:[%s2547_s16 + $0xf0] sm:$0xff]  ;;  %v2617_v42 = vld [vmem:[%s2547_s16 + $0x100] sm:$0xff]  ;;  %v2416_v35 = vld [vmem:[%s2892_s1 + $0x198] sm:$0xff]  }
  0x19   : > { %2161 = vmatpush3.bf16.msra.mxu0 %v2386_v9  ;;  %2066 = vmatprep.subr.bf16.mxu1 %v2387_v10  ;;  %v1790_v43 = vld [vmem:[%s2547_s16 + $0x210] sm:$0xff]  ;;  %v1256_v44 = vpack.c.bf16 %v2614_v41, %v2596_v32  ;;  %v1791_v45 = vld [vmem:[%s2547_s16 + $0x220] sm:$0xff]  ;;  %v240_v48 = vpack.c.bf16 %v2617_v42, %v2614_v41  ;;  %v2446_v41 = vld [vmem:[%s2892_s1 + $0x228] sm:$0xff]  }
  0x1a   : > { %2162 = vmatprep.subr.bf16.mxu0 %v2388_v13  ;;  %v198_v47 = vld [vmem:[%s2547_s16] sm:$0xff]  ;;  %v2630_v49 = vld [vmem:[%s2547_s16 + $0x10] sm:$0xff]  ;;  %v801_v50 = vpack.c.bf16 %v1791_v45, %v1790_v43  ;;  %v2420_v43 = vld [vmem:[%s2892_s1 + $0x1a8] sm:$0xff]  }
  0x1b   : > { %v1816_v51 = vld [vmem:[%s2547_s16 + $0x121] sm:$0xff]  ;;  %v1817_v52 = vld [vmem:[%s2547_s16 + $0x131] sm:$0xff]  ;;  %v206_v55 = vpack.c.bf16 %v2630_v49, %v198_v47 }
  0x1c   : > { %2067 = vmatpush3.bf16.msra.mxu1 %v2387_v10  ;;  %v948_v56 = vpack.c.bf16 %v1817_v52, %v1816_v51  ;;  %v200_v2 = vld [vmem:[%s2547_s16 + $0x20] sm:$0xff]  ;;  %v2670_v3 = vld [vmem:[%s2547_s16 + $0x30] sm:$0xff]  ;;  %v2411_v10 = vld [vmem:[%s2892_s1 + $0x88] sm:$0xff]  }
  0x1d   : > { %2163 = vmatpush3.bf16.msra.mxu0 %v2388_v13  ;;  %2068 = vmatprep.subr.bf16.mxu1 %v2389_v19  ;;  %v1818_v4 = vld [vmem:[%s2547_s16 + $0x141] sm:$0xff]  ;;  %v1819_v5 = vld [vmem:[%s2547_s16 + $0x151] sm:$0xff]  ;;  %v207_v9 = vpack.c.bf16 %v2670_v3, %v200_v2 }
  0x1e   : > { %2164 = vmatprep.subr.bf16.mxu0 %v2390_v21  ;;  %v2410_v6 = vld [vmem:[%s2892_s1 + $0x180] sm:$0xff]   ;;  %v2681_v8 = vld [vmem:[%s2547_s16 + $0x50] sm:$0xff]  ;;  %v949_v13 = vpack.c.bf16 %v1819_v5, %v1818_v4  ;;  %v2423_v47 = vld [vmem:[%s2892_s1 + $0xb8] sm:$0xff]  }
  0x1f   : > { %v2678_v7 = vld [vmem:[%s2547_s16 + $0x40] sm:$0xff]  ;;  %v1821_v14 = vld [vmem:[%s2547_s16 + $0x171] sm:$0xff] }
  0x20   : > { %2069 = vmatpush3.bf16.msra.mxu1 %v2389_v19  ;;  %v1820_v11 = vld [vmem:[%s2547_s16 + $0x161] sm:$0xff]  ;;  %v208_v16 = vpack.c.bf16 %v2681_v8, %v2678_v7  ;;  %v2413_v19 = vld [vmem:[%s2892_s1 + $0x90] sm:$0xff]  }
  0x21   : > { %2165 = vmatpush3.bf16.msra.mxu0 %v2390_v21  ;;  %2070 = vmatprep.subr.bf16.mxu1 %v2391_v22  ;;  %v2695_v17 = vld [vmem:[%s2547_s16 + $0x60] sm:$0xff]  ;;  %v950_v21 = vpack.c.bf16 %v1821_v14, %v1820_v11  ;;  %v1823_v26 = vld [vmem:[%s2547_s16 + $0x191] sm:$0xff]  ;;  %v2435_v11 = vld [vmem:[%s2892_s1 + $0xe8] sm:$0xff]  }
  0x22   : > { %2166 = vmatprep.subr.bf16.mxu0 %v2392_v23  ;;  %v484_v27 = vld [vmem:[%s2547_s16 + $0x1] sm:$0xff]  ;;  %v2421_v45 = vld [vmem:[%s2892_s1 + $0xb0] sm:$0xff]   ;;  %v2440_v14 = vld [vmem:[%s2892_s1 + $0x1f8] sm:$0xff]  }
  0x23   : > { %v2425_v51 = vld [vmem:[%s2892_s1 + $0xc0] sm:$0xff]   ;;  %v1753_v4 = vld [vmem:[%s2547_s16 + $0x130] sm:$0xff] }
  0x24   : > { %2071 = vmatpush3.bf16.msra.mxu1 %v2391_v22  ;;  %v2701_v22 = vld [vmem:[%s2547_s16 + $0x70] sm:$0xff]  ;;  %v2426_v52 = vld [vmem:[%s2892_s1 + $0x1c0] sm:$0xff]  }
  0x25   : > { %2167 = vmatpush3.bf16.msra.mxu0 %v2392_v23  ;;  %2080 = vmatprep.subr.bf16.mxu1 %v2393_v24  ;;  %v2414_v23 = vld [vmem:[%s2892_s1 + $0x190] sm:$0xff]   ;;  %v2445_v32 = vld [vmem:[%s2892_s1 + $0x220] sm:$0xff]  }
  0x26   : > { %2176 = vmatprep.subr.bf16.mxu0 %v2394_v28  ;;  %v2437_v12 = vld [vmem:[%s2892_s1 + $0xf0] sm:$0xff]  }
  0x27   : > { %2073 = vmatmul.mubr.bf16.vlgmr.msra.gmra.mrb[0].mxu1 %v238_v29  ;;  %v2712_v29 = vld [vmem:[%s2547_s16 + $0x11] sm:$0xff] }
  0x28   : > { %2081 = vmatpush3.bf16.msra.mxu1 %v2393_v24  ;;  %2169 = vmatmul.mubr.bf16.vlgmr.msra.gmra.mrb[0].mxu0 %v799_v31  ;;  %v1822_v24 = vld [vmem:[%s2547_s16 + $0x181] sm:$0xff]  ;;  %v492_v36 = vpack.c.bf16 %v2712_v29, %v484_v27  ;;  %v2438_v18 = vld [vmem:[%s2892_s1 + $0x1f0] sm:$0xff]  }
  0x29   : > { %2177 = vmatpush3.bf16.msra.mxu0 %v2394_v28  ;;  %2082 = vmatprep.subr.bf16.mxu1 %v2395_v34  ;;  %v209_v28 = vpack.c.bf16 %v2701_v22, %v2695_v17  ;;  %v951_v31 = vpack.c.bf16 %v1823_v26, %v1822_v24  ;;  %v1758_v26 = vld [vmem:[%s2547_s16 + $0x180] sm:$0xff]  ;;  %v1759_v27 = vld [vmem:[%s2547_s16 + $0x190] sm:$0xff] }
  0x2a   : > { %2178 = vmatprep.subr.bf16.mxu0 %v2396_v37  ;;  %2076 = vmatprep.mubr.bf16.mxu1 %v239_v38  ;;  %v2417_v38 = vld [vmem:[%s2892_s1 + $0xa0] sm:$0xff]  }
  0x2b   : > { %2172 = vmatprep.mubr.bf16.mxu0 %v800_v40  ;;  %v2419_v40 = vld [vmem:[%s2892_s1 + $0xa8] sm:$0xff]  }
  0x2c   : > { %2083 = vmatpush3.bf16.msra.mxu1 %v2395_v34  ;;  %v2415_v34 = vld [vmem:[%s2892_s1 + $0x98] sm:$0xff]  }
  0x2d   : > { %2179 = vmatpush3.bf16.msra.mxu0 %v2396_v37  ;;  %2084 = vmatprep.subr.bf16.mxu1 %v2397_v39  ;;  %v1101_v37 = vpack.c.bf16 %v200_v2, %v2630_v49  ;;  %v2747_v49 = vld [vmem:[%s2547_s16 + $0x21] sm:$0xff] }
  0x2e   : > { %2180 = vmatprep.subr.bf16.mxu0 %v2398_v46 }
  0x2f   : > { %2077 = vmatmul.mubr.bf16.gmra.mrb[4].mxu1 %v240_v48  ;;  %v2424_v48 = vld [vmem:[%s2892_s1 + $0x1b8] sm:$0xff]  }
  0x30   : > { %2085 = vmatpush3.bf16.msra.mxu1 %v2397_v39  ;;  %2173 = vmatmul.mubr.bf16.gmra.mrb[4].mxu0 %v801_v50  ;;  %v2418_v39 = vld [vmem:[%s2892_s1 + $0x1a0] sm:$0xff]   ;;  %v2750_v50 = vld [vmem:[%s2547_s16 + $0x31] sm:$0xff] }
  0x31   : > { %2181 = vmatpush3.bf16.msra.mxu0 %v2398_v46  ;;  %2086 = vmatprep.subr.bf16.mxu1 %v2399_v53  ;;  %v2422_v46 = vld [vmem:[%s2892_s1 + $0x1b0] sm:$0xff]  }
  0x32   : > { %2182 = vmatprep.subr.bf16.mxu0 %v2400_v54  ;;  %2096 = vmatprep.mubr.bf16.mxu1 %v206_v55  ;;  %v2764_v55 = vld [vmem:[%s2547_s16 + $0x51] sm:$0xff] }
  0x33   : > { %2192 = vmatprep.mubr.bf16.mxu0 %v948_v56  ;;  %v1102_v56 = vpack.c.bf16 %v2678_v7, %v2670_v3  ;;  %v1752_v3 = vld [vmem:[%s2547_s16 + $0x120] sm:$0xff]  ;;  %v2432_v7 = vld [vmem:[%s2892_s1 + $0x1d8] sm:$0xff]  }
  0x34   : > { %2087 = vmatpush3.bf16.msra.mxu1 %v2399_v53  ;;  %v493_v53 = vpack.c.bf16 %v2750_v50, %v2747_v49 }
  0x35   : > { %2183 = vmatpush3.bf16.msra.mxu0 %v2400_v54  ;;  %2088 = vmatprep.subr.bf16.mxu1 %v2401_v57  ;;  %v2761_v54 = vld [vmem:[%s2547_s16 + $0x41] sm:$0xff] }
  0x36   : > { %2184 = vmatprep.subr.bf16.mxu0 %v2402_v58 }
  0x38   : > { %2089 = vmatpush3.bf16.msra.mxu1 %v2401_v57  ;;  %v2427_v57 = vld [vmem:[%s2892_s1 + $0xc8] sm:$0xff]  }
  0x39   : > { %2185 = vmatpush3.bf16.msra.mxu0 %v2402_v58  ;;  %2090 = vmatprep.subr.bf16.mxu1 %v2403_v59  ;;  %v2428_v58 = vld [vmem:[%s2892_s1 + $0x1c8] sm:$0xff]  }
  0x3a   : > { %2186 = vmatprep.subr.bf16.mxu0 %v2404_v60 }
  0x3c   : > { %2091 = vmatpush3.bf16.msra.mxu1 %v2403_v59  ;;  %v494_v59 = vpack.c.bf16 %v2764_v55, %v2761_v54 }
  0x3d   : > { %2187 = vmatpush3.bf16.msra.mxu0 %v2404_v60  ;;  %2092 = vmatprep.subr.bf16.mxu1 %v2405_v61  ;;  %v1103_v60 = vpack.c.bf16 %v2695_v17, %v2681_v8  ;;  %v645_v8 = vpack.c.bf16 %v1753_v4, %v1752_v3  ;;  %v2441_v17 = vld [vmem:[%s2892_s1 + $0x200] sm:$0xff]  }
  0x3e   : > { %2188 = vmatprep.subr.bf16.mxu0 %v2406_v62 }
  0x40   : > { %2093 = vmatpush3.bf16.msra.mxu1 %v2405_v61  ;;  %v2779_v61 = vld [vmem:[%s2547_s16 + $0x61] sm:$0xff] }
  0x41   : > { %2189 = vmatpush3.bf16.msra.mxu0 %v2406_v62  ;;  %2094 = vmatprep.subr.bf16.mxu1 %v2407_v63  ;;  %v2782_v62 = vld [vmem:[%s2547_s16 + $0x71] sm:$0xff] }
  0x42   : > { %2190 = vmatprep.subr.bf16.mxu0 %v2408_v0  ;;  %v495_v2 = vpack.c.bf16 %v2782_v62, %v2779_v61 }
  0x44   : > { %2095 = vmatpush3.bf16.msra.mxu1 %v2407_v63  ;;  %v2429_v63 = vld [vmem:[%s2892_s1 + $0xd0] sm:$0xff]  }
  0x45   : > { %2191 = vmatpush3.bf16.msra.mxu0 %v2408_v0  ;;  %2104 = vmatprep.subr.bf16.mxu1 %v2409_v1  ;;  %v1855_v0 = vld [vmem:[%s2547_s16 + $0x80] sm:$0xff] }
  0x46   : > { %2200 = vmatprep.subr.bf16.mxu0 %v2410_v6  ;;  %v1104_v5 = vpack.c.bf16 %v1855_v0, %v2701_v22  ;;  %v1757_v22 = vld [vmem:[%s2547_s16 + $0x170] sm:$0xff] }
  0x47   : > { %2097 = vmatmul.mubr.bf16.vlgmr.msra.gmra.mrb[0].mxu1 %v207_v9  ;;  %v2433_v9 = vld [vmem:[%s2892_s1 + $0xe0] sm:$0xff]  }
  0x48   : > { %2105 = vmatpush3.bf16.msra.mxu1 %v2409_v1  ;;  %2193 = vmatmul.mubr.bf16.vlgmr.msra.gmra.mrb[0].mxu0 %v949_v13  ;;  %v2430_v1 = vld [vmem:[%s2892_s1 + $0x1d0] sm:$0xff]   ;;  %v2436_v13 = vld [vmem:[%s2892_s1 + $0x1e8] sm:$0xff]  }
  0x49   : > { %2201 = vmatpush3.bf16.msra.mxu0 %v2410_v6  ;;  %2106 = vmatprep.subr.bf16.mxu1 %v2411_v10  ;;  %v2431_v6 = vld [vmem:[%s2892_s1 + $0xd8] sm:$0xff]  }
  0x4a   : > { %2202 = vmatprep.subr.bf16.mxu0 %v2412_v15  ;;  %2100 = vmatprep.mubr.bf16.mxu1 %v208_v16  ;;  %v1755_v16 = vld [vmem:[%s2547_s16 + $0x150] sm:$0xff] }
  0x4b   : > { %2196 = vmatprep.mubr.bf16.mxu0 %v950_v21  ;;  %v1756_v21 = vld [vmem:[%s2547_s16 + $0x160] sm:$0xff] }
  0x4c   : > { %2107 = vmatpush3.bf16.msra.mxu1 %v2411_v10  ;;  %v2434_v10 = vld [vmem:[%s2892_s1 + $0x1e0] sm:$0xff]   ;;  %v647_v24 = vpack.c.bf16 %v1757_v22, %v1756_v21 }
  0x4d   : > { %2203 = vmatpush3.bf16.msra.mxu0 %v2412_v15  ;;  %2108 = vmatprep.subr.bf16.mxu1 %v2413_v19  ;;  %v1754_v15 = vld [vmem:[%s2547_s16 + $0x140] sm:$0xff] }
  0x4e   : > { %2204 = vmatprep.subr.bf16.mxu0 %v2414_v23 }
  0x4f   : > { %2101 = vmatmul.mubr.bf16.gmra.mrb[4].mxu1 %v209_v28  ;;  %v1887_v28 = vld [vmem:[%s2547_s16 + $0x110] sm:$0xff] }
  0x50   : > { %2109 = vmatpush3.bf16.msra.mxu1 %v2413_v19  ;;  %2197 = vmatmul.mubr.bf16.gmra.mrb[4].mxu0 %v951_v31  ;;  %v646_v19 = vpack.c.bf16 %v1755_v16, %v1754_v15  ;;  %v2443_v31 = vld [vmem:[%s2892_s1 + $0x210] sm:$0xff]   ;;  %v1257_v25 = vpack.c.bf16 %v1887_v28, %v2617_v42 }
  0x51   : > { %2205 = vmatpush3.bf16.msra.mxu0 %v2414_v23  ;;  %2110 = vmatprep.subr.bf16.mxu1 %v2415_v34  ;;  %v2442_v23 = vld [vmem:[%s2892_s1 + $0x208] sm:$0xff]   ;;  %v2447_v42 = vld [vmem:[%s2892_s1 + $0x230] sm:$0xff]  }
  0x52   : > { %2206 = vmatprep.subr.bf16.mxu0 %v2416_v35  ;;  %2120 = vmatprep.mubr.bf16.mxu1 %v492_v36 }
  0x53   : > { %2216 = vmatprep.mubr.bf16.mxu0 %v1101_v37  ;;  %v1405_v37 = vpack.c.bf16 %v2761_v54, %v2750_v50  ;;  %v1944_v54 = vld [vmem:[%s2893_s2] ss:$0 sm:$0xff] }
  0x54   : > { %2111 = vmatpush3.bf16.msra.mxu1 %v2415_v34  ;;  %v648_v34 = vpack.c.bf16 %v1759_v27, %v1758_v26 }
  0x55   : > { %2207 = vmatpush3.bf16.msra.mxu0 %v2416_v35  ;;  %2112 = vmatprep.subr.bf16.mxu1 %v2417_v38  ;;  %v1406_v35 = vpack.c.bf16 %v2779_v61, %v2764_v55 }
  0x56   : > { %2208 = vmatprep.subr.bf16.mxu0 %v2418_v39 }
  0x58   : > { %2113 = vmatpush3.bf16.msra.mxu1 %v2417_v38 }
  0x59   : > { %2209 = vmatpush3.bf16.msra.mxu0 %v2418_v39  ;;  %2114 = vmatprep.subr.bf16.mxu1 %v2419_v40 }
  0x5a   : > { %2210 = vmatprep.subr.bf16.mxu0 %v2420_v43 }
  0x5c   : > { %2115 = vmatpush3.bf16.msra.mxu1 %v2419_v40 }
  0x5d   : > { %2211 = vmatpush3.bf16.msra.mxu0 %v2420_v43  ;;  %2116 = vmatprep.subr.bf16.mxu1 %v2421_v45 }
  0x5e   : > { %2212 = vmatprep.subr.bf16.mxu0 %v2422_v46 }
  0x60   : > { %2117 = vmatpush3.bf16.msra.mxu1 %v2421_v45 }
  0x61   : > { %2213 = vmatpush3.bf16.msra.mxu0 %v2422_v46  ;;  %2118 = vmatprep.subr.bf16.mxu1 %v2423_v47 }
  0x62   : > { %2214 = vmatprep.subr.bf16.mxu0 %v2424_v48 }
  0x64   : > { %2119 = vmatpush3.bf16.msra.mxu1 %v2423_v47 }
  0x65   : > { %2215 = vmatpush3.bf16.msra.mxu0 %v2424_v48  ;;  %2128 = vmatprep.subr.bf16.mxu1 %v2425_v51 }
  0x66   : > { %2224 = vmatprep.subr.bf16.mxu0 %v2426_v52 }
  0x67   : > { %2121 = vmatmul.mubr.bf16.vlgmr.msra.gmra.mrb[0].mxu1 %v493_v53 }
  0x68   : > { %2129 = vmatpush3.bf16.msra.mxu1 %v2425_v51  ;;  %2217 = vmatmul.mubr.bf16.vlgmr.msra.gmra.mrb[0].mxu0 %v1102_v56 }
  0x69   : > { %2225 = vmatpush3.bf16.msra.mxu0 %v2426_v52  ;;  %2130 = vmatprep.subr.bf16.mxu1 %v2427_v57 }
  0x6a   : > { %2226 = vmatprep.subr.bf16.mxu0 %v2428_v58  ;;  %2124 = vmatprep.mubr.bf16.mxu1 %v494_v59 }
  0x6b   : > { %2220 = vmatprep.mubr.bf16.mxu0 %v1103_v60 }
  0x6c   : > { %2131 = vmatpush3.bf16.msra.mxu1 %v2427_v57 }
  0x6d   : > { %2227 = vmatpush3.bf16.msra.mxu0 %v2428_v58  ;;  %2132 = vmatprep.subr.bf16.mxu1 %v2429_v63 }
  0x6e   : > { %2228 = vmatprep.subr.bf16.mxu0 %v2430_v1 }
  0x6f   : > { %2125 = vmatmul.mubr.bf16.gmra.mrb[4].mxu1 %v495_v2 }
  0x70   : > { %2133 = vmatpush3.bf16.msra.mxu1 %v2429_v63  ;;  %2221 = vmatmul.mubr.bf16.gmra.mrb[4].mxu0 %v1104_v5 }
  0x71   : > { %2229 = vmatpush3.bf16.msra.mxu0 %v2430_v1  ;;  %2134 = vmatprep.subr.bf16.mxu1 %v2431_v6 }
  0x72   : > { %2230 = vmatprep.subr.bf16.mxu0 %v2432_v7  ;;  %2144 = vmatprep.mubr.bf16.mxu1 %v645_v8 }
  0x73   : > { %2240 = vmatprep.mubr.bf16.mxu0 %v1254_v20  ;;  %v2439_v20 = vld [vmem:[%s2892_s1 + $0xf8] sm:$0xff]  }
  0x74   : > { %2135 = vmatpush3.bf16.msra.mxu1 %v2431_v6 }
  0x75   : > { %2231 = vmatpush3.bf16.msra.mxu0 %v2432_v7  ;;  %2136 = vmatprep.subr.bf16.mxu1 %v2433_v9 }
  0x76   : > { %2232 = vmatprep.subr.bf16.mxu0 %v2434_v10 }
  0x78   : > { %2137 = vmatpush3.bf16.msra.mxu1 %v2433_v9 }
  0x79   : > { %2233 = vmatpush3.bf16.msra.mxu0 %v2434_v10  ;;  %2138 = vmatprep.subr.bf16.mxu1 %v2435_v11 }
  0x7a   : > { %2234 = vmatprep.subr.bf16.mxu0 %v2436_v13 }
  0x7c   : > { %2139 = vmatpush3.bf16.msra.mxu1 %v2435_v11 }
  0x7d   : > { %2235 = vmatpush3.bf16.msra.mxu0 %v2436_v13  ;;  %2140 = vmatprep.subr.bf16.mxu1 %v2437_v12 }
  0x7e   : > { %2236 = vmatprep.subr.bf16.mxu0 %v2438_v18 }
  0x80   : > { %2141 = vmatpush3.bf16.msra.mxu1 %v2437_v12 }
  0x81   : > { %2237 = vmatpush3.bf16.msra.mxu0 %v2438_v18  ;;  %2142 = vmatprep.subr.bf16.mxu1 %v2439_v20 }
  0x82   : > { %2238 = vmatprep.subr.bf16.mxu0 %v2440_v14 }
  0x84   : > { %2143 = vmatpush3.bf16.msra.mxu1 %v2439_v20 }
  0x85   : > { %2239 = vmatpush3.bf16.msra.mxu0 %v2440_v14  ;;  %2272 = vmatprep.subr.bf16.mxu1 %v2441_v17 }
  0x86   : > { %2248 = vmatprep.subr.bf16.mxu0 %v2441_v17 }
  0x87   : > { %2145 = vmatmul.mubr.bf16.vlgmr.msra.gmra.mrb[0].mxu1 %v646_v19 }
  0x88   : > { %2241 = vmatmul.mubr.bf16.vlgmr.msra.gmra.mrb[0].mxu0 %v1255_v33  ;;  %2280 = vmatpush3.bf16.msra.mxu1 %v2441_v17  ;;  %v1404_v33 = vpack.c.bf16 %v2747_v49, %v2712_v29  ;;  %v1919_v29 = vld [vmem:[%s2547_s16 + $0x81] sm:$0xff] }
  0x89   : > { %2249 = vmatpush3.bf16.msra.mxu0 %v2441_v17  ;;  %2273 = vmatprep.subr.bf16.mxu1 %v2442_v23  ;;  %v1407_v36 = vpack.c.bf16 %v1919_v29, %v2782_v62 }
  0x8a   : > { %2250 = vmatprep.subr.bf16.mxu0 %v2442_v23  ;;  %2148 = vmatprep.mubr.bf16.mxu1 %v647_v24 }
  0x8b   : > { %2244 = vmatprep.mubr.bf16.mxu0 %v1256_v44  ;;  %v2448_v44 = vld [vmem:[%s2892_s1 + $0x238] sm:$0xff]  }
  0x8c   : > { %2281 = vmatpush3.bf16.msra.mxu1 %v2442_v23 }
  0x8d   : > { %2251 = vmatpush3.bf16.msra.mxu0 %v2442_v23  ;;  %2274 = vmatprep.subr.bf16.mxu1 %v2443_v31 }
  0x8e   : > { %2252 = vmatprep.subr.bf16.mxu0 %v2443_v31 }
  0x8f   : > { %2149 = vmatmul.mubr.bf16.gmra.mrb[4].mxu1 %v648_v34 }
  0x90   : > { %2245 = vmatmul.mubr.bf16.gmra.mrb[4].mxu0 %v1257_v25  ;;  %2282 = vmatpush3.bf16.msra.mxu1 %v2443_v31 }
  0x91   : > { %2253 = vmatpush3.bf16.msra.mxu0 %v2443_v31  ;;  %2275 = vmatprep.subr.bf16.mxu1 %v2444_v30 }
  0x92   : > { %2254 = vmatprep.subr.bf16.mxu0 %v2444_v30  ;;  %2264 = vmatprep.mubr.bf16.mxu0 %v1404_v33 }
  0x93   : > { %2268 = vmatprep.mubr.bf16.mxu1 %v1406_v35 }
  0x94   : > { %2283 = vmatpush3.bf16.msra.mxu1 %v2444_v30 }
  0x95   : > { %2255 = vmatpush3.bf16.msra.mxu0 %v2444_v30  ;;  %2276 = vmatprep.subr.bf16.mxu1 %v2445_v32 }
  0x96   : > { %2256 = vmatprep.subr.bf16.mxu0 %v2445_v32 }
  0x98   : > { %2284 = vmatpush3.bf16.msra.mxu1 %v2445_v32 }
  0x99   : > { %2257 = vmatpush3.bf16.msra.mxu0 %v2445_v32  ;;  %2277 = vmatprep.subr.bf16.mxu1 %v2446_v41 }
  0x9a   : > { %2258 = vmatprep.subr.bf16.mxu0 %v2446_v41 }
  0x9c   : > { %2285 = vmatpush3.bf16.msra.mxu1 %v2446_v41 }
  0x9d   : > { %2259 = vmatpush3.bf16.msra.mxu0 %v2446_v41  ;;  %2278 = vmatprep.subr.bf16.mxu1 %v2447_v42 }
  0x9e   : > { %2260 = vmatprep.subr.bf16.mxu0 %v2447_v42 }
  0xa0   : > { %2286 = vmatpush3.bf16.msra.mxu1 %v2447_v42 }
  0xa1   : > { %2261 = vmatpush3.bf16.msra.mxu0 %v2447_v42  ;;  %2279 = vmatprep.subr.bf16.mxu1 %v2448_v44 }
  0xa2   : > { %2262 = vmatprep.subr.bf16.mxu0 %v2448_v44 }
  0xa4   : > { %2287 = vmatpush3.bf16.msra.mxu1 %v2448_v44 }
  0xa5   : > { %2263 = vmatpush3.bf16.msra.mxu0 %v2448_v44 }
  0xa7   : > { %2269 = vmatmul.mubr.bf16.vlgmr.msra.gmra.mrb[8].mxu1 %v1407_v36 }
  0xa8   : > { %2265 = vmatmul.mubr.bf16.vlgmr.msra.gmra.mrb[0].mxu0 %v1405_v37 }
 0x15a   : > { %v2146_v38 = vpop.f32.mrb[0].mxu1 }
 0x15b   : > { %v748_v39 = vpop.f32.mrb[1].mxu1 }
 0x15c   : > { %v2147_v40 = vpop.f32.mrb[2].mxu1 }
 0x15d   : > { %v751_v43 = vpop.f32.mrb[3].mxu1 }
 0x162   : > { %v2150_v45 = vpop.f32.mrb[4].mxu1 }
 0x163   : > { %v2246_v46 = vpop.f32.mrb[4].mxu0  ;;  %v764_v47 = vpop.f32.mrb[5].mxu1 }
 0x164   : > { %v2292_v48 = vadd.f32 %v2246_v46, %v2150_v45  ;;  %v1373_v49 = vpop.f32.mrb[5].mxu0  ;;  %v2151_v51 = vpop.f32.mrb[6].mxu1 }
 0x165   : > { %v2294_v52 = vadd.f32 %v1373_v49, %v764_v47  ;;  %v2247_v53 = vpop.f32.mrb[6].mxu0  ;;  %v767_v55 = vpop.f32.mrb[7].mxu1 }
 0x166   : > { %v2296_v56 = vadd.f32 %v2247_v53, %v2151_v51  ;;  %v1376_v57 = vpop.f32.mrb[7].mxu0 }
 0x167   : > { %v2298_v50 = vadd.f32 %v1376_v57, %v767_v55 }
 0x17a   : > { %v2270_v58 = vpop.f32.mrb[8].mxu1 }
 0x17b   : > { %v2266_v59 = vpop.f32.mrb[0].mxu0  ;;  %v2293_v60 = vadd.f32 %v2292_v48, %v2270_v58  ;;  %v1523_v61 = vpop.f32.mrb[9].mxu1 }
 0x17c   : > { %v2288_v62 = vadd.f32 %v2266_v59, %v2146_v38  ;;  %v1507_v63 = vpop.f32.mrb[1].mxu0  ;;  %v2295_v0 = vadd.f32 %v2294_v52, %v1523_v61  ;;  %v2271_v1 = vpop.f32.mrb[10].mxu1 }
 0x17d   : > { %v1559_v2 = vadd.f32 %v2293_v60, %v1944_v54  ;;  %v2289_v3 = vadd.f32 %v1507_v63, %v748_v39  ;;  %v2267_v4 = vpop.f32.mrb[2].mxu0  ;;  %v2297_v5 = vadd.f32 %v2296_v56, %v2271_v1  ;;  %v1526_v6 = vpop.f32.mrb[11].mxu1 }
 0x17e   : > { %v1555_v7 = vadd.f32 %v2288_v62, %v1944_v54  ;;  %v1557_v8 = vadd.f32 %v2295_v0, %v1944_v54  ;;  %v2290_v9 = vadd.f32 %v2267_v4, %v2147_v40  ;;  %v1510_v10 = vpop.f32.mrb[3].mxu0  ;;  %v2299_v11 = vadd.f32 %v2298_v50, %v1526_v6 }
 0x17f   : > { %v1567_v13 = vmax.f32 %v1559_v2, 0.0  ;;  %v1553_v12 = vadd.f32 %v2289_v3, %v1944_v54  ;;  %v1560_v18 = vadd.f32 %v2297_v5, %v1944_v54  ;;  %v2291_v20 = vadd.f32 %v1510_v10, %v751_v43 }
 0x180   : > { %v1563_v14 = vmax.f32 %v1555_v7, 0.0  ;;  %v1565_v15 = vmax.f32 %v1557_v8, 0.0  ;;  %v1556_v16 = vadd.f32 %v2290_v9, %v1944_v54  ;;  %v1558_v17 = vadd.f32 %v2299_v11, %v1944_v54 }
 0x181   : > { %1575 = vst [vmem:[%s192_s8 + $0x30] sm:$0xff] %v1567_v13  ;;  %v1561_v19 = vmax.f32 %v1553_v12, 0.0  ;;  %v1568_v21 = vmax.f32 %v1560_v18, 0.0  ;;  %v1554_v22 = vadd.f32 %v2291_v20, %v1944_v54 }
 0x182   : > { %1571 = vst [vmem:[%s192_s8 + $0x10] sm:$0xff] %v1563_v14  ;;  %1573 = vst [vmem:[%s192_s8 + $0x20] sm:$0xff] %v1565_v15  ;;  %v1564_v23 = vmax.f32 %v1556_v16, 0.0  ;;  %v1566_v24 = vmax.f32 %v1558_v17, 0.0 }
 0x183   : > { %1569 = vst [vmem:[%s192_s8] sm:$0xff] %v1561_v19  ;;  %1576 = vst [vmem:[%s192_s8 + $0x38] sm:$0xff] %v1568_v21  ;;  %v1562_v26 = vmax.f32 %v1554_v22, 0.0 }
 0x184   : > { %1572 = vst [vmem:[%s192_s8 + $0x18] sm:$0xff] %v1564_v23  ;;  %1574 = vst [vmem:[%s192_s8 + $0x28] sm:$0xff] %v1566_v24 }
 0x185   : > { %1570 = vst [vmem:[%s192_s8 + $0x8] sm:$0xff] %v1562_v26 }
 0x186 PF: > { %s13_s14 = sadd.s32 1, %s2471_s14   ;;  %s2895_s12 = smov %s2467_s13 }
 0x187   : > { %p10_p5 = scmp.ge.s32.totalorder %s13_s14, 4   ;;  %s2896_s13 = smov %s2898_s15 }
 0x189   :  { %12 = sbr.rel (!%p10_p5) target bundleno = 2 (0x2), region = 76 }

// kernel: denoiser_forward.13
= control target key start
LH: loop header
LB: loop body
LE: loop exit
PB: predicated region body
PF: predicated region fallthrough
CT: control target
= control target key end

     0   :  { %12 = vsyncpa [#allocation4], 0  ;;  %s1148_s24 = smov 0   ;;  %s1350_s0 = inlined_call_operand.vmem [shape: f32[2,4,4,128], index: 0, kind: input, shape index: {}]   ;;  %s1351_s1 = inlined_call_operand.vmem [shape: f32[2,128], index: 1, kind: input, shape index: {}]   ;;  %s1352_s2 = inlined_call_operand.vmem [shape: f32[9,128], index: 2, kind: input, shape index: {}]   ;;  %s1353_s3 = inlined_call_operand.vmem [shape: f32[1,128], index: 3, kind: input, shape index: {}]   ;;  %s1354_s4 = inlined_call_operand.vmem [shape: f32[1,128], index: 4, kind: input, shape index: {}]   ;;  %s1355_s5 = inlined_call_operand.vmem [shape: f32[128,128], index: 5, kind: input, shape index: {}]   ;;  %s1356_s6 = inlined_call_operand.vmem [shape: f32[4], index: 6, kind: input, shape index: {}]   ;;  %s1357_s7 = inlined_call_operand.vmem [shape: f32[2,4,4,128], index: 7, kind: output, shape index: {}]  }
   0x1 LB: > { %s920_s25 = sadd.s32 4294967295, %s1102_s24   ;;  %p922_p0 = scmp.ge.s32.totalorder %s1102_s24, 1  ;;  %s1102_s24 = sphi %s1148_s24, %s18_s24  }
   0x2   : > { %p201_p1 = scmp.lt.s32.totalorder %s1102_s24, 3  ;;  %s229_s28 = sshll.u32 %s1356_s6, 4  ;;  %s230_s28 = int_to_ptr.vmem [resolvable:$true] %s229_s28 }
   0x3   : > { %p1035_p3 = scmp.eq.s32.totalorder %s920_s25, 0  ;;  %s1077_s30 = scalar_lea.vmem %s230_s28, 16 }
   0x4   : > { %p1159_p2 = pnand %p922_p0, %p201_p1  ;;  %p1078_p6 = scmp.ne.s32.totalorder %s230_s28, %s1077_s30 }
   0x5   : > { %p1085_p10 = scmp.lt.s32.totalorder %s230_s28, %s230_s28  ;;  %p1086_p11 = scmp.lt.s32.totalorder %s1077_s30, %s1077_s30 }
   0x6   : > { %p1031_p4 = pneg %p1159_p2 }
   0x7   : > { %p1087_p12 = por %p1086_p11, %p1085_p10 }
   0x8   : > { %p1032_p5 = pnand %p1035_p3, %p1031_p4 }
   0xa   : > { %p1079_p7 = pneg %p1032_p5 }
   0xc   : > { %p1080_p8 = pnand %p1079_p7, %p1078_p6 }
   0xe   : > { %p1081_p9 = pneg %p1080_p8 }
  0x10   : > { %p1088_p13 = pnand %p1087_p12, %p1081_p9 }
  0x12   : > { %1091 = shalt.err (!%p1088_p13)
}
  0x13   : > { %s1104_s8 = smov [#allocation3]   ;;  %250 = sbr.rel (%p1159_p2) target bundleno = 682 (0x2aa), region = 48 }
  0x14   : > { %1034 = dma.vmem_to_smem (!%p1032_p5), %s230_s28, 16, %s1104_s8, [#allocation4]  }
  0x1a   : > { %1097 = dma.done.wait (%p1035_p3), [#allocation4], 16  }
  0x1b   : > { %1099 = vsyncadd (%p1035_p3), [#allocation4], 4294967280 }
  0x1c   : > { %256 = sfence }
  0x1d   : > { %p283_p0 = scmp.lt.s32.totalorder %s920_s25, 1  ;;  %v1105_v6 = vmov 839922192   ;;  %v317_v8 = vlaneseq  ;;  %v1106_v9 = vmov 1985246804   ;;  %v1107_v34 = vmov 0.0  }
  0x1e   : > { %v315_v7 = vunpack.c.l.s4 %v1105_v6  ;;  %v322_v10 = vunpack.c.l.s4 %v1106_v9  ;;  %666 = vst [vmem:[#allocation2] sm:$0x3f] %v1107_v34  ;;  %667 = vst [vmem:[#allocation2 + $0x8] sm:$0x3f] %v1107_v34  ;;  %v567_v35 = vld [vmem:[%s1355_s5] sm:$0xff]  ;;  %v568_v36 = vld [vmem:[%s1355_s5 + $0x8] sm:$0xff] }
  0x1f   : > { %s1360_s25 = smov (!%p283_p0, %s920_s25), 1  ;;  %v1190_v12 = vshrl.u32 %v317_v8, 7  ;;  %668 = vst [vmem:[#allocation2 + $0x10] sm:$0x3f] %v1107_v34  ;;  %669 = vst [vmem:[#allocation2 + $0x18] sm:$0x3f] %v1107_v34  ;;  %v995_v38 = vpack.c.bf16 %v568_v36, %v567_v35 }
  0x20   : > { %s940_s9 = sshll.u32 %s1360_s25, 4  ;;  %v316_v11 = vunpack.c.0.s8 %v315_v7  ;;  %v323_v13 = vunpack.c.0.s8 %v322_v10  ;;  %670 = vst [vmem:[#allocation2 + $0x20] sm:$0x3f] %v1107_v34  ;;  %671 = vst [vmem:[#allocation2 + $0x28] sm:$0x3f] %v1107_v34  ;;  %v569_v37 = vld [vmem:[%s1355_s5 + $0x10] sm:$0xff] }
  0x21   : > { %s287_s12 = scalar_lea.vmem %s1350_s0, %s940_s9  ;;  %v570_v39 = vld [vmem:[%s1355_s5 + $0x18] sm:$0xff]  ;;  %v571_v41 = vld [vmem:[%s1355_s5 + $0x20] sm:$0xff]  ;;  %v572_v42 = vld [vmem:[%s1355_s5 + $0x28] sm:$0xff]  ;;  %996 = vmatprep.subr.bf16.mxu0 %v995_v38  ;;  %s478_s8 = sld [smem:[#allocation3]] }
  0x22   : > { %v1178_v0 = vld [vmem:[%s287_s12] sm:$0xf]  ;;  %v1180_v1 = vld [vmem:[%s287_s12 + $0x4] sm:$0xf]  ;;  %v1182_v2 = vld [vmem:[%s287_s12 + $0x8] sm:$0xf]  ;;  %v1193_v14 = vsub.s32 %v316_v11, %v1190_v12  ;;  %v1196_v15 = vsub.s32 %v323_v13, %v1190_v12  ;;  %v999_v40 = vpack.c.bf16 %v570_v39, %v569_v37  ;;  %998 = vmatpush3.bf16.msra.mxu0 %v995_v38  ;;  %v1003_v43 = vpack.c.bf16 %v572_v42, %v571_v41  ;;  %s292_s23 = scalar_lea.vmem %s1357_s7, %s940_s9 }
  0x23   : > { %v301_v3 = vcombine.low %v1178_v0, %v1180_v1  ;;  %v1186_v4 = vld [vmem:[%s287_s12 + $0xc] sm:$0xf]  ;;  %v573_v44 = vld [vmem:[%s1355_s5 + $0x30] sm:$0xff]  ;;  %v574_v45 = vld [vmem:[%s1355_s5 + $0x38] sm:$0xff]  ;;  %s933_s10 = sld [smem:[#allocation3 + $0x1]]  ;;  %s934_s11 = sld [smem:[#allocation3 + $0x2]] }
  0x24   : > { %v302_v5 = vcombine.low %v1182_v2, %v1186_v4  ;;  %1000 = vmatprep.subr.bf16.mxu0 %v999_v40  ;;  %v1007_v46 = vpack.c.bf16 %v574_v45, %v573_v44  ;;  %v575_v47 = vld [vmem:[%s1355_s5 + $0x40] sm:$0xff]  ;;  %v576_v48 = vld [vmem:[%s1355_s5 + $0x48] sm:$0xff]  ;;  %v577_v50 = vld [vmem:[%s1355_s5 + $0x50] sm:$0xff]  ;;  %s935_s12 = sld [smem:[#allocation3 + $0x3]] }
  0x25   : > { %305 = vadd.xlane.f32.xlu0 %v301_v3  ;;  %v1011_v49 = vpack.c.bf16 %v576_v48, %v575_v47  ;;  %v578_v51 = vld [vmem:[%s1355_s5 + $0x58] sm:$0xff]  ;;  %v579_v53 = vld [vmem:[%s1355_s5 + $0x60] sm:$0xff]  ;;  %v580_v54 = vld [vmem:[%s1355_s5 + $0x68] sm:$0xff] }
  0x26   : > { %1002 = vmatpush3.bf16.msra.mxu0 %v999_v40  ;;  %v1015_v52 = vpack.c.bf16 %v578_v51, %v577_v50  ;;  %v1019_v55 = vpack.c.bf16 %v580_v54, %v579_v53  ;;  %v581_v56 = vld [vmem:[%s1355_s5 + $0x70] sm:$0xff]  ;;  %v582_v57 = vld [vmem:[%s1355_s5 + $0x78] sm:$0xff]  ;;  %v932_v7 = vld [vmem:[%s1351_s1 + $0x1] ss:$0 sm:$0xff] }
  0x27   : > { %1004 = vmatprep.subr.bf16.mxu0 %v1003_v43  ;;  %v1023_v58 = vpack.c.bf16 %v582_v57, %v581_v56  ;;  %v482_v56 = vstv %s478_s8 }
  0x29   : > { %307 = vadd.xlane.f32.xlu0 %v302_v5  ;;  %v931_v5 = vld [vmem:[%s1351_s1] ss:$0 sm:$0xff] }
  0x2a   : > { %1006 = vmatpush3.bf16.msra.mxu0 %v1003_v43  ;;  %v416_v10 = vcombine.high %v931_v5, %v931_v5 }
  0x2b   : > { %1008 = vmatprep.subr.bf16.mxu0 %v1007_v46 }
  0x2e   : > { %1010 = vmatpush3.bf16.msra.mxu0 %v1007_v46 }
  0x2f   : > { %1012 = vmatprep.subr.bf16.mxu0 %v1011_v49 }
  0x32   : > { %1014 = vmatpush3.bf16.msra.mxu0 %v1011_v49 }
  0x33   : > { %1016 = vmatprep.subr.bf16.mxu0 %v1015_v52 }
  0x36   : > { %1018 = vmatpush3.bf16.msra.mxu0 %v1015_v52 }
  0x37   : > { %1020 = vmatprep.subr.bf16.mxu0 %v1019_v55 }
  0x3a   : > { %1022 = vmatpush3.bf16.msra.mxu0 %v1019_v55 }
  0x3b   : > { %1024 = vmatprep.subr.bf16.mxu0 %v1023_v58 }
  0x3e   : > { %1026 = vmatpush3.bf16.msra.mxu0 %v1023_v58 }
  0xb2   : > { %v306_v16 = vpop.xlane.xlu0 %305 }
  0xb3   : > { %v310_v17 = vmul.f32 0.0078125, %v306_v16  ;;  %v428_v16 = vcombine.high %v932_v7, %v932_v7 }
  0xb5   : > { %v320_v18 = vrot.slane %v310_v17, %v1193_v14  ;;  %v327_v19 = vrot.slane %v310_v17, %v1196_v15 }
  0xb6   : > { %v308_v20 = vpop.xlane.xlu0 %307 }
  0xb7   : > { %v311_v21 = vmul.f32 0.0078125, %v308_v20  ;;  %v1201_v22 = vsub.f32 %v1178_v0, %v320_v18  ;;  %v1204_v23 = vsub.f32 %v1180_v1, %v327_v19 }
  0xb9   : > { %v334_v24 = vrot.slane %v311_v21, %v1193_v14  ;;  %v341_v25 = vrot.slane %v311_v21, %v1196_v15  ;;  %v350_v26 = vmul.f32 %v1201_v22, %v1201_v22  ;;  %v351_v27 = vmul.f32 %v1204_v23, %v1204_v23 }
  0xbb   : > { %v1213_v28 = vsub.f32 %v1182_v2, %v334_v24  ;;  %v1216_v29 = vsub.f32 %v1186_v4, %v341_v25  ;;  %v358_v30 = vcombine.low %v350_v26, %v351_v27 }
  0xbd   : > { %362 = vadd.xlane.f32.xlu1 %v358_v30  ;;  %v352_v31 = vmul.f32 %v1213_v28, %v1213_v28  ;;  %v353_v32 = vmul.f32 %v1216_v29, %v1216_v29 }
  0xbf   : > { %v359_v33 = vcombine.low %v352_v31, %v353_v32 }
  0xc1   : > { %364 = vadd.xlane.f32.xlu1 %v359_v33 }
 0x14a   : > { %v363_v59 = vpop.xlane.xlu1 %362 }
 0x14b   : > { %v366_v60 = vmul.f32 0.0078125, %v363_v59 }
 0x14d   : > { %v368_v61 = vadd.f32 1e-05, %v366_v60  ;;  %v484_v60 = vstv %s933_s10 }
 0x14e   : > { %v365_v62 = vpop.xlane.xlu1 %364 }
 0x14f   : > { %1051 = vrsqrt.f32 %v368_v61  ;;  %v367_v63 = vmul.f32 0.0078125, %v365_v62 }
 0x151   : > { %v369_v3 = vadd.f32 1e-05, %v367_v63 }
 0x153   : > { %1053 = vrsqrt.f32 %v369_v3 }
 0x159   : > { %v1052_v6 = vpop.eup %1051 }
 0x15a   : > { %v380_v8 = vrot.slane %v1052_v6, %v1193_v14  ;;  %v387_v9 = vrot.slane %v1052_v6, %v1196_v15 }
 0x15c   : > { %v406_v11 = vmul.f32 %v380_v8, %v1201_v22  ;;  %v407_v13 = vmul.f32 %v387_v9, %v1204_v23  ;;  %v505_v9 = vstv %s935_s12 }
 0x15d   : > { %v1054_v17 = vpop.eup %1053 }
 0x15e   : > { %v394_v18 = vrot.slane %v1054_v17, %v1193_v14  ;;  %v401_v19 = vrot.slane %v1054_v17, %v1196_v15  ;;  %v418_v20 = vmul.f32 %v931_v5, %v406_v11  ;;  %v419_v21 = vmul.f32 %v416_v10, %v407_v13 }
 0x160   : > { %v408_v24 = vmul.f32 %v394_v18, %v1213_v28  ;;  %v409_v25 = vmul.f32 %v401_v19, %v1216_v29  ;;  %v1284_v26 = vadd.f32 %v932_v7, %v418_v20  ;;  %v1286_v27 = vadd.f32 %v428_v16, %v419_v21 }
 0x162   : > { %v420_v30 = vmul.f32 %v931_v5, %v408_v24  ;;  %v421_v22 = vmul.f32 %v416_v10, %v409_v25  ;;  %673 = vst [vmem:[#allocation2 + $0x9] sm:$0xf] %v1284_v26  ;;  %674 = vst [vmem:[#allocation2 + $0x11] sm:$0xf] %v1286_v27  ;;  %v438_v15 = vcombine.low %v1284_v26, %v1286_v27  ;;  %v500_v5 = vstv %s934_s11 }
 0x164   : > { %v1290_v23 = vadd.f32 %v932_v7, %v420_v30  ;;  %v1292_v14 = vadd.f32 %v428_v16, %v421_v22 }
 0x166   : > { %v439_v28 = vcombine.low %v1290_v23, %v1292_v14  ;;  %675 = vst [vmem:[#allocation2 + $0x19] sm:$0xf] %v1290_v23  ;;  %676 = vst [vmem:[#allocation2 + $0x21] sm:$0xf] %v1292_v14 }
 0x168   : > { %v442_v29 = vadd.f32 %v439_v28, %v438_v15 }
 0x16a   : > { %v443_v31 = vrot.slane %v442_v29, 4 }
 0x16c   : > { %v444_v32 = vadd.f32 %v443_v31, %v442_v29 }
 0x16e   : > { %v445_v33 = vrot.slane %v444_v32, 2 }
 0x170   : > { %v446_v34 = vadd.f32 %v445_v33, %v444_v32 }
 0x172   : > { %v447_v35 = vrot.slane %v446_v34, 1 }
 0x174   : > { %v448_v36 = vadd.f32 %v447_v35, %v446_v34 }
 0x176   : > { %v450_v37 = vmul.f32 0.0625, %v448_v36 }
 0x178   : > { %v452_v38 = vcombine.high %v450_v37, %v450_v37  ;;  %v454_v39 = vsub.f32 %v1284_v26, %v450_v37  ;;  %v456_v40 = vsub.f32 %v1290_v23, %v450_v37  ;;  %v483_v58 = vmul.f32 %v482_v56, %v450_v37 }
 0x17a   : > { %v455_v41 = vsub.f32 %v1286_v27, %v452_v38  ;;  %v457_v42 = vsub.f32 %v1292_v14, %v452_v38  ;;  %v458_v43 = vmul.f32 %v454_v39, %v454_v39  ;;  %v460_v45 = vmul.f32 %v456_v40, %v456_v40 }
 0x17b   : > { %v485_v61 = vadd.f32 %v484_v60, %v483_v58 }
 0x17c   : > { %v459_v44 = vmul.f32 %v455_v41, %v455_v41  ;;  %v461_v46 = vmul.f32 %v457_v42, %v457_v42 }
 0x17d   : > { %v486_v62 = vsub.f32 0.0, %v485_v61 }
 0x17e   : > { %v466_v47 = vcombine.low %v458_v43, %v459_v44  ;;  %v467_v48 = vcombine.low %v460_v45, %v461_v46  ;;  %v530_v43 = vld [vmem:[%s1354_s4] sm:$0x1]  ;;  %v536_v46 = vsub.s32 0, %v1190_v12 }
 0x17f   : > { %v487_v3 = vmul.f32 1.442695, %v486_v62  ;;  %v532_v44 = vsub.f32 1.0, %v530_v43 }
 0x180   : > { %v470_v49 = vadd.f32 %v467_v48, %v466_v47 }
 0x182   : > { %v471_v50 = vrot.slane %v470_v49, 4 }
 0x184   : > { %v472_v51 = vadd.f32 %v471_v50, %v470_v49  ;;  %v537_v50 = vrot.slane %v532_v44, %v536_v46  ;;  %v749_v44 = vsub.s32 4, %v1190_v12 }
 0x186   : > { %v473_v52 = vrot.slane %v472_v51, 2 }
 0x188   : > { %v474_v53 = vadd.f32 %v473_v52, %v472_v51 }
 0x18a   : > { %v475_v54 = vrot.slane %v474_v53, 1 }
 0x18c   : > { %v476_v55 = vadd.f32 %v475_v54, %v474_v53 }
 0x18e   : > { %v477_v57 = vmul.f32 0.0625, %v476_v55 }
 0x190   : > { %v491_v59 = vadd.f32 1e-05, %v477_v57 }
 0x192   : > { %1055 = vrsqrt.f32 %v491_v59 }
 0x193   : > { %1057 = vpow2.f32 %v487_v3 }
 0x19c   : > { %v1056_v63 = vpop.eup %1055 }
 0x19d   : > { %v494_v6 = vcombine.high %v1056_v63, %v1056_v63  ;;  %v496_v7 = vmul.f32 %v1056_v63, %v454_v39  ;;  %v498_v8 = vmul.f32 %v1056_v63, %v456_v40  ;;  %v1058_v33 = vpop.eup %1057 }
 0x19e   : > { %v489_v34 = vadd.f32 1.0, %v1058_v33 }
 0x19f   : > { %v497_v10 = vmul.f32 %v494_v6, %v455_v41  ;;  %v499_v11 = vmul.f32 %v494_v6, %v457_v42  ;;  %v501_v13 = vmul.f32 %v500_v5, %v496_v7  ;;  %v503_v16 = vmul.f32 %v500_v5, %v498_v8 }
 0x1a0   : > { %v701_v8 = vsub.s32 1, %v1190_v12 }
 0x1a1   : > { %v502_v17 = vmul.f32 %v500_v5, %v497_v10  ;;  %v504_v18 = vmul.f32 %v500_v5, %v499_v11  ;;  %v506_v19 = vadd.f32 %v505_v9, %v501_v13  ;;  %v508_v20 = vadd.f32 %v505_v9, %v503_v16  ;;  %v697_v11 = vld [vmem:[#allocation2 + $0x11] sm:$0xf]  ;;  %v695_v13 = vld [vmem:[#allocation2 + $0x1] sm:$0xf]  ;;  %v682_v16 = vld [vmem:[#allocation2 + $0x18] sm:$0xf] }
 0x1a3   : > { %v507_v21 = vadd.f32 %v505_v9, %v502_v17  ;;  %v510_v24 = vsub.f32 0.0, %v506_v19  ;;  %v509_v25 = vadd.f32 %v505_v9, %v504_v18  ;;  %v512_v30 = vsub.f32 0.0, %v508_v20  ;;  %v1316_v9 = vld [vmem:[%s1352_s2] sm:$0xff]  ;;  %v698_v17 = vld [vmem:[#allocation2 + $0x19] sm:$0xf] }
 0x1a4   : > { %v686_v10 = vrot.slane %v1316_v9, %v536_v46  ;;  %v680_v20 = vld [vmem:[#allocation2 + $0x8] sm:$0xf] }
 0x1a5   : > { %v511_v22 = vsub.f32 0.0, %v507_v21  ;;  %v514_v15 = vmul.f32 1.442695, %v510_v24  ;;  %v513_v28 = vsub.f32 0.0, %v509_v25  ;;  %v518_v29 = vmul.f32 1.442695, %v512_v30 }
 0x1a6   : > { %v696_v21 = vld [vmem:[#allocation2 + $0x9] sm:$0xf]  ;;  %v733_v25 = vsub.s32 3, %v1190_v12 }
 0x1a7   : > { %1059 = vpow2.f32 %v514_v15  ;;  %v516_v31 = vmul.f32 1.442695, %v511_v22  ;;  %v520_v32 = vmul.f32 1.442695, %v513_v28  ;;  %v690_v15 = vmul.f32 %v686_v10, %v682_v16  ;;  %v762_v16 = vld [vmem:[#allocation2 + $0x22] sm:$0xf] }
 0x1a8   : > { %1061 = vpow2.f32 %v518_v29  ;;  %v711_v29 = vld [vmem:[#allocation2 + $0x2] sm:$0xf] }
 0x1a9   : > { %1063 = vpow2.f32 %v516_v31  ;;  %v713_v31 = vld [vmem:[#allocation2 + $0x12] sm:$0xf] }
 0x1aa   : > { %1065 = vpow2.f32 %v520_v32  ;;  %v688_v32 = vmul.f32 %v686_v10, %v680_v20 }
 0x1ab   : > { %1067 = vrcp.f32 %v489_v34 }
 0x1b1   : > { %v1060_v35 = vpop.eup %1059 }
 0x1b2   : > { %v1062_v36 = vpop.eup %1061  ;;  %v522_v37 = vadd.f32 1.0, %v1060_v35  ;;  %v714_v35 = vld [vmem:[#allocation2 + $0x1a] sm:$0xf] }
 0x1b3   : > { %v1064_v38 = vpop.eup %1063  ;;  %v524_v39 = vadd.f32 1.0, %v1062_v36  ;;  %v729_v36 = vld [vmem:[#allocation2 + $0x18] sm:$0xf] }
 0x1b4   : > { %v1066_v40 = vpop.eup %1065  ;;  %v523_v41 = vadd.f32 1.0, %v1064_v38  ;;  %1069 = vrcp.f32 %v522_v37  ;;  %v734_v37 = vrot.slane %v1316_v9, %v733_v25  ;;  %v779_v25 = vld [vmem:[#allocation2 + $0x28] sm:$0xf] }
 0x1b5   : > { %v525_v42 = vadd.f32 1.0, %v1066_v40  ;;  %1071 = vrcp.f32 %v524_v39  ;;  %v1068_v45 = vpop.eup %1067 }
 0x1b6   : > { %1073 = vrcp.f32 %v523_v41  ;;  %v531_v49 = vmul.f32 %v1068_v45, %v530_v43  ;;  %v727_v43 = vld [vmem:[#allocation2 + $0x8] sm:$0xf] }
 0x1b7   : > { %1075 = vrcp.f32 %v525_v42  ;;  %v712_v42 = vld [vmem:[#allocation2 + $0xa] sm:$0xf] }
 0x1b8   : > { %v553_v56 = vrot.slane %v531_v49, %v536_v46  ;;  %v730_v49 = vld [vmem:[#allocation2 + $0x20] sm:$0xf] }
 0x1be   : > { %v1070_v47 = vpop.eup %1069 }
 0x1bf   : > { %v1072_v48 = vpop.eup %1071 }
 0x1c0   : > { %v1074_v51 = vpop.eup %1073 }
 0x1c1   : > { %v1076_v52 = vpop.eup %1075  ;;  %v543_v53 = vcombine.low %v1070_v47, %v1074_v51 }
 0x1c2   : > { %v544_v54 = vcombine.low %v1072_v48, %v1076_v52  ;;  %v737_v48 = vmul.f32 %v734_v37, %v729_v36  ;;  %v735_v52 = vmul.f32 %v734_v37, %v727_v43 }
 0x1c3   : > { %v547_v55 = vmul.f32 %v543_v53, %v537_v50 }
 0x1c4   : > { %v548_v57 = vmul.f32 %v544_v54, %v537_v50  ;;  %v728_v54 = vld [vmem:[#allocation2 + $0x10] sm:$0xf] }
 0x1c5   : > { %v555_v58 = vadd.f32 %v553_v56, %v547_v55  ;;  %v745_v55 = vld [vmem:[#allocation2 + $0x19] sm:$0xf] }
 0x1c6   : > { %v556_v59 = vadd.f32 %v553_v56, %v548_v57  ;;  %v750_v56 = vrot.slane %v1316_v9, %v749_v44  ;;  %v765_v57 = vsub.s32 5, %v1190_v12 }
 0x1c7   : > { %v559_v60 = vcombine.high %v555_v58, %v555_v58  ;;  %v563_v62 = vmul.f32 %v555_v58, %v1284_v26  ;;  %v681_v26 = vld [vmem:[#allocation2 + $0x10] sm:$0xf] }
 0x1c8   : > { %v560_v61 = vcombine.high %v556_v59, %v556_v59  ;;  %v565_v3 = vmul.f32 %v556_v59, %v1290_v23  ;;  %v717_v23 = vsub.s32 2, %v1190_v12  ;;  %v689_v18 = vmul.f32 %v686_v10, %v681_v26 }
 0x1c9   : > { %v564_v63 = vmul.f32 %v559_v60, %v1286_v27  ;;  %v702_v27 = vrot.slane %v1316_v9, %v701_v8  ;;  %v738_v59 = vmul.f32 %v734_v37, %v730_v49  ;;  %v761_v8 = vld [vmem:[#allocation2 + $0x1a] sm:$0xf]  ;;  %v782_v26 = vsub.s32 6, %v1190_v12 }
 0x1ca   : > { %v566_v5 = vmul.f32 %v560_v61, %v1292_v14  ;;  %v679_v14 = vld [vmem:[#allocation2] sm:$0xf]  ;;  %v718_v24 = vrot.slane %v1316_v9, %v717_v23  ;;  %v743_v61 = vld [vmem:[#allocation2 + $0x9] sm:$0xf] }
 0x1cb   : > { %v587_v6 = vcombine.low %v563_v62, %v564_v63  ;;  %v705_v19 = vmul.f32 %v702_v27, %v697_v11  ;;  %v687_v30 = vmul.f32 %v686_v10, %v679_v14  ;;  %v703_v22 = vmul.f32 %v702_v27, %v695_v13  ;;  %v746_v62 = vld [vmem:[#allocation2 + $0x21] sm:$0xf]  ;;  %v759_v13 = vld [vmem:[#allocation2 + $0xa] sm:$0xf] }
 0x1cc   : > { %v588_v7 = vcombine.low %v565_v3, %v566_v5  ;;  %v706_v28 = vmul.f32 %v702_v27, %v698_v17  ;;  %v704_v33 = vmul.f32 %v702_v27, %v696_v21  ;;  %v719_v39 = vmul.f32 %v718_v24, %v711_v29  ;;  %v760_v21 = vld [vmem:[#allocation2 + $0x12] sm:$0xf] }
 0x1cd   : > { %992 = vmatprep.mubr.f32.mxu0 %v587_v6  ;;  %v709_v34 = vadd.f32 %v705_v19, %v689_v18  ;;  %v707_v38 = vadd.f32 %v703_v22, %v687_v30  ;;  %v721_v41 = vmul.f32 %v718_v24, %v713_v31  ;;  %v722_v46 = vmul.f32 %v718_v24, %v714_v35 }
 0x1ce   : > { %993 = vmatmul.mubr.f32.vlgmr.msra.gmra.mrb[0].mxu0 %v588_v7  ;;  %v710_v40 = vadd.f32 %v706_v28, %v690_v15  ;;  %v708_v45 = vadd.f32 %v704_v33, %v688_v32  ;;  %v720_v50 = vmul.f32 %v718_v24, %v712_v42  ;;  %v736_v63 = vmul.f32 %v734_v37, %v728_v54  ;;  %v744_v7 = vld [vmem:[#allocation2 + $0x11] sm:$0xf]  ;;  %v778_v24 = vld [vmem:[#allocation2 + $0x20] sm:$0xf] }
 0x1cf   : > { %v725_v47 = vadd.f32 %v721_v41, %v709_v34  ;;  %v723_v51 = vadd.f32 %v719_v39, %v707_v38  ;;  %v753_v6 = vmul.f32 %v750_v56, %v745_v55  ;;  %v766_v10 = vrot.slane %v1316_v9, %v765_v57  ;;  %v776_v32 = vld [vmem:[#allocation2 + $0x10] sm:$0xf]  ;;  %v777_v38 = vld [vmem:[#allocation2 + $0x18] sm:$0xf]  ;;  %v794_v39 = vld [vmem:[#allocation2 + $0x21] sm:$0xf] }
 0x1d0   : > { %v726_v53 = vadd.f32 %v722_v46, %v710_v40  ;;  %v724_v58 = vadd.f32 %v720_v50, %v708_v45  ;;  %v751_v27 = vmul.f32 %v750_v56, %v743_v61  ;;  %v754_v23 = vmul.f32 %v750_v56, %v746_v62  ;;  %v795_v40 = vld [vmem:[#allocation2 + $0x29] sm:$0xf]  ;;  %v792_v45 = vld [vmem:[#allocation2 + $0x11] sm:$0xf]  ;;  %v793_v50 = vld [vmem:[#allocation2 + $0x19] sm:$0xf] }
 0x1d1   : > { %v741_v60 = vadd.f32 %v737_v48, %v725_v47  ;;  %v739_v3 = vadd.f32 %v735_v52, %v723_v51  ;;  %v752_v17 = vmul.f32 %v750_v56, %v744_v7  ;;  %v769_v20 = vmul.f32 %v766_v10, %v761_v8  ;;  %v810_v51 = vld [vmem:[#allocation2 + $0x22] sm:$0xf]  ;;  %v811_v52 = vld [vmem:[#allocation2 + $0x2a] sm:$0xf]  ;;  %v936_v55 = vld [vmem:[%s1352_s2 + $0x8] ss:$0 sm:$0xff] }
 0x1d2   : > { %v742_v5 = vadd.f32 %v738_v59, %v726_v53  ;;  %v740_v11 = vadd.f32 %v736_v63, %v724_v58  ;;  %v783_v30 = vrot.slane %v1316_v9, %v782_v26  ;;  %v798_v22 = vsub.s32 7, %v1190_v12  ;;  %v809_v62 = vld [vmem:[#allocation2 + $0x1a] sm:$0xf] }
 0x1d3   : > { %v757_v14 = vadd.f32 %v753_v6, %v741_v60  ;;  %v755_v18 = vadd.f32 %v751_v27, %v739_v3  ;;  %v767_v28 = vmul.f32 %v766_v10, %v759_v13  ;;  %v770_v29 = vmul.f32 %v766_v10, %v762_v16 }
 0x1d4   : > { %v758_v19 = vadd.f32 %v754_v23, %v742_v5  ;;  %v756_v15 = vadd.f32 %v752_v17, %v740_v11  ;;  %v768_v33 = vmul.f32 %v766_v10, %v760_v21  ;;  %v786_v36 = vmul.f32 %v783_v30, %v778_v24  ;;  %v937_v10 = vld [vmem:[%s1353_s3] ss:$0 sm:$0xff] }
 0x1d5   : > { %v773_v31 = vadd.f32 %v769_v20, %v757_v14  ;;  %v771_v34 = vadd.f32 %v767_v28, %v755_v18  ;;  %v787_v37 = vmul.f32 %v783_v30, %v779_v25  ;;  %v799_v41 = vrot.slane %v1316_v9, %v798_v22  ;;  %v808_v9 = vld [vmem:[#allocation2 + $0x12] sm:$0xf] }
 0x1d6   : > { %v774_v35 = vadd.f32 %v770_v29, %v758_v19  ;;  %v772_v42 = vadd.f32 %v768_v33, %v756_v15  ;;  %v784_v43 = vmul.f32 %v783_v30, %v776_v32  ;;  %v785_v12 = vmul.f32 %v783_v30, %v777_v38 }
 0x1d7   : > { %v790_v44 = vadd.f32 %v786_v36, %v773_v31  ;;  %v802_v48 = vmul.f32 %v799_v41, %v794_v39  ;;  %v803_v49 = vmul.f32 %v799_v41, %v795_v40  ;;  %v800_v54 = vmul.f32 %v799_v41, %v792_v45 }
 0x1d8   : > { %v788_v46 = vadd.f32 %v784_v43, %v771_v34  ;;  %v791_v47 = vadd.f32 %v787_v37, %v774_v35  ;;  %v789_v53 = vadd.f32 %v785_v12, %v772_v42  ;;  %v801_v57 = vmul.f32 %v799_v41, %v793_v50 }
 0x1d9   : > { %v806_v56 = vadd.f32 %v802_v48, %v790_v44  ;;  %v818_v60 = vmul.f32 %v936_v55, %v810_v51  ;;  %v819_v61 = vmul.f32 %v936_v55, %v811_v52  ;;  %v816_v3 = vmul.f32 %v936_v55, %v808_v9 }
 0x1da   : > { %v804_v58 = vadd.f32 %v800_v54, %v788_v46  ;;  %v807_v59 = vadd.f32 %v803_v49, %v791_v47  ;;  %v805_v63 = vadd.f32 %v801_v57, %v789_v53  ;;  %v817_v6 = vmul.f32 %v936_v55, %v809_v62 }
 0x1db   : > { %v822_v5 = vadd.f32 %v818_v60, %v806_v56 }
 0x1dc   : > { %v820_v7 = vadd.f32 %v816_v3, %v804_v58  ;;  %v823_v8 = vadd.f32 %v819_v61, %v807_v59  ;;  %v821_v26 = vadd.f32 %v817_v6, %v805_v63 }
 0x1dd   : > { %v833_v11 = vadd.f32 %v937_v10, %v822_v5 }
 0x1de   : > { %v831_v23 = vadd.f32 %v937_v10, %v820_v7  ;;  %v834_v14 = vadd.f32 %v937_v10, %v823_v8  ;;  %v832_v18 = vadd.f32 %v937_v10, %v821_v26 }
 0x2a1   : > { %v994_v27 = vpop.f32.mrb[0].mxu0 }
 0x2a2   : > { %v838_v13 = vcombine.high %v994_v27, %v994_v27  ;;  %v843_v16 = vmul.f32 %v994_v27, %v833_v11  ;;  %v657_v17 = vpop.f32.mrb[1].mxu0 }
 0x2a3   : > { %v837_v19 = vcombine.high %v657_v17, %v657_v17  ;;  %v841_v20 = vmul.f32 %v831_v23, %v657_v17 }
 0x2a4   : > { %v844_v21 = vmul.f32 %v838_v13, %v834_v14  ;;  %v847_v24 = vadd.f32 %v843_v16, %v1182_v2 }
 0x2a5   : > { %v842_v25 = vmul.f32 %v837_v19, %v832_v18  ;;  %v845_v30 = vadd.f32 %v841_v20, %v1178_v0 }
 0x2a6   : > { %v848_v22 = vadd.f32 %v844_v21, %v1186_v4  ;;  %851 = vst [vmem:[%s292_s23 + $0x8] sm:$0xf] %v847_v24 }
 0x2a7   : > { %v846_v15 = vadd.f32 %v842_v25, %v1180_v1  ;;  %849 = vst [vmem:[%s292_s23] sm:$0xf] %v845_v30 }
 0x2a8   : > { %852 = vst [vmem:[%s292_s23 + $0xc] sm:$0xf] %v848_v22 }
 0x2a9   : > { %850 = vst [vmem:[%s292_s23 + $0x4] sm:$0xf] %v846_v15 }
 0x2aa PF: > { %s18_s24 = sadd.s32 1, %s1102_s24  }
 0x2ab   : > { %p15_p1 = scmp.ge.s32.totalorder %s18_s24, 4  }
 0x2ad   :  { %17 = sbr.rel (!%p15_p1) target bundleno = 1 (0x1), region = 85 }
 0x2b4   :  { %874 = vsyncpa [#allocation4], 1 }
 0x2b5   :  { %876 = vsyncpa [#allocation4 + $0x1], 1 }

// kernel: denoiser_forward.12
= control target key start
LH: loop header
LB: loop body
LE: loop exit
PB: predicated region body
PF: predicated region fallthrough
CT: control target
= control target key end

     0   :  { %s2085_s12 = smov 0   ;;  %s2087_s13 = smov 0   ;;  %s2455_s0 = inlined_call_operand.vmem [shape: f32[2,20,5,128], index: 0, kind: input, shape index: {}]   ;;  %s2456_s1 = inlined_call_operand.vmem [shape: bf16[9,128,128], index: 1, kind: input, shape index: {}]   ;;  %s2457_s2 = inlined_call_operand.vmem [shape: f32[1,128], index: 2, kind: input, shape index: {}]   ;;  %s2458_s3 = inlined_call_operand.vmem [shape: f32[2,4,4,128], index: 3, kind: output, shape index: {}]  }
   0x1   :  { %s2089_s14 = smov 0  }
   0x2 LB: > { %s25_s15 = sadd.s32 1, %s2057_s13  ;;  %p1425_p0 = scmp.ge.s32.totalorder %s2061_s14, 1  ;;  %s2061_s14 = sphi %s2089_s14, %s13_s14   ;;  %s2057_s13 = sphi %s2087_s13, %s2460_s13   ;;  %s2053_s12 = sphi %s2085_s12, %s2459_s12  }
   0x3   : > { %p27_p1 = scmp.ge.s32.totalorder %s25_s15, 2  ;;  %p151_p2 = scmp.lt.s32.totalorder %s2061_s14, 3 }
   0x5   : > { %s2462_s15 = smov (%p27_p1, %s25_s15), 0  ;;  %p152_p3 = pnand %p1425_p0, %p151_p2 }
   0x6   : > { %v1949_v0 = vld [vmem:[%s2456_s1 + $0x40] sm:$0xff] (!%p152_p3)   ;;  %v2063_v1 = vmov (!%p152_p3), 0.0   ;;  %v1951_v3 = vld [vmem:[%s2456_s1 + $0x48] sm:$0xff] (!%p152_p3)   ;;  %vm2064_vm0 = vmmov (!%p152_p3), 0   ;;  %p179_p4 = scmp.lt.s32.totalorder (!%p152_p3), %s2053_s12, 1  ;;  %v1953_v5 = vld [vmem:[%s2456_s1 + $0x50] sm:$0xff] (!%p152_p3)  }
   0x7   : > { %155 = sbr.rel (%p152_p3) target bundleno = 390 (0x186), region = 32  ;;  %1742 = vmatprep.subr.bf16.mxu0 (!%p152_p3), %v2063_v1  ;;  %1762 = vmatprep.subr.bf16.mxu1 (!%p152_p3), %v2063_v1  ;;  %v1950_v2 = vld [vmem:[%s2456_s1] sm:$0xff] (!%p152_p3)   ;;  %v1952_v4 = vld [vmem:[%s2456_s1 + $0x8] sm:$0xff] (!%p152_p3)   ;;  %v1954_v6 = vld [vmem:[%s2456_s1 + $0x10] sm:$0xff] (!%p152_p3)  }
   0x8   : > { %1743 = vmatpush3.bf16.msra.mxu0 (!%p152_p3), %v1949_v0  ;;  %1758 = vmatprep.mubr.msk.bf16.mxu0 (!%p152_p3), %vm2064_vm0, %v2063_v1  ;;  %v1955_v7 = vld [vmem:[%s2456_s1 + $0x58] sm:$0xff] (!%p152_p3)   ;;  %v1957_v9 = vld [vmem:[%s2456_s1 + $0x60] sm:$0xff] (!%p152_p3)   ;;  %v1959_v11 = vld [vmem:[%s2456_s1 + $0x68] sm:$0xff] (!%p152_p3)  }
   0x9   : > { %1763 = vmatpush3.bf16.msra.mxu1 (!%p152_p3), %v1950_v2  ;;  %1744 = vmatprep.subr.bf16.mxu0 (!%p152_p3), %v2063_v1  ;;  %v1956_v8 = vld [vmem:[%s2456_s1 + $0x18] sm:$0xff] (!%p152_p3)   ;;  %v1958_v10 = vld [vmem:[%s2456_s1 + $0x20] sm:$0xff] (!%p152_p3)   ;;  %v1960_v12 = vld [vmem:[%s2456_s1 + $0x28] sm:$0xff] (!%p152_p3)  }
   0xa   : > { %1764 = vmatprep.subr.bf16.mxu1 (!%p152_p3), %v2063_v1  ;;  %1778 = vmatprep.mubr.msk.bf16.mxu1 (!%p152_p3), %vm2064_vm0, %v2063_v1  ;;  %v1961_v13 = vld [vmem:[%s2456_s1 + $0x70] sm:$0xff] (!%p152_p3)   ;;  %v1963_v16 = vld [vmem:[%s2456_s1 + $0x78] sm:$0xff] (!%p152_p3)   ;;  %v1969_v23 = vld [vmem:[%s2456_s1 + $0x80] sm:$0xff] (!%p152_p3)  }
   0xb   : > { %v1962_v14 = vld [vmem:[%s2456_s1 + $0x30] sm:$0xff] (!%p152_p3)   ;;  %v1964_v20 = vld [vmem:[%s2456_s1 + $0x38] sm:$0xff] (!%p152_p3)   ;;  %v1970_v24 = vld [vmem:[%s2456_s1 + $0xc0] sm:$0xff] (!%p152_p3)  }
   0xc   : > { %1745 = vmatpush3.bf16.msra.mxu0 (!%p152_p3), %v1951_v3  ;;  %v1971_v25 = vld [vmem:[%s2456_s1 + $0x88] sm:$0xff] (!%p152_p3)   ;;  %v1973_v27 = vld [vmem:[%s2456_s1 + $0x90] sm:$0xff] (!%p152_p3)   ;;  %v1975_v29 = vld [vmem:[%s2456_s1 + $0x98] sm:$0xff] (!%p152_p3)  }
   0xd   : > { %1765 = vmatpush3.bf16.msra.mxu1 (!%p152_p3), %v1952_v4  ;;  %1746 = vmatprep.subr.bf16.mxu0 (!%p152_p3), %v2063_v1  ;;  %v1972_v26 = vld [vmem:[%s2456_s1 + $0xc8] sm:$0xff] (!%p152_p3)   ;;  %v1974_v28 = vld [vmem:[%s2456_s1 + $0xd0] sm:$0xff] (!%p152_p3)   ;;  %v1976_v30 = vld [vmem:[%s2456_s1 + $0xd8] sm:$0xff] (!%p152_p3)  }
   0xe   : > { %s2464_s12 = smov (!%p179_p4, %s2053_s12), 1  ;;  %1766 = vmatprep.subr.bf16.mxu1 %v2063_v1  ;;  %v1977_v31 = vld [vmem:[%s2456_s1 + $0xa0] sm:$0xff]   ;;  %v1979_v33 = vld [vmem:[%s2456_s1 + $0xa8] sm:$0xff]   ;;  %v1981_v35 = vld [vmem:[%s2456_s1 + $0xb0] sm:$0xff]  }
   0xf   : > { %s1922_s5 = smul.u32 160, %s2464_s12  ;;  %v1978_v32 = vld [vmem:[%s2456_s1 + $0xe0] sm:$0xff]   ;;  %v1980_v34 = vld [vmem:[%s2456_s1 + $0xe8] sm:$0xff]   ;;  %v1982_v36 = vld [vmem:[%s2456_s1 + $0xf0] sm:$0xff]  }
  0x10   : > { %1747 = vmatpush3.bf16.msra.mxu0 %v1953_v5  ;;  %v1983_v38 = vld [vmem:[%s2456_s1 + $0xb8] sm:$0xff]   ;;  %v1987_v44 = vld [vmem:[%s2456_s1 + $0x100] sm:$0xff]   ;;  %v1991_v47 = vld [vmem:[%s2456_s1 + $0x108] sm:$0xff]  }
  0x11   : > { %1767 = vmatpush3.bf16.msra.mxu1 %v1954_v6  ;;  %1748 = vmatprep.subr.bf16.mxu0 %v2063_v1  ;;  %s2156_s16 = scalar_lea.vmem %s2455_s0, %s1922_s5  ;;  %v1984_v39 = vld [vmem:[%s2456_s1 + $0xf8] sm:$0xff]   ;;  %v1990_v46 = vld [vmem:[%s2456_s1 + $0x140] sm:$0xff]   ;;  %v1992_v48 = vld [vmem:[%s2456_s1 + $0x148] sm:$0xff]   ;;  %s1660_s5 = sshll.u32 %s2464_s12, 4 }
  0x12   : > { %1768 = vmatprep.subr.bf16.mxu1 %v2063_v1  ;;  %v1965_v15 = vld [vmem:[%s2156_s16 + $0x28] ss:$8 sps:$4 sm:$0xff]   ;;  %v1966_v17 = vld [vmem:[%s2156_s16 + $0x38] ss:$8 sps:$4 sm:$0xff]   ;;  %s192_s8 = scalar_lea.vmem %s2458_s3, %s1660_s5 }
  0x13   : > { %v1967_v18 = vld [vmem:[%s2156_s16] ss:$8 sps:$4 sm:$0xff]   ;;  %v1968_v19 = vld [vmem:[%s2156_s16 + $0x10] ss:$8 sps:$4 sm:$0xff]   ;;  %v242_v21 = vpack.c.bf16 %v1966_v17, %v1965_v15 }
  0x14   : > { %1749 = vmatpush3.bf16.msra.mxu0 %v1955_v7  ;;  %v210_v22 = vpack.c.bf16 %v1968_v19, %v1967_v18  ;;  %v1985_v37 = vld [vmem:[%s2156_s16 + $0x1] ss:$8 sps:$4 sm:$0xff]   ;;  %v1986_v40 = vld [vmem:[%s2156_s16 + $0x11] ss:$8 sps:$4 sm:$0xff]  }
  0x15   : > { %1769 = vmatpush3.bf16.msra.mxu1 %v1956_v8  ;;  %1750 = vmatprep.subr.bf16.mxu0 %v2063_v1  ;;  %v1988_v41 = vld [vmem:[%s2156_s16 + $0x50] ss:$8 sps:$4 sm:$0xff]   ;;  %v1989_v42 = vld [vmem:[%s2156_s16 + $0x60] ss:$8 sps:$4 sm:$0xff]   ;;  %v450_v43 = vpack.c.bf16 %v1986_v40, %v1985_v37 }
  0x16   : > { %1770 = vmatprep.subr.bf16.mxu1 %v2063_v1  ;;  %v574_v45 = vpack.c.bf16 %v1989_v42, %v1988_v41  ;;  %v1993_v49 = vld [vmem:[%s2456_s1 + $0x110] sm:$0xff]   ;;  %v1995_v51 = vld [vmem:[%s2456_s1 + $0x118] sm:$0xff]   ;;  %v1997_v53 = vld [vmem:[%s2456_s1 + $0x120] sm:$0xff]  }
  0x17   : > { %v1994_v50 = vld [vmem:[%s2456_s1 + $0x150] sm:$0xff]   ;;  %v1996_v52 = vld [vmem:[%s2456_s1 + $0x158] sm:$0xff]   ;;  %v1998_v54 = vld [vmem:[%s2456_s1 + $0x160] sm:$0xff]  }
  0x18   : > { %1751 = vmatpush3.bf16.msra.mxu0 %v1957_v9  ;;  %v1999_v55 = vld [vmem:[%s2456_s1 + $0x128] sm:$0xff]   ;;  %v2001_v57 = vld [vmem:[%s2456_s1 + $0x130] sm:$0xff]   ;;  %v2005_v59 = vld [vmem:[%s2156_s16 + $0x78] ss:$8 sps:$4 sm:$0xff]  }
  0x19   : > { %1771 = vmatpush3.bf16.msra.mxu1 %v1958_v10  ;;  %1752 = vmatprep.subr.bf16.mxu0 %v2063_v1  ;;  %v2000_v56 = vld [vmem:[%s2456_s1 + $0x168] sm:$0xff]   ;;  %v2002_v58 = vld [vmem:[%s2456_s1 + $0x170] sm:$0xff]   ;;  %v2003_v61 = vld [vmem:[%s2456_s1 + $0x138] sm:$0xff]  }
  0x1a   : > { %1772 = vmatprep.subr.bf16.mxu1 %v2063_v1  ;;  %v2006_v60 = vld [vmem:[%s2156_s16 + $0x88] ss:$8 sps:$4 sm:$0xff]   ;;  %v2004_v0 = vld [vmem:[%s2456_s1 + $0x178] sm:$0xff]   ;;  %v2007_v3 = vld [vmem:[%s2456_s1 + $0x180] sm:$0xff]  }
  0x1b   : > { %v2008_v62 = vld [vmem:[%s2156_s16 + $0x51] ss:$8 sps:$4 sm:$0xff]   ;;  %v2009_v63 = vld [vmem:[%s2156_s16 + $0x61] ss:$8 sps:$4 sm:$0xff]   ;;  %v698_v2 = vpack.c.bf16 %v2006_v60, %v2005_v59 }
  0x1c   : > { %1753 = vmatpush3.bf16.msra.mxu0 %v1959_v11  ;;  %v819_v4 = vpack.c.bf16 %v2009_v63, %v2008_v62  ;;  %v2010_v5 = vld [vmem:[%s2456_s1 + $0x1c0] sm:$0xff]   ;;  %v2011_v6 = vld [vmem:[%s2456_s1 + $0x188] sm:$0xff]   ;;  %v2013_v8 = vld [vmem:[%s2456_s1 + $0x190] sm:$0xff]  }
  0x1d   : > { %1773 = vmatpush3.bf16.msra.mxu1 %v1960_v12  ;;  %1754 = vmatprep.subr.bf16.mxu0 %v2063_v1  ;;  %v2012_v7 = vld [vmem:[%s2456_s1 + $0x1c8] sm:$0xff]   ;;  %v2014_v9 = vld [vmem:[%s2456_s1 + $0x1d0] sm:$0xff]   ;;  %v2015_v10 = vld [vmem:[%s2456_s1 + $0x198] sm:$0xff]  }
  0x1e   : > { %1774 = vmatprep.subr.bf16.mxu1 %v2063_v1  ;;  %v2016_v11 = vld [vmem:[%s2456_s1 + $0x1d8] sm:$0xff]   ;;  %v2017_v12 = vld [vmem:[%s2456_s1 + $0x1a0] sm:$0xff]   ;;  %v2020_v15 = vld [vmem:[%s2456_s1 + $0x1e8] sm:$0xff]  }
  0x1f   : > { %v2022_v17 = vld [vmem:[%s2456_s1 + $0x1f0] sm:$0xff]   ;;  %v2026_v19 = vld [vmem:[%s2156_s16 + $0x18] ss:$8 sps:$4 sm:$0xff]  }
  0x20   : > { %1755 = vmatpush3.bf16.msra.mxu0 %v1961_v13  ;;  %v2018_v13 = vld [vmem:[%s2456_s1 + $0x1e0] sm:$0xff]   ;;  %v2025_v18 = vld [vmem:[%s2156_s16 + $0x8] ss:$8 sps:$4 sm:$0xff]  }
  0x21   : > { %1775 = vmatpush3.bf16.msra.mxu1 %v1962_v14  ;;  %1756 = vmatprep.subr.bf16.mxu0 %v2063_v1  ;;  %v2019_v14 = vld [vmem:[%s2456_s1 + $0x1a8] sm:$0xff]  }
  0x22   : > { %1776 = vmatprep.subr.bf16.mxu1 %v2063_v1 }
  0x24   : > { %1757 = vmatpush3.bf16.msra.mxu0 %v1963_v16  ;;  %v2021_v16 = vld [vmem:[%s2456_s1 + $0x1b0] sm:$0xff]  }
  0x25   : > { %1777 = vmatpush3.bf16.msra.mxu1 %v1964_v20  ;;  %1782 = vmatprep.subr.bf16.mxu0 %v2063_v1  ;;  %v2023_v20 = vld [vmem:[%s2456_s1 + $0x1b8] sm:$0xff]  }
  0x26   : > { %1802 = vmatprep.subr.bf16.mxu1 %v2063_v1 }
  0x27   : > { %1759 = vmatmul.mubr.bf16.vlgmr.msra.gmra.mrb[0].mxu0 %v242_v21  ;;  %v2028_v21 = vld [vmem:[%s2156_s16 + $0x30] ss:$8 sps:$4 sm:$0xff]  }
  0x28   : > { %1779 = vmatmul.mubr.bf16.vlgmr.msra.gmra.mrb[0].mxu1 %v210_v22  ;;  %1783 = vmatpush3.bf16.msra.mxu0 %v1969_v23  ;;  %v2029_v22 = vld [vmem:[%s2156_s16 + $0x40] ss:$8 sps:$4 sm:$0xff]   ;;  %v2024_v23 = vld [vmem:[%s2456_s1 + $0x1f8] sm:$0xff]  }
  0x29   : > { %1803 = vmatpush3.bf16.msra.mxu1 %v1970_v24  ;;  %1784 = vmatprep.subr.bf16.mxu0 %v2063_v1  ;;  %v943_v24 = vpack.c.bf16 %v2026_v19, %v2025_v18 }
  0x2a   : > { %1804 = vmatprep.subr.bf16.mxu1 %v2063_v1  ;;  %1798 = vmatprep.mubr.msk.bf16.mxu0 %vm2064_vm0, %v2063_v1 }
  0x2b   : > { %1818 = vmatprep.mubr.msk.bf16.mxu1 %vm2064_vm0, %v2063_v1 }
  0x2c   : > { %1785 = vmatpush3.bf16.msra.mxu0 %v1971_v25  ;;  %v2027_v25 = vld [vmem:[%s2456_s1 + $0x200] sm:$0xff]  }
  0x2d   : > { %1805 = vmatpush3.bf16.msra.mxu1 %v1972_v26  ;;  %1786 = vmatprep.subr.bf16.mxu0 %v2063_v1  ;;  %v1067_v26 = vpack.c.bf16 %v2029_v22, %v2028_v21 }
  0x2e   : > { %1806 = vmatprep.subr.bf16.mxu1 %v2063_v1 }
  0x30   : > { %1787 = vmatpush3.bf16.msra.mxu0 %v1973_v27  ;;  %v2030_v27 = vld [vmem:[%s2456_s1 + $0x208] sm:$0xff]  }
  0x31   : > { %1807 = vmatpush3.bf16.msra.mxu1 %v1974_v28  ;;  %1788 = vmatprep.subr.bf16.mxu0 %v2063_v1  ;;  %v2031_v28 = vld [vmem:[%s2456_s1 + $0x210] sm:$0xff]  }
  0x32   : > { %1808 = vmatprep.subr.bf16.mxu1 %v2063_v1 }
  0x34   : > { %1789 = vmatpush3.bf16.msra.mxu0 %v1975_v29  ;;  %v2032_v29 = vld [vmem:[%s2456_s1 + $0x218] sm:$0xff]  }
  0x35   : > { %1809 = vmatpush3.bf16.msra.mxu1 %v1976_v30  ;;  %1790 = vmatprep.subr.bf16.mxu0 %v2063_v1  ;;  %v2033_v30 = vld [vmem:[%s2456_s1 + $0x220] sm:$0xff]  }
  0x36   : > { %1810 = vmatprep.subr.bf16.mxu1 %v2063_v1 }
  0x38   : > { %1791 = vmatpush3.bf16.msra.mxu0 %v1977_v31  ;;  %v2034_v31 = vld [vmem:[%s2456_s1 + $0x228] sm:$0xff]  }
  0x39   : > { %1811 = vmatpush3.bf16.msra.mxu1 %v1978_v32  ;;  %1792 = vmatprep.subr.bf16.mxu0 %v2063_v1  ;;  %v2035_v32 = vld [vmem:[%s2456_s1 + $0x230] sm:$0xff]  }
  0x3a   : > { %1812 = vmatprep.subr.bf16.mxu1 %v2063_v1 }
  0x3c   : > { %1793 = vmatpush3.bf16.msra.mxu0 %v1979_v33  ;;  %v2037_v33 = vld [vmem:[%s2156_s16 + $0x9] ss:$8 sps:$4 sm:$0xff]  }
  0x3d   : > { %1813 = vmatpush3.bf16.msra.mxu1 %v1980_v34  ;;  %1794 = vmatprep.subr.bf16.mxu0 %v2063_v1  ;;  %v2038_v34 = vld [vmem:[%s2156_s16 + $0x19] ss:$8 sps:$4 sm:$0xff]  }
  0x3e   : > { %1814 = vmatprep.subr.bf16.mxu1 %v2063_v1 }
  0x40   : > { %1795 = vmatpush3.bf16.msra.mxu0 %v1981_v35  ;;  %v2036_v35 = vld [vmem:[%s2456_s1 + $0x238] sm:$0xff]  }
  0x41   : > { %1815 = vmatpush3.bf16.msra.mxu1 %v1982_v36  ;;  %1796 = vmatprep.subr.bf16.mxu0 %v2063_v1  ;;  %v1188_v36 = vpack.c.bf16 %v2038_v34, %v2037_v33 }
  0x42   : > { %1816 = vmatprep.subr.bf16.mxu1 %v2063_v1 }
  0x44   : > { %1797 = vmatpush3.bf16.msra.mxu0 %v1983_v38 }
  0x45   : > { %1817 = vmatpush3.bf16.msra.mxu1 %v1984_v39  ;;  %1822 = vmatprep.subr.bf16.mxu0 %v2063_v1 }
  0x46   : > { %1842 = vmatprep.subr.bf16.mxu1 %v2063_v1 }
  0x47   : > { %1799 = vmatmul.mubr.bf16.vlgmr.msra.gmra.mrb[4].mxu0 %v450_v43 }
  0x48   : > { %1823 = vmatpush3.bf16.msra.mxu0 %v1987_v44  ;;  %1819 = vmatmul.mubr.bf16.vlgmr.msra.gmra.mrb[4].mxu1 %v574_v45 }
  0x49   : > { %1843 = vmatpush3.bf16.msra.mxu1 %v1990_v46  ;;  %1824 = vmatprep.subr.bf16.mxu0 %v2063_v1 }
  0x4a   : > { %1844 = vmatprep.subr.bf16.mxu1 %v2063_v1  ;;  %1838 = vmatprep.mubr.msk.bf16.mxu0 %vm2064_vm0, %v2063_v1 }
  0x4b   : > { %1858 = vmatprep.mubr.msk.bf16.mxu1 %vm2064_vm0, %v2063_v1 }
  0x4c   : > { %1825 = vmatpush3.bf16.msra.mxu0 %v1991_v47 }
  0x4d   : > { %1845 = vmatpush3.bf16.msra.mxu1 %v1992_v48  ;;  %1826 = vmatprep.subr.bf16.mxu0 %v2063_v1 }
  0x4e   : > { %1846 = vmatprep.subr.bf16.mxu1 %v2063_v1 }
  0x50   : > { %1827 = vmatpush3.bf16.msra.mxu0 %v1993_v49 }
  0x51   : > { %1847 = vmatpush3.bf16.msra.mxu1 %v1994_v50  ;;  %1828 = vmatprep.subr.bf16.mxu0 %v2063_v1 }
  0x52   : > { %1848 = vmatprep.subr.bf16.mxu1 %v2063_v1 }
  0x54   : > { %1829 = vmatpush3.bf16.msra.mxu0 %v1995_v51 }
  0x55   : > { %1849 = vmatpush3.bf16.msra.mxu1 %v1996_v52  ;;  %1830 = vmatprep.subr.bf16.mxu0 %v2063_v1 }
  0x56   : > { %1850 = vmatprep.subr.bf16.mxu1 %v2063_v1 }
  0x58   : > { %1831 = vmatpush3.bf16.msra.mxu0 %v1997_v53 }
  0x59   : > { %1851 = vmatpush3.bf16.msra.mxu1 %v1998_v54  ;;  %1832 = vmatprep.subr.bf16.mxu0 %v2063_v1 }
  0x5a   : > { %1852 = vmatprep.subr.bf16.mxu1 %v2063_v1 }
  0x5c   : > { %1833 = vmatpush3.bf16.msra.mxu0 %v1999_v55 }
  0x5d   : > { %1853 = vmatpush3.bf16.msra.mxu1 %v2000_v56  ;;  %1834 = vmatprep.subr.bf16.mxu0 %v2063_v1 }
  0x5e   : > { %1854 = vmatprep.subr.bf16.mxu1 %v2063_v1 }
  0x60   : > { %1835 = vmatpush3.bf16.msra.mxu0 %v2001_v57 }
  0x61   : > { %1855 = vmatpush3.bf16.msra.mxu1 %v2002_v58  ;;  %1836 = vmatprep.subr.bf16.mxu0 %v2063_v1 }
  0x62   : > { %1856 = vmatprep.subr.bf16.mxu1 %v2063_v1 }
  0x64   : > { %1837 = vmatpush3.bf16.msra.mxu0 %v2003_v61 }
  0x65   : > { %1857 = vmatpush3.bf16.msra.mxu1 %v2004_v0  ;;  %1862 = vmatprep.subr.bf16.mxu0 %v2063_v1 }
  0x66   : > { %1882 = vmatprep.subr.bf16.mxu1 %v2063_v1 }
  0x67   : > { %1839 = vmatmul.mubr.bf16.vlgmr.msra.gmra.mrb[8].mxu0 %v698_v2 }
  0x68   : > { %1863 = vmatpush3.bf16.msra.mxu0 %v2007_v3  ;;  %1859 = vmatmul.mubr.bf16.vlgmr.msra.gmra.mrb[8].mxu1 %v819_v4 }
  0x69   : > { %1883 = vmatpush3.bf16.msra.mxu1 %v2010_v5  ;;  %1864 = vmatprep.subr.bf16.mxu0 %v2063_v1 }
  0x6a   : > { %1884 = vmatprep.subr.bf16.mxu1 %v2063_v1  ;;  %1878 = vmatprep.mubr.msk.bf16.mxu0 %vm2064_vm0, %v2063_v1 }
  0x6b   : > { %1898 = vmatprep.mubr.msk.bf16.mxu1 %vm2064_vm0, %v2063_v1 }
  0x6c   : > { %1865 = vmatpush3.bf16.msra.mxu0 %v2011_v6 }
  0x6d   : > { %1885 = vmatpush3.bf16.msra.mxu1 %v2012_v7  ;;  %1866 = vmatprep.subr.bf16.mxu0 %v2063_v1 }
  0x6e   : > { %1886 = vmatprep.subr.bf16.mxu1 %v2063_v1 }
  0x70   : > { %1867 = vmatpush3.bf16.msra.mxu0 %v2013_v8 }
  0x71   : > { %1887 = vmatpush3.bf16.msra.mxu1 %v2014_v9  ;;  %1868 = vmatprep.subr.bf16.mxu0 %v2063_v1 }
  0x72   : > { %1888 = vmatprep.subr.bf16.mxu1 %v2063_v1 }
  0x74   : > { %1869 = vmatpush3.bf16.msra.mxu0 %v2015_v10 }
  0x75   : > { %1889 = vmatpush3.bf16.msra.mxu1 %v2016_v11  ;;  %1870 = vmatprep.subr.bf16.mxu0 %v2063_v1 }
  0x76   : > { %1890 = vmatprep.subr.bf16.mxu1 %v2063_v1 }
  0x78   : > { %1871 = vmatpush3.bf16.msra.mxu0 %v2017_v12 }
  0x79   : > { %1891 = vmatpush3.bf16.msra.mxu1 %v2018_v13  ;;  %1872 = vmatprep.subr.bf16.mxu0 %v2063_v1 }
  0x7a   : > { %1892 = vmatprep.subr.bf16.mxu1 %v2063_v1 }
  0x7c   : > { %1873 = vmatpush3.bf16.msra.mxu0 %v2019_v14 }
  0x7d   : > { %1893 = vmatpush3.bf16.msra.mxu1 %v2020_v15  ;;  %1874 = vmatprep.subr.bf16.mxu0 %v2063_v1 }
  0x7e   : > { %1894 = vmatprep.subr.bf16.mxu1 %v2063_v1 }
  0x80   : > { %1875 = vmatpush3.bf16.msra.mxu0 %v2021_v16 }
  0x81   : > { %1895 = vmatpush3.bf16.msra.mxu1 %v2022_v17  ;;  %1876 = vmatprep.subr.bf16.mxu0 %v2063_v1 }
  0x82   : > { %1896 = vmatprep.subr.bf16.mxu1 %v2063_v1 }
  0x84   : > { %1877 = vmatpush3.bf16.msra.mxu0 %v2023_v20  ;;  %v1657_v20 = vld [vmem:[%s2457_s2] ss:$0 sm:$0xff] }
  0x85   : > { %1897 = vmatpush3.bf16.msra.mxu1 %v2024_v23  ;;  %1902 = vmatprep.subr.bf16.mxu0 %v2063_v1 }
  0x87   : > { %1879 = vmatmul.mubr.bf16.vlgmr.msra.gmra.mrb[12].mxu0 %v943_v24 }
  0x88   : > { %1903 = vmatpush3.bf16.msra.mxu0 %v2027_v25  ;;  %1899 = vmatmul.mubr.bf16.vlgmr.msra.gmra.mrb[12].mxu1 %v1067_v26 }
  0x89   : > { %1904 = vmatprep.subr.bf16.mxu0 %v2063_v1  ;;  %1918 = vmatprep.mubr.msk.bf16.mxu0 %vm2064_vm0, %v2063_v1 }
  0x8c   : > { %1905 = vmatpush3.bf16.msra.mxu0 %v2030_v27 }
  0x8d   : > { %1906 = vmatprep.subr.bf16.mxu0 %v2063_v1 }
  0x90   : > { %1907 = vmatpush3.bf16.msra.mxu0 %v2031_v28 }
  0x91   : > { %1908 = vmatprep.subr.bf16.mxu0 %v2063_v1 }
  0x94   : > { %1909 = vmatpush3.bf16.msra.mxu0 %v2032_v29 }
  0x95   : > { %1910 = vmatprep.subr.bf16.mxu0 %v2063_v1 }
  0x98   : > { %1911 = vmatpush3.bf16.msra.mxu0 %v2033_v30 }
  0x99   : > { %1912 = vmatprep.subr.bf16.mxu0 %v2063_v1 }
  0x9c   : > { %1913 = vmatpush3.bf16.msra.mxu0 %v2034_v31 }
  0x9d   : > { %1914 = vmatprep.subr.bf16.mxu0 %v2063_v1 }
  0xa0   : > { %1915 = vmatpush3.bf16.msra.mxu0 %v2035_v32 }
  0xa1   : > { %1916 = vmatprep.subr.bf16.mxu0 %v2063_v1 }
  0xa4   : > { %1917 = vmatpush3.bf16.msra.mxu0 %v2036_v35 }
  0xa7   : > { %1919 = vmatmul.mubr.bf16.vlgmr.msra.gmra.mrb[16].mxu0 %v1188_v36 }
  0xfa   : > { %v342_v37 = vpop.f32.mrb[0].mxu0 }
  0xfb   : > { %v431_v38 = vpop.f32.mrb[0].mxu1  ;;  %v1760_v39 = vpop.f32.mrb[1].mxu0 }
  0xfc   : > { %v432_v40 = vadd.f32 %v431_v38, %v342_v37  ;;  %v1780_v41 = vpop.f32.mrb[1].mxu1  ;;  %v345_v42 = vpop.f32.mrb[2].mxu0 }
  0xfd   : > { %v434_v43 = vpop.f32.mrb[2].mxu1  ;;  %v1761_v44 = vpop.f32.mrb[3].mxu0 }
  0xfe   : > { %v435_v45 = vadd.f32 %v434_v43, %v345_v42  ;;  %v1781_v46 = vpop.f32.mrb[3].mxu1 }
 0x11a   : > { %v550_v47 = vpop.f32.mrb[4].mxu0 }
 0x11b   : > { %v557_v48 = vadd.f32 %v550_v47, %v432_v40  ;;  %v1800_v49 = vpop.f32.mrb[5].mxu0  ;;  %v674_v50 = vpop.f32.mrb[4].mxu1 }
 0x11c   : > { %v553_v51 = vpop.f32.mrb[6].mxu0  ;;  %v1820_v52 = vpop.f32.mrb[5].mxu1 }
 0x11d   : > { %v558_v1 = vadd.f32 %v553_v51, %v435_v45  ;;  %v681_v53 = vadd.f32 %v674_v50, %v557_v48  ;;  %v1801_v54 = vpop.f32.mrb[7].mxu0  ;;  %v677_v55 = vpop.f32.mrb[6].mxu1 }
 0x11e   : > { %v1821_v56 = vpop.f32.mrb[7].mxu1 }
 0x11f   : > { %v682_v57 = vadd.f32 %v677_v55, %v558_v1 }
 0x13a   : > { %v798_v58 = vpop.f32.mrb[8].mxu0 }
 0x13b   : > { %v805_v59 = vadd.f32 %v798_v58, %v681_v53  ;;  %v1840_v60 = vpop.f32.mrb[9].mxu0  ;;  %v919_v61 = vpop.f32.mrb[8].mxu1 }
 0x13c   : > { %v801_v62 = vpop.f32.mrb[10].mxu0  ;;  %v1860_v63 = vpop.f32.mrb[9].mxu1 }
 0x13d   : > { %v806_v0 = vadd.f32 %v801_v62, %v682_v57  ;;  %v926_v2 = vadd.f32 %v919_v61, %v805_v59  ;;  %v1841_v3 = vpop.f32.mrb[11].mxu0  ;;  %v922_v4 = vpop.f32.mrb[10].mxu1 }
 0x13e   : > { %v1861_v5 = vpop.f32.mrb[11].mxu1 }
 0x13f   : > { %v927_v6 = vadd.f32 %v922_v4, %v806_v0 }
 0x15a   : > { %v1043_v7 = vpop.f32.mrb[12].mxu0 }
 0x15b   : > { %v1050_v8 = vadd.f32 %v1043_v7, %v926_v2  ;;  %v1880_v9 = vpop.f32.mrb[13].mxu0  ;;  %v1167_v10 = vpop.f32.mrb[12].mxu1 }
 0x15c   : > { %v1046_v11 = vpop.f32.mrb[14].mxu0  ;;  %v1900_v12 = vpop.f32.mrb[13].mxu1 }
 0x15d   : > { %v1051_v13 = vadd.f32 %v1046_v11, %v927_v6  ;;  %v1174_v14 = vadd.f32 %v1167_v10, %v1050_v8  ;;  %v1881_v15 = vpop.f32.mrb[15].mxu0  ;;  %v1170_v16 = vpop.f32.mrb[14].mxu1 }
 0x15e   : > { %v1901_v17 = vpop.f32.mrb[15].mxu1 }
 0x15f   : > { %v1175_v18 = vadd.f32 %v1170_v16, %v1051_v13 }
 0x17a   : > { %v1288_v19 = vpop.f32.mrb[16].mxu0 }
 0x17b   : > { %v1295_v21 = vadd.f32 %v1288_v19, %v1174_v14  ;;  %v1920_v22 = vpop.f32.mrb[17].mxu0 }
 0x17c   : > { %v1291_v23 = vpop.f32.mrb[18].mxu0 }
 0x17d   : > { %v1304_v24 = vadd.f32 %v1657_v20, %v1295_v21  ;;  %v1296_v25 = vadd.f32 %v1291_v23, %v1175_v18  ;;  %v1921_v26 = vpop.f32.mrb[19].mxu0 }
 0x17f   : > { %v1306_v27 = vmax.f32 %v1304_v24, 0.0  ;;  %v1305_v28 = vadd.f32 %v1657_v20, %v1296_v25 }
 0x181   : > { %v1310_v29 = vcombine.high %v1306_v27, %v1306_v27  ;;  %1314 = vst [vmem:[%s192_s8] sm:$0xf] %v1306_v27  ;;  %v1307_v30 = vmax.f32 %v1305_v28, 0.0 }
 0x183   : > { %1315 = vst [vmem:[%s192_s8 + $0x4] sm:$0xf] %v1310_v29  ;;  %v1311_v31 = vcombine.high %v1307_v30, %v1307_v30  ;;  %1316 = vst [vmem:[%s192_s8 + $0x8] sm:$0xf] %v1307_v30 }
 0x185   : > { %1317 = vst [vmem:[%s192_s8 + $0xc] sm:$0xf] %v1311_v31 }
 0x186 PF: > { %s13_s14 = sadd.s32 1, %s2061_s14   ;;  %s2459_s12 = smov %s2057_s13 }
 0x187   : > { %p10_p5 = scmp.ge.s32.totalorder %s13_s14, 4   ;;  %s2460_s13 = smov %s2462_s15 }
 0x189   :  { %12 = sbr.rel (!%p10_p5) target bundleno = 2 (0x2), region = 76 }

// kernel: denoiser_forward.14
= control target key start
LH: loop header
LB: loop body
LE: loop exit
PB: predicated region body
PF: predicated region fallthrough
CT: control target
= control target key end

     0   :  { %s522_s9 = smov 0   ;;  %s524_s10 = smov 0   ;;  %s558_s0 = inlined_call_operand.vmem [shape: f32[8,4], index: 0, kind: input, shape index: {}]   ;;  %s559_s1 = inlined_call_operand.vmem [shape: f32[2,4,512], index: 1, kind: input, shape index: {}]   ;;  %s560_s2 = inlined_call_operand.vmem [shape: f32[2,8,512], index: 2, kind: output, shape index: {}]  }
   0x1   :  { %s526_s11 = smov 0  }
   0x2 LB: > { %s24_s12 = sadd.s32 1, %s500_s10  ;;  %p440_p0 = scmp.ge.s32.totalorder %s504_s11, 1  ;;  %s504_s11 = sphi %s526_s11, %s12_s11   ;;  %s500_s10 = sphi %s524_s10, %s562_s10   ;;  %s496_s9 = sphi %s522_s9, %s561_s9  }
   0x3   : > { %p26_p1 = scmp.ge.s32.totalorder %s24_s12, 2  ;;  %p133_p2 = scmp.lt.s32.totalorder %s504_s11, 3 }
   0x5   : > { %s564_s12 = smov (%p26_p1, %s24_s12), 0  ;;  %p134_p3 = pnand %p440_p0, %p133_p2 }
   0x6   : > { %p164_p4 = scmp.lt.s32.totalorder (!%p134_p3), %s496_s9, 1  ;;  %v506_v0 = vmov (!%p134_p3), 0.0   ;;  %vm194_vm0 = vcmask (!%p134_p3), 1043456   ;;  %v183_v5 = vld [vmem:[%s558_s0] sm:$0xff] (!%p134_p3)  ;;  %vm190_vm1 = vcmask (!%p134_p3), 31744  }
   0x7   : > { %137 = sbr.rel (%p134_p3) target bundleno = 236 (0xec), region = 28  ;;  %267 = vmatprep.mubr.f32.mxu0 (!%p134_p3), %v506_v0  ;;  %338 = vmatprep.mubr.f32.mxu1 (!%p134_p3), %v506_v0 }
   0xe   : > { %s566_s9 = smov (!%p164_p4, %s496_s9), 1 }
   0xf   : > { %s453_s13 = sshll.u32 %s566_s9, 4  ;;  %s454_s19 = sshll.u32 %s566_s9, 5 }
  0x10   : > { %s171_s16 = scalar_lea.vmem %s559_s1, %s453_s13  ;;  %s181_s22 = scalar_lea.vmem %s560_s2, %s454_s19 }
  0x11   : > { %v184_v1 = vld [vmem:[%s171_s16] sm:$0xff]  ;;  %v185_v2 = vld [vmem:[%s171_s16 + $0x8] sm:$0xff] }
  0x12   : > { %v188_v3 = vcombine.high %v184_v1, %v184_v1  ;;  %v189_v4 = vcombine.high %v185_v2, %v185_v2 }
  0x14   : > { %445 = vmatprep.subr.msk.mxu0 %vm194_vm0, %v188_v3  ;;  %448 = vmatprep.subr.msk.mxu1 %vm194_vm0, %v189_v4 }
  0x15   : > { %446 = vmatpush1.msk.msra.mxu0 %vm194_vm0, %v184_v1  ;;  %449 = vmatpush1.msk.msra.mxu1 %vm194_vm0, %v185_v2 }
  0x16   : > { %447 = vmatmul.mubr.msk.f32.vlgmr.msra.gmra.mrb[0].mxu0 %vm190_vm1, %v183_v5  ;;  %450 = vmatmul.mubr.msk.f32.vlgmr.msra.gmra.mrb[0].mxu1 %vm190_vm1, %v183_v5 }
  0xe9   : > { %v269_v6 = vpop.f32.mrb[0].mxu0  ;;  %v340_v7 = vpop.f32.mrb[0].mxu1 }
  0xea   : > { %345 = vst [vmem:[%s181_s22] sm:$0xff] %v269_v6  ;;  %347 = vst [vmem:[%s181_s22 + $0x10] sm:$0xff] %v340_v7  ;;  %v271_v8 = vpop.f32.mrb[1].mxu0  ;;  %v342_v9 = vpop.f32.mrb[1].mxu1 }
  0xeb   : > { %346 = vst [vmem:[%s181_s22 + $0x8] sm:$0xff] %v271_v8  ;;  %348 = vst [vmem:[%s181_s22 + $0x18] sm:$0xff] %v342_v9 }
  0xec PF: > { %s12_s11 = sadd.s32 1, %s504_s11   ;;  %s561_s9 = smov %s500_s10 }
  0xed   : > { %p9_p5 = scmp.ge.s32.totalorder %s12_s11, 4   ;;  %s562_s10 = smov %s564_s12 }
  0xef   :  { %11 = sbr.rel (!%p9_p5) target bundleno = 2 (0x2), region = 58 }

// kernel: denoiser_forward.17
= control target key start
LH: loop header
LB: loop body
LE: loop exit
PB: predicated region body
PF: predicated region fallthrough
CT: control target
= control target key end

     0   :  { %s697_s9 = smov 0   ;;  %s699_s10 = smov 0   ;;  %s766_s0 = inlined_call_operand.vmem [shape: f32[16,8], index: 0, kind: input, shape index: {}]   ;;  %s767_s1 = inlined_call_operand.vmem [shape: f32[2,8,1024], index: 1, kind: input, shape index: {}]   ;;  %s768_s2 = inlined_call_operand.vmem [shape: f32[2,16,1024], index: 2, kind: output, shape index: {}]  }
   0x1   :  { %s701_s11 = smov 0  }
   0x2 LB: > { %s24_s12 = sadd.s32 1, %s675_s10  ;;  %p615_p0 = scmp.ge.s32.totalorder %s679_s11, 1  ;;  %s679_s11 = sphi %s701_s11, %s12_s11   ;;  %s675_s10 = sphi %s699_s10, %s770_s10   ;;  %s671_s9 = sphi %s697_s9, %s769_s9  }
   0x3   : > { %p26_p1 = scmp.ge.s32.totalorder %s24_s12, 2  ;;  %p133_p2 = scmp.lt.s32.totalorder %s679_s11, 3 }
   0x5   : > { %s772_s12 = smov (%p26_p1, %s24_s12), 0  ;;  %p134_p3 = pnand %p615_p0, %p133_p2 }
   0x6   : > { %p164_p4 = scmp.lt.s32.totalorder (!%p134_p3), %s671_s9, 1  ;;  %v681_v0 = vmov (!%p134_p3), 0.0   ;;  %v183_v1 = vld [vmem:[%s766_s0] sm:$0xff] (!%p134_p3)  ;;  %vm193_vm0 = vcmask (!%p134_p3), 64512   ;;  %v184_v10 = vld [vmem:[%s766_s0 + $0x8] sm:$0xff] (!%p134_p3) }
   0x7   : > { %137 = sbr.rel (%p134_p3) target bundleno = 246 (0xf6), region = 28  ;;  %264 = vmatprep.mubr.f32.mxu0 (!%p134_p3), %v681_v0  ;;  %341 = vmatprep.mubr.f32.mxu1 (!%p134_p3), %v681_v0 }
   0xe   : > { %s774_s9 = smov (!%p164_p4, %s671_s9), 1 }
   0xf   : > { %s630_s13 = sshll.u32 %s774_s9, 6  ;;  %s631_s21 = sshll.u32 %s774_s9, 7 }
  0x10   : > { %s171_s16 = scalar_lea.vmem %s767_s1, %s630_s13  ;;  %s739_s24 = scalar_lea.vmem %s768_s2, %s631_s21 }
  0x11   : > { %v186_v2 = vld [vmem:[%s171_s16 + $0x8] sm:$0xff]  ;;  %v188_v3 = vld [vmem:[%s171_s16 + $0x18] sm:$0xff]  ;;  %v185_v4 = vld [vmem:[%s171_s16] sm:$0xff] }
  0x12   : > { %200 = vmatprep.subr.mxu0 %v186_v2  ;;  %277 = vmatprep.subr.mxu1 %v188_v3  ;;  %v187_v5 = vld [vmem:[%s171_s16 + $0x10] sm:$0xff]  ;;  %v190_v6 = vld [vmem:[%s171_s16 + $0x28] sm:$0xff]  ;;  %v192_v7 = vld [vmem:[%s171_s16 + $0x38] sm:$0xff] }
  0x13   : > { %201 = vmatpush1.msra.mxu0 %v185_v4  ;;  %278 = vmatpush1.msra.mxu1 %v187_v5  ;;  %v189_v8 = vld [vmem:[%s171_s16 + $0x20] sm:$0xff]  ;;  %v191_v9 = vld [vmem:[%s171_s16 + $0x30] sm:$0xff] }
  0x14   : > { %620 = vmatmul.mubr.msk.f32.vlgmr.msra.gmra.mrb[0].mxu0 %vm193_vm0, %v183_v1  ;;  %622 = vmatmul.mubr.msk.f32.vlgmr.msra.gmra.mrb[0].mxu1 %vm193_vm0, %v183_v1 }
  0x15   : > { %354 = vmatprep.subr.mxu0 %v190_v6  ;;  %431 = vmatprep.subr.mxu1 %v192_v7 }
  0x16   : > { %355 = vmatpush1.msra.mxu0 %v189_v8  ;;  %432 = vmatpush1.msra.mxu1 %v191_v9 }
  0x17   : > { %270 = vmatprep.mubr.f32.mxu0 %v681_v0  ;;  %347 = vmatprep.mubr.f32.mxu1 %v681_v0 }
  0x18   : > { %621 = vmatmul.mubr.msk.f32.gmra.mrb[2].mxu0 %vm193_vm0, %v184_v10  ;;  %623 = vmatmul.mubr.msk.f32.gmra.mrb[2].mxu1 %vm193_vm0, %v184_v10 }
  0x19   : > { %418 = vmatprep.mubr.f32.mxu0 %v681_v0  ;;  %495 = vmatprep.mubr.f32.mxu1 %v681_v0 }
  0x1c   : > { %624 = vmatmul.mubr.msk.f32.vlgmr.msra.gmra.mrb[4].mxu0 %vm193_vm0, %v183_v1  ;;  %626 = vmatmul.mubr.msk.f32.vlgmr.msra.gmra.mrb[4].mxu1 %vm193_vm0, %v183_v1 }
  0x1d   : > { %424 = vmatprep.mubr.f32.mxu0 %v681_v0  ;;  %501 = vmatprep.mubr.f32.mxu1 %v681_v0 }
  0x20   : > { %625 = vmatmul.mubr.msk.f32.gmra.mrb[6].mxu0 %vm193_vm0, %v184_v10  ;;  %627 = vmatmul.mubr.msk.f32.gmra.mrb[6].mxu1 %vm193_vm0, %v184_v10 }
  0xe7   : > { %v266_v11 = vpop.f32.mrb[0].mxu0  ;;  %v343_v12 = vpop.f32.mrb[0].mxu1 }
  0xe8   : > { %508 = vst [vmem:[%s739_s24] sm:$0xff] %v266_v11  ;;  %510 = vst [vmem:[%s739_s24 + $0x10] sm:$0xff] %v343_v12  ;;  %v268_v13 = vpop.f32.mrb[1].mxu0  ;;  %v345_v14 = vpop.f32.mrb[1].mxu1 }
  0xe9   : > { %509 = vst [vmem:[%s739_s24 + $0x8] sm:$0xff] %v268_v13  ;;  %511 = vst [vmem:[%s739_s24 + $0x18] sm:$0xff] %v345_v14 }
  0xeb   : > { %v272_v15 = vpop.f32.mrb[2].mxu0  ;;  %v349_v16 = vpop.f32.mrb[2].mxu1 }
  0xec   : > { %516 = vst [vmem:[%s739_s24 + $0x40] sm:$0xff] %v272_v15  ;;  %518 = vst [vmem:[%s739_s24 + $0x50] sm:$0xff] %v349_v16  ;;  %v274_v17 = vpop.f32.mrb[3].mxu0  ;;  %v351_v18 = vpop.f32.mrb[3].mxu1 }
  0xed   : > { %517 = vst [vmem:[%s739_s24 + $0x48] sm:$0xff] %v274_v17  ;;  %519 = vst [vmem:[%s739_s24 + $0x58] sm:$0xff] %v351_v18 }
  0xef   : > { %v420_v19 = vpop.f32.mrb[4].mxu0  ;;  %v497_v20 = vpop.f32.mrb[4].mxu1 }
  0xf0   : > { %512 = vst [vmem:[%s739_s24 + $0x20] sm:$0xff] %v420_v19  ;;  %514 = vst [vmem:[%s739_s24 + $0x30] sm:$0xff] %v497_v20  ;;  %v422_v21 = vpop.f32.mrb[5].mxu0  ;;  %v499_v22 = vpop.f32.mrb[5].mxu1 }
  0xf1   : > { %513 = vst [vmem:[%s739_s24 + $0x28] sm:$0xff] %v422_v21  ;;  %515 = vst [vmem:[%s739_s24 + $0x38] sm:$0xff] %v499_v22 }
  0xf3   : > { %v426_v23 = vpop.f32.mrb[6].mxu0  ;;  %v503_v24 = vpop.f32.mrb[6].mxu1 }
  0xf4   : > { %520 = vst [vmem:[%s739_s24 + $0x60] sm:$0xff] %v426_v23  ;;  %522 = vst [vmem:[%s739_s24 + $0x70] sm:$0xff] %v503_v24  ;;  %v428_v25 = vpop.f32.mrb[7].mxu0  ;;  %v505_v26 = vpop.f32.mrb[7].mxu1 }
  0xf5   : > { %521 = vst [vmem:[%s739_s24 + $0x68] sm:$0xff] %v428_v25  ;;  %523 = vst [vmem:[%s739_s24 + $0x78] sm:$0xff] %v505_v26 }
  0xf6 PF: > { %s12_s11 = sadd.s32 1, %s679_s11   ;;  %s769_s9 = smov %s675_s10 }
  0xf7   : > { %p9_p5 = scmp.ge.s32.totalorder %s12_s11, 4   ;;  %s770_s10 = smov %s772_s12 }
  0xf9   :  { %11 = sbr.rel (!%p9_p5) target bundleno = 2 (0x2), region = 58 }

// kernel: denoiser_forward.15
= control target key start
LH: loop header
LB: loop body
LE: loop exit
PB: predicated region body
PF: predicated region fallthrough
CT: control target
= control target key end

     0   :  { %s787_s12 = smov 0   ;;  %s789_s13 = smov 0   ;;  %s842_s0 = inlined_call_operand.vmem [shape: f32[8,4], index: 0, kind: input, shape index: {}]   ;;  %s843_s1 = inlined_call_operand.vmem [shape: f32[2,4,1024], index: 1, kind: input, shape index: {}]   ;;  %s844_s2 = inlined_call_operand.vmem [shape: f32[2,8,1024], index: 2, kind: input, shape index: {}]   ;;  %s845_s3 = inlined_call_operand.vmem [shape: f32[2,8,1024], index: 3, kind: output, shape index: {}]  }
   0x1   :  { %s791_s14 = smov 0  }
   0x2 LB: > { %s25_s15 = sadd.s32 1, %s760_s13  ;;  %p689_p0 = scmp.ge.s32.totalorder %s764_s14, 1  ;;  %s764_s14 = sphi %s791_s14, %s13_s14   ;;  %s760_s13 = sphi %s789_s13, %s847_s13   ;;  %s756_s12 = sphi %s787_s12, %s846_s12  }
   0x3   : > { %p27_p1 = scmp.ge.s32.totalorder %s25_s15, 2  ;;  %p175_p2 = scmp.lt.s32.totalorder %s764_s14, 3 }
   0x5   : > { %s849_s15 = smov (%p27_p1, %s25_s15), 0  ;;  %p176_p3 = pnand %p689_p0, %p175_p2 }
   0x6   : > { %p217_p4 = scmp.lt.s32.totalorder (!%p176_p3), %s756_s12, 1  ;;  %v766_v0 = vmov (!%p176_p3), 0.0   ;;  %vm271_vm0 = vcmask (!%p176_p3), 1043456   ;;  %v246_v7 = vld [vmem:[%s842_s0] sm:$0xff] (!%p176_p3)  ;;  %vm267_vm1 = vcmask (!%p176_p3), 31744  }
   0x7   : > { %179 = sbr.rel (%p176_p3) target bundleno = 242 (0xf2), region = 32  ;;  %352 = vmatprep.mubr.f32.mxu0 (!%p176_p3), %v766_v0  ;;  %423 = vmatprep.mubr.f32.mxu1 (!%p176_p3), %v766_v0 }
   0xe   : > { %s851_s12 = smov (!%p217_p4, %s756_s12), 1 }
   0xf   : > { %s710_s16 = sshll.u32 %s851_s12, 5  ;;  %s711_s22 = sshll.u32 %s851_s12, 6 }
  0x10   : > { %s224_s19 = scalar_lea.vmem %s843_s1, %s710_s16  ;;  %s234_s25 = scalar_lea.vmem %s844_s2, %s711_s22 }
  0x11   : > { %v247_v1 = vld [vmem:[%s224_s19] sm:$0xff]  ;;  %v248_v2 = vld [vmem:[%s224_s19 + $0x8] sm:$0xff]  ;;  %v249_v3 = vld [vmem:[%s224_s19 + $0x10] sm:$0xff]  ;;  %s244_s28 = scalar_lea.vmem %s845_s3, %s711_s22 }
  0x12   : > { %v263_v4 = vcombine.high %v247_v1, %v247_v1  ;;  %v264_v5 = vcombine.high %v248_v2, %v248_v2  ;;  %v250_v6 = vld [vmem:[%s224_s19 + $0x18] sm:$0xff]  ;;  %v265_v8 = vcombine.high %v249_v3, %v249_v3  ;;  %v251_v10 = vld [vmem:[%s234_s25] sm:$0xff]  ;;  %v253_v11 = vld [vmem:[%s234_s25 + $0x10] sm:$0xff] }
  0x13   : > { %v266_v9 = vcombine.high %v250_v6, %v250_v6  ;;  %v252_v12 = vld [vmem:[%s234_s25 + $0x8] sm:$0xff]  ;;  %v254_v13 = vld [vmem:[%s234_s25 + $0x18] sm:$0xff]  ;;  %v255_v22 = vld [vmem:[%s234_s25 + $0x20] sm:$0xff] }
  0x14   : > { %696 = vmatprep.subr.msk.mxu0 %vm271_vm0, %v263_v4  ;;  %699 = vmatprep.subr.msk.mxu1 %vm271_vm0, %v264_v5  ;;  %v257_v23 = vld [vmem:[%s234_s25 + $0x30] sm:$0xff]  ;;  %v256_v24 = vld [vmem:[%s234_s25 + $0x28] sm:$0xff]  ;;  %v258_v25 = vld [vmem:[%s234_s25 + $0x38] sm:$0xff] }
  0x15   : > { %697 = vmatpush1.msk.msra.mxu0 %vm271_vm0, %v247_v1  ;;  %700 = vmatpush1.msk.msra.mxu1 %vm271_vm0, %v248_v2 }
  0x16   : > { %698 = vmatmul.mubr.msk.f32.vlgmr.msra.gmra.mrb[0].mxu0 %vm267_vm1, %v246_v7  ;;  %701 = vmatmul.mubr.msk.f32.vlgmr.msra.gmra.mrb[0].mxu1 %vm267_vm1, %v246_v7 }
  0x17   : > { %702 = vmatprep.subr.msk.mxu0 %vm271_vm0, %v265_v8  ;;  %705 = vmatprep.subr.msk.mxu1 %vm271_vm0, %v266_v9 }
  0x18   : > { %703 = vmatpush1.msk.msra.mxu0 %vm271_vm0, %v249_v3  ;;  %706 = vmatpush1.msk.msra.mxu1 %vm271_vm0, %v250_v6 }
  0x19   : > { %494 = vmatprep.mubr.f32.mxu0 %v766_v0  ;;  %565 = vmatprep.mubr.f32.mxu1 %v766_v0 }
  0x1a   : > { %704 = vmatmul.mubr.msk.f32.vlgmr.msra.gmra.mrb[2].mxu0 %vm267_vm1, %v246_v7  ;;  %707 = vmatmul.mubr.msk.f32.vlgmr.msra.gmra.mrb[2].mxu1 %vm267_vm1, %v246_v7 }
  0xe9   : > { %v354_v14 = vpop.f32.mrb[0].mxu0  ;;  %v425_v15 = vpop.f32.mrb[0].mxu1 }
  0xea   : > { %v355_v16 = vadd.f32 %v354_v14, %v251_v10  ;;  %v426_v17 = vadd.f32 %v425_v15, %v253_v11  ;;  %v356_v18 = vpop.f32.mrb[1].mxu0  ;;  %v427_v19 = vpop.f32.mrb[1].mxu1 }
  0xeb   : > { %v357_v20 = vadd.f32 %v356_v18, %v252_v12  ;;  %v428_v21 = vadd.f32 %v427_v19, %v254_v13 }
  0xec   : > { %572 = vst [vmem:[%s244_s28] sm:$0xff] %v355_v16  ;;  %574 = vst [vmem:[%s244_s28 + $0x10] sm:$0xff] %v426_v17 }
  0xed   : > { %573 = vst [vmem:[%s244_s28 + $0x8] sm:$0xff] %v357_v20  ;;  %575 = vst [vmem:[%s244_s28 + $0x18] sm:$0xff] %v428_v21  ;;  %v496_v26 = vpop.f32.mrb[2].mxu0  ;;  %v567_v27 = vpop.f32.mrb[2].mxu1 }
  0xee   : > { %v497_v28 = vadd.f32 %v496_v26, %v255_v22  ;;  %v568_v29 = vadd.f32 %v567_v27, %v257_v23  ;;  %v498_v30 = vpop.f32.mrb[3].mxu0  ;;  %v569_v31 = vpop.f32.mrb[3].mxu1 }
  0xef   : > { %v499_v32 = vadd.f32 %v498_v30, %v256_v24  ;;  %v570_v33 = vadd.f32 %v569_v31, %v258_v25 }
  0xf0   : > { %576 = vst [vmem:[%s244_s28 + $0x20] sm:$0xff] %v497_v28  ;;  %578 = vst [vmem:[%s244_s28 + $0x30] sm:$0xff] %v568_v29 }
  0xf1   : > { %577 = vst [vmem:[%s244_s28 + $0x28] sm:$0xff] %v499_v32  ;;  %579 = vst [vmem:[%s244_s28 + $0x38] sm:$0xff] %v570_v33 }
  0xf2 PF: > { %s13_s14 = sadd.s32 1, %s764_s14   ;;  %s846_s12 = smov %s760_s13 }
  0xf3   : > { %p10_p5 = scmp.ge.s32.totalorder %s13_s14, 4   ;;  %s847_s13 = smov %s849_s15 }
  0xf5   :  { %12 = sbr.rel (!%p10_p5) target bundleno = 2 (0x2), region = 65 }

// kernel: denoiser_forward.18
= control target key start
LH: loop header
LB: loop body
LE: loop exit
PB: predicated region body
PF: predicated region fallthrough
CT: control target
= control target key end

     0   :  { %s1158_s12 = smov 0   ;;  %s1160_s13 = smov 0   ;;  %s1322_s0 = inlined_call_operand.vmem [shape: f32[16,8], index: 0, kind: input, shape index: {}]   ;;  %s1323_s1 = inlined_call_operand.vmem [shape: f32[2,8,2048], index: 1, kind: input, shape index: {}]   ;;  %s1324_s2 = inlined_call_operand.vmem [shape: f32[2,16,2048], index: 2, kind: input, shape index: {}]   ;;  %s1325_s3 = inlined_call_operand.vmem [shape: f32[2,16,2048], index: 3, kind: output, shape index: {}]  }
   0x1   :  { %s1162_s14 = smov 0  }
   0x2 LB: > { %s25_s15 = sadd.s32 1, %s1131_s13  ;;  %p1060_p0 = scmp.ge.s32.totalorder %s1135_s14, 1  ;;  %s1135_s14 = sphi %s1162_s14, %s13_s14   ;;  %s1131_s13 = sphi %s1160_s13, %s1327_s13   ;;  %s1127_s12 = sphi %s1158_s12, %s1326_s12  }
   0x3   : > { %p27_p1 = scmp.ge.s32.totalorder %s25_s15, 2  ;;  %p175_p2 = scmp.lt.s32.totalorder %s1135_s14, 3 }
   0x5   : > { %s1329_s15 = smov (%p27_p1, %s25_s15), 0  ;;  %p176_p3 = pnand %p1060_p0, %p175_p2 }
   0x6   : > { %p217_p4 = scmp.lt.s32.totalorder (!%p176_p3), %s1127_s12, 1  ;;  %v1137_v0 = vmov (!%p176_p3), 0.0   ;;  %v246_v1 = vld [vmem:[%s1322_s0] sm:$0xff] (!%p176_p3)  ;;  %vm296_vm0 = vcmask (!%p176_p3), 64512   ;;  %v247_v10 = vld [vmem:[%s1322_s0 + $0x8] sm:$0xff] (!%p176_p3) }
   0x7   : > { %179 = sbr.rel (%p176_p3) target bundleno = 264 (0x108), region = 32  ;;  %367 = vmatprep.mubr.f32.mxu0 (!%p176_p3), %v1137_v0  ;;  %444 = vmatprep.mubr.f32.mxu1 (!%p176_p3), %v1137_v0 }
   0xe   : > { %s1331_s12 = smov (!%p217_p4, %s1127_s12), 1 }
   0xf   : > { %s1085_s16 = sshll.u32 %s1331_s12, 7  ;;  %s1086_s24 = sshll.u32 %s1331_s12, 8 }
  0x10   : > { %s1184_s19 = scalar_lea.vmem %s1323_s1, %s1085_s16  ;;  %s1242_s27 = scalar_lea.vmem %s1324_s2, %s1086_s24 }
  0x11   : > { %v249_v2 = vld [vmem:[%s1184_s19 + $0x8] sm:$0xff]  ;;  %v251_v3 = vld [vmem:[%s1184_s19 + $0x18] sm:$0xff]  ;;  %v248_v4 = vld [vmem:[%s1184_s19] sm:$0xff]  ;;  %s1251_s30 = scalar_lea.vmem %s1325_s3, %s1086_s24 }
  0x12   : > { %303 = vmatprep.subr.mxu0 %v249_v2  ;;  %380 = vmatprep.subr.mxu1 %v251_v3  ;;  %v250_v5 = vld [vmem:[%s1184_s19 + $0x10] sm:$0xff]  ;;  %v253_v6 = vld [vmem:[%s1184_s19 + $0x28] sm:$0xff]  ;;  %v255_v7 = vld [vmem:[%s1184_s19 + $0x38] sm:$0xff] }
  0x13   : > { %304 = vmatpush1.msra.mxu0 %v248_v4  ;;  %381 = vmatpush1.msra.mxu1 %v250_v5  ;;  %v252_v8 = vld [vmem:[%s1184_s19 + $0x20] sm:$0xff]  ;;  %v254_v9 = vld [vmem:[%s1184_s19 + $0x30] sm:$0xff]  ;;  %v257_v11 = vld [vmem:[%s1184_s19 + $0x48] sm:$0xff] }
  0x14   : > { %1067 = vmatmul.mubr.msk.f32.vlgmr.msra.gmra.mrb[0].mxu0 %vm296_vm0, %v246_v1  ;;  %1069 = vmatmul.mubr.msk.f32.vlgmr.msra.gmra.mrb[0].mxu1 %vm296_vm0, %v246_v1  ;;  %v259_v12 = vld [vmem:[%s1184_s19 + $0x58] sm:$0xff]  ;;  %v256_v13 = vld [vmem:[%s1184_s19 + $0x40] sm:$0xff]  ;;  %v258_v14 = vld [vmem:[%s1184_s19 + $0x50] sm:$0xff] }
  0x15   : > { %457 = vmatprep.subr.mxu0 %v253_v6  ;;  %534 = vmatprep.subr.mxu1 %v255_v7  ;;  %v261_v15 = vld [vmem:[%s1184_s19 + $0x68] sm:$0xff]  ;;  %v263_v16 = vld [vmem:[%s1184_s19 + $0x78] sm:$0xff]  ;;  %v260_v17 = vld [vmem:[%s1184_s19 + $0x60] sm:$0xff] }
  0x16   : > { %458 = vmatpush1.msra.mxu0 %v252_v8  ;;  %535 = vmatpush1.msra.mxu1 %v254_v9  ;;  %v262_v18 = vld [vmem:[%s1184_s19 + $0x70] sm:$0xff]  ;;  %v264_v19 = vld [vmem:[%s1242_s27] sm:$0xff]  ;;  %v265_v21 = vld [vmem:[%s1242_s27 + $0x8] sm:$0xff] }
  0x17   : > { %373 = vmatprep.mubr.f32.mxu0 %v1137_v0  ;;  %450 = vmatprep.mubr.f32.mxu1 %v1137_v0  ;;  %v266_v20 = vld [vmem:[%s1242_s27 + $0x10] sm:$0xff]  ;;  %v267_v22 = vld [vmem:[%s1242_s27 + $0x18] sm:$0xff]  ;;  %v280_v31 = vld [vmem:[%s1242_s27 + $0x80] sm:$0xff] }
  0x18   : > { %1068 = vmatmul.mubr.msk.f32.gmra.mrb[2].mxu0 %vm296_vm0, %v247_v10  ;;  %1070 = vmatmul.mubr.msk.f32.gmra.mrb[2].mxu1 %vm296_vm0, %v247_v10  ;;  %v282_v32 = vld [vmem:[%s1242_s27 + $0x90] sm:$0xff]  ;;  %v281_v33 = vld [vmem:[%s1242_s27 + $0x88] sm:$0xff]  ;;  %v283_v34 = vld [vmem:[%s1242_s27 + $0x98] sm:$0xff] }
  0x19   : > { %521 = vmatprep.mubr.f32.mxu0 %v1137_v0  ;;  %598 = vmatprep.mubr.f32.mxu1 %v1137_v0  ;;  %v268_v43 = vld [vmem:[%s1242_s27 + $0x20] sm:$0xff]  ;;  %v270_v44 = vld [vmem:[%s1242_s27 + $0x30] sm:$0xff]  ;;  %v269_v45 = vld [vmem:[%s1242_s27 + $0x28] sm:$0xff] }
  0x1a   : > { %611 = vmatprep.subr.mxu0 %v257_v11  ;;  %688 = vmatprep.subr.mxu1 %v259_v12  ;;  %v271_v46 = vld [vmem:[%s1242_s27 + $0x38] sm:$0xff]  ;;  %v284_v55 = vld [vmem:[%s1242_s27 + $0xa0] sm:$0xff]  ;;  %v286_v56 = vld [vmem:[%s1242_s27 + $0xb0] sm:$0xff] }
  0x1b   : > { %v285_v57 = vld [vmem:[%s1242_s27 + $0xa8] sm:$0xff]  ;;  %v287_v58 = vld [vmem:[%s1242_s27 + $0xb8] sm:$0xff]  ;;  %v272_v3 = vld [vmem:[%s1242_s27 + $0x40] sm:$0xff] }
  0x1c   : > { %1071 = vmatmul.mubr.msk.f32.vlgmr.msra.gmra.mrb[4].mxu0 %vm296_vm0, %v246_v1  ;;  %1073 = vmatmul.mubr.msk.f32.vlgmr.msra.gmra.mrb[4].mxu1 %vm296_vm0, %v246_v1  ;;  %v274_v4 = vld [vmem:[%s1242_s27 + $0x50] sm:$0xff]  ;;  %v273_v5 = vld [vmem:[%s1242_s27 + $0x48] sm:$0xff]  ;;  %v275_v6 = vld [vmem:[%s1242_s27 + $0x58] sm:$0xff] }
  0x1d   : > { %612 = vmatpush1.msra.mxu0 %v256_v13  ;;  %689 = vmatpush1.msra.mxu1 %v258_v14 }
  0x1e   : > { %527 = vmatprep.mubr.f32.mxu0 %v1137_v0  ;;  %604 = vmatprep.mubr.f32.mxu1 %v1137_v0 }
  0x1f   : > { %765 = vmatprep.subr.mxu0 %v261_v15  ;;  %842 = vmatprep.subr.mxu1 %v263_v16  ;;  %v288_v15 = vld [vmem:[%s1242_s27 + $0xc0] sm:$0xff]  ;;  %v290_v16 = vld [vmem:[%s1242_s27 + $0xd0] sm:$0xff] }
  0x20   : > { %1072 = vmatmul.mubr.msk.f32.gmra.mrb[6].mxu0 %vm296_vm0, %v247_v10  ;;  %1074 = vmatmul.mubr.msk.f32.gmra.mrb[6].mxu1 %vm296_vm0, %v247_v10 }
  0x21   : > { %675 = vmatprep.mubr.f32.mxu0 %v1137_v0  ;;  %752 = vmatprep.mubr.f32.mxu1 %v1137_v0 }
  0x24   : > { %1075 = vmatmul.mubr.msk.f32.vlgmr.msra.gmra.mrb[8].mxu0 %vm296_vm0, %v246_v1  ;;  %1077 = vmatmul.mubr.msk.f32.vlgmr.msra.gmra.mrb[8].mxu1 %vm296_vm0, %v246_v1 }
  0x25   : > { %766 = vmatpush1.msra.mxu0 %v260_v17  ;;  %843 = vmatpush1.msra.mxu1 %v262_v18  ;;  %v289_v17 = vld [vmem:[%s1242_s27 + $0xc8] sm:$0xff]  ;;  %v291_v18 = vld [vmem:[%s1242_s27 + $0xd8] sm:$0xff] }
  0x26   : > { %681 = vmatprep.mubr.f32.mxu0 %v1137_v0  ;;  %758 = vmatprep.mubr.f32.mxu1 %v1137_v0 }
  0x28   : > { %1076 = vmatmul.mubr.msk.f32.gmra.mrb[10].mxu0 %vm296_vm0, %v247_v10  ;;  %1078 = vmatmul.mubr.msk.f32.gmra.mrb[10].mxu1 %vm296_vm0, %v247_v10 }
  0x29   : > { %829 = vmatprep.mubr.f32.mxu0 %v1137_v0  ;;  %906 = vmatprep.mubr.f32.mxu1 %v1137_v0 }
  0x2c   : > { %1079 = vmatmul.mubr.msk.f32.vlgmr.msra.gmra.mrb[12].mxu0 %vm296_vm0, %v246_v1  ;;  %1081 = vmatmul.mubr.msk.f32.vlgmr.msra.gmra.mrb[12].mxu1 %vm296_vm0, %v246_v1 }
  0x2d   : > { %835 = vmatprep.mubr.f32.mxu0 %v1137_v0  ;;  %912 = vmatprep.mubr.f32.mxu1 %v1137_v0 }
  0x30   : > { %1080 = vmatmul.mubr.msk.f32.gmra.mrb[14].mxu0 %vm296_vm0, %v247_v10  ;;  %1082 = vmatmul.mubr.msk.f32.gmra.mrb[14].mxu1 %vm296_vm0, %v247_v10 }
  0xe7   : > { %v369_v23 = vpop.f32.mrb[0].mxu0  ;;  %v446_v24 = vpop.f32.mrb[0].mxu1 }
  0xe8   : > { %v370_v25 = vadd.f32 %v369_v23, %v264_v19  ;;  %v447_v26 = vadd.f32 %v446_v24, %v266_v20  ;;  %v371_v27 = vpop.f32.mrb[1].mxu0  ;;  %v448_v28 = vpop.f32.mrb[1].mxu1 }
  0xe9   : > { %v372_v29 = vadd.f32 %v371_v27, %v265_v21  ;;  %v449_v30 = vadd.f32 %v448_v28, %v267_v22  ;;  %v276_v27 = vld [vmem:[%s1242_s27 + $0x60] sm:$0xff]  ;;  %v278_v28 = vld [vmem:[%s1242_s27 + $0x70] sm:$0xff] }
  0xea   : > { %919 = vst [vmem:[%s1251_s30] sm:$0xff] %v370_v25  ;;  %921 = vst [vmem:[%s1251_s30 + $0x10] sm:$0xff] %v447_v26 }
  0xeb   : > { %920 = vst [vmem:[%s1251_s30 + $0x8] sm:$0xff] %v372_v29  ;;  %922 = vst [vmem:[%s1251_s30 + $0x18] sm:$0xff] %v449_v30  ;;  %v375_v35 = vpop.f32.mrb[2].mxu0  ;;  %v452_v36 = vpop.f32.mrb[2].mxu1  ;;  %v277_v29 = vld [vmem:[%s1242_s27 + $0x68] sm:$0xff]  ;;  %v279_v30 = vld [vmem:[%s1242_s27 + $0x78] sm:$0xff] }
  0xec   : > { %v376_v37 = vadd.f32 %v375_v35, %v280_v31  ;;  %v453_v38 = vadd.f32 %v452_v36, %v282_v32  ;;  %v377_v39 = vpop.f32.mrb[3].mxu0  ;;  %v454_v40 = vpop.f32.mrb[3].mxu1 }
  0xed   : > { %v378_v41 = vadd.f32 %v377_v39, %v281_v33  ;;  %v455_v42 = vadd.f32 %v454_v40, %v283_v34  ;;  %v292_v39 = vld [vmem:[%s1242_s27 + $0xe0] sm:$0xff]  ;;  %v294_v40 = vld [vmem:[%s1242_s27 + $0xf0] sm:$0xff] }
  0xee   : > { %935 = vst [vmem:[%s1251_s30 + $0x80] sm:$0xff] %v376_v37  ;;  %937 = vst [vmem:[%s1251_s30 + $0x90] sm:$0xff] %v453_v38 }
  0xef   : > { %936 = vst [vmem:[%s1251_s30 + $0x88] sm:$0xff] %v378_v41  ;;  %938 = vst [vmem:[%s1251_s30 + $0x98] sm:$0xff] %v455_v42  ;;  %v523_v47 = vpop.f32.mrb[4].mxu0  ;;  %v600_v48 = vpop.f32.mrb[4].mxu1  ;;  %v293_v41 = vld [vmem:[%s1242_s27 + $0xe8] sm:$0xff]  ;;  %v295_v42 = vld [vmem:[%s1242_s27 + $0xf8] sm:$0xff] }
  0xf0   : > { %v524_v49 = vadd.f32 %v523_v47, %v268_v43  ;;  %v601_v50 = vadd.f32 %v600_v48, %v270_v44  ;;  %v525_v51 = vpop.f32.mrb[5].mxu0  ;;  %v602_v52 = vpop.f32.mrb[5].mxu1 }
  0xf1   : > { %v526_v53 = vadd.f32 %v525_v51, %v269_v45  ;;  %v603_v54 = vadd.f32 %v602_v52, %v271_v46 }
  0xf2   : > { %923 = vst [vmem:[%s1251_s30 + $0x20] sm:$0xff] %v524_v49  ;;  %925 = vst [vmem:[%s1251_s30 + $0x30] sm:$0xff] %v601_v50 }
  0xf3   : > { %924 = vst [vmem:[%s1251_s30 + $0x28] sm:$0xff] %v526_v53  ;;  %926 = vst [vmem:[%s1251_s30 + $0x38] sm:$0xff] %v603_v54  ;;  %v529_v59 = vpop.f32.mrb[6].mxu0  ;;  %v606_v60 = vpop.f32.mrb[6].mxu1 }
  0xf4   : > { %v530_v61 = vadd.f32 %v529_v59, %v284_v55  ;;  %v607_v62 = vadd.f32 %v606_v60, %v286_v56  ;;  %v531_v63 = vpop.f32.mrb[7].mxu0  ;;  %v608_v0 = vpop.f32.mrb[7].mxu1 }
  0xf5   : > { %v532_v1 = vadd.f32 %v531_v63, %v285_v57  ;;  %v609_v2 = vadd.f32 %v608_v0, %v287_v58 }
  0xf6   : > { %939 = vst [vmem:[%s1251_s30 + $0xa0] sm:$0xff] %v530_v61  ;;  %941 = vst [vmem:[%s1251_s30 + $0xb0] sm:$0xff] %v607_v62 }
  0xf7   : > { %940 = vst [vmem:[%s1251_s30 + $0xa8] sm:$0xff] %v532_v1  ;;  %942 = vst [vmem:[%s1251_s30 + $0xb8] sm:$0xff] %v609_v2  ;;  %v677_v7 = vpop.f32.mrb[8].mxu0  ;;  %v754_v8 = vpop.f32.mrb[8].mxu1 }
  0xf8   : > { %v678_v9 = vadd.f32 %v677_v7, %v272_v3  ;;  %v755_v10 = vadd.f32 %v754_v8, %v274_v4  ;;  %v679_v11 = vpop.f32.mrb[9].mxu0  ;;  %v756_v12 = vpop.f32.mrb[9].mxu1 }
  0xf9   : > { %v680_v13 = vadd.f32 %v679_v11, %v273_v5  ;;  %v757_v14 = vadd.f32 %v756_v12, %v275_v6 }
  0xfa   : > { %927 = vst [vmem:[%s1251_s30 + $0x40] sm:$0xff] %v678_v9  ;;  %929 = vst [vmem:[%s1251_s30 + $0x50] sm:$0xff] %v755_v10 }
  0xfb   : > { %928 = vst [vmem:[%s1251_s30 + $0x48] sm:$0xff] %v680_v13  ;;  %930 = vst [vmem:[%s1251_s30 + $0x58] sm:$0xff] %v757_v14  ;;  %v683_v19 = vpop.f32.mrb[10].mxu0  ;;  %v760_v20 = vpop.f32.mrb[10].mxu1 }
  0xfc   : > { %v684_v21 = vadd.f32 %v683_v19, %v288_v15  ;;  %v761_v22 = vadd.f32 %v760_v20, %v290_v16  ;;  %v685_v23 = vpop.f32.mrb[11].mxu0  ;;  %v762_v24 = vpop.f32.mrb[11].mxu1 }
  0xfd   : > { %v686_v25 = vadd.f32 %v685_v23, %v289_v17  ;;  %v763_v26 = vadd.f32 %v762_v24, %v291_v18 }
  0xfe   : > { %943 = vst [vmem:[%s1251_s30 + $0xc0] sm:$0xff] %v684_v21  ;;  %945 = vst [vmem:[%s1251_s30 + $0xd0] sm:$0xff] %v761_v22 }
  0xff   : > { %944 = vst [vmem:[%s1251_s30 + $0xc8] sm:$0xff] %v686_v25  ;;  %946 = vst [vmem:[%s1251_s30 + $0xd8] sm:$0xff] %v763_v26  ;;  %v831_v31 = vpop.f32.mrb[12].mxu0  ;;  %v908_v32 = vpop.f32.mrb[12].mxu1 }
 0x100   : > { %v832_v33 = vadd.f32 %v831_v31, %v276_v27  ;;  %v909_v34 = vadd.f32 %v908_v32, %v278_v28  ;;  %v833_v35 = vpop.f32.mrb[13].mxu0  ;;  %v910_v36 = vpop.f32.mrb[13].mxu1 }
 0x101   : > { %v834_v37 = vadd.f32 %v833_v35, %v277_v29  ;;  %v911_v38 = vadd.f32 %v910_v36, %v279_v30 }
 0x102   : > { %931 = vst [vmem:[%s1251_s30 + $0x60] sm:$0xff] %v832_v33  ;;  %933 = vst [vmem:[%s1251_s30 + $0x70] sm:$0xff] %v909_v34 }
 0x103   : > { %932 = vst [vmem:[%s1251_s30 + $0x68] sm:$0xff] %v834_v37  ;;  %934 = vst [vmem:[%s1251_s30 + $0x78] sm:$0xff] %v911_v38  ;;  %v837_v43 = vpop.f32.mrb[14].mxu0  ;;  %v914_v44 = vpop.f32.mrb[14].mxu1 }
 0x104   : > { %v838_v45 = vadd.f32 %v837_v43, %v292_v39  ;;  %v915_v46 = vadd.f32 %v914_v44, %v294_v40  ;;  %v839_v47 = vpop.f32.mrb[15].mxu0  ;;  %v916_v48 = vpop.f32.mrb[15].mxu1 }
 0x105   : > { %v840_v49 = vadd.f32 %v839_v47, %v293_v41  ;;  %v917_v50 = vadd.f32 %v916_v48, %v295_v42 }
 0x106   : > { %947 = vst [vmem:[%s1251_s30 + $0xe0] sm:$0xff] %v838_v45  ;;  %949 = vst [vmem:[%s1251_s30 + $0xf0] sm:$0xff] %v915_v46 }
 0x107   : > { %948 = vst [vmem:[%s1251_s30 + $0xe8] sm:$0xff] %v840_v49  ;;  %950 = vst [vmem:[%s1251_s30 + $0xf8] sm:$0xff] %v917_v50 }
 0x108 PF: > { %s13_s14 = sadd.s32 1, %s1135_s14   ;;  %s1326_s12 = smov %s1131_s13 }
 0x109   : > { %p10_p5 = scmp.ge.s32.totalorder %s13_s14, 4   ;;  %s1327_s13 = smov %s1329_s15 }
 0x10b   :  { %12 = sbr.rel (!%p10_p5) target bundleno = 2 (0x2), region = 65 }

// kernel: denoiser_forward.16
= control target key start
LH: loop header
LB: loop body
LE: loop exit
PB: predicated region body
PF: predicated region fallthrough
CT: control target
= control target key end

     0   :  { %s2464_s12 = smov 0   ;;  %s2466_s13 = smov 0   ;;  %s2848_s0 = inlined_call_operand.vmem [shape: f32[2,10,10,128], index: 0, kind: input, shape index: {}]   ;;  %s2849_s1 = inlined_call_operand.vmem [shape: bf16[9,128,128], index: 1, kind: input, shape index: {}]   ;;  %s2850_s2 = inlined_call_operand.vmem [shape: f32[1,128], index: 2, kind: input, shape index: {}]   ;;  %s2851_s3 = inlined_call_operand.vmem [shape: f32[2,8,8,128], index: 3, kind: output, shape index: {}]  }
   0x1   :  { %s2468_s14 = smov 0  }
   0x2 LB: > { %s25_s15 = sadd.s32 1, %s2438_s13  ;;  %p1663_p0 = scmp.ge.s32.totalorder %s2442_s14, 1  ;;  %s2442_s14 = sphi %s2468_s14, %s13_s14   ;;  %s2438_s13 = sphi %s2466_s13, %s2853_s13   ;;  %s2434_s12 = sphi %s2464_s12, %s2852_s12  }
   0x3   : > { %p27_p1 = scmp.ge.s32.totalorder %s25_s15, 2  ;;  %p151_p2 = scmp.lt.s32.totalorder %s2442_s14, 3 }
   0x5   : > { %s2855_s15 = smov (%p27_p1, %s25_s15), 0  ;;  %p152_p3 = pnand %p1663_p0, %p151_p2 }
   0x6   : > { %v2348_v0 = vld [vmem:[%s2849_s1 + $0x40] sm:$0xff] (!%p152_p3)   ;;  %p179_p4 = scmp.lt.s32.totalorder (!%p152_p3), %s2434_s12, 1  ;;  %v2350_v2 = vld [vmem:[%s2849_s1 + $0x48] sm:$0xff] (!%p152_p3)   ;;  %v2352_v4 = vld [vmem:[%s2849_s1 + $0x50] sm:$0xff] (!%p152_p3)  }
   0x7   : > { %155 = sbr.rel (%p152_p3) target bundleno = 390 (0x186), region = 32  ;;  %v2349_v1 = vld [vmem:[%s2849_s1 + $0x100] sm:$0xff] (!%p152_p3)   ;;  %2027 = vmatprep.subr.bf16.mxu1 (!%p152_p3), %v2348_v0  ;;  %v2351_v3 = vld [vmem:[%s2849_s1 + $0x108] sm:$0xff] (!%p152_p3)   ;;  %v2353_v5 = vld [vmem:[%s2849_s1 + $0x110] sm:$0xff] (!%p152_p3)  }
   0x8   : > { %2123 = vmatprep.subr.bf16.mxu0 (!%p152_p3), %v2349_v1  ;;  %2028 = vmatpush3.bf16.msra.mxu1 (!%p152_p3), %v2348_v0  ;;  %v2354_v6 = vld [vmem:[%s2849_s1 + $0x58] sm:$0xff] (!%p152_p3)   ;;  %v2356_v8 = vld [vmem:[%s2849_s1 + $0x60] sm:$0xff] (!%p152_p3)   ;;  %v2358_v10 = vld [vmem:[%s2849_s1 + $0x68] sm:$0xff] (!%p152_p3)  }
   0x9   : > { %2124 = vmatpush3.bf16.msra.mxu0 (!%p152_p3), %v2349_v1  ;;  %2029 = vmatprep.subr.bf16.mxu1 (!%p152_p3), %v2350_v2  ;;  %v2355_v7 = vld [vmem:[%s2849_s1 + $0x118] sm:$0xff] (!%p152_p3)   ;;  %v2357_v9 = vld [vmem:[%s2849_s1 + $0x120] sm:$0xff] (!%p152_p3)   ;;  %v2359_v13 = vld [vmem:[%s2849_s1 + $0x128] sm:$0xff] (!%p152_p3)  }
   0xa   : > { %2125 = vmatprep.subr.bf16.mxu0 (!%p152_p3), %v2351_v3  ;;  %v2360_v17 = vld [vmem:[%s2849_s1 + $0x70] sm:$0xff] (!%p152_p3)   ;;  %v2362_v19 = vld [vmem:[%s2849_s1 + $0x78] sm:$0xff] (!%p152_p3)   ;;  %v2364_v21 = vld [vmem:[%s2849_s1] sm:$0xff] (!%p152_p3)  }
   0xb   : > { %v2361_v18 = vld [vmem:[%s2849_s1 + $0x130] sm:$0xff] (!%p152_p3)   ;;  %v2363_v20 = vld [vmem:[%s2849_s1 + $0x138] sm:$0xff] (!%p152_p3)   ;;  %v2365_v24 = vld [vmem:[%s2849_s1 + $0x140] sm:$0xff] (!%p152_p3)  }
   0xc   : > { %2030 = vmatpush3.bf16.msra.mxu1 (!%p152_p3), %v2350_v2  ;;  %v2366_v29 = vld [vmem:[%s2849_s1 + $0x8] sm:$0xff] (!%p152_p3)   ;;  %v2368_v34 = vld [vmem:[%s2849_s1 + $0x10] sm:$0xff] (!%p152_p3)   ;;  %v2370_v43 = vld [vmem:[%s2849_s1 + $0x18] sm:$0xff] (!%p152_p3)  }
   0xd   : > { %2126 = vmatpush3.bf16.msra.mxu0 (!%p152_p3), %v2351_v3  ;;  %2031 = vmatprep.subr.bf16.mxu1 (!%p152_p3), %v2352_v4  ;;  %v2367_v30 = vld [vmem:[%s2849_s1 + $0x148] sm:$0xff] (!%p152_p3)   ;;  %v2369_v36 = vld [vmem:[%s2849_s1 + $0x150] sm:$0xff] (!%p152_p3)   ;;  %v2371_v44 = vld [vmem:[%s2849_s1 + $0x158] sm:$0xff] (!%p152_p3)  }
   0xe   : > { %s2857_s12 = smov (!%p179_p4, %s2434_s12), 1  ;;  %2127 = vmatprep.subr.bf16.mxu0 %v2353_v5  ;;  %v2372_v47 = vld [vmem:[%s2849_s1 + $0x20] sm:$0xff]   ;;  %v2374_v49 = vld [vmem:[%s2849_s1 + $0x28] sm:$0xff]   ;;  %v2376_v51 = vld [vmem:[%s2849_s1 + $0x30] sm:$0xff]  }
   0xf   : > { %s2323_s5 = smul.u32 160, %s2857_s12  ;;  %v2373_v48 = vld [vmem:[%s2849_s1 + $0x160] sm:$0xff]   ;;  %v2375_v50 = vld [vmem:[%s2849_s1 + $0x168] sm:$0xff]   ;;  %v2377_v52 = vld [vmem:[%s2849_s1 + $0x170] sm:$0xff]  }
  0x10   : > { %2032 = vmatpush3.bf16.msra.mxu1 %v2352_v4  ;;  %v2378_v53 = vld [vmem:[%s2849_s1 + $0x38] sm:$0xff]   ;;  %v2380_v57 = vld [vmem:[%s2849_s1 + $0x80] sm:$0xff]   ;;  %v2382_v0 = vld [vmem:[%s2849_s1 + $0x88] sm:$0xff]  }
  0x11   : > { %2128 = vmatpush3.bf16.msra.mxu0 %v2353_v5  ;;  %2033 = vmatprep.subr.bf16.mxu1 %v2354_v6  ;;  %s2518_s16 = scalar_lea.vmem %s2848_s0, %s2323_s5  ;;  %v2379_v54 = vld [vmem:[%s2849_s1 + $0x178] sm:$0xff]   ;;  %v2381_v59 = vld [vmem:[%s2849_s1 + $0x180] sm:$0xff]   ;;  %v2383_v4 = vld [vmem:[%s2849_s1 + $0x188] sm:$0xff]   ;;  %s1918_s5 = sshll.u32 %s2857_s12, 6 }
  0x12   : > { %2129 = vmatprep.subr.bf16.mxu0 %v2355_v7  ;;  %v226_v11 = vld [vmem:[%s2518_s16 + $0x1] sm:$0xff]  ;;  %v227_v12 = vld [vmem:[%s2518_s16 + $0x11] sm:$0xff]  ;;  %s192_s8 = scalar_lea.vmem %s2851_s3, %s1918_s5 }
  0x13   : > { %v234_v14 = vpack.c.bf16 %v227_v12, %v226_v11  ;;  %v1756_v15 = vld [vmem:[%s2518_s16 + $0x21] sm:$0xff]  ;;  %v229_v22 = vld [vmem:[%s2518_s16 + $0x31] sm:$0xff] }
  0x14   : > { %2034 = vmatpush3.bf16.msra.mxu1 %v2354_v6  ;;  %v792_v16 = vpack.c.bf16 %v1756_v15, %v227_v12  ;;  %v1758_v23 = vld [vmem:[%s2518_s16 + $0x41] sm:$0xff]  ;;  %v2549_v25 = vpack.c.bf16 %v229_v22, %v1756_v15  ;;  %v231_v26 = vld [vmem:[%s2518_s16 + $0x51] sm:$0xff] }
  0x15   : > { %2130 = vmatpush3.bf16.msra.mxu0 %v2355_v7  ;;  %2035 = vmatprep.subr.bf16.mxu1 %v2356_v8  ;;  %v793_v27 = vpack.c.bf16 %v1758_v23, %v229_v22  ;;  %v1760_v28 = vld [vmem:[%s2518_s16 + $0x61] sm:$0xff]  ;;  %v2559_v31 = vpack.c.bf16 %v231_v26, %v1758_v23  ;;  %v233_v33 = vld [vmem:[%s2518_s16 + $0x71] sm:$0xff] }
  0x16   : > { %2131 = vmatprep.subr.bf16.mxu0 %v2357_v9  ;;  %2043 = vmatprep.mubr.bf16.mxu1 %v234_v14  ;;  %v794_v32 = vpack.c.bf16 %v1760_v28, %v231_v26  ;;  %v2567_v35 = vld [vmem:[%s2518_s16 + $0x81] sm:$0xff]  ;;  %v2573_v37 = vpack.c.bf16 %v233_v33, %v1760_v28  ;;  %v2577_v39 = vld [vmem:[%s2518_s16 + $0x10] sm:$0xff]  ;;  %v2394_v26 = vld [vmem:[%s2849_s1 + $0xb8] sm:$0xff]  }
  0x17   : > { %2139 = vmatprep.mubr.bf16.mxu0 %v792_v16  ;;  %v198_v38 = vld [vmem:[%s2518_s16] sm:$0xff]  ;;  %v795_v40 = vpack.c.bf16 %v2567_v35, %v233_v33  ;;  %v2581_v41 = vld [vmem:[%s2518_s16 + $0x12] sm:$0xff]  ;;  %v2391_v22 = vld [vmem:[%s2849_s1 + $0x1a8] sm:$0xff]  }
  0x18   : > { %2036 = vmatpush3.bf16.msra.mxu1 %v2356_v8  ;;  %v2584_v42 = vld [vmem:[%s2518_s16 + $0x22] sm:$0xff]  ;;  %v206_v45 = vpack.c.bf16 %v2577_v39, %v198_v38  ;;  %v2624_v56 = vld [vmem:[%s2518_s16 + $0x30] sm:$0xff]  ;;  %v2386_v16 = vld [vmem:[%s2849_s1 + $0x98] sm:$0xff]  }
  0x19   : > { %2132 = vmatpush3.bf16.msra.mxu0 %v2357_v9  ;;  %2037 = vmatprep.subr.bf16.mxu1 %v2358_v10  ;;  %v942_v46 = vpack.c.bf16 %v2584_v42, %v2581_v41  ;;  %v2621_v55 = vld [vmem:[%s2518_s16 + $0x20] sm:$0xff]  ;;  %v2630_v58 = vld [vmem:[%s2518_s16 + $0x32] sm:$0xff]  ;;  %v2399_v33 = vld [vmem:[%s2849_s1 + $0x1c8] sm:$0xff]  }
  0x1a   : > { %2133 = vmatprep.subr.bf16.mxu0 %v2359_v13  ;;  %v2636_v60 = vld [vmem:[%s2518_s16 + $0x42] sm:$0xff]  ;;  %v2642_v62 = vld [vmem:[%s2518_s16 + $0x50] sm:$0xff]  ;;  %v207_v63 = vpack.c.bf16 %v2624_v56, %v2621_v55 }
  0x1b   : > { %v2639_v61 = vld [vmem:[%s2518_s16 + $0x40] sm:$0xff]  ;;  %v2650_v1 = vld [vmem:[%s2518_s16 + $0x52] sm:$0xff]  ;;  %v943_v2 = vpack.c.bf16 %v2636_v60, %v2630_v58 }
  0x1c   : > { %2038 = vmatpush3.bf16.msra.mxu1 %v2358_v10  ;;  %v2655_v3 = vld [vmem:[%s2518_s16 + $0x62] sm:$0xff]  ;;  %v2662_v5 = vpack.c.bf16 %v2642_v62, %v2639_v61  ;;  %v2384_v7 = vld [vmem:[%s2849_s1 + $0x90] sm:$0xff]  }
  0x1d   : > { %2134 = vmatpush3.bf16.msra.mxu0 %v2359_v13  ;;  %2039 = vmatprep.subr.bf16.mxu1 %v2360_v17  ;;  %v2665_v6 = vld [vmem:[%s2518_s16 + $0x60] sm:$0xff]  ;;  %v944_v8 = vpack.c.bf16 %v2655_v3, %v2650_v1  ;;  %v2673_v9 = vld [vmem:[%s2518_s16 + $0x70] sm:$0xff] }
  0x1e   : > { %2135 = vmatprep.subr.bf16.mxu0 %v2361_v18  ;;  %v2676_v10 = vld [vmem:[%s2518_s16 + $0x72] sm:$0xff]  ;;  %v2679_v11 = vld [vmem:[%s2518_s16 + $0x82] sm:$0xff]  ;;  %v209_v13 = vpack.c.bf16 %v2673_v9, %v2665_v6 }
  0x1f   : > { %v2385_v12 = vld [vmem:[%s2849_s1 + $0x190] sm:$0xff]   ;;  %v481_v14 = vld [vmem:[%s2518_s16 + $0x2] sm:$0xff]  ;;  %v945_v15 = vpack.c.bf16 %v2679_v11, %v2676_v10 }
  0x20   : > { %2040 = vmatpush3.bf16.msra.mxu1 %v2360_v17  ;;  %v2387_v17 = vld [vmem:[%s2849_s1 + $0x198] sm:$0xff]   ;;  %v2392_v23 = vld [vmem:[%s2849_s1 + $0xb0] sm:$0xff]   ;;  %v2396_v28 = vld [vmem:[%s2849_s1 + $0xc0] sm:$0xff]  }
  0x21   : > { %2136 = vmatpush3.bf16.msra.mxu0 %v2361_v18  ;;  %2041 = vmatprep.subr.bf16.mxu1 %v2362_v19  ;;  %v489_v18 = vpack.c.bf16 %v2581_v41, %v481_v14  ;;  %v2747_v38 = vld [vmem:[%s2518_s16 + $0x80] sm:$0xff]  ;;  %v2401_v41 = vld [vmem:[%s2849_s1 + $0x1d0] sm:$0xff]  }
  0x22   : > { %2137 = vmatprep.subr.bf16.mxu0 %v2363_v20 }
  0x24   : > { %2042 = vmatpush3.bf16.msra.mxu1 %v2362_v19  ;;  %v2388_v19 = vld [vmem:[%s2849_s1 + $0xa0] sm:$0xff]  }
  0x25   : > { %2138 = vmatpush3.bf16.msra.mxu0 %v2363_v20  ;;  %2051 = vmatprep.subr.bf16.mxu1 %v2364_v21  ;;  %v2389_v20 = vld [vmem:[%s2849_s1 + $0x1a0] sm:$0xff]  }
  0x26   : > { %2147 = vmatprep.subr.bf16.mxu0 %v2365_v24 }
  0x27   : > { %2044 = vmatmul.mubr.bf16.vlgmr.msra.gmra.mrb[0].mxu1 %v2549_v25 }
  0x28   : > { %2052 = vmatpush3.bf16.msra.mxu1 %v2364_v21  ;;  %2140 = vmatmul.mubr.bf16.vlgmr.msra.gmra.mrb[0].mxu0 %v793_v27  ;;  %v2390_v21 = vld [vmem:[%s2849_s1 + $0xa8] sm:$0xff]   ;;  %v2395_v27 = vld [vmem:[%s2849_s1 + $0x1b8] sm:$0xff]  }
  0x29   : > { %2148 = vmatpush3.bf16.msra.mxu0 %v2365_v24  ;;  %2053 = vmatprep.subr.bf16.mxu1 %v2366_v29  ;;  %v2393_v24 = vld [vmem:[%s2849_s1 + $0x1b0] sm:$0xff]  }
  0x2a   : > { %2149 = vmatprep.subr.bf16.mxu0 %v2367_v30  ;;  %2047 = vmatprep.mubr.bf16.mxu1 %v2559_v31 }
  0x2b   : > { %2143 = vmatprep.mubr.bf16.mxu0 %v794_v32  ;;  %v2398_v32 = vld [vmem:[%s2849_s1 + $0xc8] sm:$0xff]  }
  0x2c   : > { %2054 = vmatpush3.bf16.msra.mxu1 %v2366_v29  ;;  %v2397_v29 = vld [vmem:[%s2849_s1 + $0x1c0] sm:$0xff]  }
  0x2d   : > { %2150 = vmatpush3.bf16.msra.mxu0 %v2367_v30  ;;  %2055 = vmatprep.subr.bf16.mxu1 %v2368_v34  ;;  %v2729_v30 = vpack.c.bf16 %v2630_v58, %v2584_v42  ;;  %v2756_v42 = vpack.c.bf16 %v2676_v10, %v2655_v3  ;;  %v1858_v58 = vld [vmem:[%s2518_s16 + $0x91] sm:$0xff] }
  0x2e   : > { %2151 = vmatprep.subr.bf16.mxu0 %v2369_v36 }
  0x2f   : > { %2048 = vmatmul.mubr.bf16.gmra.mrb[4].mxu1 %v2573_v37 }
  0x30   : > { %2056 = vmatpush3.bf16.msra.mxu1 %v2368_v34  ;;  %2144 = vmatmul.mubr.bf16.gmra.mrb[4].mxu0 %v795_v40  ;;  %v2739_v34 = vpack.c.bf16 %v2650_v1, %v2636_v60  ;;  %v1826_v40 = vld [vmem:[%s2518_s16 + $0x90] sm:$0xff]  ;;  %v1248_v60 = vpack.c.bf16 %v1858_v58, %v2567_v35  ;;  %v2417_v35 = vld [vmem:[%s2849_s1 + $0x228] sm:$0xff]  }
  0x31   : > { %2152 = vmatpush3.bf16.msra.mxu0 %v2369_v36  ;;  %2057 = vmatprep.subr.bf16.mxu1 %v2370_v43  ;;  %v2400_v36 = vld [vmem:[%s2849_s1 + $0xd0] sm:$0xff]  }
  0x32   : > { %2153 = vmatprep.subr.bf16.mxu0 %v2371_v44  ;;  %2067 = vmatprep.mubr.bf16.mxu1 %v206_v45  ;;  %v2403_v45 = vld [vmem:[%s2849_s1 + $0x1d8] sm:$0xff]  }
  0x33   : > { %2163 = vmatprep.mubr.bf16.mxu0 %v942_v46  ;;  %v642_v46 = vpack.c.bf16 %v2621_v55, %v2577_v39  ;;  %v2406_v39 = vld [vmem:[%s2849_s1 + $0xe8] sm:$0xff]  }
  0x34   : > { %2058 = vmatpush3.bf16.msra.mxu1 %v2370_v43  ;;  %v1098_v43 = vpack.c.bf16 %v1826_v40, %v2747_v38  ;;  %v2413_v55 = vld [vmem:[%s2849_s1 + $0x208] sm:$0xff]  }
  0x35   : > { %2154 = vmatpush3.bf16.msra.mxu0 %v2371_v44  ;;  %2059 = vmatprep.subr.bf16.mxu1 %v2372_v47  ;;  %v2402_v44 = vld [vmem:[%s2849_s1 + $0xd8] sm:$0xff]  }
  0x36   : > { %2155 = vmatprep.subr.bf16.mxu0 %v2373_v48 }
  0x38   : > { %2060 = vmatpush3.bf16.msra.mxu1 %v2372_v47  ;;  %v2404_v47 = vld [vmem:[%s2849_s1 + $0xe0] sm:$0xff]  }
  0x39   : > { %2156 = vmatpush3.bf16.msra.mxu0 %v2373_v48  ;;  %2061 = vmatprep.subr.bf16.mxu1 %v2374_v49  ;;  %v2405_v48 = vld [vmem:[%s2849_s1 + $0x1e0] sm:$0xff]  }
  0x3a   : > { %2157 = vmatprep.subr.bf16.mxu0 %v2375_v50 }
  0x3c   : > { %2062 = vmatpush3.bf16.msra.mxu1 %v2374_v49  ;;  %v2407_v49 = vld [vmem:[%s2849_s1 + $0x1e8] sm:$0xff]  }
  0x3d   : > { %2158 = vmatpush3.bf16.msra.mxu0 %v2375_v50  ;;  %2063 = vmatprep.subr.bf16.mxu1 %v2376_v51  ;;  %v2408_v50 = vld [vmem:[%s2849_s1 + $0xf0] sm:$0xff]  }
  0x3e   : > { %2159 = vmatprep.subr.bf16.mxu0 %v2377_v52 }
  0x40   : > { %2064 = vmatpush3.bf16.msra.mxu1 %v2376_v51  ;;  %v2410_v51 = vld [vmem:[%s2849_s1 + $0xf8] sm:$0xff]  }
  0x41   : > { %2160 = vmatpush3.bf16.msra.mxu0 %v2377_v52  ;;  %2065 = vmatprep.subr.bf16.mxu1 %v2378_v53  ;;  %v2411_v52 = vld [vmem:[%s2849_s1 + $0x1f8] sm:$0xff]  }
  0x42   : > { %2161 = vmatprep.subr.bf16.mxu0 %v2379_v54 }
  0x44   : > { %2066 = vmatpush3.bf16.msra.mxu1 %v2378_v53  ;;  %v2412_v53 = vld [vmem:[%s2849_s1 + $0x200] sm:$0xff]  }
  0x45   : > { %2162 = vmatpush3.bf16.msra.mxu0 %v2379_v54  ;;  %2075 = vmatprep.subr.bf16.mxu1 %v2380_v57  ;;  %v643_v54 = vpack.c.bf16 %v2639_v61, %v2624_v56  ;;  %v2414_v56 = vld [vmem:[%s2849_s1 + $0x210] sm:$0xff]  }
  0x46   : > { %2171 = vmatprep.subr.bf16.mxu0 %v2381_v59  ;;  %v2418_v61 = vld [vmem:[%s2849_s1 + $0x230] sm:$0xff]  }
  0x47   : > { %2068 = vmatmul.mubr.bf16.vlgmr.msra.gmra.mrb[0].mxu1 %v207_v63 }
  0x48   : > { %2076 = vmatpush3.bf16.msra.mxu1 %v2380_v57  ;;  %2164 = vmatmul.mubr.bf16.vlgmr.msra.gmra.mrb[0].mxu0 %v943_v2  ;;  %v644_v57 = vpack.c.bf16 %v2665_v6, %v2642_v62  ;;  %v2419_v62 = vld [vmem:[%s2849_s1 + $0x238] sm:$0xff]  }
  0x49   : > { %2172 = vmatpush3.bf16.msra.mxu0 %v2381_v59  ;;  %2077 = vmatprep.subr.bf16.mxu1 %v2382_v0  ;;  %v645_v59 = vpack.c.bf16 %v2747_v38, %v2673_v9 }
  0x4a   : > { %2173 = vmatprep.subr.bf16.mxu0 %v2383_v4  ;;  %2071 = vmatprep.mubr.bf16.mxu1 %v2662_v5 }
  0x4b   : > { %2167 = vmatprep.mubr.bf16.mxu0 %v944_v8 }
  0x4c   : > { %2078 = vmatpush3.bf16.msra.mxu1 %v2382_v0 }
  0x4d   : > { %2174 = vmatpush3.bf16.msra.mxu0 %v2383_v4  ;;  %2079 = vmatprep.subr.bf16.mxu1 %v2384_v7 }
  0x4e   : > { %2175 = vmatprep.subr.bf16.mxu0 %v2385_v12 }
  0x4f   : > { %2072 = vmatmul.mubr.bf16.gmra.mrb[4].mxu1 %v209_v13 }
  0x50   : > { %2080 = vmatpush3.bf16.msra.mxu1 %v2384_v7  ;;  %2168 = vmatmul.mubr.bf16.gmra.mrb[4].mxu0 %v945_v15 }
  0x51   : > { %2176 = vmatpush3.bf16.msra.mxu0 %v2385_v12  ;;  %2081 = vmatprep.subr.bf16.mxu1 %v2386_v16 }
  0x52   : > { %2177 = vmatprep.subr.bf16.mxu0 %v2387_v17  ;;  %2091 = vmatprep.mubr.bf16.mxu1 %v489_v18 }
  0x53   : > { %2187 = vmatprep.mubr.bf16.mxu0 %v207_v63  ;;  %v1890_v63 = vld [vmem:[%s2518_s16 + $0x92] sm:$0xff] }
  0x54   : > { %2082 = vmatpush3.bf16.msra.mxu1 %v2386_v16  ;;  %v1398_v0 = vpack.c.bf16 %v1890_v63, %v2679_v11 }
  0x55   : > { %2178 = vmatpush3.bf16.msra.mxu0 %v2387_v17  ;;  %2083 = vmatprep.subr.bf16.mxu1 %v2388_v19  ;;  %v1915_v17 = vld [vmem:[%s2850_s2] ss:$0 sm:$0xff] }
  0x56   : > { %2179 = vmatprep.subr.bf16.mxu0 %v2389_v20 }
  0x58   : > { %2084 = vmatpush3.bf16.msra.mxu1 %v2388_v19 }
  0x59   : > { %2180 = vmatpush3.bf16.msra.mxu0 %v2389_v20  ;;  %2085 = vmatprep.subr.bf16.mxu1 %v2390_v21 }
  0x5a   : > { %2181 = vmatprep.subr.bf16.mxu0 %v2391_v22 }
  0x5c   : > { %2086 = vmatpush3.bf16.msra.mxu1 %v2390_v21 }
  0x5d   : > { %2182 = vmatpush3.bf16.msra.mxu0 %v2391_v22  ;;  %2087 = vmatprep.subr.bf16.mxu1 %v2392_v23 }
  0x5e   : > { %2183 = vmatprep.subr.bf16.mxu0 %v2393_v24 }
  0x60   : > { %2088 = vmatpush3.bf16.msra.mxu1 %v2392_v23 }
  0x61   : > { %2184 = vmatpush3.bf16.msra.mxu0 %v2393_v24  ;;  %2089 = vmatprep.subr.bf16.mxu1 %v2394_v26 }
  0x62   : > { %2185 = vmatprep.subr.bf16.mxu0 %v2395_v27 }
  0x64   : > { %2090 = vmatpush3.bf16.msra.mxu1 %v2394_v26 }
  0x65   : > { %2186 = vmatpush3.bf16.msra.mxu0 %v2395_v27  ;;  %2099 = vmatprep.subr.bf16.mxu1 %v2396_v28 }
  0x66   : > { %2195 = vmatprep.subr.bf16.mxu0 %v2397_v29 }
  0x67   : > { %2092 = vmatmul.mubr.bf16.vlgmr.msra.gmra.mrb[0].mxu1 %v2729_v30 }
  0x68   : > { %2100 = vmatpush3.bf16.msra.mxu1 %v2396_v28  ;;  %2188 = vmatmul.mubr.bf16.vlgmr.msra.gmra.mrb[0].mxu0 %v2662_v5 }
  0x69   : > { %2196 = vmatpush3.bf16.msra.mxu0 %v2397_v29  ;;  %2101 = vmatprep.subr.bf16.mxu1 %v2398_v32 }
  0x6a   : > { %2197 = vmatprep.subr.bf16.mxu0 %v2399_v33  ;;  %2095 = vmatprep.mubr.bf16.mxu1 %v2739_v34 }
  0x6b   : > { %2191 = vmatprep.mubr.bf16.mxu0 %v209_v13 }
  0x6c   : > { %2102 = vmatpush3.bf16.msra.mxu1 %v2398_v32 }
  0x6d   : > { %2198 = vmatpush3.bf16.msra.mxu0 %v2399_v33  ;;  %2103 = vmatprep.subr.bf16.mxu1 %v2400_v36 }
  0x6e   : > { %2199 = vmatprep.subr.bf16.mxu0 %v2401_v41 }
  0x6f   : > { %2096 = vmatmul.mubr.bf16.gmra.mrb[4].mxu1 %v2756_v42 }
  0x70   : > { %2104 = vmatpush3.bf16.msra.mxu1 %v2400_v36  ;;  %2192 = vmatmul.mubr.bf16.gmra.mrb[4].mxu0 %v1098_v43 }
  0x71   : > { %2200 = vmatpush3.bf16.msra.mxu0 %v2401_v41  ;;  %2105 = vmatprep.subr.bf16.mxu1 %v2402_v44 }
  0x72   : > { %2201 = vmatprep.subr.bf16.mxu0 %v2403_v45  ;;  %2115 = vmatprep.mubr.bf16.mxu1 %v642_v46 }
  0x73   : > { %2211 = vmatprep.mubr.bf16.mxu0 %v2549_v25  ;;  %v2409_v25 = vld [vmem:[%s2849_s1 + $0x1f0] sm:$0xff]  }
  0x74   : > { %2106 = vmatpush3.bf16.msra.mxu1 %v2402_v44 }
  0x75   : > { %2202 = vmatpush3.bf16.msra.mxu0 %v2403_v45  ;;  %2107 = vmatprep.subr.bf16.mxu1 %v2404_v47 }
  0x76   : > { %2203 = vmatprep.subr.bf16.mxu0 %v2405_v48 }
  0x78   : > { %2108 = vmatpush3.bf16.msra.mxu1 %v2404_v47 }
  0x79   : > { %2204 = vmatpush3.bf16.msra.mxu0 %v2405_v48  ;;  %2109 = vmatprep.subr.bf16.mxu1 %v2406_v39 }
  0x7a   : > { %2205 = vmatprep.subr.bf16.mxu0 %v2407_v49 }
  0x7c   : > { %2110 = vmatpush3.bf16.msra.mxu1 %v2406_v39 }
  0x7d   : > { %2206 = vmatpush3.bf16.msra.mxu0 %v2407_v49  ;;  %2111 = vmatprep.subr.bf16.mxu1 %v2408_v50 }
  0x7e   : > { %2207 = vmatprep.subr.bf16.mxu0 %v2409_v25 }
  0x80   : > { %2112 = vmatpush3.bf16.msra.mxu1 %v2408_v50 }
  0x81   : > { %2208 = vmatpush3.bf16.msra.mxu0 %v2409_v25  ;;  %2113 = vmatprep.subr.bf16.mxu1 %v2410_v51 }
  0x82   : > { %2209 = vmatprep.subr.bf16.mxu0 %v2411_v52 }
  0x84   : > { %2114 = vmatpush3.bf16.msra.mxu1 %v2410_v51 }
  0x85   : > { %2210 = vmatpush3.bf16.msra.mxu0 %v2411_v52  ;;  %2243 = vmatprep.subr.bf16.mxu1 %v2412_v53 }
  0x86   : > { %2219 = vmatprep.subr.bf16.mxu0 %v2412_v53 }
  0x87   : > { %2116 = vmatmul.mubr.bf16.vlgmr.msra.gmra.mrb[0].mxu1 %v643_v54 }
  0x88   : > { %2212 = vmatmul.mubr.bf16.vlgmr.msra.gmra.mrb[0].mxu0 %v2559_v31  ;;  %2251 = vmatpush3.bf16.msra.mxu1 %v2412_v53  ;;  %v2415_v31 = vld [vmem:[%s2849_s1 + $0x218] sm:$0xff]  }
  0x89   : > { %2220 = vmatpush3.bf16.msra.mxu0 %v2412_v53  ;;  %2244 = vmatprep.subr.bf16.mxu1 %v2413_v55 }
  0x8a   : > { %2221 = vmatprep.subr.bf16.mxu0 %v2413_v55  ;;  %2119 = vmatprep.mubr.bf16.mxu1 %v644_v57 }
  0x8b   : > { %2215 = vmatprep.mubr.bf16.mxu0 %v2573_v37  ;;  %v2416_v37 = vld [vmem:[%s2849_s1 + $0x220] sm:$0xff]  }
  0x8c   : > { %2252 = vmatpush3.bf16.msra.mxu1 %v2413_v55 }
  0x8d   : > { %2222 = vmatpush3.bf16.msra.mxu0 %v2413_v55  ;;  %2245 = vmatprep.subr.bf16.mxu1 %v2414_v56 }
  0x8e   : > { %2223 = vmatprep.subr.bf16.mxu0 %v2414_v56 }
  0x8f   : > { %2120 = vmatmul.mubr.bf16.gmra.mrb[4].mxu1 %v645_v59 }
  0x90   : > { %2216 = vmatmul.mubr.bf16.gmra.mrb[4].mxu0 %v1248_v60  ;;  %2253 = vmatpush3.bf16.msra.mxu1 %v2414_v56 }
  0x91   : > { %2224 = vmatpush3.bf16.msra.mxu0 %v2414_v56  ;;  %2246 = vmatprep.subr.bf16.mxu1 %v2415_v31 }
  0x92   : > { %2225 = vmatprep.subr.bf16.mxu0 %v2415_v31  ;;  %2235 = vmatprep.mubr.bf16.mxu0 %v2729_v30 }
  0x93   : > { %2239 = vmatprep.mubr.bf16.mxu1 %v2756_v42 }
  0x94   : > { %2254 = vmatpush3.bf16.msra.mxu1 %v2415_v31 }
  0x95   : > { %2226 = vmatpush3.bf16.msra.mxu0 %v2415_v31  ;;  %2247 = vmatprep.subr.bf16.mxu1 %v2416_v37 }
  0x96   : > { %2227 = vmatprep.subr.bf16.mxu0 %v2416_v37 }
  0x98   : > { %2255 = vmatpush3.bf16.msra.mxu1 %v2416_v37 }
  0x99   : > { %2228 = vmatpush3.bf16.msra.mxu0 %v2416_v37  ;;  %2248 = vmatprep.subr.bf16.mxu1 %v2417_v35 }
  0x9a   : > { %2229 = vmatprep.subr.bf16.mxu0 %v2417_v35 }
  0x9c   : > { %2256 = vmatpush3.bf16.msra.mxu1 %v2417_v35 }
  0x9d   : > { %2230 = vmatpush3.bf16.msra.mxu0 %v2417_v35  ;;  %2249 = vmatprep.subr.bf16.mxu1 %v2418_v61 }
  0x9e   : > { %2231 = vmatprep.subr.bf16.mxu0 %v2418_v61 }
  0xa0   : > { %2257 = vmatpush3.bf16.msra.mxu1 %v2418_v61 }
  0xa1   : > { %2232 = vmatpush3.bf16.msra.mxu0 %v2418_v61  ;;  %2250 = vmatprep.subr.bf16.mxu1 %v2419_v62 }
  0xa2   : > { %2233 = vmatprep.subr.bf16.mxu0 %v2419_v62 }
  0xa4   : > { %2258 = vmatpush3.bf16.msra.mxu1 %v2419_v62 }
  0xa5   : > { %2234 = vmatpush3.bf16.msra.mxu0 %v2419_v62 }
  0xa7   : > { %2240 = vmatmul.mubr.bf16.vlgmr.msra.gmra.mrb[8].mxu1 %v1398_v0 }
  0xa8   : > { %2236 = vmatmul.mubr.bf16.vlgmr.msra.gmra.mrb[0].mxu0 %v2739_v34 }
 0x15a   : > { %v2117_v1 = vpop.f32.mrb[0].mxu1 }
 0x15b   : > { %v745_v2 = vpop.f32.mrb[1].mxu1 }
 0x15c   : > { %v2118_v3 = vpop.f32.mrb[2].mxu1 }
 0x15d   : > { %v748_v4 = vpop.f32.mrb[3].mxu1 }
 0x162   : > { %v2121_v5 = vpop.f32.mrb[4].mxu1 }
 0x163   : > { %v2217_v6 = vpop.f32.mrb[4].mxu0  ;;  %v761_v7 = vpop.f32.mrb[5].mxu1 }
 0x164   : > { %v2263_v8 = vadd.f32 %v2217_v6, %v2121_v5  ;;  %v1364_v9 = vpop.f32.mrb[5].mxu0  ;;  %v2122_v10 = vpop.f32.mrb[6].mxu1 }
 0x165   : > { %v2265_v12 = vadd.f32 %v1364_v9, %v761_v7  ;;  %v2218_v13 = vpop.f32.mrb[6].mxu0  ;;  %v764_v14 = vpop.f32.mrb[7].mxu1 }
 0x166   : > { %v2267_v11 = vadd.f32 %v2218_v13, %v2122_v10  ;;  %v1367_v15 = vpop.f32.mrb[7].mxu0 }
 0x167   : > { %v2269_v16 = vadd.f32 %v1367_v15, %v764_v14 }
 0x17a   : > { %v2241_v18 = vpop.f32.mrb[8].mxu1 }
 0x17b   : > { %v2237_v19 = vpop.f32.mrb[0].mxu0  ;;  %v2264_v20 = vadd.f32 %v2263_v8, %v2241_v18  ;;  %v1514_v21 = vpop.f32.mrb[9].mxu1 }
 0x17c   : > { %v2259_v22 = vadd.f32 %v2237_v19, %v2117_v1  ;;  %v1498_v23 = vpop.f32.mrb[1].mxu0  ;;  %v2266_v24 = vadd.f32 %v2265_v12, %v1514_v21  ;;  %v2242_v26 = vpop.f32.mrb[10].mxu1 }
 0x17d   : > { %v1550_v27 = vadd.f32 %v2264_v20, %v1915_v17  ;;  %v2260_v28 = vadd.f32 %v1498_v23, %v745_v2  ;;  %v2238_v29 = vpop.f32.mrb[2].mxu0  ;;  %v2268_v30 = vadd.f32 %v2267_v11, %v2242_v26  ;;  %v1517_v32 = vpop.f32.mrb[11].mxu1 }
 0x17e   : > { %v1546_v33 = vadd.f32 %v2259_v22, %v1915_v17  ;;  %v1548_v34 = vadd.f32 %v2266_v24, %v1915_v17  ;;  %v2261_v36 = vadd.f32 %v2238_v29, %v2118_v3  ;;  %v1501_v38 = vpop.f32.mrb[3].mxu0  ;;  %v2270_v40 = vadd.f32 %v2269_v16, %v1517_v32 }
 0x17f   : > { %v1558_v41 = vmax.f32 %v1550_v27, 0.0  ;;  %v1544_v42 = vadd.f32 %v2260_v28, %v1915_v17  ;;  %v1551_v43 = vadd.f32 %v2268_v30, %v1915_v17  ;;  %v2262_v44 = vadd.f32 %v1501_v38, %v748_v4 }
 0x180   : > { %v1554_v45 = vmax.f32 %v1546_v33, 0.0  ;;  %v1556_v46 = vmax.f32 %v1548_v34, 0.0  ;;  %v1547_v47 = vadd.f32 %v2261_v36, %v1915_v17  ;;  %v1549_v48 = vadd.f32 %v2270_v40, %v1915_v17 }
 0x181   : > { %1566 = vst [vmem:[%s192_s8 + $0x30] sm:$0xff] %v1558_v41  ;;  %v1552_v39 = vmax.f32 %v1544_v42, 0.0  ;;  %v1559_v49 = vmax.f32 %v1551_v43, 0.0  ;;  %v1545_v50 = vadd.f32 %v2262_v44, %v1915_v17 }
 0x182   : > { %1562 = vst [vmem:[%s192_s8 + $0x10] sm:$0xff] %v1554_v45  ;;  %1564 = vst [vmem:[%s192_s8 + $0x20] sm:$0xff] %v1556_v46  ;;  %v1555_v25 = vmax.f32 %v1547_v47, 0.0  ;;  %v1557_v51 = vmax.f32 %v1549_v48, 0.0 }
 0x183   : > { %1560 = vst [vmem:[%s192_s8] sm:$0xff] %v1552_v39  ;;  %1567 = vst [vmem:[%s192_s8 + $0x38] sm:$0xff] %v1559_v49  ;;  %v1553_v52 = vmax.f32 %v1545_v50, 0.0 }
 0x184   : > { %1563 = vst [vmem:[%s192_s8 + $0x18] sm:$0xff] %v1555_v25  ;;  %1565 = vst [vmem:[%s192_s8 + $0x28] sm:$0xff] %v1557_v51 }
 0x185   : > { %1561 = vst [vmem:[%s192_s8 + $0x8] sm:$0xff] %v1553_v52 }
 0x186 PF: > { %s13_s14 = sadd.s32 1, %s2442_s14   ;;  %s2852_s12 = smov %s2438_s13 }
 0x187   : > { %p10_p5 = scmp.ge.s32.totalorder %s13_s14, 4   ;;  %s2853_s13 = smov %s2855_s15 }
 0x189   :  { %12 = sbr.rel (!%p10_p5) target bundleno = 2 (0x2), region = 73 }

// kernel: denoiser_forward.19
= control target key start
LH: loop header
LB: loop body
LE: loop exit
PB: predicated region body
PF: predicated region fallthrough
CT: control target
= control target key end

     0   :  { %8 = vsyncpa [#allocation3], 0  ;;  %s5449_s0 = inlined_call_operand.vmem [shape: f32[2,18,18,128], index: 0, kind: input, shape index: {}]   ;;  %s5450_s1 = inlined_call_operand.vmem [shape: bf16[9,128,128], index: 1, kind: input, shape index: {}]   ;;  %s5451_s2 = inlined_call_operand.vmem [shape: f32[1,128], index: 2, kind: input, shape index: {}]   ;;  %s5452_s3 = inlined_call_operand.hbm [shape: f32[2,16,16,128], index: 3, kind: output, shape index: {}]  }
   0x1   :  { %10 = vsyncpa [#allocation3 + $0x1], 0  ;;  %s4653_s12 = smov 0   ;;  %s4655_s13 = smov 0  }
   0x2   :  { %s4657_s14 = smov 0   ;;  %s4659_s15 = smov 0  }
   0x3   :  { %s4661_s16 = smov 0   ;;  %s4663_s17 = smov 0  }
   0x4 LB: > { %s3086_s18 = sadd.s32 4294967295, %s4628_s17   ;;  %s3087_s19 = sadd.s32 4294967294, %s4628_s17   ;;  %s4628_s17 = sphi %s4663_s17, %s16_s17   ;;  %s4624_s16 = sphi %s4661_s16, %s5459_s16   ;;  %s4620_s15 = sphi %s4659_s15, %s5458_s15   ;;  %s4616_s14 = sphi %s4657_s14, %s5457_s14   ;;  %s4612_s13 = sphi %s4655_s13, %s5456_s13   ;;  %s4608_s12 = sphi %s4653_s12, %s5455_s12  }
   0x5   : > { %s28_s20 = sadd.s32 1, %s4624_s16  ;;  %s105_s21 = sadd.s32 1, %s4616_s14 }
   0x6   : > { %p30_p0 = scmp.ge.s32.totalorder %s28_s20, 2  ;;  %p115_p1 = scmp.ne.s32.totalorder %s4616_s14, %s4612_s13 }
   0x7   : > { %p116_p2 = scmp.eq.s32.totalorder %s3086_s18, 1  ;;  %p121_p3 = scmp.ne.s32.totalorder %s4612_s13, %s4608_s12 }
   0x8   : > { %s5461_s20 = smov (%p30_p0, %s28_s20), 0  ;;  %p122_p5 = scmp.eq.s32.totalorder %s3087_s19, 1 }
   0x9   : > { %p4693_p4 = por %p116_p2, %p115_p1  ;;  %s100_s23 = ssub.s32 %s4624_s16, %s5461_s20 }
   0xa   : > { %p3090_p6 = scmp.ge.s32.totalorder %s4628_s17, 1  ;;  %p103_p7 = scmp.eq.s32.totalorder %s100_s23, 0 }
   0xb   : > { %p4700_p8 = por %p122_p5, %p121_p3  ;;  %p154_p9 = scmp.lt.s32.totalorder %s4628_s17, 3 }
   0xc   : > { %s4706_s25 = scalar_select %p103_p7, %s4616_s14, %s105_s21  }
   0xd   : > { %p155_p10 = pnand %p3090_p6, %p154_p9 }
   0xe   : > { %v4470_v0 = vld [vmem:[%s5450_s1 + $0x40] sm:$0xff] (!%p155_p10)   ;;  %p178_p11 = scmp.lt.s32.totalorder (!%p155_p10), %s4620_s15, 1  ;;  %v4472_v2 = vld [vmem:[%s5450_s1 + $0x48] sm:$0xff] (!%p155_p10)   ;;  %v4474_v4 = vld [vmem:[%s5450_s1 + $0x50] sm:$0xff] (!%p155_p10)   ;;  %s3491_s7 = sshll.u32 (!%p155_p10), %s4620_s15, 12 }
   0xf   : > { %158 = sbr.rel (%p155_p10) target bundleno = 564 (0x234), region = 32  ;;  %v4471_v1 = vld [vmem:[%s5450_s1 + $0x100] sm:$0xff] (!%p155_p10)   ;;  %3708 = vmatprep.subr.bf16.mxu1 (!%p155_p10), %v4470_v0  ;;  %v4473_v3 = vld [vmem:[%s5450_s1 + $0x108] sm:$0xff] (!%p155_p10)   ;;  %v4475_v5 = vld [vmem:[%s5450_s1 + $0x110] sm:$0xff] (!%p155_p10)   ;;  %s4630_s19 = smov (!%p155_p10), [#allocation2]  }
  0x10   : > { %3900 = vmatprep.subr.bf16.mxu0 (!%p155_p10), %v4471_v1  ;;  %3709 = vmatpush3.bf16.msra.mxu1 (!%p155_p10), %v4470_v0  ;;  %v4476_v6 = vld [vmem:[%s5450_s1 + $0x58] sm:$0xff] (!%p155_p10)   ;;  %v4478_v8 = vld [vmem:[%s5450_s1 + $0x60] sm:$0xff] (!%p155_p10)   ;;  %v4480_v10 = vld [vmem:[%s5450_s1 + $0x68] sm:$0xff] (!%p155_p10)   ;;  %s4554_s21 = sshll.u32 (!%p155_p10), %s4630_s19, 4  ;;  %s4555_s21 = int_to_ptr.vmem [resolvable:$false] %s4554_s21 }
  0x11   : > { %3901 = vmatpush3.bf16.msra.mxu0 (!%p155_p10), %v4471_v1  ;;  %3710 = vmatprep.subr.bf16.mxu1 (!%p155_p10), %v4472_v2  ;;  %v4477_v7 = vld [vmem:[%s5450_s1 + $0x118] sm:$0xff] (!%p155_p10)   ;;  %v4479_v9 = vld [vmem:[%s5450_s1 + $0x120] sm:$0xff] (!%p155_p10)   ;;  %v4481_v11 = vld [vmem:[%s5450_s1 + $0x128] sm:$0xff] (!%p155_p10)   ;;  %s4556_s23 = scalar_lea.vmem (!%p155_p10), %s4555_s21, 8192 }
  0x12   : > { %3902 = vmatprep.subr.bf16.mxu0 (!%p155_p10), %v4473_v3  ;;  %v4482_v18 = vld [vmem:[%s5450_s1 + $0x70] sm:$0xff] (!%p155_p10)   ;;  %v4484_v20 = vld [vmem:[%s5450_s1 + $0x78] sm:$0xff] (!%p155_p10)   ;;  %v4486_v22 = vld [vmem:[%s5450_s1] sm:$0xff] (!%p155_p10)  }
  0x13   : > { %v4483_v19 = vld [vmem:[%s5450_s1 + $0x130] sm:$0xff] (!%p155_p10)   ;;  %v4485_v21 = vld [vmem:[%s5450_s1 + $0x138] sm:$0xff] (!%p155_p10)   ;;  %v4487_v25 = vld [vmem:[%s5450_s1 + $0x140] sm:$0xff] (!%p155_p10)  }
  0x14   : > { %3711 = vmatpush3.bf16.msra.mxu1 (!%p155_p10), %v4472_v2  ;;  %v4488_v29 = vld [vmem:[%s5450_s1 + $0x148] sm:$0xff] (!%p155_p10)   ;;  %v4490_v34 = vld [vmem:[%s5450_s1 + $0x150] sm:$0xff] (!%p155_p10)   ;;  %v4491_v40 = vld [vmem:[%s5450_s1 + $0x158] sm:$0xff] (!%p155_p10)  }
  0x15   : > { %3903 = vmatpush3.bf16.msra.mxu0 (!%p155_p10), %v4473_v3  ;;  %3712 = vmatprep.subr.bf16.mxu1 (!%p155_p10), %v4474_v4  ;;  %v4489_v31 = vld [vmem:[%s5450_s1 + $0x8] sm:$0xff] (!%p155_p10)   ;;  %v4492_v36 = vld [vmem:[%s5450_s1 + $0x10] sm:$0xff] (!%p155_p10)   ;;  %v4495_v41 = vld [vmem:[%s5450_s1 + $0x18] sm:$0xff] (!%p155_p10)  }
  0x16   : > { %s179_s11 = scalar_select %p178_p11, %s4620_s15, 1  ;;  %3904 = vmatprep.subr.bf16.mxu0 %v4475_v5  ;;  %v4493_v44 = vld [vmem:[%s5450_s1 + $0x160] sm:$0xff]   ;;  %v4494_v50 = vld [vmem:[%s5450_s1 + $0x168] sm:$0xff]   ;;  %v4496_v54 = vld [vmem:[%s5450_s1 + $0x170] sm:$0xff]  }
  0x17   : > { %v4498_v47 = vld [vmem:[%s5450_s1 + $0x20] sm:$0xff]   ;;  %v4500_v51 = vld [vmem:[%s5450_s1 + $0x28] sm:$0xff]   ;;  %v4502_v57 = vld [vmem:[%s5450_s1 + $0x30] sm:$0xff]  }
  0x18   : > { %s4412_s26 = smul.u32 432, %s179_s11  ;;  %3713 = vmatpush3.bf16.msra.mxu1 %v4474_v4  ;;  %v4497_v60 = vld [vmem:[%s5450_s1 + $0x178] sm:$0xff]   ;;  %v4499_v4 = vld [vmem:[%s5450_s1 + $0x180] sm:$0xff]   ;;  %s5394_s11 = scalar_lea.hbm %s5452_s3, %s3491_s7 }
  0x19   : > { %3905 = vmatpush3.bf16.msra.mxu0 %v4475_v5  ;;  %3714 = vmatprep.subr.bf16.mxu1 %v4476_v6  ;;  %v4504_v0 = vld [vmem:[%s5450_s1 + $0x38] sm:$0xff]  }
  0x1a   : > { %3906 = vmatprep.subr.bf16.mxu0 %v4477_v7  ;;  %s4743_s6 = scalar_lea.vmem %s5449_s0, %s4412_s26 }
  0x1b   : > { %v252_v12 = vld [vmem:[%s4743_s6 + $0x1] sm:$0xff]  ;;  %v253_v13 = vld [vmem:[%s4743_s6 + $0x9] sm:$0xff]  ;;  %v3205_v14 = vld [vmem:[%s4743_s6 + $0x19] sm:$0xff] }
  0x1c   : > { %3715 = vmatpush3.bf16.msra.mxu1 %v4476_v6  ;;  %v284_v15 = vpack.c.bf16 %v253_v13, %v252_v12  ;;  %v3206_v16 = vld [vmem:[%s4743_s6 + $0x21] sm:$0xff]  ;;  %v3207_v23 = vld [vmem:[%s4743_s6 + $0x31] sm:$0xff]  ;;  %v3208_v24 = vld [vmem:[%s4743_s6 + $0x39] sm:$0xff] }
  0x1d   : > { %3907 = vmatpush3.bf16.msra.mxu0 %v4477_v7  ;;  %3716 = vmatprep.subr.bf16.mxu1 %v4478_v8  ;;  %v1382_v17 = vpack.c.bf16 %v3206_v16, %v3205_v14  ;;  %v3209_v26 = vld [vmem:[%s4743_s6 + $0x49] sm:$0xff]  ;;  %v3210_v27 = vld [vmem:[%s4743_s6 + $0x51] sm:$0xff]  ;;  %v1383_v28 = vpack.c.bf16 %v3208_v24, %v3207_v23  ;;  %v3211_v32 = vld [vmem:[%s4743_s6 + $0x61] sm:$0xff] }
  0x1e   : > { %3908 = vmatprep.subr.bf16.mxu0 %v4479_v9  ;;  %3724 = vmatprep.mubr.bf16.mxu1 %v284_v15  ;;  %v1384_v30 = vpack.c.bf16 %v3210_v27, %v3209_v26  ;;  %v3212_v33 = vld [vmem:[%s4743_s6 + $0x69] sm:$0xff]  ;;  %v3213_v35 = vld [vmem:[%s4743_s6 + $0x79] sm:$0xff]  ;;  %v3214_v37 = vld [vmem:[%s4743_s6 + $0x81] sm:$0xff] }
  0x1f   : > { %3916 = vmatprep.mubr.bf16.mxu0 %v1382_v17  ;;  %v1385_v38 = vpack.c.bf16 %v3212_v33, %v3211_v32  ;;  %v1386_v39 = vpack.c.bf16 %v3214_v37, %v3213_v35  ;;  %v3215_v42 = vld [vmem:[%s4743_s6 + $0x91] sm:$0xff]  ;;  %v3216_v43 = vld [vmem:[%s4743_s6 + $0x99] sm:$0xff]  ;;  %v3217_v45 = vld [vmem:[%s4743_s6 + $0xa9] sm:$0xff] }
  0x20   : > { %3717 = vmatpush3.bf16.msra.mxu1 %v4478_v8  ;;  %v3218_v46 = vld [vmem:[%s4743_s6 + $0xb1] sm:$0xff]  ;;  %v1387_v48 = vpack.c.bf16 %v3216_v43, %v3215_v42  ;;  %v3219_v52 = vld [vmem:[%s4743_s6 + $0xc1] sm:$0xff]  ;;  %v3220_v53 = vld [vmem:[%s4743_s6 + $0xc9] sm:$0xff] }
  0x21   : > { %3909 = vmatpush3.bf16.msra.mxu0 %v4479_v9  ;;  %3718 = vmatprep.subr.bf16.mxu1 %v4480_v10  ;;  %v4809_v49 = vpack.c.bf16 %v3218_v46, %v3217_v45  ;;  %v3261_v55 = vld [vmem:[%s4743_s6 + $0x1a] sm:$0xff]  ;;  %v3262_v56 = vld [vmem:[%s4743_s6 + $0x22] sm:$0xff]  ;;  %v1389_v58 = vpack.c.bf16 %v3220_v53, %v3219_v52  ;;  %v3263_v63 = vld [vmem:[%s4743_s6 + $0x32] sm:$0xff] }
  0x22   : > { %3910 = vmatprep.subr.bf16.mxu0 %v4481_v11  ;;  %v4828_v59 = vpack.c.bf16 %v3262_v56, %v3261_v55  ;;  %v270_v61 = vld [vmem:[%s4743_s6 + $0xd9] sm:$0xff]  ;;  %v271_v62 = vld [vmem:[%s4743_s6 + $0xe1] sm:$0xff]  ;;  %v272_v2 = vld [vmem:[%s4743_s6 + $0xf1] sm:$0xff] }
  0x23   : > { %v3264_v1 = vld [vmem:[%s4743_s6 + $0x3a] sm:$0xff]  ;;  %v3265_v5 = vld [vmem:[%s4743_s6 + $0x4a] sm:$0xff]  ;;  %v3266_v6 = vld [vmem:[%s4743_s6 + $0x52] sm:$0xff]  ;;  %v4849_v7 = vpack.c.bf16 %v271_v62, %v270_v61 }
  0x24   : > { %3719 = vmatpush3.bf16.msra.mxu1 %v4480_v10  ;;  %v273_v3 = vld [vmem:[%s4743_s6 + $0xf9] sm:$0xff]  ;;  %v4856_v9 = vpack.c.bf16 %v3264_v1, %v3263_v63  ;;  %v4501_v12 = vld [vmem:[%s5450_s1 + $0x188] sm:$0xff]   ;;  %v275_v14 = vld [vmem:[%s4743_s6 + $0x111] sm:$0xff] }
  0x25   : > { %3911 = vmatpush3.bf16.msra.mxu0 %v4481_v11  ;;  %3720 = vmatprep.subr.bf16.mxu1 %v4482_v18  ;;  %v4854_v8 = vld [vmem:[%s5450_s1 + $0x80] sm:$0xff]   ;;  %v4858_v10 = vpack.c.bf16 %v273_v3, %v272_v2  ;;  %v4860_v11 = vpack.c.bf16 %v3266_v6, %v3265_v5  ;;  %v274_v13 = vld [vmem:[%s4743_s6 + $0x109] sm:$0xff]  ;;  %v4505_v27 = vld [vmem:[%s5450_s1 + $0x198] sm:$0xff]  }
  0x26   : > { %3912 = vmatprep.subr.bf16.mxu0 %v4483_v19  ;;  %v3267_v15 = vld [vmem:[%s4743_s6 + $0x62] sm:$0xff]  ;;  %v3268_v16 = vld [vmem:[%s4743_s6 + $0x6a] sm:$0xff]  ;;  %v278_v26 = vld [vmem:[%s4743_s6 + $0x139] sm:$0xff] }
  0x27   : > { %v4883_v23 = vpack.c.bf16 %v3268_v16, %v3267_v15  ;;  %v281_v32 = vld [vmem:[%s4743_s6 + $0x159] sm:$0xff]  ;;  %v3273_v33 = vld [vmem:[%s4743_s6 + $0xaa] sm:$0xff]  ;;  %v3275_v43 = vld [vmem:[%s4743_s6 + $0xc2] sm:$0xff] }
  0x28   : > { %3721 = vmatpush3.bf16.msra.mxu1 %v4482_v18  ;;  %v277_v18 = vld [vmem:[%s4743_s6 + $0x129] sm:$0xff]  ;;  %v4507_v35 = vld [vmem:[%s5450_s1 + $0x1a0] sm:$0xff]   ;;  %v190_v55 = vld [vmem:[%s4743_s6 + $0x18] sm:$0xff] }
  0x29   : > { %3913 = vmatpush3.bf16.msra.mxu0 %v4483_v19  ;;  %3722 = vmatprep.subr.bf16.mxu1 %v4484_v20  ;;  %v3269_v19 = vld [vmem:[%s4743_s6 + $0x7a] sm:$0xff]  ;;  %v4509_v42 = vld [vmem:[%s5450_s1 + $0x1a8] sm:$0xff]   ;;  %v192_v61 = vld [vmem:[%s4743_s6 + $0x30] sm:$0xff] }
  0x2a   : > { %3914 = vmatprep.subr.bf16.mxu0 %v4485_v21  ;;  %v188_v45 = vld [vmem:[%s4743_s6] sm:$0xff]  ;;  %v189_v46 = vld [vmem:[%s4743_s6 + $0x8] sm:$0xff]  ;;  %v193_v62 = vld [vmem:[%s4743_s6 + $0x38] sm:$0xff] }
  0x2b   : > { %v220_v53 = vpack.c.bf16 %v189_v46, %v188_v45  ;;  %v191_v56 = vld [vmem:[%s4743_s6 + $0x20] sm:$0xff]  ;;  %v3281_v63 = vld [vmem:[%s4743_s6 + $0x10a] sm:$0xff] }
  0x2c   : > { %3723 = vmatpush3.bf16.msra.mxu1 %v4484_v20  ;;  %v3270_v20 = vld [vmem:[%s4743_s6 + $0x82] sm:$0xff]  ;;  %v4958_v2 = vpack.c.bf16 %v191_v56, %v190_v55  ;;  %v3284_v15 = vld [vmem:[%s4743_s6 + $0x12a] sm:$0xff] }
  0x2d   : > { %3915 = vmatpush3.bf16.msra.mxu0 %v4485_v21  ;;  %3756 = vmatprep.subr.bf16.mxu1 %v4486_v22  ;;  %v4503_v21 = vld [vmem:[%s5450_s1 + $0x190] sm:$0xff]   ;;  %v4956_v1 = vld [vmem:[%s5450_s1 + $0x1c0] sm:$0xff]   ;;  %v194_v6 = vld [vmem:[%s4743_s6 + $0x48] sm:$0xff] }
  0x2e   : > { %3948 = vmatprep.subr.bf16.mxu0 %v4487_v25  ;;  %v196_v16 = vld [vmem:[%s4743_s6 + $0x60] sm:$0xff]  ;;  %v4516_v46 = vld [vmem:[%s5450_s1 + $0xa8] sm:$0xff]  }
  0x2f   : > { %3725 = vmatmul.mubr.bf16.vlgmr.msra.gmra.mrb[0].mxu1 %v1382_v17  ;;  %v276_v17 = vld [vmem:[%s4743_s6 + $0x121] sm:$0xff] }
  0x30   : > { %3917 = vmatmul.mubr.bf16.vlgmr.msra.gmra.mrb[0].mxu0 %v1383_v28  ;;  %3757 = vmatpush3.bf16.msra.mxu1 %v4486_v22  ;;  %v4881_v22 = vpack.c.bf16 %v275_v14, %v274_v13  ;;  %v4885_v24 = vpack.c.bf16 %v277_v18, %v276_v17  ;;  %v4508_v13 = vld [vmem:[%s5450_s1 + $0x88] sm:$0xff]   ;;  %v3285_v18 = vld [vmem:[%s4743_s6 + $0x13a] sm:$0xff] }
  0x31   : > { %3949 = vmatpush3.bf16.msra.mxu0 %v4487_v25  ;;  %3728 = vmatprep.mubr.bf16.mxu1 %v1383_v28  ;;  %v4887_v25 = vpack.c.bf16 %v3270_v20, %v3269_v19  ;;  %v279_v28 = vld [vmem:[%s4743_s6 + $0x141] sm:$0xff]  ;;  %v4510_v19 = vld [vmem:[%s5450_s1 + $0x90] sm:$0xff]  }
  0x32   : > { %3950 = vmatprep.subr.bf16.mxu0 %v4488_v29  ;;  %3920 = vmatprep.mubr.bf16.mxu0 %v1384_v30  ;;  %v3283_v14 = vld [vmem:[%s4743_s6 + $0x122] sm:$0xff] }
  0x33   : > { %3758 = vmatprep.subr.bf16.mxu1 %v4489_v31  ;;  %v197_v17 = vld [vmem:[%s4743_s6 + $0x68] sm:$0xff]  ;;  %v204_v55 = vld [vmem:[%s4743_s6 + $0xc0] sm:$0xff] }
  0x34   : > { %3759 = vmatpush3.bf16.msra.mxu1 %v4489_v31  ;;  %v280_v31 = vld [vmem:[%s4743_s6 + $0x151] sm:$0xff]  ;;  %v3286_v20 = vld [vmem:[%s4743_s6 + $0x142] sm:$0xff] }
  0x35   : > { %3951 = vmatpush3.bf16.msra.mxu0 %v4488_v29  ;;  %3760 = vmatprep.subr.bf16.mxu1 %v4492_v36  ;;  %v3271_v29 = vld [vmem:[%s4743_s6 + $0x92] sm:$0xff]  ;;  %v205_v56 = vld [vmem:[%s4743_s6 + $0xc8] sm:$0xff] }
  0x36   : > { %3952 = vmatprep.subr.bf16.mxu0 %v4490_v34 }
  0x37   : > { %3729 = vmatmul.mubr.bf16.gmra.mrb[4].mxu1 %v1384_v30  ;;  %v3272_v30 = vld [vmem:[%s4743_s6 + $0x9a] sm:$0xff] }
  0x38   : > { %3921 = vmatmul.mubr.bf16.gmra.mrb[4].mxu0 %v1385_v38  ;;  %3732 = vmatprep.mubr.bf16.mxu1 %v1385_v38  ;;  %v4909_v37 = vpack.c.bf16 %v3272_v30, %v3271_v29  ;;  %v4911_v38 = vpack.c.bf16 %v281_v32, %v280_v31  ;;  %v199_v29 = vld [vmem:[%s4743_s6 + $0x80] sm:$0xff]  ;;  %v4512_v30 = vld [vmem:[%s5450_s1 + $0x98] sm:$0xff]  }
  0x39   : > { %3953 = vmatpush3.bf16.msra.mxu0 %v4490_v34  ;;  %3924 = vmatprep.mubr.bf16.mxu0 %v1386_v39  ;;  %v3274_v34 = vld [vmem:[%s4743_s6 + $0xb2] sm:$0xff]  ;;  %v3288_v32 = vld [vmem:[%s4743_s6 + $0x15a] sm:$0xff] }
  0x3a   : > { %3954 = vmatprep.subr.bf16.mxu0 %v4491_v40  ;;  %3761 = vmatpush3.bf16.msra.mxu1 %v4492_v36  ;;  %v4907_v36 = vpack.c.bf16 %v279_v28, %v278_v26  ;;  %v4990_v26 = vpack.c.bf16 %v197_v17, %v196_v16  ;;  %v198_v28 = vld [vmem:[%s4743_s6 + $0x78] sm:$0xff]  ;;  %v4517_v16 = vld [vmem:[%s5450_s1 + $0x1c8] sm:$0xff]  }
  0x3b   : > { %3762 = vmatprep.subr.bf16.mxu1 %v4495_v41  ;;  %v3287_v31 = vld [vmem:[%s4743_s6 + $0x152] sm:$0xff]  ;;  %v210_v17 = vld [vmem:[%s4743_s6 + $0x108] sm:$0xff] }
  0x3d   : > { %3955 = vmatpush3.bf16.msra.mxu0 %v4491_v40  ;;  %v282_v40 = vld [vmem:[%s4743_s6 + $0x169] sm:$0xff] }
  0x3e   : > { %3956 = vmatprep.subr.bf16.mxu0 %v4493_v44  ;;  %3763 = vmatpush3.bf16.msra.mxu1 %v4495_v41  ;;  %v283_v41 = vld [vmem:[%s4743_s6 + $0x171] sm:$0xff] }
  0x3f   : > { %3733 = vmatmul.mubr.bf16.gmra.mrb[8].mxu1 %v1386_v39  ;;  %3764 = vmatprep.subr.bf16.mxu1 %v4498_v47  ;;  %v4913_v39 = vpack.c.bf16 %v3274_v34, %v3273_v33  ;;  %v200_v33 = vld [vmem:[%s4743_s6 + $0x90] sm:$0xff]  ;;  %v201_v34 = vld [vmem:[%s4743_s6 + $0x98] sm:$0xff] }
  0x40   : > { %3925 = vmatmul.mubr.bf16.gmra.mrb[8].mxu0 %v1387_v48  ;;  %3736 = vmatprep.mubr.bf16.mxu1 %v1387_v48  ;;  %v3278_v48 = vld [vmem:[%s4743_s6 + $0xe2] sm:$0xff] }
  0x41   : > { %3957 = vmatpush3.bf16.msra.mxu0 %v4493_v44  ;;  %3928 = vmatprep.mubr.bf16.mxu0 %v4809_v49  ;;  %v3276_v44 = vld [vmem:[%s4743_s6 + $0xca] sm:$0xff] }
  0x42   : > { %3958 = vmatprep.subr.bf16.mxu0 %v4494_v50  ;;  %3765 = vmatpush3.bf16.msra.mxu1 %v4498_v47  ;;  %v3277_v47 = vld [vmem:[%s4743_s6 + $0xda] sm:$0xff]  ;;  %v4935_v52 = vpack.c.bf16 %v3276_v44, %v3275_v43  ;;  %v5014_v43 = vpack.c.bf16 %v3288_v32, %v3287_v31  ;;  %v5016_v44 = vpack.c.bf16 %v201_v34, %v200_v33  ;;  %v216_v33 = vld [vmem:[%s4743_s6 + $0x150] sm:$0xff] }
  0x43   : > { %3766 = vmatprep.subr.bf16.mxu1 %v4500_v51  ;;  %v214_v31 = vld [vmem:[%s4743_s6 + $0x138] sm:$0xff]  ;;  %v215_v32 = vld [vmem:[%s4743_s6 + $0x140] sm:$0xff] }
  0x44   : > { %v217_v34 = vld [vmem:[%s4743_s6 + $0x158] sm:$0xff] }
  0x45   : > { %3959 = vmatpush3.bf16.msra.mxu0 %v4494_v50  ;;  %v4511_v50 = vld [vmem:[%s5450_s1 + $0x1b0] sm:$0xff]  }
  0x46   : > { %3960 = vmatprep.subr.bf16.mxu0 %v4496_v54  ;;  %3767 = vmatpush3.bf16.msra.mxu1 %v4500_v51  ;;  %v4933_v51 = vpack.c.bf16 %v283_v41, %v282_v40  ;;  %v3290_v40 = vld [vmem:[%s4743_s6 + $0x172] sm:$0xff]  ;;  %v4514_v41 = vld [vmem:[%s5450_s1 + $0xa0] sm:$0xff]  }
  0x47   : > { %3737 = vmatmul.mubr.bf16.gmra.mrb[12].mxu1 %v4809_v49  ;;  %3768 = vmatprep.subr.bf16.mxu1 %v4502_v57 }
  0x48   : > { %3929 = vmatmul.mubr.bf16.gmra.mrb[12].mxu0 %v1389_v58  ;;  %3740 = vmatprep.mubr.bf16.mxu1 %v1389_v58  ;;  %v3279_v58 = vld [vmem:[%s4743_s6 + $0xf2] sm:$0xff] }
  0x49   : > { %3961 = vmatpush3.bf16.msra.mxu0 %v4496_v54  ;;  %3964 = vmatprep.mubr.bf16.mxu0 %v4828_v59  ;;  %v4937_v54 = vpack.c.bf16 %v3278_v48, %v3277_v47  ;;  %v202_v47 = vld [vmem:[%s4743_s6 + $0xa8] sm:$0xff]  ;;  %v203_v48 = vld [vmem:[%s4743_s6 + $0xb0] sm:$0xff] }
  0x4a   : > { %3962 = vmatprep.subr.bf16.mxu0 %v4497_v60  ;;  %3769 = vmatpush3.bf16.msra.mxu1 %v4502_v57  ;;  %v4513_v57 = vld [vmem:[%s5450_s1 + $0x1b8] sm:$0xff]  }
  0x4b   : > { %3770 = vmatprep.subr.bf16.mxu1 %v4504_v0 }
  0x4d   : > { %3963 = vmatpush3.bf16.msra.mxu0 %v4497_v60  ;;  %v3280_v60 = vld [vmem:[%s4743_s6 + $0xfa] sm:$0xff] }
  0x4e   : > { %3996 = vmatprep.subr.bf16.mxu0 %v4499_v4  ;;  %3771 = vmatpush3.bf16.msra.mxu1 %v4504_v0  ;;  %v3282_v0 = vld [vmem:[%s4743_s6 + $0x112] sm:$0xff]  ;;  %v4960_v3 = vpack.c.bf16 %v3280_v60, %v3279_v58  ;;  %v5036_v58 = vpack.c.bf16 %v203_v48, %v202_v47  ;;  %v218_v47 = vld [vmem:[%s4743_s6 + $0x168] sm:$0xff] }
  0x4f   : > { %3741 = vmatmul.mubr.bf16.gmra.mrb[16].mxu1 %v4849_v7  ;;  %3804 = vmatprep.subr.bf16.mxu1 %v4854_v8  ;;  %v4964_v5 = vpack.c.bf16 %v3282_v0, %v3281_v63  ;;  %v206_v63 = vld [vmem:[%s4743_s6 + $0xd8] sm:$0xff]  ;;  %v207_v0 = vld [vmem:[%s4743_s6 + $0xe0] sm:$0xff]  ;;  %v219_v48 = vld [vmem:[%s4743_s6 + $0x170] sm:$0xff] }
  0x50   : > { %3965 = vmatmul.mubr.bf16.vlgmr.msra.gmra.mrb[0].mxu0 %v4856_v9  ;;  %3744 = vmatprep.mubr.bf16.mxu1 %v4858_v10 }
  0x51   : > { %3997 = vmatpush3.bf16.msra.mxu0 %v4499_v4  ;;  %3968 = vmatprep.mubr.bf16.mxu0 %v4860_v11  ;;  %v4962_v4 = vpack.c.bf16 %v193_v62, %v192_v61  ;;  %v5038_v61 = vpack.c.bf16 %v205_v56, %v204_v55  ;;  %v4520_v62 = vld [vmem:[%s5450_s1 + $0xb8] sm:$0xff]   ;;  %v4527_v55 = vld [vmem:[%s5450_s1 + $0x1f0] sm:$0xff]   ;;  %v5111_v56 = vpack.c.bf16 %v219_v48, %v218_v47 }
  0x52   : > { %3998 = vmatprep.subr.bf16.mxu0 %v4501_v12  ;;  %v3381_v47 = vld [vmem:[%s4743_s6 + $0x91] sm:$0xff]  ;;  %v3382_v48 = vld [vmem:[%s4743_s6 + $0x99] sm:$0xff] }
  0x55   : > { %3999 = vmatpush3.bf16.msra.mxu0 %v4501_v12  ;;  %v195_v12 = vld [vmem:[%s4743_s6 + $0x50] sm:$0xff] }
  0x56   : > { %4000 = vmatprep.subr.bf16.mxu0 %v4503_v21 }
  0x57   : > { %3745 = vmatmul.mubr.bf16.gmra.mrb[20].mxu1 %v4881_v22 }
  0x58   : > { %3969 = vmatmul.mubr.bf16.gmra.mrb[4].mxu0 %v4883_v23  ;;  %3748 = vmatprep.mubr.bf16.mxu1 %v4885_v24 }
  0x59   : > { %3972 = vmatprep.mubr.bf16.mxu0 %v4887_v25  ;;  %4001 = vmatpush3.bf16.msra.mxu0 %v4503_v21  ;;  %v4986_v21 = vpack.c.bf16 %v195_v12, %v194_v6  ;;  %v208_v6 = vld [vmem:[%s4743_s6 + $0xf0] sm:$0xff]  ;;  %v209_v12 = vld [vmem:[%s4743_s6 + $0xf8] sm:$0xff] }
  0x5a   : > { %4002 = vmatprep.subr.bf16.mxu0 %v4505_v27 }
  0x5d   : > { %4003 = vmatpush3.bf16.msra.mxu0 %v4505_v27  ;;  %v4992_v27 = vpack.c.bf16 %v3286_v20, %v3285_v18  ;;  %v211_v18 = vld [vmem:[%s4743_s6 + $0x110] sm:$0xff]  ;;  %v213_v20 = vld [vmem:[%s4743_s6 + $0x128] sm:$0xff] }
  0x5e   : > { %4004 = vmatprep.subr.bf16.mxu0 %v4507_v35 }
  0x5f   : > { %3749 = vmatmul.mubr.bf16.gmra.mrb[24].mxu1 %v4907_v36 }
  0x60   : > { %3973 = vmatmul.mubr.bf16.gmra.mrb[8].mxu0 %v4909_v37  ;;  %3752 = vmatprep.mubr.bf16.mxu1 %v4911_v38 }
  0x61   : > { %3976 = vmatprep.mubr.bf16.mxu0 %v4913_v39  ;;  %4005 = vmatpush3.bf16.msra.mxu0 %v4507_v35  ;;  %v3289_v35 = vld [vmem:[%s4743_s6 + $0x16a] sm:$0xff] }
  0x62   : > { %4006 = vmatprep.subr.bf16.mxu0 %v4509_v42  ;;  %v5018_v45 = vpack.c.bf16 %v3290_v40, %v3289_v35  ;;  %v4523_v35 = vld [vmem:[%s5450_s1 + $0x1e0] sm:$0xff]   ;;  %v5093_v40 = vpack.c.bf16 %v215_v32, %v214_v31  ;;  %v3378_v32 = vld [vmem:[%s4743_s6 + $0x69] sm:$0xff] }
  0x63   : > { %v3377_v31 = vld [vmem:[%s4743_s6 + $0x61] sm:$0xff] }
  0x65   : > { %4007 = vmatpush3.bf16.msra.mxu0 %v4509_v42  ;;  %v5012_v42 = vpack.c.bf16 %v199_v29, %v198_v28  ;;  %v4519_v28 = vld [vmem:[%s5450_s1 + $0x1d0] sm:$0xff]   ;;  %v5075_v29 = vpack.c.bf16 %v211_v18, %v210_v17  ;;  %v3374_v18 = vld [vmem:[%s4743_s6 + $0x39] sm:$0xff] }
  0x66   : > { %4008 = vmatprep.subr.bf16.mxu0 %v4511_v50  ;;  %v3373_v17 = vld [vmem:[%s4743_s6 + $0x31] sm:$0xff] }
  0x67   : > { %3753 = vmatmul.mubr.bf16.gmra.mrb[28].mxu1 %v4933_v51 }
  0x68   : > { %3977 = vmatmul.mubr.bf16.gmra.mrb[12].mxu0 %v4935_v52  ;;  %3772 = vmatprep.mubr.bf16.mxu1 %v220_v53  ;;  %v3292_v53 = vld [vmem:[%s4743_s6 + $0x18a] sm:$0xff] }
  0x69   : > { %3980 = vmatprep.mubr.bf16.mxu0 %v4937_v54  ;;  %4009 = vmatpush3.bf16.msra.mxu0 %v4511_v50  ;;  %v3291_v50 = vld [vmem:[%s4743_s6 + $0x182] sm:$0xff] }
  0x6a   : > { %4010 = vmatprep.subr.bf16.mxu0 %v4513_v57  ;;  %v1703_v60 = vpack.c.bf16 %v3292_v53, %v3291_v50  ;;  %v735_v50 = vld [vmem:[%s4743_s6 + $0x2] sm:$0xff]  ;;  %v736_v53 = vld [vmem:[%s4743_s6 + $0xa] sm:$0xff] }
  0x6d   : > { %4011 = vmatpush3.bf16.msra.mxu0 %v4513_v57  ;;  %v4518_v57 = vld [vmem:[%s5450_s1 + $0xb0] sm:$0xff]  }
  0x6e   : > { %4044 = vmatprep.subr.bf16.mxu0 %v4956_v1 }
  0x6f   : > { %3773 = vmatmul.mubr.bf16.vlgmr.msra.gmra.mrb[0].mxu1 %v4958_v2 }
  0x70   : > { %3981 = vmatmul.mubr.bf16.gmra.mrb[16].mxu0 %v4960_v3  ;;  %3805 = vmatpush3.bf16.msra.mxu1 %v4854_v8  ;;  %v4988_v8 = vpack.c.bf16 %v3284_v15, %v3283_v14  ;;  %v5055_v14 = vpack.c.bf16 %v207_v0, %v206_v63  ;;  %v5057_v15 = vpack.c.bf16 %v209_v12, %v208_v6  ;;  %v4524_v63 = vld [vmem:[%s5450_s1 + $0xc8] sm:$0xff]   ;;  %v4526_v0 = vld [vmem:[%s5450_s1 + $0xd0] sm:$0xff]   ;;  %v4530_v12 = vld [vmem:[%s5450_s1 + $0xe0] sm:$0xff]  }
  0x71   : > { %3776 = vmatprep.mubr.bf16.mxu1 %v4962_v4  ;;  %3984 = vmatprep.mubr.bf16.mxu0 %v4964_v5  ;;  %v3346_v6 = vld [vmem:[%s4743_s6 + $0x188] sm:$0xff] }
  0x72   : > { %3806 = vmatprep.subr.bf16.mxu1 %v4508_v13 }
  0x74   : > { %3807 = vmatpush3.bf16.msra.mxu1 %v4508_v13  ;;  %v5053_v13 = vld [vmem:[%s5450_s1 + $0xc0] sm:$0xff]  }
  0x75   : > { %3808 = vmatprep.subr.bf16.mxu1 %v4510_v19 }
  0x77   : > { %3777 = vmatmul.mubr.bf16.gmra.mrb[4].mxu1 %v4986_v21 }
  0x78   : > { %3985 = vmatmul.mubr.bf16.gmra.mrb[20].mxu0 %v4988_v8  ;;  %3780 = vmatprep.mubr.bf16.mxu1 %v4990_v26 }
  0x79   : > { %3988 = vmatprep.mubr.bf16.mxu0 %v4992_v27  ;;  %3809 = vmatpush3.bf16.msra.mxu1 %v4510_v19  ;;  %v212_v19 = vld [vmem:[%s4743_s6 + $0x120] sm:$0xff] }
  0x7a   : > { %3810 = vmatprep.subr.bf16.mxu1 %v4512_v30 }
  0x7d   : > { %3811 = vmatpush3.bf16.msra.mxu1 %v4512_v30  ;;  %v5077_v30 = vpack.c.bf16 %v213_v20, %v212_v19  ;;  %v2303_v20 = vpack.c.bf16 %v3374_v18, %v3373_v17  ;;  %v3441_v17 = vld [vmem:[%s4743_s6 + $0xc2] sm:$0xff]  ;;  %v3442_v18 = vld [vmem:[%s4743_s6 + $0xca] sm:$0xff] }
  0x7e   : > { %3812 = vmatprep.subr.bf16.mxu1 %v4514_v41 }
  0x7f   : > { %3781 = vmatmul.mubr.bf16.gmra.mrb[8].mxu1 %v5012_v42 }
  0x80   : > { %3989 = vmatmul.mubr.bf16.gmra.mrb[24].mxu0 %v5014_v43  ;;  %3784 = vmatprep.mubr.bf16.mxu1 %v5016_v44 }
  0x81   : > { %3992 = vmatprep.mubr.bf16.mxu0 %v5018_v45  ;;  %3813 = vmatpush3.bf16.msra.mxu1 %v4514_v41  ;;  %v5095_v41 = vpack.c.bf16 %v217_v34, %v216_v33  ;;  %v2305_v34 = vpack.c.bf16 %v3378_v32, %v3377_v31 }
  0x82   : > { %3814 = vmatprep.subr.bf16.mxu1 %v4516_v46 }
  0x85   : > { %3815 = vmatpush3.bf16.msra.mxu1 %v4516_v46  ;;  %v4525_v46 = vld [vmem:[%s5450_s1 + $0x1e8] sm:$0xff]  }
  0x86   : > { %3816 = vmatprep.subr.bf16.mxu1 %v4518_v57 }
  0x87   : > { %3785 = vmatmul.mubr.bf16.gmra.mrb[12].mxu1 %v5036_v58 }
  0x88   : > { %3993 = vmatmul.mubr.bf16.gmra.mrb[28].mxu0 %v1703_v60  ;;  %3788 = vmatprep.mubr.bf16.mxu1 %v5038_v61  ;;  %v4529_v60 = vld [vmem:[%s5450_s1 + $0x1f8] sm:$0xff]  }
  0x89   : > { %4012 = vmatprep.mubr.bf16.mxu0 %v4962_v4  ;;  %3817 = vmatpush3.bf16.msra.mxu1 %v4518_v57  ;;  %v767_v57 = vpack.c.bf16 %v736_v53, %v735_v50  ;;  %v4535_v50 = vld [vmem:[%s5450_s1 + $0x210] sm:$0xff]  }
  0x8a   : > { %3818 = vmatprep.subr.bf16.mxu1 %v4520_v62 }
  0x8d   : > { %3819 = vmatpush3.bf16.msra.mxu1 %v4520_v62  ;;  %v4531_v62 = vld [vmem:[%s5450_s1 + $0x200] sm:$0xff]  }
  0x8e   : > { %3852 = vmatprep.subr.bf16.mxu1 %v5053_v13 }
  0x8f   : > { %3789 = vmatmul.mubr.bf16.gmra.mrb[16].mxu1 %v5055_v14 }
  0x90   : > { %4013 = vmatmul.mubr.bf16.vlgmr.msra.gmra.mrb[0].mxu0 %v4986_v21  ;;  %3792 = vmatprep.mubr.bf16.mxu1 %v5057_v15 }
  0x91   : > { %4045 = vmatpush3.bf16.msra.mxu0 %v4956_v1  ;;  %4016 = vmatprep.mubr.bf16.mxu0 %v4990_v26  ;;  %v4521_v1 = vld [vmem:[%s5450_s1 + $0x1d8] sm:$0xff]  }
  0x92   : > { %4046 = vmatprep.subr.bf16.mxu0 %v4517_v16 }
  0x95   : > { %4047 = vmatpush3.bf16.msra.mxu0 %v4517_v16  ;;  %v3348_v16 = vld [vmem:[%s4743_s6 + $0x1a0] sm:$0xff] }
  0x96   : > { %4048 = vmatprep.subr.bf16.mxu0 %v4519_v28 }
  0x97   : > { %3793 = vmatmul.mubr.bf16.gmra.mrb[20].mxu1 %v5075_v29 }
  0x98   : > { %4017 = vmatmul.mubr.bf16.gmra.mrb[4].mxu0 %v5012_v42  ;;  %3796 = vmatprep.mubr.bf16.mxu1 %v5077_v30 }
  0x99   : > { %4020 = vmatprep.mubr.bf16.mxu0 %v5016_v44  ;;  %4049 = vmatpush3.bf16.msra.mxu0 %v4519_v28  ;;  %v3375_v28 = vld [vmem:[%s4743_s6 + $0x49] sm:$0xff] }
  0x9a   : > { %4050 = vmatprep.subr.bf16.mxu0 %v4521_v1 }
  0x9d   : > { %4051 = vmatpush3.bf16.msra.mxu0 %v4521_v1  ;;  %v3376_v1 = vld [vmem:[%s4743_s6 + $0x51] sm:$0xff] }
  0x9e   : > { %4052 = vmatprep.subr.bf16.mxu0 %v4523_v35  ;;  %v2304_v33 = vpack.c.bf16 %v3376_v1, %v3375_v28  ;;  %v3445_v28 = vld [vmem:[%s4743_s6 + $0xf2] sm:$0xff]  ;;  %v3446_v1 = vld [vmem:[%s4743_s6 + $0xfa] sm:$0xff] }
  0x9f   : > { %3797 = vmatmul.mubr.bf16.gmra.mrb[24].mxu1 %v5093_v40  ;;  %v2617_v32 = vpack.c.bf16 %v3446_v1, %v3445_v28 }
  0xa0   : > { %4021 = vmatmul.mubr.bf16.gmra.mrb[8].mxu0 %v5036_v58  ;;  %3800 = vmatprep.mubr.bf16.mxu1 %v5095_v41 }
  0xa1   : > { %4024 = vmatprep.mubr.bf16.mxu0 %v5038_v61  ;;  %4053 = vmatpush3.bf16.msra.mxu0 %v4523_v35  ;;  %v3379_v35 = vld [vmem:[%s4743_s6 + $0x79] sm:$0xff] }
  0xa2   : > { %4054 = vmatprep.subr.bf16.mxu0 %v4525_v46 }
  0xa5   : > { %4055 = vmatpush3.bf16.msra.mxu0 %v4525_v46  ;;  %v3380_v46 = vld [vmem:[%s4743_s6 + $0x81] sm:$0xff] }
  0xa6   : > { %4056 = vmatprep.subr.bf16.mxu0 %v4527_v55  ;;  %v2306_v53 = vpack.c.bf16 %v3380_v46, %v3379_v35  ;;  %v3226_v35 = vld [vmem:[%s4743_s6 + $0x111] sm:$0xff]  ;;  %v3449_v46 = vld [vmem:[%s4743_s6 + $0x122] sm:$0xff] }
  0xa7   : > { %3801 = vmatmul.mubr.bf16.gmra.mrb[28].mxu1 %v5111_v56 }
  0xa8   : > { %4025 = vmatmul.mubr.bf16.gmra.mrb[12].mxu0 %v5055_v14  ;;  %3820 = vmatprep.mubr.bf16.mxu1 %v767_v57  ;;  %v3386_v57 = vld [vmem:[%s4743_s6 + $0xc9] sm:$0xff] }
  0xa9   : > { %4028 = vmatprep.mubr.bf16.mxu0 %v5057_v15  ;;  %4057 = vmatpush3.bf16.msra.mxu0 %v4527_v55  ;;  %v2307_v55 = vpack.c.bf16 %v3382_v48, %v3381_v47  ;;  %v3450_v47 = vld [vmem:[%s4743_s6 + $0x12a] sm:$0xff] }
  0xaa   : > { %4058 = vmatprep.subr.bf16.mxu0 %v4529_v60 }
  0xad   : > { %4059 = vmatpush3.bf16.msra.mxu0 %v4529_v60  ;;  %v4538_v60 = vld [vmem:[%s5450_s1 + $0x220] sm:$0xff]  }
  0xae   : > { %4092 = vmatprep.subr.bf16.mxu0 %v4531_v62 }
  0xaf   : > { %3821 = vmatmul.mubr.bf16.vlgmr.msra.gmra.mrb[0].mxu1 %v4828_v59  ;;  %v4528_v59 = vld [vmem:[%s5450_s1 + $0xd8] sm:$0xff]  }
  0xb0   : > { %4029 = vmatmul.mubr.bf16.gmra.mrb[16].mxu0 %v5075_v29  ;;  %3853 = vmatpush3.bf16.msra.mxu1 %v5053_v13 }
  0xb1   : > { %3824 = vmatprep.mubr.bf16.mxu1 %v4856_v9  ;;  %4032 = vmatprep.mubr.bf16.mxu0 %v5077_v30  ;;  %v3345_v9 = vld [vmem:[%s4743_s6 + $0x180] sm:$0xff] }
  0xb2   : > { %3854 = vmatprep.subr.bf16.mxu1 %v4524_v63  ;;  %v5145_v13 = vpack.c.bf16 %v3346_v6, %v3345_v9  ;;  %v3436_v6 = vld [vmem:[%s4743_s6 + $0x82] sm:$0xff] }
  0xb4   : > { %3855 = vmatpush3.bf16.msra.mxu1 %v4524_v63  ;;  %v4539_v63 = vld [vmem:[%s5450_s1 + $0x228] sm:$0xff]  }
  0xb5   : > { %3856 = vmatprep.subr.bf16.mxu1 %v4526_v0 }
  0xb7   : > { %3825 = vmatmul.mubr.bf16.gmra.mrb[4].mxu1 %v4860_v11  ;;  %v4532_v11 = vld [vmem:[%s5450_s1 + $0xe8] sm:$0xff]  }
  0xb8   : > { %4033 = vmatmul.mubr.bf16.gmra.mrb[20].mxu0 %v5093_v40  ;;  %3828 = vmatprep.mubr.bf16.mxu1 %v4883_v23  ;;  %v3347_v23 = vld [vmem:[%s4743_s6 + $0x198] sm:$0xff] }
  0xb9   : > { %4036 = vmatprep.mubr.bf16.mxu0 %v5095_v41  ;;  %3857 = vmatpush3.bf16.msra.mxu1 %v4526_v0  ;;  %v2012_v19 = vpack.c.bf16 %v3348_v16, %v3347_v23  ;;  %v3434_v0 = vld [vmem:[%s4743_s6 + $0x6a] sm:$0xff] }
  0xba   : > { %3858 = vmatprep.subr.bf16.mxu1 %v4528_v59 }
  0xbd   : > { %3859 = vmatpush3.bf16.msra.mxu1 %v4528_v59  ;;  %v4549_v59 = vld [vmem:[%s5450_s1 + $0x138] sm:$0xff]  }
  0xbe   : > { %3860 = vmatprep.subr.bf16.mxu1 %v4530_v12 }
  0xbf   : > { %3829 = vmatmul.mubr.bf16.gmra.mrb[8].mxu1 %v4887_v25  ;;  %v4534_v25 = vld [vmem:[%s5450_s1 + $0xf0] sm:$0xff]  }
  0xc0   : > { %4037 = vmatmul.mubr.bf16.gmra.mrb[24].mxu0 %v5111_v56  ;;  %3832 = vmatprep.mubr.bf16.mxu1 %v4909_v37  ;;  %v4536_v37 = vld [vmem:[%s5450_s1 + $0xf8] sm:$0xff]  }
  0xc1   : > { %4040 = vmatprep.mubr.bf16.mxu0 %v5145_v13  ;;  %3861 = vmatpush3.bf16.msra.mxu1 %v4530_v12  ;;  %v3437_v12 = vld [vmem:[%s4743_s6 + $0x92] sm:$0xff] }
  0xc2   : > { %3862 = vmatprep.subr.bf16.mxu1 %v4532_v11 }
  0xc5   : > { %3863 = vmatpush3.bf16.msra.mxu1 %v4532_v11  ;;  %v3438_v11 = vld [vmem:[%s4743_s6 + $0x9a] sm:$0xff] }
  0xc6   : > { %3864 = vmatprep.subr.bf16.mxu1 %v4534_v25  ;;  %v2613_v16 = vpack.c.bf16 %v3438_v11, %v3437_v12 }
  0xc7   : > { %3833 = vmatmul.mubr.bf16.gmra.mrb[12].mxu1 %v4913_v39  ;;  %v4533_v39 = vld [vmem:[%s5450_s1 + $0x208] sm:$0xff]  }
  0xc8   : > { %4041 = vmatmul.mubr.bf16.gmra.mrb[28].mxu0 %v2012_v19  ;;  %3836 = vmatprep.mubr.bf16.mxu1 %v4935_v52  ;;  %v4542_v52 = vld [vmem:[%s5450_s1 + $0x100] sm:$0xff]   ;;  %v2615_v19 = vpack.c.bf16 %v3442_v18, %v3441_v17 }
  0xc9   : > { %4060 = vmatprep.mubr.bf16.mxu0 %v2303_v20  ;;  %3865 = vmatpush3.bf16.msra.mxu1 %v4534_v25  ;;  %v3221_v20 = vld [vmem:[%s4743_s6 + $0xd9] sm:$0xff] }
  0xca   : > { %3866 = vmatprep.subr.bf16.mxu1 %v4536_v37 }
  0xcd   : > { %3867 = vmatpush3.bf16.msra.mxu1 %v4536_v37  ;;  %v3222_v37 = vld [vmem:[%s4743_s6 + $0xe1] sm:$0xff] }
  0xce   : > { %4140 = vmatprep.subr.bf16.mxu1 %v4542_v52 }
  0xcf   : > { %3837 = vmatmul.mubr.bf16.gmra.mrb[16].mxu1 %v4937_v54  ;;  %v4537_v54 = vld [vmem:[%s5450_s1 + $0x218] sm:$0xff]  }
  0xd0   : > { %4061 = vmatmul.mubr.bf16.vlgmr.msra.gmra.mrb[0].mxu0 %v2304_v33  ;;  %3840 = vmatprep.mubr.bf16.mxu1 %v4960_v3  ;;  %v3385_v3 = vld [vmem:[%s4743_s6 + $0xc1] sm:$0xff]  ;;  %v3224_v33 = vld [vmem:[%s4743_s6 + $0xf9] sm:$0xff] }
  0xd1   : > { %4093 = vmatpush3.bf16.msra.mxu0 %v4531_v62  ;;  %4064 = vmatprep.mubr.bf16.mxu0 %v2305_v34  ;;  %v2309_v62 = vpack.c.bf16 %v3386_v57, %v3385_v3  ;;  %v3447_v34 = vld [vmem:[%s4743_s6 + $0x10a] sm:$0xff]  ;;  %v3451_v3 = vld [vmem:[%s4743_s6 + $0x13a] sm:$0xff]  ;;  %v3452_v57 = vld [vmem:[%s4743_s6 + $0x142] sm:$0xff] }
  0xd2   : > { %4094 = vmatprep.subr.bf16.mxu0 %v4533_v39 }
  0xd5   : > { %4095 = vmatpush3.bf16.msra.mxu0 %v4533_v39  ;;  %v3448_v39 = vld [vmem:[%s4743_s6 + $0x112] sm:$0xff] }
  0xd6   : > { %4096 = vmatprep.subr.bf16.mxu0 %v4535_v50  ;;  %v2618_v48 = vpack.c.bf16 %v3448_v39, %v3447_v34 }
  0xd7   : > { %3841 = vmatmul.mubr.bf16.gmra.mrb[20].mxu1 %v4964_v5  ;;  %v4540_v5 = vld [vmem:[%s5450_s1 + $0x230] sm:$0xff]  }
  0xd8   : > { %4065 = vmatmul.mubr.bf16.gmra.mrb[4].mxu0 %v2306_v53  ;;  %3844 = vmatprep.mubr.bf16.mxu1 %v4988_v8  ;;  %v4541_v8 = vld [vmem:[%s5450_s1 + $0x238] sm:$0xff]   ;;  %v2619_v53 = vpack.c.bf16 %v3450_v47, %v3449_v46 }
  0xd9   : > { %4068 = vmatprep.mubr.bf16.mxu0 %v2307_v55  ;;  %4097 = vmatpush3.bf16.msra.mxu0 %v4535_v50  ;;  %v3227_v55 = vld [vmem:[%s4743_s6 + $0x121] sm:$0xff] }
  0xda   : > { %4098 = vmatprep.subr.bf16.mxu0 %v4537_v54 }
  0xdd   : > { %4099 = vmatpush3.bf16.msra.mxu0 %v4537_v54  ;;  %v3228_v54 = vld [vmem:[%s4743_s6 + $0x129] sm:$0xff] }
  0xde   : > { %4100 = vmatprep.subr.bf16.mxu0 %v4538_v60 }
  0xdf   : > { %3845 = vmatmul.mubr.bf16.gmra.mrb[24].mxu1 %v4992_v27  ;;  %v4547_v27 = vld [vmem:[%s5450_s1 + $0x128] sm:$0xff]  }
  0xe0   : > { %4069 = vmatmul.mubr.bf16.gmra.mrb[8].mxu0 %v4809_v49  ;;  %3848 = vmatprep.mubr.bf16.mxu1 %v5014_v43  ;;  %v4543_v49 = vld [vmem:[%s5450_s1 + $0x108] sm:$0xff]   ;;  %v4548_v43 = vld [vmem:[%s5450_s1 + $0x130] sm:$0xff]  }
  0xe1   : > { %4072 = vmatprep.mubr.bf16.mxu0 %v2309_v62  ;;  %4101 = vmatpush3.bf16.msra.mxu0 %v4538_v60  ;;  %v3229_v60 = vld [vmem:[%s4743_s6 + $0x139] sm:$0xff]  ;;  %v3230_v62 = vld [vmem:[%s4743_s6 + $0x141] sm:$0xff] }
  0xe2   : > { %4102 = vmatprep.subr.bf16.mxu0 %v4539_v63 }
  0xe5   : > { %4103 = vmatpush3.bf16.msra.mxu0 %v4539_v63  ;;  %v3453_v63 = vld [vmem:[%s4743_s6 + $0x152] sm:$0xff] }
  0xe6   : > { %4104 = vmatprep.subr.bf16.mxu0 %v4540_v5 }
  0xe7   : > { %3849 = vmatmul.mubr.bf16.gmra.mrb[28].mxu1 %v5018_v45  ;;  %v3432_v45 = vld [vmem:[%s4743_s6 + $0x52] sm:$0xff] }
  0xe8   : > { %4073 = vmatmul.mubr.bf16.gmra.mrb[12].mxu0 %v4849_v7  ;;  %3868 = vmatprep.mubr.bf16.mxu1 %v4958_v2  ;;  %v4544_v7 = vld [vmem:[%s5450_s1 + $0x110] sm:$0xff]  }
  0xe9   : > { %4076 = vmatprep.mubr.bf16.mxu0 %v4858_v10  ;;  %4105 = vmatpush3.bf16.msra.mxu0 %v4540_v5  ;;  %v3401_v10 = vld [vmem:[%s4743_s6 + $0x181] sm:$0xff] }
  0xea   : > { %4106 = vmatprep.subr.bf16.mxu0 %v4541_v8  ;;  %v3454_v5 = vld [vmem:[%s4743_s6 + $0x15a] sm:$0xff] }
  0xed   : > { %4107 = vmatpush3.bf16.msra.mxu0 %v4541_v8  ;;  %v1393_v8 = vpack.c.bf16 %v3228_v54, %v3227_v55 }
  0xef   : > { %3869 = vmatmul.mubr.bf16.vlgmr.msra.gmra.mrb[0].mxu1 %v4962_v4  ;;  %v3404_v4 = vld [vmem:[%s4743_s6 + $0x1a1] sm:$0xff] }
  0xf0   : > { %4077 = vmatmul.mubr.bf16.gmra.mrb[16].mxu0 %v4881_v22  ;;  %4148 = vmatpush3.bf16.msra.mxu1 %v4542_v52  ;;  %v3402_v22 = vld [vmem:[%s4743_s6 + $0x189] sm:$0xff] }
  0xf1   : > { %3872 = vmatprep.mubr.bf16.mxu1 %v4986_v21  ;;  %4080 = vmatprep.mubr.bf16.mxu0 %v4885_v24  ;;  %v4545_v24 = vld [vmem:[%s5450_s1 + $0x118] sm:$0xff]   ;;  %v5230_v2 = vpack.c.bf16 %v3402_v22, %v3401_v10  ;;  %v3225_v52 = vld [vmem:[%s4743_s6 + $0x109] sm:$0xff]  ;;  %v2621_v10 = vpack.c.bf16 %v3454_v5, %v3453_v63 }
  0xf2   : > { %4141 = vmatprep.subr.bf16.mxu1 %v4543_v49  ;;  %v3429_v21 = vld [vmem:[%s4743_s6 + $0x32] sm:$0xff]  ;;  %v1392_v50 = vpack.c.bf16 %v3226_v35, %v3225_v52 }
  0xf3   : > { %v3231_v22 = vld [vmem:[%s4743_s6 + $0x151] sm:$0xff] }
  0xf4   : > { %4149 = vmatpush3.bf16.msra.mxu1 %v4543_v49  ;;  %v2620_v49 = vpack.c.bf16 %v3452_v57, %v3451_v3 }
  0xf5   : > { %4142 = vmatprep.subr.bf16.mxu1 %v4544_v7 }
  0xf7   : > { %3873 = vmatmul.mubr.bf16.gmra.mrb[4].mxu1 %v4990_v26  ;;  %v3430_v26 = vld [vmem:[%s4743_s6 + $0x3a] sm:$0xff] }
  0xf8   : > { %4081 = vmatmul.mubr.bf16.gmra.mrb[20].mxu0 %v4907_v36  ;;  %3876 = vmatprep.mubr.bf16.mxu1 %v5012_v42  ;;  %v4546_v36 = vld [vmem:[%s5450_s1 + $0x120] sm:$0xff]  }
  0xf9   : > { %4084 = vmatprep.mubr.bf16.mxu0 %v4911_v38  ;;  %4150 = vmatpush3.bf16.msra.mxu1 %v4544_v7  ;;  %v3403_v38 = vld [vmem:[%s4743_s6 + $0x199] sm:$0xff]  ;;  %v1394_v7 = vpack.c.bf16 %v3230_v62, %v3229_v60 }
  0xfa   : > { %4143 = vmatprep.subr.bf16.mxu1 %v4545_v24  ;;  %v2318_v42 = vpack.c.bf16 %v3404_v4, %v3403_v38  ;;  %v3456_v38 = vld [vmem:[%s4743_s6 + $0x172] sm:$0xff]  ;;  %v3233_v4 = vld [vmem:[%s4743_s6 + $0x169] sm:$0xff] }
  0xfd   : > { %4151 = vmatpush3.bf16.msra.mxu1 %v4545_v24  ;;  %v3232_v24 = vld [vmem:[%s4743_s6 + $0x159] sm:$0xff] }
  0xfe   : > { %4144 = vmatprep.subr.bf16.mxu1 %v4546_v36 }
  0xff   : > { %3877 = vmatmul.mubr.bf16.gmra.mrb[8].mxu1 %v5016_v44  ;;  %v3431_v44 = vld [vmem:[%s4743_s6 + $0x4a] sm:$0xff] }
 0x100   : > { %4085 = vmatmul.mubr.bf16.gmra.mrb[24].mxu0 %v4933_v51  ;;  %3880 = vmatprep.mubr.bf16.mxu1 %v5036_v58  ;;  %v2609_v51 = vpack.c.bf16 %v3430_v26, %v3429_v21  ;;  %v3433_v58 = vld [vmem:[%s4743_s6 + $0x62] sm:$0xff]  ;;  %v2610_v9 = vpack.c.bf16 %v3432_v45, %v3431_v44  ;;  %v3234_v21 = vld [vmem:[%s4743_s6 + $0x171] sm:$0xff]  ;;  %v3459_v45 = vld [vmem:[%s4743_s6 + $0x19a] sm:$0xff] }
 0x101   : > { %4088 = vmatprep.mubr.bf16.mxu0 %v5230_v2  ;;  %4152 = vmatpush3.bf16.msra.mxu1 %v4546_v36  ;;  %v3455_v36 = vld [vmem:[%s4743_s6 + $0x16a] sm:$0xff]  ;;  %v3457_v26 = vld [vmem:[%s4743_s6 + $0x182] sm:$0xff] }
 0x102   : > { %4145 = vmatprep.subr.bf16.mxu1 %v4547_v27 }
 0x105   : > { %4153 = vmatpush3.bf16.msra.mxu1 %v4547_v27  ;;  %v3458_v27 = vld [vmem:[%s4743_s6 + $0x18a] sm:$0xff] }
 0x106   : > { %4146 = vmatprep.subr.bf16.mxu1 %v4548_v43  ;;  %v2623_v44 = vpack.c.bf16 %v3458_v27, %v3457_v26 }
 0x107   : > { %3881 = vmatmul.mubr.bf16.gmra.mrb[12].mxu1 %v5038_v61  ;;  %v2611_v61 = vpack.c.bf16 %v3434_v0, %v3433_v58  ;;  %v3460_v58 = vld [vmem:[%s4743_s6 + $0x1a2] sm:$0xff] }
 0x108   : > { %4089 = vmatmul.mubr.bf16.gmra.mrb[28].mxu0 %v2318_v42  ;;  %3884 = vmatprep.mubr.bf16.mxu1 %v5055_v14  ;;  %v3435_v14 = vld [vmem:[%s4743_s6 + $0x7a] sm:$0xff]  ;;  %v1395_v42 = vpack.c.bf16 %v3232_v24, %v3231_v22  ;;  %v2624_v0 = vpack.c.bf16 %v3460_v58, %v3459_v45 }
 0x109   : > { %4108 = vmatprep.mubr.bf16.mxu0 %v2609_v51  ;;  %4154 = vmatpush3.bf16.msra.mxu1 %v4548_v43  ;;  %v2612_v23 = vpack.c.bf16 %v3436_v6, %v3435_v14  ;;  %v2622_v51 = vpack.c.bf16 %v3456_v38, %v3455_v36  ;;  %v1396_v43 = vpack.c.bf16 %v3234_v21, %v3233_v4 }
 0x10a   : > { %4147 = vmatprep.subr.bf16.mxu1 %v4549_v59 }
 0x10d   : > { %4155 = vmatpush3.bf16.msra.mxu1 %v4549_v59 }
 0x10f   : > { %3885 = vmatmul.mubr.bf16.gmra.mrb[16].mxu1 %v5057_v15  ;;  %v3439_v15 = vld [vmem:[%s4743_s6 + $0xaa] sm:$0xff] }
 0x110   : > { %4109 = vmatmul.mubr.bf16.vlgmr.msra.gmra.mrb[0].mxu0 %v2610_v9  ;;  %3888 = vmatprep.mubr.bf16.mxu1 %v5075_v29  ;;  %v3440_v29 = vld [vmem:[%s4743_s6 + $0xb2] sm:$0xff] }
 0x111   : > { %4112 = vmatprep.mubr.bf16.mxu0 %v2611_v61  ;;  %v2614_v25 = vpack.c.bf16 %v3440_v29, %v3439_v15 }
 0x117   : > { %3889 = vmatmul.mubr.bf16.gmra.mrb[20].mxu1 %v5077_v30  ;;  %v3443_v30 = vld [vmem:[%s4743_s6 + $0xda] sm:$0xff] }
 0x118   : > { %4113 = vmatmul.mubr.bf16.gmra.mrb[4].mxu0 %v2612_v23  ;;  %3892 = vmatprep.mubr.bf16.mxu1 %v5093_v40  ;;  %v3444_v40 = vld [vmem:[%s4743_s6 + $0xe2] sm:$0xff] }
 0x119   : > { %4116 = vmatprep.mubr.bf16.mxu0 %v2613_v16  ;;  %v2616_v31 = vpack.c.bf16 %v3444_v40, %v3443_v30  ;;  %v5318_v40 = vld [vmem:[%s5451_s2] ss:$0 sm:$0xff] }
 0x11f   : > { %3893 = vmatmul.mubr.bf16.gmra.mrb[24].mxu1 %v5095_v41  ;;  %v1390_v41 = vpack.c.bf16 %v3222_v37, %v3221_v20 }
 0x120   : > { %4117 = vmatmul.mubr.bf16.gmra.mrb[8].mxu0 %v2614_v25  ;;  %3896 = vmatprep.mubr.bf16.mxu1 %v5111_v56  ;;  %v3223_v56 = vld [vmem:[%s4743_s6 + $0xf1] sm:$0xff]  ;;  %s175_s6 = sand.u32 1, %s4612_s13  }
 0x121   : > { %4120 = vmatprep.mubr.bf16.mxu0 %v2615_v19  ;;  %s3091_s4 = sshll.u32 %s175_s6, 8  ;;  %s5403_s15 = scalar_lea.sflag [#allocation3], %s175_s6 }
 0x122   : > { %s5326_s5 = scalar_lea.vmem [#allocation2], %s3091_s4 }
 0x123   : > { %s3003_s8 = sshll.u32 %s5326_s5, 4  ;;  %s5396_s8 = int_to_ptr.vmem [resolvable:$true] %s3003_s8 }
 0x124   : > { %s4550_s18 = scalar_lea.vmem %s5396_s8, 4096  ;;  %p4557_p1 = scmp.lt.s32.totalorder %s5396_s8, %s4555_s21 }
 0x125   : > { %p4551_p12 = scmp.ne.s32.totalorder %s5396_s8, %s4550_s18  ;;  %p4558_p2 = scmp.lt.s32.totalorder %s4556_s23, %s4550_s18 }
 0x127   : > { %3897 = vmatmul.mubr.bf16.gmra.mrb[28].mxu1 %v5145_v13  ;;  %v1391_v13 = vpack.c.bf16 %v3224_v33, %v3223_v56  ;;  %p4552_p13 = pnand %p4551_p12, %p4693_p4  ;;  %p4559_p3 = por %p4558_p2, %p4557_p1 }
 0x128   : > { %4121 = vmatmul.mubr.bf16.gmra.mrb[12].mxu0 %v2616_v31  ;;  %3932 = vmatprep.mubr.bf16.mxu1 %v1390_v41 }
 0x129   : > { %4124 = vmatprep.mubr.bf16.mxu0 %v2617_v32  ;;  %p4553_p0 = pneg %p4552_p13 }
 0x12b   : > { %p4560_p5 = pnand %p4559_p3, %p4553_p0 }
 0x12f   : > { %3933 = vmatmul.mubr.bf16.vlgmr.msra.gmra.mrb[16].mxu1 %v1391_v13 }
 0x130   : > { %4125 = vmatmul.mubr.bf16.gmra.mrb[16].mxu0 %v2618_v48  ;;  %3936 = vmatprep.mubr.bf16.mxu1 %v1392_v50 }
 0x131   : > { %4128 = vmatprep.mubr.bf16.mxu0 %v2619_v53 }
 0x137   : > { %3937 = vmatmul.mubr.bf16.gmra.mrb[20].mxu1 %v1393_v8 }
 0x138   : > { %4129 = vmatmul.mubr.bf16.gmra.mrb[20].mxu0 %v2620_v49  ;;  %3940 = vmatprep.mubr.bf16.mxu1 %v1394_v7 }
 0x139   : > { %4132 = vmatprep.mubr.bf16.mxu0 %v2621_v10 }
 0x13f   : > { %3941 = vmatmul.mubr.bf16.gmra.mrb[24].mxu1 %v1395_v42 }
 0x140   : > { %4133 = vmatmul.mubr.bf16.gmra.mrb[24].mxu0 %v2622_v51  ;;  %3944 = vmatprep.mubr.bf16.mxu1 %v1396_v43 }
 0x141   : > { %4136 = vmatprep.mubr.bf16.mxu0 %v2623_v44 }
 0x147   : > { %3945 = vmatmul.mubr.bf16.gmra.mrb[28].mxu1 %v5230_v2 }
 0x148   : > { %4137 = vmatmul.mubr.bf16.gmra.mrb[28].mxu0 %v2624_v0 }
 0x1c2   : > { %v3870_v59 = vpop.f32.mrb[0].mxu1 }
 0x1c3   : > { %v1191_v9 = vpop.f32.mrb[1].mxu1 }
 0x1c4   : > { %v3871_v61 = vpop.f32.mrb[2].mxu1 }
 0x1c5   : > { %v1194_v14 = vpop.f32.mrb[3].mxu1 }
 0x1ca   : > { %v3874_v6 = vpop.f32.mrb[4].mxu1 }
 0x1cb   : > { %v1207_v12 = vpop.f32.mrb[5].mxu1 }
 0x1cc   : > { %v3875_v11 = vpop.f32.mrb[6].mxu1 }
 0x1cd   : > { %v1210_v23 = vpop.f32.mrb[7].mxu1 }
 0x1d2   : > { %v3878_v16 = vpop.f32.mrb[8].mxu1 }
 0x1d3   : > { %v1223_v15 = vpop.f32.mrb[9].mxu1 }
 0x1d4   : > { %v3879_v29 = vpop.f32.mrb[10].mxu1 }
 0x1d5   : > { %v1226_v17 = vpop.f32.mrb[11].mxu1 }
 0x1da   : > { %v5306_v18 = vpop.f32.mrb[12].mxu1 }
 0x1db   : > { %v5308_v25 = vpop.f32.mrb[13].mxu1 }
 0x1dc   : > { %v5310_v2 = vpop.f32.mrb[14].mxu1 }
 0x1dd   : > { %v5312_v19 = vpop.f32.mrb[15].mxu1 }
 0x1e3   : > { %v4110_v30 = vpop.f32.mrb[0].mxu0 }
 0x1e4   : > { %v4156_v20 = vadd.f32 %v4110_v30, %v3870_v59  ;;  %v2724_v37 = vpop.f32.mrb[1].mxu0 }
 0x1e5   : > { %v4157_v28 = vadd.f32 %v2724_v37, %v1191_v9  ;;  %v4111_v1 = vpop.f32.mrb[2].mxu0 }
 0x1e6   : > { %v2892_v31 = vadd.f32 %v4156_v20, %v5318_v40  ;;  %v4158_v41 = vadd.f32 %v4111_v1, %v3871_v61  ;;  %v2727_v32 = vpop.f32.mrb[3].mxu0 }
 0x1e7   : > { %v2890_v56 = vadd.f32 %v4157_v28, %v5318_v40  ;;  %v4159_v33 = vadd.f32 %v2727_v32, %v1194_v14 }
 0x1e8   : > { %v2924_v34 = vmax.f32 %v2892_v31, 0.0  ;;  %v2893_v39 = vadd.f32 %v4158_v41, %v5318_v40 }
 0x1e9   : > { %v2922_v52 = vmax.f32 %v2890_v56, 0.0  ;;  %v2891_v35 = vadd.f32 %v4159_v33, %v5318_v40 }
 0x1ea   : > { %2956 = vst [vmem:[%s5326_s5 + $0x10] sm:$0xff] %v2924_v34  ;;  %v2925_v46 = vmax.f32 %v2893_v39, 0.0 }
 0x1eb   : > { %2954 = vst [vmem:[%s5326_s5] sm:$0xff] %v2922_v52  ;;  %v2923_v47 = vmax.f32 %v2891_v35, 0.0  ;;  %v4114_v13 = vpop.f32.mrb[4].mxu0 }
 0x1ec   : > { %2957 = vst [vmem:[%s5326_s5 + $0x18] sm:$0xff] %v2925_v46  ;;  %v4160_v48 = vadd.f32 %v4114_v13, %v3874_v6  ;;  %v2740_v50 = vpop.f32.mrb[5].mxu0 }
 0x1ed   : > { %2955 = vst [vmem:[%s5326_s5 + $0x8] sm:$0xff] %v2923_v47  ;;  %v4161_v53 = vadd.f32 %v2740_v50, %v1207_v12  ;;  %v4115_v55 = vpop.f32.mrb[6].mxu0 }
 0x1ee   : > { %v2896_v54 = vadd.f32 %v4160_v48, %v5318_v40  ;;  %v4162_v3 = vadd.f32 %v4115_v55, %v3875_v11  ;;  %v2743_v57 = vpop.f32.mrb[7].mxu0 }
 0x1ef   : > { %v2894_v60 = vadd.f32 %v4161_v53, %v5318_v40  ;;  %v4163_v62 = vadd.f32 %v2743_v57, %v1210_v23 }
 0x1f0   : > { %v2928_v63 = vmax.f32 %v2896_v54, 0.0  ;;  %v2897_v5 = vadd.f32 %v4162_v3, %v5318_v40 }
 0x1f1   : > { %v2926_v8 = vmax.f32 %v2894_v60, 0.0  ;;  %v2895_v49 = vadd.f32 %v4163_v62, %v5318_v40 }
 0x1f2   : > { %2960 = vst [vmem:[%s5326_s5 + $0x30] sm:$0xff] %v2928_v63  ;;  %v2929_v7 = vmax.f32 %v2897_v5, 0.0 }
 0x1f3   : > { %2958 = vst [vmem:[%s5326_s5 + $0x20] sm:$0xff] %v2926_v8  ;;  %v2927_v10 = vmax.f32 %v2895_v49, 0.0  ;;  %v4118_v22 = vpop.f32.mrb[8].mxu0 }
 0x1f4   : > { %2961 = vst [vmem:[%s5326_s5 + $0x38] sm:$0xff] %v2929_v7  ;;  %v4164_v24 = vadd.f32 %v4118_v22, %v3878_v16  ;;  %v2756_v36 = vpop.f32.mrb[9].mxu0 }
 0x1f5   : > { %2959 = vst [vmem:[%s5326_s5 + $0x28] sm:$0xff] %v2927_v10  ;;  %v4165_v38 = vadd.f32 %v2756_v36, %v1223_v15  ;;  %v4119_v4 = vpop.f32.mrb[10].mxu0 }
 0x1f6   : > { %v2900_v21 = vadd.f32 %v4164_v24, %v5318_v40  ;;  %v4166_v26 = vadd.f32 %v4119_v4, %v3879_v29  ;;  %v2759_v27 = vpop.f32.mrb[11].mxu0 }
 0x1f7   : > { %v2898_v42 = vadd.f32 %v4165_v38, %v5318_v40  ;;  %v4167_v51 = vadd.f32 %v2759_v27, %v1226_v17 }
 0x1f8   : > { %v2932_v43 = vmax.f32 %v2900_v21, 0.0  ;;  %v2901_v44 = vadd.f32 %v4166_v26, %v5318_v40 }
 0x1f9   : > { %v2930_v45 = vmax.f32 %v2898_v42, 0.0  ;;  %v2899_v58 = vadd.f32 %v4167_v51, %v5318_v40 }
 0x1fa   : > { %2964 = vst [vmem:[%s5326_s5 + $0x50] sm:$0xff] %v2932_v43  ;;  %v2933_v0 = vmax.f32 %v2901_v44, 0.0 }
 0x1fb   : > { %2962 = vst [vmem:[%s5326_s5 + $0x40] sm:$0xff] %v2930_v45  ;;  %v2931_v59 = vmax.f32 %v2899_v58, 0.0  ;;  %v4122_v9 = vpop.f32.mrb[12].mxu0 }
 0x1fc   : > { %2965 = vst [vmem:[%s5326_s5 + $0x58] sm:$0xff] %v2933_v0  ;;  %v4168_v61 = vadd.f32 %v4122_v9, %v5306_v18  ;;  %v2772_v14 = vpop.f32.mrb[13].mxu0 }
 0x1fd   : > { %2963 = vst [vmem:[%s5326_s5 + $0x48] sm:$0xff] %v2931_v59  ;;  %v4169_v6 = vadd.f32 %v2772_v14, %v5308_v25  ;;  %v4123_v12 = vpop.f32.mrb[14].mxu0 }
 0x1fe   : > { %v2904_v11 = vadd.f32 %v4168_v61, %v5318_v40  ;;  %v4170_v23 = vadd.f32 %v4123_v12, %v5310_v2  ;;  %v2775_v16 = vpop.f32.mrb[15].mxu0 }
 0x1ff   : > { %v2902_v15 = vadd.f32 %v4169_v6, %v5318_v40  ;;  %v4171_v29 = vadd.f32 %v2775_v16, %v5312_v19 }
 0x200   : > { %v2936_v17 = vmax.f32 %v2904_v11, 0.0  ;;  %v2905_v18 = vadd.f32 %v4170_v23, %v5318_v40 }
 0x201   : > { %v2934_v30 = vmax.f32 %v2902_v15, 0.0  ;;  %v2903_v20 = vadd.f32 %v4171_v29, %v5318_v40 }
 0x202   : > { %2968 = vst [vmem:[%s5326_s5 + $0x70] sm:$0xff] %v2936_v17  ;;  %v2937_v25 = vmax.f32 %v2905_v18, 0.0  ;;  %v3934_v37 = vpop.f32.mrb[16].mxu1 }
 0x203   : > { %2966 = vst [vmem:[%s5326_s5 + $0x60] sm:$0xff] %v2934_v30  ;;  %v2935_v28 = vmax.f32 %v2903_v20, 0.0  ;;  %v4126_v1 = vpop.f32.mrb[16].mxu0  ;;  %v1561_v31 = vpop.f32.mrb[17].mxu1 }
 0x204   : > { %2969 = vst [vmem:[%s5326_s5 + $0x78] sm:$0xff] %v2937_v25  ;;  %v4172_v2 = vadd.f32 %v4126_v1, %v3934_v37  ;;  %v2788_v41 = vpop.f32.mrb[17].mxu0  ;;  %v3935_v32 = vpop.f32.mrb[18].mxu1 }
 0x205   : > { %2967 = vst [vmem:[%s5326_s5 + $0x68] sm:$0xff] %v2935_v28  ;;  %v4173_v19 = vadd.f32 %v2788_v41, %v1561_v31  ;;  %v4127_v56 = vpop.f32.mrb[18].mxu0  ;;  %v1564_v33 = vpop.f32.mrb[19].mxu1 }
 0x206   : > { %v2908_v34 = vadd.f32 %v4172_v2, %v5318_v40  ;;  %v4174_v39 = vadd.f32 %v4127_v56, %v3935_v32  ;;  %v2791_v52 = vpop.f32.mrb[19].mxu0 }
 0x207   : > { %v2906_v35 = vadd.f32 %v4173_v19, %v5318_v40  ;;  %v4175_v46 = vadd.f32 %v2791_v52, %v1564_v33 }
 0x208   : > { %v2940_v47 = vmax.f32 %v2908_v34, 0.0  ;;  %v2909_v13 = vadd.f32 %v4174_v39, %v5318_v40 }
 0x209   : > { %v2938_v48 = vmax.f32 %v2906_v35, 0.0  ;;  %v2907_v50 = vadd.f32 %v4175_v46, %v5318_v40 }
 0x20a   : > { %2972 = vst [vmem:[%s5326_s5 + $0x90] sm:$0xff] %v2940_v47  ;;  %v2941_v53 = vmax.f32 %v2909_v13, 0.0  ;;  %v3938_v55 = vpop.f32.mrb[20].mxu1 }
 0x20b   : > { %2970 = vst [vmem:[%s5326_s5 + $0x80] sm:$0xff] %v2938_v48  ;;  %v2939_v54 = vmax.f32 %v2907_v50, 0.0  ;;  %v4130_v3 = vpop.f32.mrb[20].mxu0  ;;  %v1577_v57 = vpop.f32.mrb[21].mxu1 }
 0x20c   : > { %2973 = vst [vmem:[%s5326_s5 + $0x98] sm:$0xff] %v2941_v53  ;;  %v4176_v60 = vadd.f32 %v4130_v3, %v3938_v55  ;;  %v2804_v62 = vpop.f32.mrb[21].mxu0  ;;  %v3939_v63 = vpop.f32.mrb[22].mxu1 }
 0x20d   : > { %2971 = vst [vmem:[%s5326_s5 + $0x88] sm:$0xff] %v2939_v54  ;;  %v4177_v5 = vadd.f32 %v2804_v62, %v1577_v57  ;;  %v4131_v8 = vpop.f32.mrb[22].mxu0  ;;  %v1580_v49 = vpop.f32.mrb[23].mxu1 }
 0x20e   : > { %v2912_v7 = vadd.f32 %v4176_v60, %v5318_v40  ;;  %v4178_v10 = vadd.f32 %v4131_v8, %v3939_v63  ;;  %v2807_v22 = vpop.f32.mrb[23].mxu0 }
 0x20f   : > { %v2910_v24 = vadd.f32 %v4177_v5, %v5318_v40  ;;  %v4179_v36 = vadd.f32 %v2807_v22, %v1580_v49 }
 0x210   : > { %v2944_v38 = vmax.f32 %v2912_v7, 0.0  ;;  %v2913_v4 = vadd.f32 %v4178_v10, %v5318_v40 }
 0x211   : > { %v2942_v21 = vmax.f32 %v2910_v24, 0.0  ;;  %v2911_v26 = vadd.f32 %v4179_v36, %v5318_v40 }
 0x212   : > { %2976 = vst [vmem:[%s5326_s5 + $0xb0] sm:$0xff] %v2944_v38  ;;  %v2945_v27 = vmax.f32 %v2913_v4, 0.0  ;;  %v3942_v42 = vpop.f32.mrb[24].mxu1 }
 0x213   : > { %2974 = vst [vmem:[%s5326_s5 + $0xa0] sm:$0xff] %v2942_v21  ;;  %v2943_v51 = vmax.f32 %v2911_v26, 0.0  ;;  %v4134_v43 = vpop.f32.mrb[24].mxu0  ;;  %v1593_v44 = vpop.f32.mrb[25].mxu1 }
 0x214   : > { %2977 = vst [vmem:[%s5326_s5 + $0xb8] sm:$0xff] %v2945_v27  ;;  %v4180_v45 = vadd.f32 %v4134_v43, %v3942_v42  ;;  %v2820_v58 = vpop.f32.mrb[25].mxu0  ;;  %v3943_v0 = vpop.f32.mrb[26].mxu1 }
 0x215   : > { %2975 = vst [vmem:[%s5326_s5 + $0xa8] sm:$0xff] %v2943_v51  ;;  %v4181_v59 = vadd.f32 %v2820_v58, %v1593_v44  ;;  %v4135_v9 = vpop.f32.mrb[26].mxu0  ;;  %v1596_v61 = vpop.f32.mrb[27].mxu1 }
 0x216   : > { %v2916_v14 = vadd.f32 %v4180_v45, %v5318_v40  ;;  %v4182_v6 = vadd.f32 %v4135_v9, %v3943_v0  ;;  %v2823_v12 = vpop.f32.mrb[27].mxu0 }
 0x217   : > { %v2914_v11 = vadd.f32 %v4181_v59, %v5318_v40  ;;  %v4183_v23 = vadd.f32 %v2823_v12, %v1596_v61 }
 0x218   : > { %v2948_v16 = vmax.f32 %v2916_v14, 0.0  ;;  %v2917_v15 = vadd.f32 %v4182_v6, %v5318_v40 }
 0x219   : > { %v2946_v29 = vmax.f32 %v2914_v11, 0.0  ;;  %v2915_v17 = vadd.f32 %v4183_v23, %v5318_v40 }
 0x21a   : > { %2980 = vst [vmem:[%s5326_s5 + $0xd0] sm:$0xff] %v2948_v16  ;;  %v2949_v18 = vmax.f32 %v2917_v15, 0.0  ;;  %v3946_v30 = vpop.f32.mrb[28].mxu1 }
 0x21b   : > { %2978 = vst [vmem:[%s5326_s5 + $0xc0] sm:$0xff] %v2946_v29  ;;  %v2947_v20 = vmax.f32 %v2915_v17, 0.0  ;;  %v4138_v25 = vpop.f32.mrb[28].mxu0  ;;  %v1609_v37 = vpop.f32.mrb[29].mxu1 }
 0x21c   : > { %2981 = vst [vmem:[%s5326_s5 + $0xd8] sm:$0xff] %v2949_v18  ;;  %v4184_v28 = vadd.f32 %v4138_v25, %v3946_v30  ;;  %v2836_v1 = vpop.f32.mrb[29].mxu0  ;;  %v3947_v31 = vpop.f32.mrb[30].mxu1 }
 0x21d   : > { %2979 = vst [vmem:[%s5326_s5 + $0xc8] sm:$0xff] %v2947_v20  ;;  %v4185_v2 = vadd.f32 %v2836_v1, %v1609_v37  ;;  %v4139_v41 = vpop.f32.mrb[30].mxu0  ;;  %v1612_v32 = vpop.f32.mrb[31].mxu1 }
 0x21e   : > { %v2920_v19 = vadd.f32 %v4184_v28, %v5318_v40  ;;  %v4186_v56 = vadd.f32 %v4139_v41, %v3947_v31  ;;  %v2839_v33 = vpop.f32.mrb[31].mxu0 }
 0x21f   : > { %v2918_v34 = vadd.f32 %v4185_v2, %v5318_v40  ;;  %v4187_v39 = vadd.f32 %v2839_v33, %v1612_v32 }
 0x220   : > { %v2952_v52 = vmax.f32 %v2920_v19, 0.0  ;;  %v2921_v35 = vadd.f32 %v4186_v56, %v5318_v40 }
 0x221   : > { %v2950_v46 = vmax.f32 %v2918_v34, 0.0  ;;  %v2919_v47 = vadd.f32 %v4187_v39, %v5318_v40 }
 0x222   : > { %2984 = vst [vmem:[%s5326_s5 + $0xf0] sm:$0xff] %v2952_v52  ;;  %v2953_v13 = vmax.f32 %v2921_v35, 0.0 }
 0x223   : > { %2982 = vst [vmem:[%s5326_s5 + $0xe0] sm:$0xff] %v2950_v46  ;;  %v2951_v48 = vmax.f32 %v2919_v47, 0.0 }
 0x224   : > { %2985 = vst [vmem:[%s5326_s5 + $0xf8] sm:$0xff] %v2953_v13 }
 0x225   : > { %2983 = vst [vmem:[%s5326_s5 + $0xe8] sm:$0xff] %v2951_v48 }
 0x226   : > { %4563 = shalt.err (!%p4560_p5)
}
 0x227   : > { %s4564_s26 = scalar_lea.hbm %s5394_s11, 4096  ;;  %s4568_s6 = scalar_lea.hbm %s5452_s3, 8192 }
 0x228   : > { %p4565_p6 = scmp.ne.s32.totalorder %s5394_s11, %s4564_s26  ;;  %p4569_p10 = scmp.lt.u32.totalorder %s5394_s11, %s5452_s3 }
 0x229   : > { %p4570_p11 = scmp.lt.u32.totalorder %s4568_s6, %s4564_s26  ;;  %p4572_p13 = scmp.lt.u32.totalorder %s4564_s26, %s5394_s11 }
 0x22a   : > { %p4566_p7 = pnand %p4565_p6, %p4693_p4 }
 0x22b   : > { %p4571_p12 = por %p4570_p11, %p4569_p10 }
 0x22c   : > { %p4567_p9 = pneg %p4566_p7 }
 0x22d   : > { %p4573_p0 = por %p4572_p13, %p4571_p12 }
 0x22f   : > { %p4574_p1 = pnand %p4573_p0, %p4567_p9 }
 0x231   : > { %4577 = shalt.err (!%p4574_p1)
}
 0x232   : > { %s4631_s4 = smov 128   ;;  %s4632_s5 = smov 8  }
 0x233   : > { %4413 = dma.vmem_to_hbm [thread:$0]  (%p4693_p4), %s5396_s8, 4096, %s5394_s11, %s5403_s15, %s4631_s4, %s4631_s4, %s4632_s5  }
 0x234 PF: > { %p4419_p2 = scmp.ge.s32.totalorder %s4628_s17, 2  ;;  %s3018_s7 = sand.u32 1, %s4608_s12  }
 0x235   : > { %s3019_s9 = scalar_lea.sflag [#allocation3], %s3018_s7 }
 0x236   : > { %p4416_p3 = pnand %p4419_p2, %p4700_p8 }
 0x238   : > { %4603 = dma.done.wait (!%p4416_p3), %s3019_s9, 4096  }
 0x239   : > { %4605 = vsyncadd (!%p4416_p3), %s3019_s9, 4294963200  ;;  %s16_s17 = sadd.s32 1, %s4628_s17   ;;  %s5455_s12 = smov %s4612_s13 }
 0x23a   : > { %p13_p5 = scmp.ge.s32.totalorder %s16_s17, 4   ;;  %s5456_s13 = smov %s4616_s14 }
 0x23b   : > { %s5457_s14 = smov %s4706_s25  ;;  %s5458_s15 = smov %s4624_s16 }
 0x23c   : > { %s5459_s16 = smov %s5461_s20  ;;  %15 = sbr.rel (!%p13_p5) target bundleno = 4 (0x4), region = 78 }
 0x243   :  { %3024 = vsyncpa [#allocation3], 1 }
 0x244   :  { %3026 = vsyncpa [#allocation3 + $0x1], 1 }

</bundles_post_ra>
